<compile_context>
chip_gen: v7x
topology: tpu7x:2x2x1
jax: 0.10.0
libtpu: 0.0.40
codegen_flags: <defaults>
</compile_context>

<pallas_src>
import functools

import jax
import jax.numpy as jnp
from jax.experimental import pallas as pl
from jax.experimental.pallas import tpu as pltpu

_VMEM_LIMIT = 32 * 1024 * 1024   # tiles are small; safe on v5e/v6e and v7x (64 MiB/TC)
_LRELU_SLOPE = 0.2
_BN_EPS = 1e-5
_M_TILE = 1024                   # target matmul rows (TH * Wo_pad) per grid step


def _round_up(v, m):
    return ((v + m - 1) // m) * m


# ----------------------------------------------------------------------------
# Pallas kernels
# ----------------------------------------------------------------------------
def _conv_kernel(x_ref, w_ref, b_ref, y_ref, sum_ref, sq_ref, acc_ref, *,
                 R, TH, WO, NB, HO, WOT, apply_lrelu):
    """One (row-block, cout-tile) step of a stride-1 RxR conv.

    x_ref : [1, TH+R-1, WI, CI] bf16 input rows (halo included)
    w_ref : [R, R, CI, tn]      bf16 taps
    b_ref : [1, tn]             f32 bias
    y_ref : [1, TH, WO, tn]     conv output (+bias, optional LeakyReLU)
    sum_ref/sq_ref : [1,1,tn]   masked per-tile BatchNorm partial statistics
    acc_ref: [TH*WO, tn]        f32 VMEM accumulator
    """
    acc_ref[...] = jnp.zeros_like(acc_ref)
    xfull = x_ref[0]                                    # [THI, WI, CI]
    ci = xfull.shape[-1]
    for kh in range(R):
        for kw in range(R):
            lhs = xfull[kh:kh + TH, kw:kw + WO, :].reshape(TH * WO, ci)
            acc_ref[...] += jnp.dot(lhs, w_ref[kh, kw],
                                    preferred_element_type=jnp.float32)

    y = acc_ref[...] + b_ref[...]                       # [TH*WO, tn] f32
    if apply_lrelu:
        y = jnp.where(y >= 0.0, y, _LRELU_SLOPE * y)
    tn = y.shape[-1]
    y3 = y.reshape(TH, WO, tn)
    y_ref[0] = y3.astype(y_ref.dtype)

    # Fused (masked) BatchNorm partial statistics: exclude the alignment-padding
    # rows/cols so the JAX-side mean/var over the true M elements is exact.
    r_idx = jax.lax.broadcasted_iota(jnp.int32, (TH, WO, 1), 0)
    c_idx = jax.lax.broadcasted_iota(jnp.int32, (TH, WO, 1), 1)
    row0 = (pl.program_id(0) % NB) * TH
    valid = jnp.logical_and(row0 + r_idx < HO, c_idx < WOT)
    ys = jnp.where(valid, y3, 0.0).reshape(TH * WO, tn)
    sum_ref[0] = jnp.sum(ys, axis=0, keepdims=True)
    sq_ref[0] = jnp.sum(ys * ys, axis=0, keepdims=True)


def _bn_lrelu_kernel(y_ref, scale_ref, shift_ref, o_ref):
    """y * scale + shift (per channel), then LeakyReLU, stored bf16."""
    z = y_ref[...].astype(jnp.float32) * scale_ref[...] + shift_ref[...]
    o_ref[...] = jnp.where(z >= 0.0, z, _LRELU_SLOPE * z).astype(o_ref.dtype)


# ----------------------------------------------------------------------------
# Pallas wrappers
# ----------------------------------------------------------------------------
def _conv_pallas(x_blk, w_k, bias_p, *, R, TH, WO, NB, HO, WOT, tn,
                 apply_lrelu, out_dtype):
    NBt, THI, WI, CI = x_blk.shape
    COP = w_k.shape[-1]
    J = COP // tn
    kernel = functools.partial(
        _conv_kernel, R=R, TH=TH, WO=WO, NB=NB, HO=HO, WOT=WOT,
        apply_lrelu=apply_lrelu)
    out_bytes = NBt * TH * WO * COP * jnp.dtype(out_dtype).itemsize
    return pl.pallas_call(
        kernel,
        out_shape=(jax.ShapeDtypeStruct((NBt, TH, WO, COP), out_dtype),
                   jax.ShapeDtypeStruct((NBt, 1, COP), jnp.float32),
                   jax.ShapeDtypeStruct((NBt, 1, COP), jnp.float32)),
        grid_spec=pltpu.PrefetchScalarGridSpec(
            num_scalar_prefetch=0,
            grid=(NBt, J),
            in_specs=[
                pl.BlockSpec((1, THI, WI, CI), lambda b, j: (b, 0, 0, 0)),
                pl.BlockSpec((R, R, CI, tn), lambda b, j: (0, 0, 0, j)),
                pl.BlockSpec((1, tn), lambda b, j: (0, j)),
            ],
            out_specs=(
                pl.BlockSpec((1, TH, WO, tn), lambda b, j: (b, 0, 0, j)),
                pl.BlockSpec((1, 1, tn), lambda b, j: (b, 0, j)),
                pl.BlockSpec((1, 1, tn), lambda b, j: (b, 0, j)),
            ),
            scratch_shapes=[pltpu.VMEM((TH * WO, tn), jnp.float32)],
        ),
        compiler_params=pltpu.CompilerParams(
            dimension_semantics=("parallel", "parallel"),
            vmem_limit_bytes=_VMEM_LIMIT,
        ),
        cost_estimate=pl.CostEstimate(
            flops=2 * NBt * TH * WO * R * R * CI * COP,
            transcendentals=0,
            bytes_accessed=int(x_blk.size) * 2 + int(w_k.size) * 2 + int(out_bytes),
        ),
    )(x_blk, w_k, bias_p)


def _bn_lrelu_pallas(y, scale, shift):
    NBt, TH, WO, COP = y.shape
    return pl.pallas_call(
        _bn_lrelu_kernel,
        out_shape=jax.ShapeDtypeStruct(y.shape, jnp.bfloat16),
        grid_spec=pltpu.PrefetchScalarGridSpec(
            num_scalar_prefetch=0,
            grid=(NBt,),
            in_specs=[
                pl.BlockSpec((1, TH, WO, COP), lambda b: (b, 0, 0, 0)),
                pl.BlockSpec((1, 1, 1, COP), lambda b: (0, 0, 0, 0)),
                pl.BlockSpec((1, 1, 1, COP), lambda b: (0, 0, 0, 0)),
            ],
            out_specs=pl.BlockSpec((1, TH, WO, COP), lambda b: (b, 0, 0, 0)),
        ),
        compiler_params=pltpu.CompilerParams(
            dimension_semantics=("parallel",),
            vmem_limit_bytes=_VMEM_LIMIT,
        ),
        cost_estimate=pl.CostEstimate(
            flops=3 * NBt * TH * WO * COP,
            transcendentals=0,
            bytes_accessed=4 * NBt * TH * WO * COP,
        ),
    )(y, scale, shift)


# ----------------------------------------------------------------------------
# Layer glue (NHWC, no HBM im2col)
# ----------------------------------------------------------------------------
def conv_layer_pallas(x, layer, *, out_dtype):
    """PyTorch-semantics Conv2d(k=4, p=1, s=1|2) [+ BatchNorm2d + LeakyReLU]."""
    N, H, W, Ci = x.shape
    w = layer["w"]
    cout = w.shape[0]
    stride = layer["stride"]
    wk = jnp.transpose(w, (2, 3, 1, 0))               # [kh, kw, ci, cout]

    if stride == 2:
        # k=4/s=2/p=1 conv == k=2/s=1 conv on the space-to-depth'd padded input.
        R = 2
        Ho, Wo = (H - 2) // 2 + 1, (W - 2) // 2 + 1
    else:
        R = 4
        Ho, Wo = H - 1, W - 1

    WOp = _round_up(Wo, 8)                  # sublane-friendly tile width
    TH = max(1, min(Ho, _M_TILE // WOp))    # output rows per grid step
    HOp = _round_up(Ho, TH)
    NB = HOp // TH

    if stride == 2:
        rows_need, cols_need = 2 * (HOp + 1), 2 * (WOp + 1)
    else:
        rows_need, cols_need = HOp + R - 1, WOp + R - 1
    xp = jnp.pad(x.astype(jnp.bfloat16),
                 ((0, 0), (1, rows_need - H - 1), (1, cols_need - W - 1), (0, 0)))

    if stride == 2:
        Hw, Ww = rows_need // 2, cols_need // 2
        xp = xp.reshape(N, Hw, 2, Ww, 2, Ci).transpose(0, 1, 3, 2, 4, 5)
        xp = xp.reshape(N, Hw, Ww, 4 * Ci)
        wk = wk.reshape(2, 2, 2, 2, Ci, cout).transpose(0, 2, 1, 3, 4, 5)
        wk = wk.reshape(2, 2, 4 * Ci, cout)
        Ciw = 4 * Ci
    else:
        Hw, Ww, Ciw = rows_need, cols_need, Ci

    THI = TH + R - 1                        # block rows incl. halo (== Hw if NB == 1)
    if NB == 1:
        x_blk = xp
    else:
        x_blk = jnp.concatenate(
            [xp[:, b * TH:b * TH + THI][:, None] for b in range(NB)], axis=1)
        x_blk = x_blk.reshape(N * NB, THI, Ww, Ciw)

    COP = _round_up(cout, 128)              # lane-dense output stores
    tn = COP if COP <= 256 else 256
    wkp = jnp.zeros((R, R, Ciw, COP), jnp.bfloat16)
    wkp = wkp.at[..., :cout].set(wk.astype(jnp.bfloat16))
    bias_p = jnp.zeros((1, COP), jnp.float32)
    if layer["b"] is not None:
        bias_p = bias_p.at[0, :cout].set(layer["b"].astype(jnp.float32))

    y, s_part, sq_part = _conv_pallas(
        x_blk, wkp, bias_p, R=R, TH=TH, WO=WOp, NB=NB, HO=Ho, WOT=Wo, tn=tn,
        apply_lrelu=(layer["lrelu"] and not layer["norm"]),
        out_dtype=(jnp.bfloat16 if layer["norm"] else out_dtype))

    if layer["norm"]:
        # Training-mode BatchNorm2d from the fused (masked) partial statistics.
        m_true = float(N * Ho * Wo)
        s = jnp.sum(s_part, axis=(0, 1))
        sq = jnp.sum(sq_part, axis=(0, 1))
        mean = s / m_true
        var = jnp.maximum(sq / m_true - mean * mean, 0.0)   # clamp (review)
        gp = jnp.zeros((COP,), jnp.float32).at[:cout].set(
            layer["gamma"].astype(jnp.float32))
        bp = jnp.zeros((COP,), jnp.float32).at[:cout].set(
            layer["beta"].astype(jnp.float32))
        scale = gp * jax.lax.rsqrt(var + _BN_EPS)
        shift = bp - mean * scale
        y = _bn_lrelu_pallas(y, scale.reshape(1, 1, 1, COP),
                             shift.reshape(1, 1, 1, COP))

    # Drop alignment padding / padded channels; feeds the next layer in NHWC.
    return y.reshape(N, NB * TH, WOp, COP)[:, :Ho, :Wo, :cout]


# ----------------------------------------------------------------------------
# Parameter construction (matches module __init__ layer schedule)
# ----------------------------------------------------------------------------
def init_params(key, input_nc, ndf=64, n_layers=3):
    """Layer schedule (norm_layer = BatchNorm2d -> use_bias = False on BN layers):
      0:             Conv(input_nc, ndf,      k4 s2 p1, bias) + LReLU
      1..n_layers-1: Conv(prev,     ndf*mult, k4 s2 p1, no bias) + BN + LReLU
      n_layers:      Conv(prev,     ndf*mult, k4 s1 p1, no bias) + BN + LReLU
      last:          Conv(prev,     1,        k4 s1 p1, bias)
    """
    keys = iter(jax.random.split(key, 4 * (n_layers + 3)))
    params = []

    def conv_w(co, ci):
        return 0.02 * jax.random.normal(next(keys), (co, ci, 4, 4), jnp.float32)

    params.append(dict(w=conv_w(ndf, input_nc),
                       b=0.02 * jax.random.normal(next(keys), (ndf,), jnp.float32),
                       stride=2, norm=False, lrelu=True))
    nf_mult = 1
    for n in range(1, n_layers):
        nf_prev, nf_mult = nf_mult, min(2 ** n, 8)
        params.append(dict(
            w=conv_w(ndf * nf_mult, ndf * nf_prev), b=None,
            gamma=1.0 + 0.02 * jax.random.normal(next(keys), (ndf * nf_mult,), jnp.float32),
            beta=0.02 * jax.random.normal(next(keys), (ndf * nf_mult,), jnp.float32),
            stride=2, norm=True, lrelu=True))
    nf_prev, nf_mult = nf_mult, min(2 ** n_layers, 8)
    params.append(dict(
        w=conv_w(ndf * nf_mult, ndf * nf_prev), b=None,
        gamma=1.0 + 0.02 * jax.random.normal(next(keys), (ndf * nf_mult,), jnp.float32),
        beta=0.02 * jax.random.normal(next(keys), (ndf * nf_mult,), jnp.float32),
        stride=1, norm=True, lrelu=True))
    params.append(dict(w=conv_w(1, ndf * nf_mult),
                       b=0.02 * jax.random.normal(next(keys), (1,), jnp.float32),
                       stride=1, norm=False, lrelu=False))
    return params


def nlayer_discriminator_forward(x_nchw, params):
    """Pallas forward of NLayerDiscriminator. x: [N, C, H, W] f32 -> NCHW f32."""
    x = jnp.transpose(x_nchw, (0, 2, 3, 1))            # NHWC once
    for i, layer in enumerate(params):
        last = i == len(params) - 1
        x = conv_layer_pallas(
            x, layer, out_dtype=(jnp.float32 if last else jnp.bfloat16))
    return jnp.transpose(x, (0, 3, 1, 2)).astype(jnp.float32)


# ----------------------------------------------------------------------------
# Pure-JAX reference mirroring the kernel numerics model
# (bf16 matmul operands + bf16 inter-layer storage, f32 accumulation/statistics).
# ----------------------------------------------------------------------------
def _forward_ref(x_nchw, params):
    x = x_nchw.astype(jnp.float32)
    for layer in params:
        y = jax.lax.conv_general_dilated(
            x.astype(jnp.bfloat16), layer["w"].astype(jnp.bfloat16),
            (layer["stride"], layer["stride"]), [(1, 1), (1, 1)],
            dimension_numbers=("NCHW", "OIHW", "NCHW"),
            preferred_element_type=jnp.float32)
        if layer["b"] is not None:
            y = y + layer["b"].reshape(1, -1, 1, 1)
        if layer["norm"]:
            mean = y.mean(axis=(0, 2, 3), keepdims=True)
            var = jnp.maximum((y * y).mean(axis=(0, 2, 3), keepdims=True)
                              - mean * mean, 0.0)
            scale = layer["gamma"].reshape(1, -1, 1, 1) * jax.lax.rsqrt(var + _BN_EPS)
            shift = layer["beta"].reshape(1, -1, 1, 1) - mean * scale
            yb = y.astype(jnp.bfloat16).astype(jnp.float32)
            z = yb * scale + shift
            z = jnp.where(z >= 0, z, _LRELU_SLOPE * z)
            x = z.astype(jnp.bfloat16).astype(jnp.float32)
        elif layer["lrelu"]:
            z = jnp.where(y >= 0, y, _LRELU_SLOPE * y)
            x = z.astype(jnp.bfloat16).astype(jnp.float32)
        else:
            x = y
    return x


# ----------------------------------------------------------------------------
if __name__ == "__main__":
    key = jax.random.PRNGKey(0)
    k_param, k_input = jax.random.split(key)

    # Small shapes: batch=2, input_nc=4, ndf=8, n_layers=3, spatial=32
    # (spatial >= 32 keeps the 5-conv stack valid; output is 2x2 patches).
    input_nc, ndf, n_layers = 4, 8, 3
    x = jax.random.normal(k_input, (2, input_nc, 32, 32), jnp.float32)
    params = init_params(k_param, input_nc, ndf=ndf, n_layers=n_layers)

    fwd = jax.jit(lambda inp: nlayer_discriminator_forward(inp, params))
    out = jax.block_until_ready(fwd(x))

    ref = _forward_ref(x, params)
    assert out.shape == ref.shape == (2, 1, 2, 2), (out.shape, ref.shape)
    err = float(jnp.abs(out - ref).max())
    assert jnp.allclose(out, ref, atol=5e-3, rtol=5e-3), err

    print("KERNEL_OK")
</pallas_src>

<mosaic_0001>
module attributes {stable_mosaic.version = 11 : i64} {
  func.func @_conv_kernel(%arg0: i32, %arg1: i32, %arg2: memref<1x17x17x16xbf16, #tpu.memory_space<vmem>>, %arg3: memref<2x2x16x128xbf16, #tpu.memory_space<vmem>>, %arg4: memref<1x128xf32, #tpu.memory_space<vmem>>, %arg5: memref<1x16x16x128xbf16, #tpu.memory_space<vmem>>, %arg6: memref<1x1x128xf32, #tpu.memory_space<vmem>>, %arg7: memref<1x1x128xf32, #tpu.memory_space<vmem>>, %arg8: memref<256x128xf32, #tpu.memory_space<vmem>>) attributes {dimension_semantics = [#tpu.dimension_semantics<parallel>, #tpu.dimension_semantics<parallel>], iteration_bounds = array<i64: 2, 1>, scalar_prefetch = 0 : i64, scratch_operands = 1 : i64, tpu.core_type = #tpu.core_type<tc>, window_params = [{transform_indices = @transform_0, window_bounds = array<i64: 1, 17, 17, 16>}, {transform_indices = @transform_1, window_bounds = array<i64: 2, 2, 16, 128>}, {transform_indices = @transform_2, window_bounds = array<i64: 1, 128>}, {transform_indices = @transform_3, window_bounds = array<i64: 1, 16, 16, 128>}, {transform_indices = @transform_4, window_bounds = array<i64: 1, 1, 128>}, {transform_indices = @transform_5, window_bounds = array<i64: 1, 1, 128>}]} {
    %cst = arith.constant 0.000000e+00 : f32
    %0 = vector.broadcast %cst : f32 to vector<256x128xf32>
    %c0 = arith.constant 0 : index
    %c0_0 = arith.constant 0 : index
    %1 = vector.load %arg8[%c0, %c0_0] : memref<256x128xf32, #tpu.memory_space<vmem>>, vector<256x128xf32>
    tpu.vector_store %arg8[%c0, %c0_0], %0 {strides = array<i32>} : memref<256x128xf32, #tpu.memory_space<vmem>>, vector<256x128xf32>,
    %c0_1 = arith.constant 0 : index
    %c0_2 = arith.constant 0 : index
    %c0_3 = arith.constant 0 : index
    %c0_4 = arith.constant 0 : index
    %2 = vector.load %arg2[%c0_1, %c0_2, %c0_3, %c0_4] : memref<1x17x17x16xbf16, #tpu.memory_space<vmem>>, vector<1x17x17x16xbf16>
    %3 = vector.shape_cast %2 : vector<1x17x17x16xbf16> to vector<17x17x16xbf16>
    %4 = vector.extract_strided_slice %3 {offsets = [0, 0, 0], sizes = [16, 16, 16], strides = [1, 1, 1]} : vector<17x17x16xbf16> to vector<16x16x16xbf16>
    %5 = vector.shape_cast %4 : vector<16x16x16xbf16> to vector<256x16xbf16>
    %c0_5 = arith.constant 0 : index
    %c0_6 = arith.constant 0 : index
    %6 = vector.load %arg8[%c0_5, %c0_6] : memref<256x128xf32, #tpu.memory_space<vmem>>, vector<256x128xf32>
    %c0_7 = arith.constant 0 : index
    %c0_8 = arith.constant 0 : index
    %c0_9 = arith.constant 0 : index
    %c0_10 = arith.constant 0 : index
    %7 = vector.load %arg3[%c0_7, %c0_8, %c0_9, %c0_10] : memref<2x2x16x128xbf16, #tpu.memory_space<vmem>>, vector<1x1x16x128xbf16>
    %8 = vector.shape_cast %7 : vector<1x1x16x128xbf16> to vector<16x128xbf16>
    %cst_11 = arith.constant dense<0.000000e+00> : vector<256x128xf32>
    %9 = tpu.matmul %5, %8, %cst_11 {dimension_numbers = #tpu.dot_dimension_numbers<[1], [0], [0], [1], [0, 0, 1, 1], [], []>} : vector<256x16xbf16>, vector<16x128xbf16>, vector<256x128xf32> -> vector<256x128xf32>
    %10 = arith.addf %6, %9 : vector<256x128xf32>
    %c0_12 = arith.constant 0 : index
    %c0_13 = arith.constant 0 : index
    %11 = vector.load %arg8[%c0_12, %c0_13] : memref<256x128xf32, #tpu.memory_space<vmem>>, vector<256x128xf32>
    tpu.vector_store %arg8[%c0_12, %c0_13], %10 {strides = array<i32>} : memref<256x128xf32, #tpu.memory_space<vmem>>, vector<256x128xf32>,
    %12 = vector.extract_strided_slice %3 {offsets = [0, 1, 0], sizes = [16, 16, 16], strides = [1, 1, 1]} : vector<17x17x16xbf16> to vector<16x16x16xbf16>
    %13 = vector.shape_cast %12 : vector<16x16x16xbf16> to vector<256x16xbf16>
    %c0_14 = arith.constant 0 : index
    %c0_15 = arith.constant 0 : index
    %14 = vector.load %arg8[%c0_14, %c0_15] : memref<256x128xf32, #tpu.memory_space<vmem>>, vector<256x128xf32>
    %c0_16 = arith.constant 0 : index
    %c1 = arith.constant 1 : index
    %c0_17 = arith.constant 0 : index
    %c0_18 = arith.constant 0 : index
    %15 = vector.load %arg3[%c0_16, %c1, %c0_17, %c0_18] : memref<2x2x16x128xbf16, #tpu.memory_space<vmem>>, vector<1x1x16x128xbf16>
    %16 = vector.shape_cast %15 : vector<1x1x16x128xbf16> to vector<16x128xbf16>
    %cst_19 = arith.constant dense<0.000000e+00> : vector<256x128xf32>
    %17 = tpu.matmul %13, %16, %cst_19 {dimension_numbers = #tpu.dot_dimension_numbers<[1], [0], [0], [1], [0, 0, 1, 1], [], []>} : vector<256x16xbf16>, vector<16x128xbf16>, vector<256x128xf32> -> vector<256x128xf32>
    %18 = arith.addf %14, %17 : vector<256x128xf32>
    %c0_20 = arith.constant 0 : index
    %c0_21 = arith.constant 0 : index
    %19 = vector.load %arg8[%c0_20, %c0_21] : memref<256x128xf32, #tpu.memory_space<vmem>>, vector<256x128xf32>
    tpu.vector_store %arg8[%c0_20, %c0_21], %18 {strides = array<i32>} : memref<256x128xf32, #tpu.memory_space<vmem>>, vector<256x128xf32>,
    %20 = vector.extract_strided_slice %3 {offsets = [1, 0, 0], sizes = [16, 16, 16], strides = [1, 1, 1]} : vector<17x17x16xbf16> to vector<16x16x16xbf16>
    %21 = vector.shape_cast %20 : vector<16x16x16xbf16> to vector<256x16xbf16>
    %c0_22 = arith.constant 0 : index
    %c0_23 = arith.constant 0 : index
    %22 = vector.load %arg8[%c0_22, %c0_23] : memref<256x128xf32, #tpu.memory_space<vmem>>, vector<256x128xf32>
    %c1_24 = arith.constant 1 : index
    %c0_25 = arith.constant 0 : index
    %c0_26 = arith.constant 0 : index
    %c0_27 = arith.constant 0 : index
    %23 = vector.load %arg3[%c1_24, %c0_25, %c0_26, %c0_27] : memref<2x2x16x128xbf16, #tpu.memory_space<vmem>>, vector<1x1x16x128xbf16>
    %24 = vector.shape_cast %23 : vector<1x1x16x128xbf16> to vector<16x128xbf16>
    %cst_28 = arith.constant dense<0.000000e+00> : vector<256x128xf32>
    %25 = tpu.matmul %21, %24, %cst_28 {dimension_numbers = #tpu.dot_dimension_numbers<[1], [0], [0], [1], [0, 0, 1, 1], [], []>} : vector<256x16xbf16>, vector<16x128xbf16>, vector<256x128xf32> -> vector<256x128xf32>
    %26 = arith.addf %22, %25 : vector<256x128xf32>
    %c0_29 = arith.constant 0 : index
    %c0_30 = arith.constant 0 : index
    %27 = vector.load %arg8[%c0_29, %c0_30] : memref<256x128xf32, #tpu.memory_space<vmem>>, vector<256x128xf32>
    tpu.vector_store %arg8[%c0_29, %c0_30], %26 {strides = array<i32>} : memref<256x128xf32, #tpu.memory_space<vmem>>, vector<256x128xf32>,
    %28 = vector.extract_strided_slice %3 {offsets = [1, 1, 0], sizes = [16, 16, 16], strides = [1, 1, 1]} : vector<17x17x16xbf16> to vector<16x16x16xbf16>
    %29 = vector.shape_cast %28 : vector<16x16x16xbf16> to vector<256x16xbf16>
    %c0_31 = arith.constant 0 : index
    %c0_32 = arith.constant 0 : index
    %30 = vector.load %arg8[%c0_31, %c0_32] : memref<256x128xf32, #tpu.memory_space<vmem>>, vector<256x128xf32>
    %c1_33 = arith.constant 1 : index
    %c1_34 = arith.constant 1 : index
    %c0_35 = arith.constant 0 : index
    %c0_36 = arith.constant 0 : index
    %31 = vector.load %arg3[%c1_33, %c1_34, %c0_35, %c0_36] : memref<2x2x16x128xbf16, #tpu.memory_space<vmem>>, vector<1x1x16x128xbf16>
    %32 = vector.shape_cast %31 : vector<1x1x16x128xbf16> to vector<16x128xbf16>
    %cst_37 = arith.constant dense<0.000000e+00> : vector<256x128xf32>
    %33 = tpu.matmul %29, %32, %cst_37 {dimension_numbers = #tpu.dot_dimension_numbers<[1], [0], [0], [1], [0, 0, 1, 1], [], []>} : vector<256x16xbf16>, vector<16x128xbf16>, vector<256x128xf32> -> vector<256x128xf32>
    %34 = arith.addf %30, %33 : vector<256x128xf32>
    %c0_38 = arith.constant 0 : index
    %c0_39 = arith.constant 0 : index
    %35 = vector.load %arg8[%c0_38, %c0_39] : memref<256x128xf32, #tpu.memory_space<vmem>>, vector<256x128xf32>
    tpu.vector_store %arg8[%c0_38, %c0_39], %34 {strides = array<i32>} : memref<256x128xf32, #tpu.memory_space<vmem>>, vector<256x128xf32>,
    %c0_40 = arith.constant 0 : index
    %c0_41 = arith.constant 0 : index
    %36 = vector.load %arg8[%c0_40, %c0_41] : memref<256x128xf32, #tpu.memory_space<vmem>>, vector<256x128xf32>
    %c0_42 = arith.constant 0 : index
    %c0_43 = arith.constant 0 : index
    %37 = vector.load %arg4[%c0_42, %c0_43] : memref<1x128xf32, #tpu.memory_space<vmem>>, vector<1x128xf32>
    %38 = vector.broadcast %37 : vector<1x128xf32> to vector<256x128xf32>
    %39 = arith.addf %36, %38 : vector<256x128xf32>
    %cst_44 = arith.constant 0.000000e+00 : f32
    %40 = vector.broadcast %cst_44 : f32 to vector<256x128xf32>
    %41 = arith.cmpf oge, %39, %40 : vector<256x128xf32>
    %cst_45 = arith.constant 2.000000e-01 : f32
    %42 = vector.broadcast %cst_45 : f32 to vector<256x128xf32>
    %43 = arith.mulf %42, %39 : vector<256x128xf32>
    %44 = arith.select %41, %39, %43 : vector<256x128xi1>, vector<256x128xf32>
    %45 = vector.shape_cast %44 : vector<256x128xf32> to vector<16x16x128xf32>
    %46 = arith.truncf %45 : vector<16x16x128xf32> to vector<16x16x128xbf16>
    %c0_46 = arith.constant 0 : index
    %c0_47 = arith.constant 0 : index
    %c0_48 = arith.constant 0 : index
    %c0_49 = arith.constant 0 : index
    %47 = vector.load %arg5[%c0_46, %c0_47, %c0_48, %c0_49] : memref<1x16x16x128xbf16, #tpu.memory_space<vmem>>, vector<1x16x16x128xbf16>
    %48 = vector.shape_cast %47 : vector<1x16x16x128xbf16> to vector<16x16x128xbf16>
    %49 = vector.shape_cast %46 : vector<16x16x128xbf16> to vector<1x16x16x128xbf16>
    tpu.vector_store %arg5[%c0_46, %c0_47, %c0_48, %c0_49], %49 {strides = array<i32>} : memref<1x16x16x128xbf16, #tpu.memory_space<vmem>>, vector<1x16x16x128xbf16>,
    %50 = tpu.iota {dimensions = array<i32: 0>} : vector<16x16x1xi32>
    %51 = tpu.iota {dimensions = array<i32: 1>} : vector<16x16x1xi32>
    %c1_i32 = arith.constant 1 : i32
    %c0_i32 = arith.constant 0 : i32
    %52 = arith.cmpi eq, %c1_i32, %c0_i32 : i32
    %c1_i32_50 = arith.constant 1 : i32
    %53 = arith.select %52, %c1_i32_50, %c1_i32 : i32
    %54 = arith.remsi %arg0, %53 : i32
    %c0_i32_51 = arith.constant 0 : i32
    %55 = arith.cmpi ne, %54, %c0_i32_51 : i32
    %c0_i32_52 = arith.constant 0 : i32
    %56 = arith.cmpi slt, %54, %c0_i32_52 : i32
    %c0_i32_53 = arith.constant 0 : i32
    %57 = arith.cmpi slt, %53, %c0_i32_53 : i32
    %58 = arith.xori %56, %57 : i1
    %59 = arith.andi %58, %55 : i1
    %60 = arith.addi %54, %53 : i32
    %61 = arith.select %59, %60, %54 : i32
    %c16_i32 = arith.constant 16 : i32
    %62 = arith.muli %61, %c16_i32 : i32
    %63 = vector.broadcast %62 : i32 to vector<16x16x1xi32>
    %64 = arith.addi %63, %50 : vector<16x16x1xi32>
    %c16_i32_54 = arith.constant 16 : i32
    %65 = vector.broadcast %c16_i32_54 : i32 to vector<16x16x1xi32>
    %66 = arith.cmpi slt, %64, %65 : vector<16x16x1xi32>
    %c16_i32_55 = arith.constant 16 : i32
    %67 = vector.broadcast %c16_i32_55 : i32 to vector<16x16x1xi32>
    %68 = arith.cmpi slt, %51, %67 : vector<16x16x1xi32>
    %69 = arith.andi %66, %68 : vector<16x16x1xi1>
    %cst_56 = arith.constant 0.000000e+00 : f32
    %70 = vector.shape_cast %69 : vector<16x16x1xi1> to vector<16x16x1xi1>
    %71 = vector.broadcast %70 : vector<16x16x1xi1> to vector<16x16x128xi1>
    %72 = vector.broadcast %cst_56 : f32 to vector<16x16x128xf32>
    %73 = arith.select %71, %45, %72 : vector<16x16x128xi1>, vector<16x16x128xf32>
    %74 = vector.shape_cast %73 : vector<16x16x128xf32> to vector<256x128xf32>
    %cst_57 = arith.constant dense<0.000000e+00> : vector<128xf32>
    %75 = vector.multi_reduction <add>, %74, %cst_57 [0] : vector<256x128xf32> to vector<128xf32>
    %76 = vector.shape_cast %75 : vector<128xf32> to vector<1x128xf32>
    %c0_58 = arith.constant 0 : index
    %c0_59 = arith.constant 0 : index
    %c0_60 = arith.constant 0 : index
    %77 = vector.load %arg6[%c0_58, %c0_59, %c0_60] : memref<1x1x128xf32, #tpu.memory_space<vmem>>, vector<1x1x128xf32>
    %78 = vector.shape_cast %77 : vector<1x1x128xf32> to vector<1x128xf32>
    %79 = vector.shape_cast %76 : vector<1x128xf32> to vector<1x1x128xf32>
    tpu.vector_store %arg6[%c0_58, %c0_59, %c0_60], %79 {strides = array<i32>} : memref<1x1x128xf32, #tpu.memory_space<vmem>>, vector<1x1x128xf32>,
    %80 = arith.mulf %74, %74 : vector<256x128xf32>
    %cst_61 = arith.constant dense<0.000000e+00> : vector<128xf32>
    %81 = vector.multi_reduction <add>, %80, %cst_61 [0] : vector<256x128xf32> to vector<128xf32>
    %82 = vector.shape_cast %81 : vector<128xf32> to vector<1x128xf32>
    %c0_62 = arith.constant 0 : index
    %c0_63 = arith.constant 0 : index
    %c0_64 = arith.constant 0 : index
    %83 = vector.load %arg7[%c0_62, %c0_63, %c0_64] : memref<1x1x128xf32, #tpu.memory_space<vmem>>, vector<1x1x128xf32>
    %84 = vector.shape_cast %83 : vector<1x1x128xf32> to vector<1x128xf32>
    %85 = vector.shape_cast %82 : vector<1x128xf32> to vector<1x1x128xf32>
    tpu.vector_store %arg7[%c0_62, %c0_63, %c0_64], %85 {strides = array<i32>} : memref<1x1x128xf32, #tpu.memory_space<vmem>>, vector<1x1x128xf32>,
    return
  }
  func.func @transform_0(%arg0: i32, %arg1: i32) -> (i32, i32, i32, i32) {
    %c0_i32 = arith.constant 0 : i32
    %c0_i32_0 = arith.constant 0 : i32
    %c0_i32_1 = arith.constant 0 : i32
    %c0_i32_2 = arith.constant 0 : i32
    return %arg0, %c0_i32, %c0_i32_0, %c0_i32_1 : i32, i32, i32, i32
  }
  func.func @transform_1(%arg0: i32, %arg1: i32) -> (i32, i32, i32, i32) {
    %c0_i32 = arith.constant 0 : i32
    %c0_i32_0 = arith.constant 0 : i32
    %c0_i32_1 = arith.constant 0 : i32
    %c0_i32_2 = arith.constant 0 : i32
    return %c0_i32, %c0_i32_0, %c0_i32_1, %arg1 : i32, i32, i32, i32
  }
  func.func @transform_2(%arg0: i32, %arg1: i32) -> (i32, i32) {
    %c0_i32 = arith.constant 0 : i32
    %c0_i32_0 = arith.constant 0 : i32
    return %c0_i32, %arg1 : i32, i32
  }
  func.func @transform_3(%arg0: i32, %arg1: i32) -> (i32, i32, i32, i32) {
    %c0_i32 = arith.constant 0 : i32
    %c0_i32_0 = arith.constant 0 : i32
    %c0_i32_1 = arith.constant 0 : i32
    return %arg0, %c0_i32, %c0_i32_0, %arg1 : i32, i32, i32, i32
  }
  func.func @transform_4(%arg0: i32, %arg1: i32) -> (i32, i32, i32) {
    %c0_i32 = arith.constant 0 : i32
    %c0_i32_0 = arith.constant 0 : i32
    return %arg0, %c0_i32, %arg1 : i32, i32, i32
  }
  func.func @transform_5(%arg0: i32, %arg1: i32) -> (i32, i32, i32) {
    %c0_i32 = arith.constant 0 : i32
    %c0_i32_0 = arith.constant 0 : i32
    return %arg0, %c0_i32, %arg1 : i32, i32, i32
  }
}

module attributes {stable_mosaic.version = 11 : i64} {
  func.func @_conv_kernel(%arg0: i32, %arg1: i32, %arg2: memref<1x9x9x32xbf16, #tpu.memory_space<vmem>>, %arg3: memref<2x2x32x128xbf16, #tpu.memory_space<vmem>>, %arg4: memref<1x128xf32, #tpu.memory_space<vmem>>, %arg5: memref<1x8x8x128xbf16, #tpu.memory_space<vmem>>, %arg6: memref<1x1x128xf32, #tpu.memory_space<vmem>>, %arg7: memref<1x1x128xf32, #tpu.memory_space<vmem>>, %arg8: memref<64x128xf32, #tpu.memory_space<vmem>>) attributes {dimension_semantics = [#tpu.dimension_semantics<parallel>, #tpu.dimension_semantics<parallel>], iteration_bounds = array<i64: 2, 1>, scalar_prefetch = 0 : i64, scratch_operands = 1 : i64, tpu.core_type = #tpu.core_type<tc>, window_params = [{transform_indices = @transform_0, window_bounds = array<i64: 1, 9, 9, 32>}, {transform_indices = @transform_1, window_bounds = array<i64: 2, 2, 32, 128>}, {transform_indices = @transform_2, window_bounds = array<i64: 1, 128>}, {transform_indices = @transform_3, window_bounds = array<i64: 1, 8, 8, 128>}, {transform_indices = @transform_4, window_bounds = array<i64: 1, 1, 128>}, {transform_indices = @transform_5, window_bounds = array<i64: 1, 1, 128>}]} {
    %cst = arith.constant 0.000000e+00 : f32
    %0 = vector.broadcast %cst : f32 to vector<64x128xf32>
    %c0 = arith.constant 0 : index
    %c0_0 = arith.constant 0 : index
    %1 = vector.load %arg8[%c0, %c0_0] : memref<64x128xf32, #tpu.memory_space<vmem>>, vector<64x128xf32>
    tpu.vector_store %arg8[%c0, %c0_0], %0 {strides = array<i32>} : memref<64x128xf32, #tpu.memory_space<vmem>>, vector<64x128xf32>,
    %c0_1 = arith.constant 0 : index
    %c0_2 = arith.constant 0 : index
    %c0_3 = arith.constant 0 : index
    %c0_4 = arith.constant 0 : index
    %2 = vector.load %arg2[%c0_1, %c0_2, %c0_3, %c0_4] : memref<1x9x9x32xbf16, #tpu.memory_space<vmem>>, vector<1x9x9x32xbf16>
    %3 = vector.shape_cast %2 : vector<1x9x9x32xbf16> to vector<9x9x32xbf16>
    %4 = vector.extract_strided_slice %3 {offsets = [0, 0, 0], sizes = [8, 8, 32], strides = [1, 1, 1]} : vector<9x9x32xbf16> to vector<8x8x32xbf16>
    %5 = vector.shape_cast %4 : vector<8x8x32xbf16> to vector<64x32xbf16>
    %c0_5 = arith.constant 0 : index
    %c0_6 = arith.constant 0 : index
    %6 = vector.load %arg8[%c0_5, %c0_6] : memref<64x128xf32, #tpu.memory_space<vmem>>, vector<64x128xf32>
    %c0_7 = arith.constant 0 : index
    %c0_8 = arith.constant 0 : index
    %c0_9 = arith.constant 0 : index
    %c0_10 = arith.constant 0 : index
    %7 = vector.load %arg3[%c0_7, %c0_8, %c0_9, %c0_10] : memref<2x2x32x128xbf16, #tpu.memory_space<vmem>>, vector<1x1x32x128xbf16>
    %8 = vector.shape_cast %7 : vector<1x1x32x128xbf16> to vector<32x128xbf16>
    %cst_11 = arith.constant dense<0.000000e+00> : vector<64x128xf32>
    %9 = tpu.matmul %5, %8, %cst_11 {dimension_numbers = #tpu.dot_dimension_numbers<[1], [0], [0], [1], [0, 0, 1, 1], [], []>} : vector<64x32xbf16>, vector<32x128xbf16>, vector<64x128xf32> -> vector<64x128xf32>
    %10 = arith.addf %6, %9 : vector<64x128xf32>
    %c0_12 = arith.constant 0 : index
    %c0_13 = arith.constant 0 : index
    %11 = vector.load %arg8[%c0_12, %c0_13] : memref<64x128xf32, #tpu.memory_space<vmem>>, vector<64x128xf32>
    tpu.vector_store %arg8[%c0_12, %c0_13], %10 {strides = array<i32>} : memref<64x128xf32, #tpu.memory_space<vmem>>, vector<64x128xf32>,
    %12 = vector.extract_strided_slice %3 {offsets = [0, 1, 0], sizes = [8, 8, 32], strides = [1, 1, 1]} : vector<9x9x32xbf16> to vector<8x8x32xbf16>
    %13 = vector.shape_cast %12 : vector<8x8x32xbf16> to vector<64x32xbf16>
    %c0_14 = arith.constant 0 : index
    %c0_15 = arith.constant 0 : index
    %14 = vector.load %arg8[%c0_14, %c0_15] : memref<64x128xf32, #tpu.memory_space<vmem>>, vector<64x128xf32>
    %c0_16 = arith.constant 0 : index
    %c1 = arith.constant 1 : index
    %c0_17 = arith.constant 0 : index
    %c0_18 = arith.constant 0 : index
    %15 = vector.load %arg3[%c0_16, %c1, %c0_17, %c0_18] : memref<2x2x32x128xbf16, #tpu.memory_space<vmem>>, vector<1x1x32x128xbf16>
    %16 = vector.shape_cast %15 : vector<1x1x32x128xbf16> to vector<32x128xbf16>
    %cst_19 = arith.constant dense<0.000000e+00> : vector<64x128xf32>
    %17 = tpu.matmul %13, %16, %cst_19 {dimension_numbers = #tpu.dot_dimension_numbers<[1], [0], [0], [1], [0, 0, 1, 1], [], []>} : vector<64x32xbf16>, vector<32x128xbf16>, vector<64x128xf32> -> vector<64x128xf32>
    %18 = arith.addf %14, %17 : vector<64x128xf32>
    %c0_20 = arith.constant 0 : index
    %c0_21 = arith.constant 0 : index
    %19 = vector.load %arg8[%c0_20, %c0_21] : memref<64x128xf32, #tpu.memory_space<vmem>>, vector<64x128xf32>
    tpu.vector_store %arg8[%c0_20, %c0_21], %18 {strides = array<i32>} : memref<64x128xf32, #tpu.memory_space<vmem>>, vector<64x128xf32>,
    %20 = vector.extract_strided_slice %3 {offsets = [1, 0, 0], sizes = [8, 8, 32], strides = [1, 1, 1]} : vector<9x9x32xbf16> to vector<8x8x32xbf16>
    %21 = vector.shape_cast %20 : vector<8x8x32xbf16> to vector<64x32xbf16>
    %c0_22 = arith.constant 0 : index
    %c0_23 = arith.constant 0 : index
    %22 = vector.load %arg8[%c0_22, %c0_23] : memref<64x128xf32, #tpu.memory_space<vmem>>, vector<64x128xf32>
    %c1_24 = arith.constant 1 : index
    %c0_25 = arith.constant 0 : index
    %c0_26 = arith.constant 0 : index
    %c0_27 = arith.constant 0 : index
    %23 = vector.load %arg3[%c1_24, %c0_25, %c0_26, %c0_27] : memref<2x2x32x128xbf16, #tpu.memory_space<vmem>>, vector<1x1x32x128xbf16>
    %24 = vector.shape_cast %23 : vector<1x1x32x128xbf16> to vector<32x128xbf16>
    %cst_28 = arith.constant dense<0.000000e+00> : vector<64x128xf32>
    %25 = tpu.matmul %21, %24, %cst_28 {dimension_numbers = #tpu.dot_dimension_numbers<[1], [0], [0], [1], [0, 0, 1, 1], [], []>} : vector<64x32xbf16>, vector<32x128xbf16>, vector<64x128xf32> -> vector<64x128xf32>
    %26 = arith.addf %22, %25 : vector<64x128xf32>
    %c0_29 = arith.constant 0 : index
    %c0_30 = arith.constant 0 : index
    %27 = vector.load %arg8[%c0_29, %c0_30] : memref<64x128xf32, #tpu.memory_space<vmem>>, vector<64x128xf32>
    tpu.vector_store %arg8[%c0_29, %c0_30], %26 {strides = array<i32>} : memref<64x128xf32, #tpu.memory_space<vmem>>, vector<64x128xf32>,
    %28 = vector.extract_strided_slice %3 {offsets = [1, 1, 0], sizes = [8, 8, 32], strides = [1, 1, 1]} : vector<9x9x32xbf16> to vector<8x8x32xbf16>
    %29 = vector.shape_cast %28 : vector<8x8x32xbf16> to vector<64x32xbf16>
    %c0_31 = arith.constant 0 : index
    %c0_32 = arith.constant 0 : index
    %30 = vector.load %arg8[%c0_31, %c0_32] : memref<64x128xf32, #tpu.memory_space<vmem>>, vector<64x128xf32>
    %c1_33 = arith.constant 1 : index
    %c1_34 = arith.constant 1 : index
    %c0_35 = arith.constant 0 : index
    %c0_36 = arith.constant 0 : index
    %31 = vector.load %arg3[%c1_33, %c1_34, %c0_35, %c0_36] : memref<2x2x32x128xbf16, #tpu.memory_space<vmem>>, vector<1x1x32x128xbf16>
    %32 = vector.shape_cast %31 : vector<1x1x32x128xbf16> to vector<32x128xbf16>
    %cst_37 = arith.constant dense<0.000000e+00> : vector<64x128xf32>
    %33 = tpu.matmul %29, %32, %cst_37 {dimension_numbers = #tpu.dot_dimension_numbers<[1], [0], [0], [1], [0, 0, 1, 1], [], []>} : vector<64x32xbf16>, vector<32x128xbf16>, vector<64x128xf32> -> vector<64x128xf32>
    %34 = arith.addf %30, %33 : vector<64x128xf32>
    %c0_38 = arith.constant 0 : index
    %c0_39 = arith.constant 0 : index
    %35 = vector.load %arg8[%c0_38, %c0_39] : memref<64x128xf32, #tpu.memory_space<vmem>>, vector<64x128xf32>
    tpu.vector_store %arg8[%c0_38, %c0_39], %34 {strides = array<i32>} : memref<64x128xf32, #tpu.memory_space<vmem>>, vector<64x128xf32>,
    %c0_40 = arith.constant 0 : index
    %c0_41 = arith.constant 0 : index
    %36 = vector.load %arg8[%c0_40, %c0_41] : memref<64x128xf32, #tpu.memory_space<vmem>>, vector<64x128xf32>
    %c0_42 = arith.constant 0 : index
    %c0_43 = arith.constant 0 : index
    %37 = vector.load %arg4[%c0_42, %c0_43] : memref<1x128xf32, #tpu.memory_space<vmem>>, vector<1x128xf32>
    %38 = vector.broadcast %37 : vector<1x128xf32> to vector<64x128xf32>
    %39 = arith.addf %36, %38 : vector<64x128xf32>
    %40 = vector.shape_cast %39 : vector<64x128xf32> to vector<8x8x128xf32>
    %41 = arith.truncf %40 : vector<8x8x128xf32> to vector<8x8x128xbf16>
    %c0_44 = arith.constant 0 : index
    %c0_45 = arith.constant 0 : index
    %c0_46 = arith.constant 0 : index
    %c0_47 = arith.constant 0 : index
    %42 = vector.load %arg5[%c0_44, %c0_45, %c0_46, %c0_47] : memref<1x8x8x128xbf16, #tpu.memory_space<vmem>>, vector<1x8x8x128xbf16>
    %43 = vector.shape_cast %42 : vector<1x8x8x128xbf16> to vector<8x8x128xbf16>
    %44 = vector.shape_cast %41 : vector<8x8x128xbf16> to vector<1x8x8x128xbf16>
    tpu.vector_store %arg5[%c0_44, %c0_45, %c0_46, %c0_47], %44 {strides = array<i32>} : memref<1x8x8x128xbf16, #tpu.memory_space<vmem>>, vector<1x8x8x128xbf16>,
    %45 = tpu.iota {dimensions = array<i32: 0>} : vector<8x8x1xi32>
    %46 = tpu.iota {dimensions = array<i32: 1>} : vector<8x8x1xi32>
    %c1_i32 = arith.constant 1 : i32
    %c0_i32 = arith.constant 0 : i32
    %47 = arith.cmpi eq, %c1_i32, %c0_i32 : i32
    %c1_i32_48 = arith.constant 1 : i32
    %48 = arith.select %47, %c1_i32_48, %c1_i32 : i32
    %49 = arith.remsi %arg0, %48 : i32
    %c0_i32_49 = arith.constant 0 : i32
    %50 = arith.cmpi ne, %49, %c0_i32_49 : i32
    %c0_i32_50 = arith.constant 0 : i32
    %51 = arith.cmpi slt, %49, %c0_i32_50 : i32
    %c0_i32_51 = arith.constant 0 : i32
    %52 = arith.cmpi slt, %48, %c0_i32_51 : i32
    %53 = arith.xori %51, %52 : i1
    %54 = arith.andi %53, %50 : i1
    %55 = arith.addi %49, %48 : i32
    %56 = arith.select %54, %55, %49 : i32
    %c8_i32 = arith.constant 8 : i32
    %57 = arith.muli %56, %c8_i32 : i32
    %58 = vector.broadcast %57 : i32 to vector<8x8x1xi32>
    %59 = arith.addi %58, %45 : vector<8x8x1xi32>
    %c8_i32_52 = arith.constant 8 : i32
    %60 = vector.broadcast %c8_i32_52 : i32 to vector<8x8x1xi32>
    %61 = arith.cmpi slt, %59, %60 : vector<8x8x1xi32>
    %c8_i32_53 = arith.constant 8 : i32
    %62 = vector.broadcast %c8_i32_53 : i32 to vector<8x8x1xi32>
    %63 = arith.cmpi slt, %46, %62 : vector<8x8x1xi32>
    %64 = arith.andi %61, %63 : vector<8x8x1xi1>
    %cst_54 = arith.constant 0.000000e+00 : f32
    %65 = vector.shape_cast %64 : vector<8x8x1xi1> to vector<8x8x1xi1>
    %66 = vector.broadcast %65 : vector<8x8x1xi1> to vector<8x8x128xi1>
    %67 = vector.broadcast %cst_54 : f32 to vector<8x8x128xf32>
    %68 = arith.select %66, %40, %67 : vector<8x8x128xi1>, vector<8x8x128xf32>
    %69 = vector.shape_cast %68 : vector<8x8x128xf32> to vector<64x128xf32>
    %cst_55 = arith.constant dense<0.000000e+00> : vector<128xf32>
    %70 = vector.multi_reduction <add>, %69, %cst_55 [0] : vector<64x128xf32> to vector<128xf32>
    %71 = vector.shape_cast %70 : vector<128xf32> to vector<1x128xf32>
    %c0_56 = arith.constant 0 : index
    %c0_57 = arith.constant 0 : index
    %c0_58 = arith.constant 0 : index
    %72 = vector.load %arg6[%c0_56, %c0_57, %c0_58] : memref<1x1x128xf32, #tpu.memory_space<vmem>>, vector<1x1x128xf32>
    %73 = vector.shape_cast %72 : vector<1x1x128xf32> to vector<1x128xf32>
    %74 = vector.shape_cast %71 : vector<1x128xf32> to vector<1x1x128xf32>
    tpu.vector_store %arg6[%c0_56, %c0_57, %c0_58], %74 {strides = array<i32>} : memref<1x1x128xf32, #tpu.memory_space<vmem>>, vector<1x1x128xf32>,
    %75 = arith.mulf %69, %69 : vector<64x128xf32>
    %cst_59 = arith.constant dense<0.000000e+00> : vector<128xf32>
    %76 = vector.multi_reduction <add>, %75, %cst_59 [0] : vector<64x128xf32> to vector<128xf32>
    %77 = vector.shape_cast %76 : vector<128xf32> to vector<1x128xf32>
    %c0_60 = arith.constant 0 : index
    %c0_61 = arith.constant 0 : index
    %c0_62 = arith.constant 0 : index
    %78 = vector.load %arg7[%c0_60, %c0_61, %c0_62] : memref<1x1x128xf32, #tpu.memory_space<vmem>>, vector<1x1x128xf32>
    %79 = vector.shape_cast %78 : vector<1x1x128xf32> to vector<1x128xf32>
    %80 = vector.shape_cast %77 : vector<1x128xf32> to vector<1x1x128xf32>
    tpu.vector_store %arg7[%c0_60, %c0_61, %c0_62], %80 {strides = array<i32>} : memref<1x1x128xf32, #tpu.memory_space<vmem>>, vector<1x1x128xf32>,
    return
  }
  func.func @transform_0(%arg0: i32, %arg1: i32) -> (i32, i32, i32, i32) {
    %c0_i32 = arith.constant 0 : i32
    %c0_i32_0 = arith.constant 0 : i32
    %c0_i32_1 = arith.constant 0 : i32
    %c0_i32_2 = arith.constant 0 : i32
    return %arg0, %c0_i32, %c0_i32_0, %c0_i32_1 : i32, i32, i32, i32
  }
  func.func @transform_1(%arg0: i32, %arg1: i32) -> (i32, i32, i32, i32) {
    %c0_i32 = arith.constant 0 : i32
    %c0_i32_0 = arith.constant 0 : i32
    %c0_i32_1 = arith.constant 0 : i32
    %c0_i32_2 = arith.constant 0 : i32
    return %c0_i32, %c0_i32_0, %c0_i32_1, %arg1 : i32, i32, i32, i32
  }
  func.func @transform_2(%arg0: i32, %arg1: i32) -> (i32, i32) {
    %c0_i32 = arith.constant 0 : i32
    %c0_i32_0 = arith.constant 0 : i32
    return %c0_i32, %arg1 : i32, i32
  }
  func.func @transform_3(%arg0: i32, %arg1: i32) -> (i32, i32, i32, i32) {
    %c0_i32 = arith.constant 0 : i32
    %c0_i32_0 = arith.constant 0 : i32
    %c0_i32_1 = arith.constant 0 : i32
    return %arg0, %c0_i32, %c0_i32_0, %arg1 : i32, i32, i32, i32
  }
  func.func @transform_4(%arg0: i32, %arg1: i32) -> (i32, i32, i32) {
    %c0_i32 = arith.constant 0 : i32
    %c0_i32_0 = arith.constant 0 : i32
    return %arg0, %c0_i32, %arg1 : i32, i32, i32
  }
  func.func @transform_5(%arg0: i32, %arg1: i32) -> (i32, i32, i32) {
    %c0_i32 = arith.constant 0 : i32
    %c0_i32_0 = arith.constant 0 : i32
    return %arg0, %c0_i32, %arg1 : i32, i32, i32
  }
}

module attributes {stable_mosaic.version = 11 : i64} {
  func.func @_bn_lrelu_kernel(%arg0: i32, %arg1: memref<1x8x8x128xbf16, #tpu.memory_space<vmem>>, %arg2: memref<1x1x1x128xf32, #tpu.memory_space<vmem>>, %arg3: memref<1x1x1x128xf32, #tpu.memory_space<vmem>>, %arg4: memref<1x8x8x128xbf16, #tpu.memory_space<vmem>>) attributes {dimension_semantics = [#tpu.dimension_semantics<parallel>], iteration_bounds = array<i64: 2>, scalar_prefetch = 0 : i64, scratch_operands = 0 : i64, tpu.core_type = #tpu.core_type<tc>, window_params = [{transform_indices = @transform_0, window_bounds = array<i64: 1, 8, 8, 128>}, {pipeline_mode = #tpu.pipeline_mode<synchronous>, transform_indices = @transform_1, window_bounds = array<i64: 1, 1, 1, 128>}, {pipeline_mode = #tpu.pipeline_mode<synchronous>, transform_indices = @transform_2, window_bounds = array<i64: 1, 1, 1, 128>}, {transform_indices = @transform_3, window_bounds = array<i64: 1, 8, 8, 128>}]} {
    %c0 = arith.constant 0 : index
    %c0_0 = arith.constant 0 : index
    %c0_1 = arith.constant 0 : index
    %c0_2 = arith.constant 0 : index
    %0 = vector.load %arg1[%c0, %c0_0, %c0_1, %c0_2] : memref<1x8x8x128xbf16, #tpu.memory_space<vmem>>, vector<1x8x8x128xbf16>
    %1 = arith.extf %0 : vector<1x8x8x128xbf16> to vector<1x8x8x128xf32>
    %c0_3 = arith.constant 0 : index
    %c0_4 = arith.constant 0 : index
    %c0_5 = arith.constant 0 : index
    %c0_6 = arith.constant 0 : index
    %2 = vector.load %arg2[%c0_3, %c0_4, %c0_5, %c0_6] : memref<1x1x1x128xf32, #tpu.memory_space<vmem>>, vector<1x1x1x128xf32>
    %3 = vector.broadcast %2 : vector<1x1x1x128xf32> to vector<1x8x8x128xf32>
    %4 = arith.mulf %1, %3 : vector<1x8x8x128xf32>
    %c0_7 = arith.constant 0 : index
    %c0_8 = arith.constant 0 : index
    %c0_9 = arith.constant 0 : index
    %c0_10 = arith.constant 0 : index
    %5 = vector.load %arg3[%c0_7, %c0_8, %c0_9, %c0_10] : memref<1x1x1x128xf32, #tpu.memory_space<vmem>>, vector<1x1x1x128xf32>
    %6 = vector.broadcast %5 : vector<1x1x1x128xf32> to vector<1x8x8x128xf32>
    %7 = arith.addf %4, %6 : vector<1x8x8x128xf32>
    %cst = arith.constant 0.000000e+00 : f32
    %8 = vector.broadcast %cst : f32 to vector<1x8x8x128xf32>
    %9 = arith.cmpf oge, %7, %8 : vector<1x8x8x128xf32>
    %cst_11 = arith.constant 2.000000e-01 : f32
    %10 = vector.broadcast %cst_11 : f32 to vector<1x8x8x128xf32>
    %11 = arith.mulf %10, %7 : vector<1x8x8x128xf32>
    %12 = arith.select %9, %7, %11 : vector<1x8x8x128xi1>, vector<1x8x8x128xf32>
    %13 = arith.truncf %12 : vector<1x8x8x128xf32> to vector<1x8x8x128xbf16>
    %c0_12 = arith.constant 0 : index
    %c0_13 = arith.constant 0 : index
    %c0_14 = arith.constant 0 : index
    %c0_15 = arith.constant 0 : index
    %14 = vector.load %arg4[%c0_12, %c0_13, %c0_14, %c0_15] : memref<1x8x8x128xbf16, #tpu.memory_space<vmem>>, vector<1x8x8x128xbf16>
    tpu.vector_store %arg4[%c0_12, %c0_13, %c0_14, %c0_15], %13 {strides = array<i32>} : memref<1x8x8x128xbf16, #tpu.memory_space<vmem>>, vector<1x8x8x128xbf16>,
    return
  }
  func.func @transform_0(%arg0: i32) -> (i32, i32, i32, i32) {
    %c0_i32 = arith.constant 0 : i32
    %c0_i32_0 = arith.constant 0 : i32
    %c0_i32_1 = arith.constant 0 : i32
    %c0_i32_2 = arith.constant 0 : i32
    return %arg0, %c0_i32, %c0_i32_0, %c0_i32_1 : i32, i32, i32, i32
  }
  func.func @transform_1(%arg0: i32) -> (i32, i32, i32, i32) {
    %c0_i32 = arith.constant 0 : i32
    %c0_i32_0 = arith.constant 0 : i32
    %c0_i32_1 = arith.constant 0 : i32
    %c0_i32_2 = arith.constant 0 : i32
    %c0_i32_3 = arith.constant 0 : i32
    return %c0_i32, %c0_i32_0, %c0_i32_1, %c0_i32_2 : i32, i32, i32, i32
  }
  func.func @transform_2(%arg0: i32) -> (i32, i32, i32, i32) {
    %c0_i32 = arith.constant 0 : i32
    %c0_i32_0 = arith.constant 0 : i32
    %c0_i32_1 = arith.constant 0 : i32
    %c0_i32_2 = arith.constant 0 : i32
    %c0_i32_3 = arith.constant 0 : i32
    return %c0_i32, %c0_i32_0, %c0_i32_1, %c0_i32_2 : i32, i32, i32, i32
  }
  func.func @transform_3(%arg0: i32) -> (i32, i32, i32, i32) {
    %c0_i32 = arith.constant 0 : i32
    %c0_i32_0 = arith.constant 0 : i32
    %c0_i32_1 = arith.constant 0 : i32
    %c0_i32_2 = arith.constant 0 : i32
    return %arg0, %c0_i32, %c0_i32_0, %c0_i32_1 : i32, i32, i32, i32
  }
}

module attributes {stable_mosaic.version = 11 : i64} {
  func.func @_conv_kernel(%arg0: i32, %arg1: i32, %arg2: memref<1x5x9x64xbf16, #tpu.memory_space<vmem>>, %arg3: memref<2x2x64x128xbf16, #tpu.memory_space<vmem>>, %arg4: memref<1x128xf32, #tpu.memory_space<vmem>>, %arg5: memref<1x4x8x128xbf16, #tpu.memory_space<vmem>>, %arg6: memref<1x1x128xf32, #tpu.memory_space<vmem>>, %arg7: memref<1x1x128xf32, #tpu.memory_space<vmem>>, %arg8: memref<32x128xf32, #tpu.memory_space<vmem>>) attributes {dimension_semantics = [#tpu.dimension_semantics<parallel>, #tpu.dimension_semantics<parallel>], iteration_bounds = array<i64: 2, 1>, scalar_prefetch = 0 : i64, scratch_operands = 1 : i64, tpu.core_type = #tpu.core_type<tc>, window_params = [{transform_indices = @transform_0, window_bounds = array<i64: 1, 5, 9, 64>}, {transform_indices = @transform_1, window_bounds = array<i64: 2, 2, 64, 128>}, {transform_indices = @transform_2, window_bounds = array<i64: 1, 128>}, {transform_indices = @transform_3, window_bounds = array<i64: 1, 4, 8, 128>}, {transform_indices = @transform_4, window_bounds = array<i64: 1, 1, 128>}, {transform_indices = @transform_5, window_bounds = array<i64: 1, 1, 128>}]} {
    %cst = arith.constant 0.000000e+00 : f32
    %0 = vector.broadcast %cst : f32 to vector<32x128xf32>
    %c0 = arith.constant 0 : index
    %c0_0 = arith.constant 0 : index
    %1 = vector.load %arg8[%c0, %c0_0] : memref<32x128xf32, #tpu.memory_space<vmem>>, vector<32x128xf32>
    tpu.vector_store %arg8[%c0, %c0_0], %0 {strides = array<i32>} : memref<32x128xf32, #tpu.memory_space<vmem>>, vector<32x128xf32>,
    %c0_1 = arith.constant 0 : index
    %c0_2 = arith.constant 0 : index
    %c0_3 = arith.constant 0 : index
    %c0_4 = arith.constant 0 : index
    %2 = vector.load %arg2[%c0_1, %c0_2, %c0_3, %c0_4] : memref<1x5x9x64xbf16, #tpu.memory_space<vmem>>, vector<1x5x9x64xbf16>
    %3 = vector.shape_cast %2 : vector<1x5x9x64xbf16> to vector<5x9x64xbf16>
    %4 = vector.extract_strided_slice %3 {offsets = [0, 0, 0], sizes = [4, 8, 64], strides = [1, 1, 1]} : vector<5x9x64xbf16> to vector<4x8x64xbf16>
    %5 = vector.shape_cast %4 : vector<4x8x64xbf16> to vector<32x64xbf16>
    %c0_5 = arith.constant 0 : index
    %c0_6 = arith.constant 0 : index
    %6 = vector.load %arg8[%c0_5, %c0_6] : memref<32x128xf32, #tpu.memory_space<vmem>>, vector<32x128xf32>
    %c0_7 = arith.constant 0 : index
    %c0_8 = arith.constant 0 : index
    %c0_9 = arith.constant 0 : index
    %c0_10 = arith.constant 0 : index
    %7 = vector.load %arg3[%c0_7, %c0_8, %c0_9, %c0_10] : memref<2x2x64x128xbf16, #tpu.memory_space<vmem>>, vector<1x1x64x128xbf16>
    %8 = vector.shape_cast %7 : vector<1x1x64x128xbf16> to vector<64x128xbf16>
    %cst_11 = arith.constant dense<0.000000e+00> : vector<32x128xf32>
    %9 = tpu.matmul %5, %8, %cst_11 {dimension_numbers = #tpu.dot_dimension_numbers<[1], [0], [0], [1], [0, 0, 1, 1], [], []>} : vector<32x64xbf16>, vector<64x128xbf16>, vector<32x128xf32> -> vector<32x128xf32>
    %10 = arith.addf %6, %9 : vector<32x128xf32>
    %c0_12 = arith.constant 0 : index
    %c0_13 = arith.constant 0 : index
    %11 = vector.load %arg8[%c0_12, %c0_13] : memref<32x128xf32, #tpu.memory_space<vmem>>, vector<32x128xf32>
    tpu.vector_store %arg8[%c0_12, %c0_13], %10 {strides = array<i32>} : memref<32x128xf32, #tpu.memory_space<vmem>>, vector<32x128xf32>,
    %12 = vector.extract_strided_slice %3 {offsets = [0, 1, 0], sizes = [4, 8, 64], strides = [1, 1, 1]} : vector<5x9x64xbf16> to vector<4x8x64xbf16>
    %13 = vector.shape_cast %12 : vector<4x8x64xbf16> to vector<32x64xbf16>
    %c0_14 = arith.constant 0 : index
    %c0_15 = arith.constant 0 : index
    %14 = vector.load %arg8[%c0_14, %c0_15] : memref<32x128xf32, #tpu.memory_space<vmem>>, vector<32x128xf32>
    %c0_16 = arith.constant 0 : index
    %c1 = arith.constant 1 : index
    %c0_17 = arith.constant 0 : index
    %c0_18 = arith.constant 0 : index
    %15 = vector.load %arg3[%c0_16, %c1, %c0_17, %c0_18] : memref<2x2x64x128xbf16, #tpu.memory_space<vmem>>, vector<1x1x64x128xbf16>
    %16 = vector.shape_cast %15 : vector<1x1x64x128xbf16> to vector<64x128xbf16>
    %cst_19 = arith.constant dense<0.000000e+00> : vector<32x128xf32>
    %17 = tpu.matmul %13, %16, %cst_19 {dimension_numbers = #tpu.dot_dimension_numbers<[1], [0], [0], [1], [0, 0, 1, 1], [], []>} : vector<32x64xbf16>, vector<64x128xbf16>, vector<32x128xf32> -> vector<32x128xf32>
    %18 = arith.addf %14, %17 : vector<32x128xf32>
    %c0_20 = arith.constant 0 : index
    %c0_21 = arith.constant 0 : index
    %19 = vector.load %arg8[%c0_20, %c0_21] : memref<32x128xf32, #tpu.memory_space<vmem>>, vector<32x128xf32>
    tpu.vector_store %arg8[%c0_20, %c0_21], %18 {strides = array<i32>} : memref<32x128xf32, #tpu.memory_space<vmem>>, vector<32x128xf32>,
    %20 = vector.extract_strided_slice %3 {offsets = [1, 0, 0], sizes = [4, 8, 64], strides = [1, 1, 1]} : vector<5x9x64xbf16> to vector<4x8x64xbf16>
    %21 = vector.shape_cast %20 : vector<4x8x64xbf16> to vector<32x64xbf16>
    %c0_22 = arith.constant 0 : index
    %c0_23 = arith.constant 0 : index
    %22 = vector.load %arg8[%c0_22, %c0_23] : memref<32x128xf32, #tpu.memory_space<vmem>>, vector<32x128xf32>
    %c1_24 = arith.constant 1 : index
    %c0_25 = arith.constant 0 : index
    %c0_26 = arith.constant 0 : index
    %c0_27 = arith.constant 0 : index
    %23 = vector.load %arg3[%c1_24, %c0_25, %c0_26, %c0_27] : memref<2x2x64x128xbf16, #tpu.memory_space<vmem>>, vector<1x1x64x128xbf16>
    %24 = vector.shape_cast %23 : vector<1x1x64x128xbf16> to vector<64x128xbf16>
    %cst_28 = arith.constant dense<0.000000e+00> : vector<32x128xf32>
    %25 = tpu.matmul %21, %24, %cst_28 {dimension_numbers = #tpu.dot_dimension_numbers<[1], [0], [0], [1], [0, 0, 1, 1], [], []>} : vector<32x64xbf16>, vector<64x128xbf16>, vector<32x128xf32> -> vector<32x128xf32>
    %26 = arith.addf %22, %25 : vector<32x128xf32>
    %c0_29 = arith.constant 0 : index
    %c0_30 = arith.constant 0 : index
    %27 = vector.load %arg8[%c0_29, %c0_30] : memref<32x128xf32, #tpu.memory_space<vmem>>, vector<32x128xf32>
    tpu.vector_store %arg8[%c0_29, %c0_30], %26 {strides = array<i32>} : memref<32x128xf32, #tpu.memory_space<vmem>>, vector<32x128xf32>,
    %28 = vector.extract_strided_slice %3 {offsets = [1, 1, 0], sizes = [4, 8, 64], strides = [1, 1, 1]} : vector<5x9x64xbf16> to vector<4x8x64xbf16>
    %29 = vector.shape_cast %28 : vector<4x8x64xbf16> to vector<32x64xbf16>
    %c0_31 = arith.constant 0 : index
    %c0_32 = arith.constant 0 : index
    %30 = vector.load %arg8[%c0_31, %c0_32] : memref<32x128xf32, #tpu.memory_space<vmem>>, vector<32x128xf32>
    %c1_33 = arith.constant 1 : index
    %c1_34 = arith.constant 1 : index
    %c0_35 = arith.constant 0 : index
    %c0_36 = arith.constant 0 : index
    %31 = vector.load %arg3[%c1_33, %c1_34, %c0_35, %c0_36] : memref<2x2x64x128xbf16, #tpu.memory_space<vmem>>, vector<1x1x64x128xbf16>
    %32 = vector.shape_cast %31 : vector<1x1x64x128xbf16> to vector<64x128xbf16>
    %cst_37 = arith.constant dense<0.000000e+00> : vector<32x128xf32>
    %33 = tpu.matmul %29, %32, %cst_37 {dimension_numbers = #tpu.dot_dimension_numbers<[1], [0], [0], [1], [0, 0, 1, 1], [], []>} : vector<32x64xbf16>, vector<64x128xbf16>, vector<32x128xf32> -> vector<32x128xf32>
    %34 = arith.addf %30, %33 : vector<32x128xf32>
    %c0_38 = arith.constant 0 : index
    %c0_39 = arith.constant 0 : index
    %35 = vector.load %arg8[%c0_38, %c0_39] : memref<32x128xf32, #tpu.memory_space<vmem>>, vector<32x128xf32>
    tpu.vector_store %arg8[%c0_38, %c0_39], %34 {strides = array<i32>} : memref<32x128xf32, #tpu.memory_space<vmem>>, vector<32x128xf32>,
    %c0_40 = arith.constant 0 : index
    %c0_41 = arith.constant 0 : index
    %36 = vector.load %arg8[%c0_40, %c0_41] : memref<32x128xf32, #tpu.memory_space<vmem>>, vector<32x128xf32>
    %c0_42 = arith.constant 0 : index
    %c0_43 = arith.constant 0 : index
    %37 = vector.load %arg4[%c0_42, %c0_43] : memref<1x128xf32, #tpu.memory_space<vmem>>, vector<1x128xf32>
    %38 = vector.broadcast %37 : vector<1x128xf32> to vector<32x128xf32>
    %39 = arith.addf %36, %38 : vector<32x128xf32>
    %40 = vector.shape_cast %39 : vector<32x128xf32> to vector<4x8x128xf32>
    %41 = arith.truncf %40 : vector<4x8x128xf32> to vector<4x8x128xbf16>
    %c0_44 = arith.constant 0 : index
    %c0_45 = arith.constant 0 : index
    %c0_46 = arith.constant 0 : index
    %c0_47 = arith.constant 0 : index
    %42 = vector.load %arg5[%c0_44, %c0_45, %c0_46, %c0_47] : memref<1x4x8x128xbf16, #tpu.memory_space<vmem>>, vector<1x4x8x128xbf16>
    %43 = vector.shape_cast %42 : vector<1x4x8x128xbf16> to vector<4x8x128xbf16>
    %44 = vector.shape_cast %41 : vector<4x8x128xbf16> to vector<1x4x8x128xbf16>
    tpu.vector_store %arg5[%c0_44, %c0_45, %c0_46, %c0_47], %44 {strides = array<i32>} : memref<1x4x8x128xbf16, #tpu.memory_space<vmem>>, vector<1x4x8x128xbf16>,
    %45 = tpu.iota {dimensions = array<i32: 0>} : vector<4x8x1xi32>
    %46 = tpu.iota {dimensions = array<i32: 1>} : vector<4x8x1xi32>
    %c1_i32 = arith.constant 1 : i32
    %c0_i32 = arith.constant 0 : i32
    %47 = arith.cmpi eq, %c1_i32, %c0_i32 : i32
    %c1_i32_48 = arith.constant 1 : i32
    %48 = arith.select %47, %c1_i32_48, %c1_i32 : i32
    %49 = arith.remsi %arg0, %48 : i32
    %c0_i32_49 = arith.constant 0 : i32
    %50 = arith.cmpi ne, %49, %c0_i32_49 : i32
    %c0_i32_50 = arith.constant 0 : i32
    %51 = arith.cmpi slt, %49, %c0_i32_50 : i32
    %c0_i32_51 = arith.constant 0 : i32
    %52 = arith.cmpi slt, %48, %c0_i32_51 : i32
    %53 = arith.xori %51, %52 : i1
    %54 = arith.andi %53, %50 : i1
    %55 = arith.addi %49, %48 : i32
    %56 = arith.select %54, %55, %49 : i32
    %c4_i32 = arith.constant 4 : i32
    %57 = arith.muli %56, %c4_i32 : i32
    %58 = vector.broadcast %57 : i32 to vector<4x8x1xi32>
    %59 = arith.addi %58, %45 : vector<4x8x1xi32>
    %c4_i32_52 = arith.constant 4 : i32
    %60 = vector.broadcast %c4_i32_52 : i32 to vector<4x8x1xi32>
    %61 = arith.cmpi slt, %59, %60 : vector<4x8x1xi32>
    %c4_i32_53 = arith.constant 4 : i32
    %62 = vector.broadcast %c4_i32_53 : i32 to vector<4x8x1xi32>
    %63 = arith.cmpi slt, %46, %62 : vector<4x8x1xi32>
    %64 = arith.andi %61, %63 : vector<4x8x1xi1>
    %cst_54 = arith.constant 0.000000e+00 : f32
    %65 = vector.shape_cast %64 : vector<4x8x1xi1> to vector<4x8x1xi1>
    %66 = vector.broadcast %65 : vector<4x8x1xi1> to vector<4x8x128xi1>
    %67 = vector.broadcast %cst_54 : f32 to vector<4x8x128xf32>
    %68 = arith.select %66, %40, %67 : vector<4x8x128xi1>, vector<4x8x128xf32>
    %69 = vector.shape_cast %68 : vector<4x8x128xf32> to vector<32x128xf32>
    %cst_55 = arith.constant dense<0.000000e+00> : vector<128xf32>
    %70 = vector.multi_reduction <add>, %69, %cst_55 [0] : vector<32x128xf32> to vector<128xf32>
    %71 = vector.shape_cast %70 : vector<128xf32> to vector<1x128xf32>
    %c0_56 = arith.constant 0 : index
    %c0_57 = arith.constant 0 : index
    %c0_58 = arith.constant 0 : index
    %72 = vector.load %arg6[%c0_56, %c0_57, %c0_58] : memref<1x1x128xf32, #tpu.memory_space<vmem>>, vector<1x1x128xf32>
    %73 = vector.shape_cast %72 : vector<1x1x128xf32> to vector<1x128xf32>
    %74 = vector.shape_cast %71 : vector<1x128xf32> to vector<1x1x128xf32>
    tpu.vector_store %arg6[%c0_56, %c0_57, %c0_58], %74 {strides = array<i32>} : memref<1x1x128xf32, #tpu.memory_space<vmem>>, vector<1x1x128xf32>,
    %75 = arith.mulf %69, %69 : vector<32x128xf32>
    %cst_59 = arith.constant dense<0.000000e+00> : vector<128xf32>
    %76 = vector.multi_reduction <add>, %75, %cst_59 [0] : vector<32x128xf32> to vector<128xf32>
    %77 = vector.shape_cast %76 : vector<128xf32> to vector<1x128xf32>
    %c0_60 = arith.constant 0 : index
    %c0_61 = arith.constant 0 : index
    %c0_62 = arith.constant 0 : index
    %78 = vector.load %arg7[%c0_60, %c0_61, %c0_62] : memref<1x1x128xf32, #tpu.memory_space<vmem>>, vector<1x1x128xf32>
    %79 = vector.shape_cast %78 : vector<1x1x128xf32> to vector<1x128xf32>
    %80 = vector.shape_cast %77 : vector<1x128xf32> to vector<1x1x128xf32>
    tpu.vector_store %arg7[%c0_60, %c0_61, %c0_62], %80 {strides = array<i32>} : memref<1x1x128xf32, #tpu.memory_space<vmem>>, vector<1x1x128xf32>,
    return
  }
  func.func @transform_0(%arg0: i32, %arg1: i32) -> (i32, i32, i32, i32) {
    %c0_i32 = arith.constant 0 : i32
    %c0_i32_0 = arith.constant 0 : i32
    %c0_i32_1 = arith.constant 0 : i32
    %c0_i32_2 = arith.constant 0 : i32
    return %arg0, %c0_i32, %c0_i32_0, %c0_i32_1 : i32, i32, i32, i32
  }
  func.func @transform_1(%arg0: i32, %arg1: i32) -> (i32, i32, i32, i32) {
    %c0_i32 = arith.constant 0 : i32
    %c0_i32_0 = arith.constant 0 : i32
    %c0_i32_1 = arith.constant 0 : i32
    %c0_i32_2 = arith.constant 0 : i32
    return %c0_i32, %c0_i32_0, %c0_i32_1, %arg1 : i32, i32, i32, i32
  }
  func.func @transform_2(%arg0: i32, %arg1: i32) -> (i32, i32) {
    %c0_i32 = arith.constant 0 : i32
    %c0_i32_0 = arith.constant 0 : i32
    return %c0_i32, %arg1 : i32, i32
  }
  func.func @transform_3(%arg0: i32, %arg1: i32) -> (i32, i32, i32, i32) {
    %c0_i32 = arith.constant 0 : i32
    %c0_i32_0 = arith.constant 0 : i32
    %c0_i32_1 = arith.constant 0 : i32
    return %arg0, %c0_i32, %c0_i32_0, %arg1 : i32, i32, i32, i32
  }
  func.func @transform_4(%arg0: i32, %arg1: i32) -> (i32, i32, i32) {
    %c0_i32 = arith.constant 0 : i32
    %c0_i32_0 = arith.constant 0 : i32
    return %arg0, %c0_i32, %arg1 : i32, i32, i32
  }
  func.func @transform_5(%arg0: i32, %arg1: i32) -> (i32, i32, i32) {
    %c0_i32 = arith.constant 0 : i32
    %c0_i32_0 = arith.constant 0 : i32
    return %arg0, %c0_i32, %arg1 : i32, i32, i32
  }
}

module attributes {stable_mosaic.version = 11 : i64} {
  func.func @_bn_lrelu_kernel(%arg0: i32, %arg1: memref<1x4x8x128xbf16, #tpu.memory_space<vmem>>, %arg2: memref<1x1x1x128xf32, #tpu.memory_space<vmem>>, %arg3: memref<1x1x1x128xf32, #tpu.memory_space<vmem>>, %arg4: memref<1x4x8x128xbf16, #tpu.memory_space<vmem>>) attributes {dimension_semantics = [#tpu.dimension_semantics<parallel>], iteration_bounds = array<i64: 2>, scalar_prefetch = 0 : i64, scratch_operands = 0 : i64, tpu.core_type = #tpu.core_type<tc>, window_params = [{transform_indices = @transform_0, window_bounds = array<i64: 1, 4, 8, 128>}, {pipeline_mode = #tpu.pipeline_mode<synchronous>, transform_indices = @transform_1, window_bounds = array<i64: 1, 1, 1, 128>}, {pipeline_mode = #tpu.pipeline_mode<synchronous>, transform_indices = @transform_2, window_bounds = array<i64: 1, 1, 1, 128>}, {transform_indices = @transform_3, window_bounds = array<i64: 1, 4, 8, 128>}]} {
    %c0 = arith.constant 0 : index
    %c0_0 = arith.constant 0 : index
    %c0_1 = arith.constant 0 : index
    %c0_2 = arith.constant 0 : index
    %0 = vector.load %arg1[%c0, %c0_0, %c0_1, %c0_2] : memref<1x4x8x128xbf16, #tpu.memory_space<vmem>>, vector<1x4x8x128xbf16>
    %1 = arith.extf %0 : vector<1x4x8x128xbf16> to vector<1x4x8x128xf32>
    %c0_3 = arith.constant 0 : index
    %c0_4 = arith.constant 0 : index
    %c0_5 = arith.constant 0 : index
    %c0_6 = arith.constant 0 : index
    %2 = vector.load %arg2[%c0_3, %c0_4, %c0_5, %c0_6] : memref<1x1x1x128xf32, #tpu.memory_space<vmem>>, vector<1x1x1x128xf32>
    %3 = vector.broadcast %2 : vector<1x1x1x128xf32> to vector<1x4x8x128xf32>
    %4 = arith.mulf %1, %3 : vector<1x4x8x128xf32>
    %c0_7 = arith.constant 0 : index
    %c0_8 = arith.constant 0 : index
    %c0_9 = arith.constant 0 : index
    %c0_10 = arith.constant 0 : index
    %5 = vector.load %arg3[%c0_7, %c0_8, %c0_9, %c0_10] : memref<1x1x1x128xf32, #tpu.memory_space<vmem>>, vector<1x1x1x128xf32>
    %6 = vector.broadcast %5 : vector<1x1x1x128xf32> to vector<1x4x8x128xf32>
    %7 = arith.addf %4, %6 : vector<1x4x8x128xf32>
    %cst = arith.constant 0.000000e+00 : f32
    %8 = vector.broadcast %cst : f32 to vector<1x4x8x128xf32>
    %9 = arith.cmpf oge, %7, %8 : vector<1x4x8x128xf32>
    %cst_11 = arith.constant 2.000000e-01 : f32
    %10 = vector.broadcast %cst_11 : f32 to vector<1x4x8x128xf32>
    %11 = arith.mulf %10, %7 : vector<1x4x8x128xf32>
    %12 = arith.select %9, %7, %11 : vector<1x4x8x128xi1>, vector<1x4x8x128xf32>
    %13 = arith.truncf %12 : vector<1x4x8x128xf32> to vector<1x4x8x128xbf16>
    %c0_12 = arith.constant 0 : index
    %c0_13 = arith.constant 0 : index
    %c0_14 = arith.constant 0 : index
    %c0_15 = arith.constant 0 : index
    %14 = vector.load %arg4[%c0_12, %c0_13, %c0_14, %c0_15] : memref<1x4x8x128xbf16, #tpu.memory_space<vmem>>, vector<1x4x8x128xbf16>
    tpu.vector_store %arg4[%c0_12, %c0_13, %c0_14, %c0_15], %13 {strides = array<i32>} : memref<1x4x8x128xbf16, #tpu.memory_space<vmem>>, vector<1x4x8x128xbf16>,
    return
  }
  func.func @transform_0(%arg0: i32) -> (i32, i32, i32, i32) {
    %c0_i32 = arith.constant 0 : i32
    %c0_i32_0 = arith.constant 0 : i32
    %c0_i32_1 = arith.constant 0 : i32
    %c0_i32_2 = arith.constant 0 : i32
    return %arg0, %c0_i32, %c0_i32_0, %c0_i32_1 : i32, i32, i32, i32
  }
  func.func @transform_1(%arg0: i32) -> (i32, i32, i32, i32) {
    %c0_i32 = arith.constant 0 : i32
    %c0_i32_0 = arith.constant 0 : i32
    %c0_i32_1 = arith.constant 0 : i32
    %c0_i32_2 = arith.constant 0 : i32
    %c0_i32_3 = arith.constant 0 : i32
    return %c0_i32, %c0_i32_0, %c0_i32_1, %c0_i32_2 : i32, i32, i32, i32
  }
  func.func @transform_2(%arg0: i32) -> (i32, i32, i32, i32) {
    %c0_i32 = arith.constant 0 : i32
    %c0_i32_0 = arith.constant 0 : i32
    %c0_i32_1 = arith.constant 0 : i32
    %c0_i32_2 = arith.constant 0 : i32
    %c0_i32_3 = arith.constant 0 : i32
    return %c0_i32, %c0_i32_0, %c0_i32_1, %c0_i32_2 : i32, i32, i32, i32
  }
  func.func @transform_3(%arg0: i32) -> (i32, i32, i32, i32) {
    %c0_i32 = arith.constant 0 : i32
    %c0_i32_0 = arith.constant 0 : i32
    %c0_i32_1 = arith.constant 0 : i32
    %c0_i32_2 = arith.constant 0 : i32
    return %arg0, %c0_i32, %c0_i32_0, %c0_i32_1 : i32, i32, i32, i32
  }
}

module attributes {stable_mosaic.version = 11 : i64} {
  func.func @_bn_lrelu_kernel(%arg0: i32, %arg1: memref<1x3x8x128xbf16, #tpu.memory_space<vmem>>, %arg2: memref<1x1x1x128xf32, #tpu.memory_space<vmem>>, %arg3: memref<1x1x1x128xf32, #tpu.memory_space<vmem>>, %arg4: memref<1x3x8x128xbf16, #tpu.memory_space<vmem>>) attributes {dimension_semantics = [#tpu.dimension_semantics<parallel>], iteration_bounds = array<i64: 2>, scalar_prefetch = 0 : i64, scratch_operands = 0 : i64, tpu.core_type = #tpu.core_type<tc>, window_params = [{transform_indices = @transform_0, window_bounds = array<i64: 1, 3, 8, 128>}, {pipeline_mode = #tpu.pipeline_mode<synchronous>, transform_indices = @transform_1, window_bounds = array<i64: 1, 1, 1, 128>}, {pipeline_mode = #tpu.pipeline_mode<synchronous>, transform_indices = @transform_2, window_bounds = array<i64: 1, 1, 1, 128>}, {transform_indices = @transform_3, window_bounds = array<i64: 1, 3, 8, 128>}]} {
    %c0 = arith.constant 0 : index
    %c0_0 = arith.constant 0 : index
    %c0_1 = arith.constant 0 : index
    %c0_2 = arith.constant 0 : index
    %0 = vector.load %arg1[%c0, %c0_0, %c0_1, %c0_2] : memref<1x3x8x128xbf16, #tpu.memory_space<vmem>>, vector<1x3x8x128xbf16>
    %1 = arith.extf %0 : vector<1x3x8x128xbf16> to vector<1x3x8x128xf32>
    %c0_3 = arith.constant 0 : index
    %c0_4 = arith.constant 0 : index
    %c0_5 = arith.constant 0 : index
    %c0_6 = arith.constant 0 : index
    %2 = vector.load %arg2[%c0_3, %c0_4, %c0_5, %c0_6] : memref<1x1x1x128xf32, #tpu.memory_space<vmem>>, vector<1x1x1x128xf32>
    %3 = vector.broadcast %2 : vector<1x1x1x128xf32> to vector<1x3x8x128xf32>
    %4 = arith.mulf %1, %3 : vector<1x3x8x128xf32>
    %c0_7 = arith.constant 0 : index
    %c0_8 = arith.constant 0 : index
    %c0_9 = arith.constant 0 : index
    %c0_10 = arith.constant 0 : index
    %5 = vector.load %arg3[%c0_7, %c0_8, %c0_9, %c0_10] : memref<1x1x1x128xf32, #tpu.memory_space<vmem>>, vector<1x1x1x128xf32>
    %6 = vector.broadcast %5 : vector<1x1x1x128xf32> to vector<1x3x8x128xf32>
    %7 = arith.addf %4, %6 : vector<1x3x8x128xf32>
    %cst = arith.constant 0.000000e+00 : f32
    %8 = vector.broadcast %cst : f32 to vector<1x3x8x128xf32>
    %9 = arith.cmpf oge, %7, %8 : vector<1x3x8x128xf32>
    %cst_11 = arith.constant 2.000000e-01 : f32
    %10 = vector.broadcast %cst_11 : f32 to vector<1x3x8x128xf32>
    %11 = arith.mulf %10, %7 : vector<1x3x8x128xf32>
    %12 = arith.select %9, %7, %11 : vector<1x3x8x128xi1>, vector<1x3x8x128xf32>
    %13 = arith.truncf %12 : vector<1x3x8x128xf32> to vector<1x3x8x128xbf16>
    %c0_12 = arith.constant 0 : index
    %c0_13 = arith.constant 0 : index
    %c0_14 = arith.constant 0 : index
    %c0_15 = arith.constant 0 : index
    %14 = vector.load %arg4[%c0_12, %c0_13, %c0_14, %c0_15] : memref<1x3x8x128xbf16, #tpu.memory_space<vmem>>, vector<1x3x8x128xbf16>
    tpu.vector_store %arg4[%c0_12, %c0_13, %c0_14, %c0_15], %13 {strides = array<i32>} : memref<1x3x8x128xbf16, #tpu.memory_space<vmem>>, vector<1x3x8x128xbf16>,
    return
  }
  func.func @transform_0(%arg0: i32) -> (i32, i32, i32, i32) {
    %c0_i32 = arith.constant 0 : i32
    %c0_i32_0 = arith.constant 0 : i32
    %c0_i32_1 = arith.constant 0 : i32
    %c0_i32_2 = arith.constant 0 : i32
    return %arg0, %c0_i32, %c0_i32_0, %c0_i32_1 : i32, i32, i32, i32
  }
  func.func @transform_1(%arg0: i32) -> (i32, i32, i32, i32) {
    %c0_i32 = arith.constant 0 : i32
    %c0_i32_0 = arith.constant 0 : i32
    %c0_i32_1 = arith.constant 0 : i32
    %c0_i32_2 = arith.constant 0 : i32
    %c0_i32_3 = arith.constant 0 : i32
    return %c0_i32, %c0_i32_0, %c0_i32_1, %c0_i32_2 : i32, i32, i32, i32
  }
  func.func @transform_2(%arg0: i32) -> (i32, i32, i32, i32) {
    %c0_i32 = arith.constant 0 : i32
    %c0_i32_0 = arith.constant 0 : i32
    %c0_i32_1 = arith.constant 0 : i32
    %c0_i32_2 = arith.constant 0 : i32
    %c0_i32_3 = arith.constant 0 : i32
    return %c0_i32, %c0_i32_0, %c0_i32_1, %c0_i32_2 : i32, i32, i32, i32
  }
  func.func @transform_3(%arg0: i32) -> (i32, i32, i32, i32) {
    %c0_i32 = arith.constant 0 : i32
    %c0_i32_0 = arith.constant 0 : i32
    %c0_i32_1 = arith.constant 0 : i32
    %c0_i32_2 = arith.constant 0 : i32
    return %arg0, %c0_i32, %c0_i32_0, %c0_i32_1 : i32, i32, i32, i32
  }
}

module attributes {stable_mosaic.version = 11 : i64} {
  func.func @_conv_kernel(%arg0: i32, %arg1: i32, %arg2: memref<1x6x11x32xbf16, #tpu.memory_space<vmem>>, %arg3: memref<4x4x32x128xbf16, #tpu.memory_space<vmem>>, %arg4: memref<1x128xf32, #tpu.memory_space<vmem>>, %arg5: memref<1x3x8x128xbf16, #tpu.memory_space<vmem>>, %arg6: memref<1x1x128xf32, #tpu.memory_space<vmem>>, %arg7: memref<1x1x128xf32, #tpu.memory_space<vmem>>, %arg8: memref<24x128xf32, #tpu.memory_space<vmem>>) attributes {dimension_semantics = [#tpu.dimension_semantics<parallel>, #tpu.dimension_semantics<parallel>], iteration_bounds = array<i64: 2, 1>, scalar_prefetch = 0 : i64, scratch_operands = 1 : i64, tpu.core_type = #tpu.core_type<tc>, window_params = [{transform_indices = @transform_0, window_bounds = array<i64: 1, 6, 11, 32>}, {transform_indices = @transform_1, window_bounds = array<i64: 4, 4, 32, 128>}, {transform_indices = @transform_2, window_bounds = array<i64: 1, 128>}, {transform_indices = @transform_3, window_bounds = array<i64: 1, 3, 8, 128>}, {transform_indices = @transform_4, window_bounds = array<i64: 1, 1, 128>}, {transform_indices = @transform_5, window_bounds = array<i64: 1, 1, 128>}]} {
    %cst = arith.constant 0.000000e+00 : f32
    %0 = vector.broadcast %cst : f32 to vector<24x128xf32>
    %c0 = arith.constant 0 : index
    %c0_0 = arith.constant 0 : index
    %1 = vector.load %arg8[%c0, %c0_0] : memref<24x128xf32, #tpu.memory_space<vmem>>, vector<24x128xf32>
    tpu.vector_store %arg8[%c0, %c0_0], %0 {strides = array<i32>} : memref<24x128xf32, #tpu.memory_space<vmem>>, vector<24x128xf32>,
    %c0_1 = arith.constant 0 : index
    %c0_2 = arith.constant 0 : index
    %c0_3 = arith.constant 0 : index
    %c0_4 = arith.constant 0 : index
    %2 = vector.load %arg2[%c0_1, %c0_2, %c0_3, %c0_4] : memref<1x6x11x32xbf16, #tpu.memory_space<vmem>>, vector<1x6x11x32xbf16>
    %3 = vector.shape_cast %2 : vector<1x6x11x32xbf16> to vector<6x11x32xbf16>
    %4 = vector.extract_strided_slice %3 {offsets = [0, 0, 0], sizes = [3, 8, 32], strides = [1, 1, 1]} : vector<6x11x32xbf16> to vector<3x8x32xbf16>
    %5 = vector.shape_cast %4 : vector<3x8x32xbf16> to vector<24x32xbf16>
    %c0_5 = arith.constant 0 : index
    %c0_6 = arith.constant 0 : index
    %6 = vector.load %arg8[%c0_5, %c0_6] : memref<24x128xf32, #tpu.memory_space<vmem>>, vector<24x128xf32>
    %c0_7 = arith.constant 0 : index
    %c0_8 = arith.constant 0 : index
    %c0_9 = arith.constant 0 : index
    %c0_10 = arith.constant 0 : index
    %7 = vector.load %arg3[%c0_7, %c0_8, %c0_9, %c0_10] : memref<4x4x32x128xbf16, #tpu.memory_space<vmem>>, vector<1x1x32x128xbf16>
    %8 = vector.shape_cast %7 : vector<1x1x32x128xbf16> to vector<32x128xbf16>
    %cst_11 = arith.constant dense<0.000000e+00> : vector<24x128xf32>
    %9 = tpu.matmul %5, %8, %cst_11 {dimension_numbers = #tpu.dot_dimension_numbers<[1], [0], [0], [1], [0, 0, 1, 1], [], []>} : vector<24x32xbf16>, vector<32x128xbf16>, vector<24x128xf32> -> vector<24x128xf32>
    %10 = arith.addf %6, %9 : vector<24x128xf32>
    %c0_12 = arith.constant 0 : index
    %c0_13 = arith.constant 0 : index
    %11 = vector.load %arg8[%c0_12, %c0_13] : memref<24x128xf32, #tpu.memory_space<vmem>>, vector<24x128xf32>
    tpu.vector_store %arg8[%c0_12, %c0_13], %10 {strides = array<i32>} : memref<24x128xf32, #tpu.memory_space<vmem>>, vector<24x128xf32>,
    %12 = vector.extract_strided_slice %3 {offsets = [0, 1, 0], sizes = [3, 8, 32], strides = [1, 1, 1]} : vector<6x11x32xbf16> to vector<3x8x32xbf16>
    %13 = vector.shape_cast %12 : vector<3x8x32xbf16> to vector<24x32xbf16>
    %c0_14 = arith.constant 0 : index
    %c0_15 = arith.constant 0 : index
    %14 = vector.load %arg8[%c0_14, %c0_15] : memref<24x128xf32, #tpu.memory_space<vmem>>, vector<24x128xf32>
    %c0_16 = arith.constant 0 : index
    %c1 = arith.constant 1 : index
    %c0_17 = arith.constant 0 : index
    %c0_18 = arith.constant 0 : index
    %15 = vector.load %arg3[%c0_16, %c1, %c0_17, %c0_18] : memref<4x4x32x128xbf16, #tpu.memory_space<vmem>>, vector<1x1x32x128xbf16>
    %16 = vector.shape_cast %15 : vector<1x1x32x128xbf16> to vector<32x128xbf16>
    %cst_19 = arith.constant dense<0.000000e+00> : vector<24x128xf32>
    %17 = tpu.matmul %13, %16, %cst_19 {dimension_numbers = #tpu.dot_dimension_numbers<[1], [0], [0], [1], [0, 0, 1, 1], [], []>} : vector<24x32xbf16>, vector<32x128xbf16>, vector<24x128xf32> -> vector<24x128xf32>
    %18 = arith.addf %14, %17 : vector<24x128xf32>
    %c0_20 = arith.constant 0 : index
    %c0_21 = arith.constant 0 : index
    %19 = vector.load %arg8[%c0_20, %c0_21] : memref<24x128xf32, #tpu.memory_space<vmem>>, vector<24x128xf32>
    tpu.vector_store %arg8[%c0_20, %c0_21], %18 {strides = array<i32>} : memref<24x128xf32, #tpu.memory_space<vmem>>, vector<24x128xf32>,
    %20 = vector.extract_strided_slice %3 {offsets = [0, 2, 0], sizes = [3, 8, 32], strides = [1, 1, 1]} : vector<6x11x32xbf16> to vector<3x8x32xbf16>
    %21 = vector.shape_cast %20 : vector<3x8x32xbf16> to vector<24x32xbf16>
    %c0_22 = arith.constant 0 : index
    %c0_23 = arith.constant 0 : index
    %22 = vector.load %arg8[%c0_22, %c0_23] : memref<24x128xf32, #tpu.memory_space<vmem>>, vector<24x128xf32>
    %c0_24 = arith.constant 0 : index
    %c2 = arith.constant 2 : index
    %c0_25 = arith.constant 0 : index
    %c0_26 = arith.constant 0 : index
    %23 = vector.load %arg3[%c0_24, %c2, %c0_25, %c0_26] : memref<4x4x32x128xbf16, #tpu.memory_space<vmem>>, vector<1x1x32x128xbf16>
    %24 = vector.shape_cast %23 : vector<1x1x32x128xbf16> to vector<32x128xbf16>
    %cst_27 = arith.constant dense<0.000000e+00> : vector<24x128xf32>
    %25 = tpu.matmul %21, %24, %cst_27 {dimension_numbers = #tpu.dot_dimension_numbers<[1], [0], [0], [1], [0, 0, 1, 1], [], []>} : vector<24x32xbf16>, vector<32x128xbf16>, vector<24x128xf32> -> vector<24x128xf32>
    %26 = arith.addf %22, %25 : vector<24x128xf32>
    %c0_28 = arith.constant 0 : index
    %c0_29 = arith.constant 0 : index
    %27 = vector.load %arg8[%c0_28, %c0_29] : memref<24x128xf32, #tpu.memory_space<vmem>>, vector<24x128xf32>
    tpu.vector_store %arg8[%c0_28, %c0_29], %26 {strides = array<i32>} : memref<24x128xf32, #tpu.memory_space<vmem>>, vector<24x128xf32>,
    %28 = vector.extract_strided_slice %3 {offsets = [0, 3, 0], sizes = [3, 8, 32], strides = [1, 1, 1]} : vector<6x11x32xbf16> to vector<3x8x32xbf16>
    %29 = vector.shape_cast %28 : vector<3x8x32xbf16> to vector<24x32xbf16>
    %c0_30 = arith.constant 0 : index
    %c0_31 = arith.constant 0 : index
    %30 = vector.load %arg8[%c0_30, %c0_31] : memref<24x128xf32, #tpu.memory_space<vmem>>, vector<24x128xf32>
    %c0_32 = arith.constant 0 : index
    %c3 = arith.constant 3 : index
    %c0_33 = arith.constant 0 : index
    %c0_34 = arith.constant 0 : index
    %31 = vector.load %arg3[%c0_32, %c3, %c0_33, %c0_34] : memref<4x4x32x128xbf16, #tpu.memory_space<vmem>>, vector<1x1x32x128xbf16>
    %32 = vector.shape_cast %31 : vector<1x1x32x128xbf16> to vector<32x128xbf16>
    %cst_35 = arith.constant dense<0.000000e+00> : vector<24x128xf32>
    %33 = tpu.matmul %29, %32, %cst_35 {dimension_numbers = #tpu.dot_dimension_numbers<[1], [0], [0], [1], [0, 0, 1, 1], [], []>} : vector<24x32xbf16>, vector<32x128xbf16>, vector<24x128xf32> -> vector<24x128xf32>
    %34 = arith.addf %30, %33 : vector<24x128xf32>
    %c0_36 = arith.constant 0 : index
    %c0_37 = arith.constant 0 : index
    %35 = vector.load %arg8[%c0_36, %c0_37] : memref<24x128xf32, #tpu.memory_space<vmem>>, vector<24x128xf32>
    tpu.vector_store %arg8[%c0_36, %c0_37], %34 {strides = array<i32>} : memref<24x128xf32, #tpu.memory_space<vmem>>, vector<24x128xf32>,
    %36 = vector.extract_strided_slice %3 {offsets = [1, 0, 0], sizes = [3, 8, 32], strides = [1, 1, 1]} : vector<6x11x32xbf16> to vector<3x8x32xbf16>
    %37 = vector.shape_cast %36 : vector<3x8x32xbf16> to vector<24x32xbf16>
    %c0_38 = arith.constant 0 : index
    %c0_39 = arith.constant 0 : index
    %38 = vector.load %arg8[%c0_38, %c0_39] : memref<24x128xf32, #tpu.memory_space<vmem>>, vector<24x128xf32>
    %c1_40 = arith.constant 1 : index
    %c0_41 = arith.constant 0 : index
    %c0_42 = arith.constant 0 : index
    %c0_43 = arith.constant 0 : index
    %39 = vector.load %arg3[%c1_40, %c0_41, %c0_42, %c0_43] : memref<4x4x32x128xbf16, #tpu.memory_space<vmem>>, vector<1x1x32x128xbf16>
    %40 = vector.shape_cast %39 : vector<1x1x32x128xbf16> to vector<32x128xbf16>
    %cst_44 = arith.constant dense<0.000000e+00> : vector<24x128xf32>
    %41 = tpu.matmul %37, %40, %cst_44 {dimension_numbers = #tpu.dot_dimension_numbers<[1], [0], [0], [1], [0, 0, 1, 1], [], []>} : vector<24x32xbf16>, vector<32x128xbf16>, vector<24x128xf32> -> vector<24x128xf32>
    %42 = arith.addf %38, %41 : vector<24x128xf32>
    %c0_45 = arith.constant 0 : index
    %c0_46 = arith.constant 0 : index
    %43 = vector.load %arg8[%c0_45, %c0_46] : memref<24x128xf32, #tpu.memory_space<vmem>>, vector<24x128xf32>
    tpu.vector_store %arg8[%c0_45, %c0_46], %42 {strides = array<i32>} : memref<24x128xf32, #tpu.memory_space<vmem>>, vector<24x128xf32>,
    %44 = vector.extract_strided_slice %3 {offsets = [1, 1, 0], sizes = [3, 8, 32], strides = [1, 1, 1]} : vector<6x11x32xbf16> to vector<3x8x32xbf16>
    %45 = vector.shape_cast %44 : vector<3x8x32xbf16> to vector<24x32xbf16>
    %c0_47 = arith.constant 0 : index
    %c0_48 = arith.constant 0 : index
    %46 = vector.load %arg8[%c0_47, %c0_48] : memref<24x128xf32, #tpu.memory_space<vmem>>, vector<24x128xf32>
    %c1_49 = arith.constant 1 : index
    %c1_50 = arith.constant 1 : index
    %c0_51 = arith.constant 0 : index
    %c0_52 = arith.constant 0 : index
    %47 = vector.load %arg3[%c1_49, %c1_50, %c0_51, %c0_52] : memref<4x4x32x128xbf16, #tpu.memory_space<vmem>>, vector<1x1x32x128xbf16>
    %48 = vector.shape_cast %47 : vector<1x1x32x128xbf16> to vector<32x128xbf16>
    %cst_53 = arith.constant dense<0.000000e+00> : vector<24x128xf32>
    %49 = tpu.matmul %45, %48, %cst_53 {dimension_numbers = #tpu.dot_dimension_numbers<[1], [0], [0], [1], [0, 0, 1, 1], [], []>} : vector<24x32xbf16>, vector<32x128xbf16>, vector<24x128xf32> -> vector<24x128xf32>
    %50 = arith.addf %46, %49 : vector<24x128xf32>
    %c0_54 = arith.constant 0 : index
    %c0_55 = arith.constant 0 : index
    %51 = vector.load %arg8[%c0_54, %c0_55] : memref<24x128xf32, #tpu.memory_space<vmem>>, vector<24x128xf32>
    tpu.vector_store %arg8[%c0_54, %c0_55], %50 {strides = array<i32>} : memref<24x128xf32, #tpu.memory_space<vmem>>, vector<24x128xf32>,
    %52 = vector.extract_strided_slice %3 {offsets = [1, 2, 0], sizes = [3, 8, 32], strides = [1, 1, 1]} : vector<6x11x32xbf16> to vector<3x8x32xbf16>
    %53 = vector.shape_cast %52 : vector<3x8x32xbf16> to vector<24x32xbf16>
    %c0_56 = arith.constant 0 : index
    %c0_57 = arith.constant 0 : index
    %54 = vector.load %arg8[%c0_56, %c0_57] : memref<24x128xf32, #tpu.memory_space<vmem>>, vector<24x128xf32>
    %c1_58 = arith.constant 1 : index
    %c2_59 = arith.constant 2 : index
    %c0_60 = arith.constant 0 : index
    %c0_61 = arith.constant 0 : index
    %55 = vector.load %arg3[%c1_58, %c2_59, %c0_60, %c0_61] : memref<4x4x32x128xbf16, #tpu.memory_space<vmem>>, vector<1x1x32x128xbf16>
    %56 = vector.shape_cast %55 : vector<1x1x32x128xbf16> to vector<32x128xbf16>
    %cst_62 = arith.constant dense<0.000000e+00> : vector<24x128xf32>
    %57 = tpu.matmul %53, %56, %cst_62 {dimension_numbers = #tpu.dot_dimension_numbers<[1], [0], [0], [1], [0, 0, 1, 1], [], []>} : vector<24x32xbf16>, vector<32x128xbf16>, vector<24x128xf32> -> vector<24x128xf32>
    %58 = arith.addf %54, %57 : vector<24x128xf32>
    %c0_63 = arith.constant 0 : index
    %c0_64 = arith.constant 0 : index
    %59 = vector.load %arg8[%c0_63, %c0_64] : memref<24x128xf32, #tpu.memory_space<vmem>>, vector<24x128xf32>
    tpu.vector_store %arg8[%c0_63, %c0_64], %58 {strides = array<i32>} : memref<24x128xf32, #tpu.memory_space<vmem>>, vector<24x128xf32>,
    %60 = vector.extract_strided_slice %3 {offsets = [1, 3, 0], sizes = [3, 8, 32], strides = [1, 1, 1]} : vector<6x11x32xbf16> to vector<3x8x32xbf16>
    %61 = vector.shape_cast %60 : vector<3x8x32xbf16> to vector<24x32xbf16>
    %c0_65 = arith.constant 0 : index
    %c0_66 = arith.constant 0 : index
    %62 = vector.load %arg8[%c0_65, %c0_66] : memref<24x128xf32, #tpu.memory_space<vmem>>, vector<24x128xf32>
    %c1_67 = arith.constant 1 : index
    %c3_68 = arith.constant 3 : index
    %c0_69 = arith.constant 0 : index
    %c0_70 = arith.constant 0 : index
    %63 = vector.load %arg3[%c1_67, %c3_68, %c0_69, %c0_70] : memref<4x4x32x128xbf16, #tpu.memory_space<vmem>>, vector<1x1x32x128xbf16>
    %64 = vector.shape_cast %63 : vector<1x1x32x128xbf16> to vector<32x128xbf16>
    %cst_71 = arith.constant dense<0.000000e+00> : vector<24x128xf32>
    %65 = tpu.matmul %61, %64, %cst_71 {dimension_numbers = #tpu.dot_dimension_numbers<[1], [0], [0], [1], [0, 0, 1, 1], [], []>} : vector<24x32xbf16>, vector<32x128xbf16>, vector<24x128xf32> -> vector<24x128xf32>
    %66 = arith.addf %62, %65 : vector<24x128xf32>
    %c0_72 = arith.constant 0 : index
    %c0_73 = arith.constant 0 : index
    %67 = vector.load %arg8[%c0_72, %c0_73] : memref<24x128xf32, #tpu.memory_space<vmem>>, vector<24x128xf32>
    tpu.vector_store %arg8[%c0_72, %c0_73], %66 {strides = array<i32>} : memref<24x128xf32, #tpu.memory_space<vmem>>, vector<24x128xf32>,
    %68 = vector.extract_strided_slice %3 {offsets = [2, 0, 0], sizes = [3, 8, 32], strides = [1, 1, 1]} : vector<6x11x32xbf16> to vector<3x8x32xbf16>
    %69 = vector.shape_cast %68 : vector<3x8x32xbf16> to vector<24x32xbf16>
    %c0_74 = arith.constant 0 : index
    %c0_75 = arith.constant 0 : index
    %70 = vector.load %arg8[%c0_74, %c0_75] : memref<24x128xf32, #tpu.memory_space<vmem>>, vector<24x128xf32>
    %c2_76 = arith.constant 2 : index
    %c0_77 = arith.constant 0 : index
    %c0_78 = arith.constant 0 : index
    %c0_79 = arith.constant 0 : index
    %71 = vector.load %arg3[%c2_76, %c0_77, %c0_78, %c0_79] : memref<4x4x32x128xbf16, #tpu.memory_space<vmem>>, vector<1x1x32x128xbf16>
    %72 = vector.shape_cast %71 : vector<1x1x32x128xbf16> to vector<32x128xbf16>
    %cst_80 = arith.constant dense<0.000000e+00> : vector<24x128xf32>
    %73 = tpu.matmul %69, %72, %cst_80 {dimension_numbers = #tpu.dot_dimension_numbers<[1], [0], [0], [1], [0, 0, 1, 1], [], []>} : vector<24x32xbf16>, vector<32x128xbf16>, vector<24x128xf32> -> vector<24x128xf32>
    %74 = arith.addf %70, %73 : vector<24x128xf32>
    %c0_81 = arith.constant 0 : index
    %c0_82 = arith.constant 0 : index
    %75 = vector.load %arg8[%c0_81, %c0_82] : memref<24x128xf32, #tpu.memory_space<vmem>>, vector<24x128xf32>
    tpu.vector_store %arg8[%c0_81, %c0_82], %74 {strides = array<i32>} : memref<24x128xf32, #tpu.memory_space<vmem>>, vector<24x128xf32>,
    %76 = vector.extract_strided_slice %3 {offsets = [2, 1, 0], sizes = [3, 8, 32], strides = [1, 1, 1]} : vector<6x11x32xbf16> to vector<3x8x32xbf16>
    %77 = vector.shape_cast %76 : vector<3x8x32xbf16> to vector<24x32xbf16>
    %c0_83 = arith.constant 0 : index
    %c0_84 = arith.constant 0 : index
    %78 = vector.load %arg8[%c0_83, %c0_84] : memref<24x128xf32, #tpu.memory_space<vmem>>, vector<24x128xf32>
    %c2_85 = arith.constant 2 : index
    %c1_86 = arith.constant 1 : index
    %c0_87 = arith.constant 0 : index
    %c0_88 = arith.constant 0 : index
    %79 = vector.load %arg3[%c2_85, %c1_86, %c0_87, %c0_88] : memref<4x4x32x128xbf16, #tpu.memory_space<vmem>>, vector<1x1x32x128xbf16>
    %80 = vector.shape_cast %79 : vector<1x1x32x128xbf16> to vector<32x128xbf16>
    %cst_89 = arith.constant dense<0.000000e+00> : vector<24x128xf32>
    %81 = tpu.matmul %77, %80, %cst_89 {dimension_numbers = #tpu.dot_dimension_numbers<[1], [0], [0], [1], [0, 0, 1, 1], [], []>} : vector<24x32xbf16>, vector<32x128xbf16>, vector<24x128xf32> -> vector<24x128xf32>
    %82 = arith.addf %78, %81 : vector<24x128xf32>
    %c0_90 = arith.constant 0 : index
    %c0_91 = arith.constant 0 : index
    %83 = vector.load %arg8[%c0_90, %c0_91] : memref<24x128xf32, #tpu.memory_space<vmem>>, vector<24x128xf32>
    tpu.vector_store %arg8[%c0_90, %c0_91], %82 {strides = array<i32>} : memref<24x128xf32, #tpu.memory_space<vmem>>, vector<24x128xf32>,
    %84 = vector.extract_strided_slice %3 {offsets = [2, 2, 0], sizes = [3, 8, 32], strides = [1, 1, 1]} : vector<6x11x32xbf16> to vector<3x8x32xbf16>
    %85 = vector.shape_cast %84 : vector<3x8x32xbf16> to vector<24x32xbf16>
    %c0_92 = arith.constant 0 : index
    %c0_93 = arith.constant 0 : index
    %86 = vector.load %arg8[%c0_92, %c0_93] : memref<24x128xf32, #tpu.memory_space<vmem>>, vector<24x128xf32>
    %c2_94 = arith.constant 2 : index
    %c2_95 = arith.constant 2 : index
    %c0_96 = arith.constant 0 : index
    %c0_97 = arith.constant 0 : index
    %87 = vector.load %arg3[%c2_94, %c2_95, %c0_96, %c0_97] : memref<4x4x32x128xbf16, #tpu.memory_space<vmem>>, vector<1x1x32x128xbf16>
    %88 = vector.shape_cast %87 : vector<1x1x32x128xbf16> to vector<32x128xbf16>
    %cst_98 = arith.constant dense<0.000000e+00> : vector<24x128xf32>
    %89 = tpu.matmul %85, %88, %cst_98 {dimension_numbers = #tpu.dot_dimension_numbers<[1], [0], [0], [1], [0, 0, 1, 1], [], []>} : vector<24x32xbf16>, vector<32x128xbf16>, vector<24x128xf32> -> vector<24x128xf32>
    %90 = arith.addf %86, %89 : vector<24x128xf32>
    %c0_99 = arith.constant 0 : index
    %c0_100 = arith.constant 0 : index
    %91 = vector.load %arg8[%c0_99, %c0_100] : memref<24x128xf32, #tpu.memory_space<vmem>>, vector<24x128xf32>
    tpu.vector_store %arg8[%c0_99, %c0_100], %90 {strides = array<i32>} : memref<24x128xf32, #tpu.memory_space<vmem>>, vector<24x128xf32>,
    %92 = vector.extract_strided_slice %3 {offsets = [2, 3, 0], sizes = [3, 8, 32], strides = [1, 1, 1]} : vector<6x11x32xbf16> to vector<3x8x32xbf16>
    %93 = vector.shape_cast %92 : vector<3x8x32xbf16> to vector<24x32xbf16>
    %c0_101 = arith.constant 0 : index
    %c0_102 = arith.constant 0 : index
    %94 = vector.load %arg8[%c0_101, %c0_102] : memref<24x128xf32, #tpu.memory_space<vmem>>, vector<24x128xf32>
    %c2_103 = arith.constant 2 : index
    %c3_104 = arith.constant 3 : index
    %c0_105 = arith.constant 0 : index
    %c0_106 = arith.constant 0 : index
    %95 = vector.load %arg3[%c2_103, %c3_104, %c0_105, %c0_106] : memref<4x4x32x128xbf16, #tpu.memory_space<vmem>>, vector<1x1x32x128xbf16>
    %96 = vector.shape_cast %95 : vector<1x1x32x128xbf16> to vector<32x128xbf16>
    %cst_107 = arith.constant dense<0.000000e+00> : vector<24x128xf32>
    %97 = tpu.matmul %93, %96, %cst_107 {dimension_numbers = #tpu.dot_dimension_numbers<[1], [0], [0], [1], [0, 0, 1, 1], [], []>} : vector<24x32xbf16>, vector<32x128xbf16>, vector<24x128xf32> -> vector<24x128xf32>
    %98 = arith.addf %94, %97 : vector<24x128xf32>
    %c0_108 = arith.constant 0 : index
    %c0_109 = arith.constant 0 : index
    %99 = vector.load %arg8[%c0_108, %c0_109] : memref<24x128xf32, #tpu.memory_space<vmem>>, vector<24x128xf32>
    tpu.vector_store %arg8[%c0_108, %c0_109], %98 {strides = array<i32>} : memref<24x128xf32, #tpu.memory_space<vmem>>, vector<24x128xf32>,
    %100 = vector.extract_strided_slice %3 {offsets = [3, 0, 0], sizes = [3, 8, 32], strides = [1, 1, 1]} : vector<6x11x32xbf16> to vector<3x8x32xbf16>
    %101 = vector.shape_cast %100 : vector<3x8x32xbf16> to vector<24x32xbf16>
    %c0_110 = arith.constant 0 : index
    %c0_111 = arith.constant 0 : index
    %102 = vector.load %arg8[%c0_110, %c0_111] : memref<24x128xf32, #tpu.memory_space<vmem>>, vector<24x128xf32>
    %c3_112 = arith.constant 3 : index
    %c0_113 = arith.constant 0 : index
    %c0_114 = arith.constant 0 : index
    %c0_115 = arith.constant 0 : index
    %103 = vector.load %arg3[%c3_112, %c0_113, %c0_114, %c0_115] : memref<4x4x32x128xbf16, #tpu.memory_space<vmem>>, vector<1x1x32x128xbf16>
    %104 = vector.shape_cast %103 : vector<1x1x32x128xbf16> to vector<32x128xbf16>
    %cst_116 = arith.constant dense<0.000000e+00> : vector<24x128xf32>
    %105 = tpu.matmul %101, %104, %cst_116 {dimension_numbers = #tpu.dot_dimension_numbers<[1], [0], [0], [1], [0, 0, 1, 1], [], []>} : vector<24x32xbf16>, vector<32x128xbf16>, vector<24x128xf32> -> vector<24x128xf32>
    %106 = arith.addf %102, %105 : vector<24x128xf32>
    %c0_117 = arith.constant 0 : index
    %c0_118 = arith.constant 0 : index
    %107 = vector.load %arg8[%c0_117, %c0_118] : memref<24x128xf32, #tpu.memory_space<vmem>>, vector<24x128xf32>
    tpu.vector_store %arg8[%c0_117, %c0_118], %106 {strides = array<i32>} : memref<24x128xf32, #tpu.memory_space<vmem>>, vector<24x128xf32>,
    %108 = vector.extract_strided_slice %3 {offsets = [3, 1, 0], sizes = [3, 8, 32], strides = [1, 1, 1]} : vector<6x11x32xbf16> to vector<3x8x32xbf16>
    %109 = vector.shape_cast %108 : vector<3x8x32xbf16> to vector<24x32xbf16>
    %c0_119 = arith.constant 0 : index
    %c0_120 = arith.constant 0 : index
    %110 = vector.load %arg8[%c0_119, %c0_120] : memref<24x128xf32, #tpu.memory_space<vmem>>, vector<24x128xf32>
    %c3_121 = arith.constant 3 : index
    %c1_122 = arith.constant 1 : index
    %c0_123 = arith.constant 0 : index
    %c0_124 = arith.constant 0 : index
    %111 = vector.load %arg3[%c3_121, %c1_122, %c0_123, %c0_124] : memref<4x4x32x128xbf16, #tpu.memory_space<vmem>>, vector<1x1x32x128xbf16>
    %112 = vector.shape_cast %111 : vector<1x1x32x128xbf16> to vector<32x128xbf16>
    %cst_125 = arith.constant dense<0.000000e+00> : vector<24x128xf32>
    %113 = tpu.matmul %109, %112, %cst_125 {dimension_numbers = #tpu.dot_dimension_numbers<[1], [0], [0], [1], [0, 0, 1, 1], [], []>} : vector<24x32xbf16>, vector<32x128xbf16>, vector<24x128xf32> -> vector<24x128xf32>
    %114 = arith.addf %110, %113 : vector<24x128xf32>
    %c0_126 = arith.constant 0 : index
    %c0_127 = arith.constant 0 : index
    %115 = vector.load %arg8[%c0_126, %c0_127] : memref<24x128xf32, #tpu.memory_space<vmem>>, vector<24x128xf32>
    tpu.vector_store %arg8[%c0_126, %c0_127], %114 {strides = array<i32>} : memref<24x128xf32, #tpu.memory_space<vmem>>, vector<24x128xf32>,
    %116 = vector.extract_strided_slice %3 {offsets = [3, 2, 0], sizes = [3, 8, 32], strides = [1, 1, 1]} : vector<6x11x32xbf16> to vector<3x8x32xbf16>
    %117 = vector.shape_cast %116 : vector<3x8x32xbf16> to vector<24x32xbf16>
    %c0_128 = arith.constant 0 : index
    %c0_129 = arith.constant 0 : index
    %118 = vector.load %arg8[%c0_128, %c0_129] : memref<24x128xf32, #tpu.memory_space<vmem>>, vector<24x128xf32>
    %c3_130 = arith.constant 3 : index
    %c2_131 = arith.constant 2 : index
    %c0_132 = arith.constant 0 : index
    %c0_133 = arith.constant 0 : index
    %119 = vector.load %arg3[%c3_130, %c2_131, %c0_132, %c0_133] : memref<4x4x32x128xbf16, #tpu.memory_space<vmem>>, vector<1x1x32x128xbf16>
    %120 = vector.shape_cast %119 : vector<1x1x32x128xbf16> to vector<32x128xbf16>
    %cst_134 = arith.constant dense<0.000000e+00> : vector<24x128xf32>
    %121 = tpu.matmul %117, %120, %cst_134 {dimension_numbers = #tpu.dot_dimension_numbers<[1], [0], [0], [1], [0, 0, 1, 1], [], []>} : vector<24x32xbf16>, vector<32x128xbf16>, vector<24x128xf32> -> vector<24x128xf32>
    %122 = arith.addf %118, %121 : vector<24x128xf32>
    %c0_135 = arith.constant 0 : index
    %c0_136 = arith.constant 0 : index
    %123 = vector.load %arg8[%c0_135, %c0_136] : memref<24x128xf32, #tpu.memory_space<vmem>>, vector<24x128xf32>
    tpu.vector_store %arg8[%c0_135, %c0_136], %122 {strides = array<i32>} : memref<24x128xf32, #tpu.memory_space<vmem>>, vector<24x128xf32>,
    %124 = vector.extract_strided_slice %3 {offsets = [3, 3, 0], sizes = [3, 8, 32], strides = [1, 1, 1]} : vector<6x11x32xbf16> to vector<3x8x32xbf16>
    %125 = vector.shape_cast %124 : vector<3x8x32xbf16> to vector<24x32xbf16>
    %c0_137 = arith.constant 0 : index
    %c0_138 = arith.constant 0 : index
    %126 = vector.load %arg8[%c0_137, %c0_138] : memref<24x128xf32, #tpu.memory_space<vmem>>, vector<24x128xf32>
    %c3_139 = arith.constant 3 : index
    %c3_140 = arith.constant 3 : index
    %c0_141 = arith.constant 0 : index
    %c0_142 = arith.constant 0 : index
    %127 = vector.load %arg3[%c3_139, %c3_140, %c0_141, %c0_142] : memref<4x4x32x128xbf16, #tpu.memory_space<vmem>>, vector<1x1x32x128xbf16>
    %128 = vector.shape_cast %127 : vector<1x1x32x128xbf16> to vector<32x128xbf16>
    %cst_143 = arith.constant dense<0.000000e+00> : vector<24x128xf32>
    %129 = tpu.matmul %125, %128, %cst_143 {dimension_numbers = #tpu.dot_dimension_numbers<[1], [0], [0], [1], [0, 0, 1, 1], [], []>} : vector<24x32xbf16>, vector<32x128xbf16>, vector<24x128xf32> -> vector<24x128xf32>
    %130 = arith.addf %126, %129 : vector<24x128xf32>
    %c0_144 = arith.constant 0 : index
    %c0_145 = arith.constant 0 : index
    %131 = vector.load %arg8[%c0_144, %c0_145] : memref<24x128xf32, #tpu.memory_space<vmem>>, vector<24x128xf32>
    tpu.vector_store %arg8[%c0_144, %c0_145], %130 {strides = array<i32>} : memref<24x128xf32, #tpu.memory_space<vmem>>, vector<24x128xf32>,
    %c0_146 = arith.constant 0 : index
    %c0_147 = arith.constant 0 : index
    %132 = vector.load %arg8[%c0_146, %c0_147] : memref<24x128xf32, #tpu.memory_space<vmem>>, vector<24x128xf32>
    %c0_148 = arith.constant 0 : index
    %c0_149 = arith.constant 0 : index
    %133 = vector.load %arg4[%c0_148, %c0_149] : memref<1x128xf32, #tpu.memory_space<vmem>>, vector<1x128xf32>
    %134 = vector.broadcast %133 : vector<1x128xf32> to vector<24x128xf32>
    %135 = arith.addf %132, %134 : vector<24x128xf32>
    %136 = vector.shape_cast %135 : vector<24x128xf32> to vector<3x8x128xf32>
    %137 = arith.truncf %136 : vector<3x8x128xf32> to vector<3x8x128xbf16>
    %c0_150 = arith.constant 0 : index
    %c0_151 = arith.constant 0 : index
    %c0_152 = arith.constant 0 : index
    %c0_153 = arith.constant 0 : index
    %138 = vector.load %arg5[%c0_150, %c0_151, %c0_152, %c0_153] : memref<1x3x8x128xbf16, #tpu.memory_space<vmem>>, vector<1x3x8x128xbf16>
    %139 = vector.shape_cast %138 : vector<1x3x8x128xbf16> to vector<3x8x128xbf16>
    %140 = vector.shape_cast %137 : vector<3x8x128xbf16> to vector<1x3x8x128xbf16>
    tpu.vector_store %arg5[%c0_150, %c0_151, %c0_152, %c0_153], %140 {strides = array<i32>} : memref<1x3x8x128xbf16, #tpu.memory_space<vmem>>, vector<1x3x8x128xbf16>,
    %141 = tpu.iota {dimensions = array<i32: 0>} : vector<3x8x1xi32>
    %142 = tpu.iota {dimensions = array<i32: 1>} : vector<3x8x1xi32>
    %c1_i32 = arith.constant 1 : i32
    %c0_i32 = arith.constant 0 : i32
    %143 = arith.cmpi eq, %c1_i32, %c0_i32 : i32
    %c1_i32_154 = arith.constant 1 : i32
    %144 = arith.select %143, %c1_i32_154, %c1_i32 : i32
    %145 = arith.remsi %arg0, %144 : i32
    %c0_i32_155 = arith.constant 0 : i32
    %146 = arith.cmpi ne, %145, %c0_i32_155 : i32
    %c0_i32_156 = arith.constant 0 : i32
    %147 = arith.cmpi slt, %145, %c0_i32_156 : i32
    %c0_i32_157 = arith.constant 0 : i32
    %148 = arith.cmpi slt, %144, %c0_i32_157 : i32
    %149 = arith.xori %147, %148 : i1
    %150 = arith.andi %149, %146 : i1
    %151 = arith.addi %145, %144 : i32
    %152 = arith.select %150, %151, %145 : i32
    %c3_i32 = arith.constant 3 : i32
    %153 = arith.muli %152, %c3_i32 : i32
    %154 = vector.broadcast %153 : i32 to vector<3x8x1xi32>
    %155 = arith.addi %154, %141 : vector<3x8x1xi32>
    %c3_i32_158 = arith.constant 3 : i32
    %156 = vector.broadcast %c3_i32_158 : i32 to vector<3x8x1xi32>
    %157 = arith.cmpi slt, %155, %156 : vector<3x8x1xi32>
    %c3_i32_159 = arith.constant 3 : i32
    %158 = vector.broadcast %c3_i32_159 : i32 to vector<3x8x1xi32>
    %159 = arith.cmpi slt, %142, %158 : vector<3x8x1xi32>
    %160 = arith.andi %157, %159 : vector<3x8x1xi1>
    %cst_160 = arith.constant 0.000000e+00 : f32
    %161 = vector.shape_cast %160 : vector<3x8x1xi1> to vector<3x8x1xi1>
    %162 = vector.broadcast %161 : vector<3x8x1xi1> to vector<3x8x128xi1>
    %163 = vector.broadcast %cst_160 : f32 to vector<3x8x128xf32>
    %164 = arith.select %162, %136, %163 : vector<3x8x128xi1>, vector<3x8x128xf32>
    %165 = vector.shape_cast %164 : vector<3x8x128xf32> to vector<24x128xf32>
    %cst_161 = arith.constant dense<0.000000e+00> : vector<128xf32>
    %166 = vector.multi_reduction <add>, %165, %cst_161 [0] : vector<24x128xf32> to vector<128xf32>
    %167 = vector.shape_cast %166 : vector<128xf32> to vector<1x128xf32>
    %c0_162 = arith.constant 0 : index
    %c0_163 = arith.constant 0 : index
    %c0_164 = arith.constant 0 : index
    %168 = vector.load %arg6[%c0_162, %c0_163, %c0_164] : memref<1x1x128xf32, #tpu.memory_space<vmem>>, vector<1x1x128xf32>
    %169 = vector.shape_cast %168 : vector<1x1x128xf32> to vector<1x128xf32>
    %170 = vector.shape_cast %167 : vector<1x128xf32> to vector<1x1x128xf32>
    tpu.vector_store %arg6[%c0_162, %c0_163, %c0_164], %170 {strides = array<i32>} : memref<1x1x128xf32, #tpu.memory_space<vmem>>, vector<1x1x128xf32>,
    %171 = arith.mulf %165, %165 : vector<24x128xf32>
    %cst_165 = arith.constant dense<0.000000e+00> : vector<128xf32>
    %172 = vector.multi_reduction <add>, %171, %cst_165 [0] : vector<24x128xf32> to vector<128xf32>
    %173 = vector.shape_cast %172 : vector<128xf32> to vector<1x128xf32>
    %c0_166 = arith.constant 0 : index
    %c0_167 = arith.constant 0 : index
    %c0_168 = arith.constant 0 : index
    %174 = vector.load %arg7[%c0_166, %c0_167, %c0_168] : memref<1x1x128xf32, #tpu.memory_space<vmem>>, vector<1x1x128xf32>
    %175 = vector.shape_cast %174 : vector<1x1x128xf32> to vector<1x128xf32>
    %176 = vector.shape_cast %173 : vector<1x128xf32> to vector<1x1x128xf32>
    tpu.vector_store %arg7[%c0_166, %c0_167, %c0_168], %176 {strides = array<i32>} : memref<1x1x128xf32, #tpu.memory_space<vmem>>, vector<1x1x128xf32>,
    return
  }
  func.func @transform_0(%arg0: i32, %arg1: i32) -> (i32, i32, i32, i32) {
    %c0_i32 = arith.constant 0 : i32
    %c0_i32_0 = arith.constant 0 : i32
    %c0_i32_1 = arith.constant 0 : i32
    %c0_i32_2 = arith.constant 0 : i32
    return %arg0, %c0_i32, %c0_i32_0, %c0_i32_1 : i32, i32, i32, i32
  }
  func.func @transform_1(%arg0: i32, %arg1: i32) -> (i32, i32, i32, i32) {
    %c0_i32 = arith.constant 0 : i32
    %c0_i32_0 = arith.constant 0 : i32
    %c0_i32_1 = arith.constant 0 : i32
    %c0_i32_2 = arith.constant 0 : i32
    return %c0_i32, %c0_i32_0, %c0_i32_1, %arg1 : i32, i32, i32, i32
  }
  func.func @transform_2(%arg0: i32, %arg1: i32) -> (i32, i32) {
    %c0_i32 = arith.constant 0 : i32
    %c0_i32_0 = arith.constant 0 : i32
    return %c0_i32, %arg1 : i32, i32
  }
  func.func @transform_3(%arg0: i32, %arg1: i32) -> (i32, i32, i32, i32) {
    %c0_i32 = arith.constant 0 : i32
    %c0_i32_0 = arith.constant 0 : i32
    %c0_i32_1 = arith.constant 0 : i32
    return %arg0, %c0_i32, %c0_i32_0, %arg1 : i32, i32, i32, i32
  }
  func.func @transform_4(%arg0: i32, %arg1: i32) -> (i32, i32, i32) {
    %c0_i32 = arith.constant 0 : i32
    %c0_i32_0 = arith.constant 0 : i32
    return %arg0, %c0_i32, %arg1 : i32, i32, i32
  }
  func.func @transform_5(%arg0: i32, %arg1: i32) -> (i32, i32, i32) {
    %c0_i32 = arith.constant 0 : i32
    %c0_i32_0 = arith.constant 0 : i32
    return %arg0, %c0_i32, %arg1 : i32, i32, i32
  }
}

module attributes {stable_mosaic.version = 11 : i64} {
  func.func @_conv_kernel(%arg0: i32, %arg1: i32, %arg2: memref<1x5x11x64xbf16, #tpu.memory_space<vmem>>, %arg3: memref<4x4x64x128xbf16, #tpu.memory_space<vmem>>, %arg4: memref<1x128xf32, #tpu.memory_space<vmem>>, %arg5: memref<1x2x8x128xf32, #tpu.memory_space<vmem>>, %arg6: memref<1x1x128xf32, #tpu.memory_space<vmem>>, %arg7: memref<1x1x128xf32, #tpu.memory_space<vmem>>, %arg8: memref<16x128xf32, #tpu.memory_space<vmem>>) attributes {dimension_semantics = [#tpu.dimension_semantics<parallel>, #tpu.dimension_semantics<parallel>], iteration_bounds = array<i64: 2, 1>, scalar_prefetch = 0 : i64, scratch_operands = 1 : i64, tpu.core_type = #tpu.core_type<tc>, window_params = [{transform_indices = @transform_0, window_bounds = array<i64: 1, 5, 11, 64>}, {transform_indices = @transform_1, window_bounds = array<i64: 4, 4, 64, 128>}, {transform_indices = @transform_2, window_bounds = array<i64: 1, 128>}, {transform_indices = @transform_3, window_bounds = array<i64: 1, 2, 8, 128>}, {transform_indices = @transform_4, window_bounds = array<i64: 1, 1, 128>}, {transform_indices = @transform_5, window_bounds = array<i64: 1, 1, 128>}]} {
    %cst = arith.constant 0.000000e+00 : f32
    %0 = vector.broadcast %cst : f32 to vector<16x128xf32>
    %c0 = arith.constant 0 : index
    %c0_0 = arith.constant 0 : index
    %1 = vector.load %arg8[%c0, %c0_0] : memref<16x128xf32, #tpu.memory_space<vmem>>, vector<16x128xf32>
    tpu.vector_store %arg8[%c0, %c0_0], %0 {strides = array<i32>} : memref<16x128xf32, #tpu.memory_space<vmem>>, vector<16x128xf32>,
    %c0_1 = arith.constant 0 : index
    %c0_2 = arith.constant 0 : index
    %c0_3 = arith.constant 0 : index
    %c0_4 = arith.constant 0 : index
    %2 = vector.load %arg2[%c0_1, %c0_2, %c0_3, %c0_4] : memref<1x5x11x64xbf16, #tpu.memory_space<vmem>>, vector<1x5x11x64xbf16>
    %3 = vector.shape_cast %2 : vector<1x5x11x64xbf16> to vector<5x11x64xbf16>
    %4 = vector.extract_strided_slice %3 {offsets = [0, 0, 0], sizes = [2, 8, 64], strides = [1, 1, 1]} : vector<5x11x64xbf16> to vector<2x8x64xbf16>
    %5 = vector.shape_cast %4 : vector<2x8x64xbf16> to vector<16x64xbf16>
    %c0_5 = arith.constant 0 : index
    %c0_6 = arith.constant 0 : index
    %6 = vector.load %arg8[%c0_5, %c0_6] : memref<16x128xf32, #tpu.memory_space<vmem>>, vector<16x128xf32>
    %c0_7 = arith.constant 0 : index
    %c0_8 = arith.constant 0 : index
    %c0_9 = arith.constant 0 : index
    %c0_10 = arith.constant 0 : index
    %7 = vector.load %arg3[%c0_7, %c0_8, %c0_9, %c0_10] : memref<4x4x64x128xbf16, #tpu.memory_space<vmem>>, vector<1x1x64x128xbf16>
    %8 = vector.shape_cast %7 : vector<1x1x64x128xbf16> to vector<64x128xbf16>
    %cst_11 = arith.constant dense<0.000000e+00> : vector<16x128xf32>
    %9 = tpu.matmul %5, %8, %cst_11 {dimension_numbers = #tpu.dot_dimension_numbers<[1], [0], [0], [1], [0, 0, 1, 1], [], []>} : vector<16x64xbf16>, vector<64x128xbf16>, vector<16x128xf32> -> vector<16x128xf32>
    %10 = arith.addf %6, %9 : vector<16x128xf32>
    %c0_12 = arith.constant 0 : index
    %c0_13 = arith.constant 0 : index
    %11 = vector.load %arg8[%c0_12, %c0_13] : memref<16x128xf32, #tpu.memory_space<vmem>>, vector<16x128xf32>
    tpu.vector_store %arg8[%c0_12, %c0_13], %10 {strides = array<i32>} : memref<16x128xf32, #tpu.memory_space<vmem>>, vector<16x128xf32>,
    %12 = vector.extract_strided_slice %3 {offsets = [0, 1, 0], sizes = [2, 8, 64], strides = [1, 1, 1]} : vector<5x11x64xbf16> to vector<2x8x64xbf16>
    %13 = vector.shape_cast %12 : vector<2x8x64xbf16> to vector<16x64xbf16>
    %c0_14 = arith.constant 0 : index
    %c0_15 = arith.constant 0 : index
    %14 = vector.load %arg8[%c0_14, %c0_15] : memref<16x128xf32, #tpu.memory_space<vmem>>, vector<16x128xf32>
    %c0_16 = arith.constant 0 : index
    %c1 = arith.constant 1 : index
    %c0_17 = arith.constant 0 : index
    %c0_18 = arith.constant 0 : index
    %15 = vector.load %arg3[%c0_16, %c1, %c0_17, %c0_18] : memref<4x4x64x128xbf16, #tpu.memory_space<vmem>>, vector<1x1x64x128xbf16>
    %16 = vector.shape_cast %15 : vector<1x1x64x128xbf16> to vector<64x128xbf16>
    %cst_19 = arith.constant dense<0.000000e+00> : vector<16x128xf32>
    %17 = tpu.matmul %13, %16, %cst_19 {dimension_numbers = #tpu.dot_dimension_numbers<[1], [0], [0], [1], [0, 0, 1, 1], [], []>} : vector<16x64xbf16>, vector<64x128xbf16>, vector<16x128xf32> -> vector<16x128xf32>
    %18 = arith.addf %14, %17 : vector<16x128xf32>
    %c0_20 = arith.constant 0 : index
    %c0_21 = arith.constant 0 : index
    %19 = vector.load %arg8[%c0_20, %c0_21] : memref<16x128xf32, #tpu.memory_space<vmem>>, vector<16x128xf32>
    tpu.vector_store %arg8[%c0_20, %c0_21], %18 {strides = array<i32>} : memref<16x128xf32, #tpu.memory_space<vmem>>, vector<16x128xf32>,
    %20 = vector.extract_strided_slice %3 {offsets = [0, 2, 0], sizes = [2, 8, 64], strides = [1, 1, 1]} : vector<5x11x64xbf16> to vector<2x8x64xbf16>
    %21 = vector.shape_cast %20 : vector<2x8x64xbf16> to vector<16x64xbf16>
    %c0_22 = arith.constant 0 : index
    %c0_23 = arith.constant 0 : index
    %22 = vector.load %arg8[%c0_22, %c0_23] : memref<16x128xf32, #tpu.memory_space<vmem>>, vector<16x128xf32>
    %c0_24 = arith.constant 0 : index
    %c2 = arith.constant 2 : index
    %c0_25 = arith.constant 0 : index
    %c0_26 = arith.constant 0 : index
    %23 = vector.load %arg3[%c0_24, %c2, %c0_25, %c0_26] : memref<4x4x64x128xbf16, #tpu.memory_space<vmem>>, vector<1x1x64x128xbf16>
    %24 = vector.shape_cast %23 : vector<1x1x64x128xbf16> to vector<64x128xbf16>
    %cst_27 = arith.constant dense<0.000000e+00> : vector<16x128xf32>
    %25 = tpu.matmul %21, %24, %cst_27 {dimension_numbers = #tpu.dot_dimension_numbers<[1], [0], [0], [1], [0, 0, 1, 1], [], []>} : vector<16x64xbf16>, vector<64x128xbf16>, vector<16x128xf32> -> vector<16x128xf32>
    %26 = arith.addf %22, %25 : vector<16x128xf32>
    %c0_28 = arith.constant 0 : index
    %c0_29 = arith.constant 0 : index
    %27 = vector.load %arg8[%c0_28, %c0_29] : memref<16x128xf32, #tpu.memory_space<vmem>>, vector<16x128xf32>
    tpu.vector_store %arg8[%c0_28, %c0_29], %26 {strides = array<i32>} : memref<16x128xf32, #tpu.memory_space<vmem>>, vector<16x128xf32>,
    %28 = vector.extract_strided_slice %3 {offsets = [0, 3, 0], sizes = [2, 8, 64], strides = [1, 1, 1]} : vector<5x11x64xbf16> to vector<2x8x64xbf16>
    %29 = vector.shape_cast %28 : vector<2x8x64xbf16> to vector<16x64xbf16>
    %c0_30 = arith.constant 0 : index
    %c0_31 = arith.constant 0 : index
    %30 = vector.load %arg8[%c0_30, %c0_31] : memref<16x128xf32, #tpu.memory_space<vmem>>, vector<16x128xf32>
    %c0_32 = arith.constant 0 : index
    %c3 = arith.constant 3 : index
    %c0_33 = arith.constant 0 : index
    %c0_34 = arith.constant 0 : index
    %31 = vector.load %arg3[%c0_32, %c3, %c0_33, %c0_34] : memref<4x4x64x128xbf16, #tpu.memory_space<vmem>>, vector<1x1x64x128xbf16>
    %32 = vector.shape_cast %31 : vector<1x1x64x128xbf16> to vector<64x128xbf16>
    %cst_35 = arith.constant dense<0.000000e+00> : vector<16x128xf32>
    %33 = tpu.matmul %29, %32, %cst_35 {dimension_numbers = #tpu.dot_dimension_numbers<[1], [0], [0], [1], [0, 0, 1, 1], [], []>} : vector<16x64xbf16>, vector<64x128xbf16>, vector<16x128xf32> -> vector<16x128xf32>
    %34 = arith.addf %30, %33 : vector<16x128xf32>
    %c0_36 = arith.constant 0 : index
    %c0_37 = arith.constant 0 : index
    %35 = vector.load %arg8[%c0_36, %c0_37] : memref<16x128xf32, #tpu.memory_space<vmem>>, vector<16x128xf32>
    tpu.vector_store %arg8[%c0_36, %c0_37], %34 {strides = array<i32>} : memref<16x128xf32, #tpu.memory_space<vmem>>, vector<16x128xf32>,
    %36 = vector.extract_strided_slice %3 {offsets = [1, 0, 0], sizes = [2, 8, 64], strides = [1, 1, 1]} : vector<5x11x64xbf16> to vector<2x8x64xbf16>
    %37 = vector.shape_cast %36 : vector<2x8x64xbf16> to vector<16x64xbf16>
    %c0_38 = arith.constant 0 : index
    %c0_39 = arith.constant 0 : index
    %38 = vector.load %arg8[%c0_38, %c0_39] : memref<16x128xf32, #tpu.memory_space<vmem>>, vector<16x128xf32>
    %c1_40 = arith.constant 1 : index
    %c0_41 = arith.constant 0 : index
    %c0_42 = arith.constant 0 : index
    %c0_43 = arith.constant 0 : index
    %39 = vector.load %arg3[%c1_40, %c0_41, %c0_42, %c0_43] : memref<4x4x64x128xbf16, #tpu.memory_space<vmem>>, vector<1x1x64x128xbf16>
    %40 = vector.shape_cast %39 : vector<1x1x64x128xbf16> to vector<64x128xbf16>
    %cst_44 = arith.constant dense<0.000000e+00> : vector<16x128xf32>
    %41 = tpu.matmul %37, %40, %cst_44 {dimension_numbers = #tpu.dot_dimension_numbers<[1], [0], [0], [1], [0, 0, 1, 1], [], []>} : vector<16x64xbf16>, vector<64x128xbf16>, vector<16x128xf32> -> vector<16x128xf32>
    %42 = arith.addf %38, %41 : vector<16x128xf32>
    %c0_45 = arith.constant 0 : index
    %c0_46 = arith.constant 0 : index
    %43 = vector.load %arg8[%c0_45, %c0_46] : memref<16x128xf32, #tpu.memory_space<vmem>>, vector<16x128xf32>
    tpu.vector_store %arg8[%c0_45, %c0_46], %42 {strides = array<i32>} : memref<16x128xf32, #tpu.memory_space<vmem>>, vector<16x128xf32>,
    %44 = vector.extract_strided_slice %3 {offsets = [1, 1, 0], sizes = [2, 8, 64], strides = [1, 1, 1]} : vector<5x11x64xbf16> to vector<2x8x64xbf16>
    %45 = vector.shape_cast %44 : vector<2x8x64xbf16> to vector<16x64xbf16>
    %c0_47 = arith.constant 0 : index
    %c0_48 = arith.constant 0 : index
    %46 = vector.load %arg8[%c0_47, %c0_48] : memref<16x128xf32, #tpu.memory_space<vmem>>, vector<16x128xf32>
    %c1_49 = arith.constant 1 : index
    %c1_50 = arith.constant 1 : index
    %c0_51 = arith.constant 0 : index
    %c0_52 = arith.constant 0 : index
    %47 = vector.load %arg3[%c1_49, %c1_50, %c0_51, %c0_52] : memref<4x4x64x128xbf16, #tpu.memory_space<vmem>>, vector<1x1x64x128xbf16>
    %48 = vector.shape_cast %47 : vector<1x1x64x128xbf16> to vector<64x128xbf16>
    %cst_53 = arith.constant dense<0.000000e+00> : vector<16x128xf32>
    %49 = tpu.matmul %45, %48, %cst_53 {dimension_numbers = #tpu.dot_dimension_numbers<[1], [0], [0], [1], [0, 0, 1, 1], [], []>} : vector<16x64xbf16>, vector<64x128xbf16>, vector<16x128xf32> -> vector<16x128xf32>
    %50 = arith.addf %46, %49 : vector<16x128xf32>
    %c0_54 = arith.constant 0 : index
    %c0_55 = arith.constant 0 : index
    %51 = vector.load %arg8[%c0_54, %c0_55] : memref<16x128xf32, #tpu.memory_space<vmem>>, vector<16x128xf32>
    tpu.vector_store %arg8[%c0_54, %c0_55], %50 {strides = array<i32>} : memref<16x128xf32, #tpu.memory_space<vmem>>, vector<16x128xf32>,
    %52 = vector.extract_strided_slice %3 {offsets = [1, 2, 0], sizes = [2, 8, 64], strides = [1, 1, 1]} : vector<5x11x64xbf16> to vector<2x8x64xbf16>
    %53 = vector.shape_cast %52 : vector<2x8x64xbf16> to vector<16x64xbf16>
    %c0_56 = arith.constant 0 : index
    %c0_57 = arith.constant 0 : index
    %54 = vector.load %arg8[%c0_56, %c0_57] : memref<16x128xf32, #tpu.memory_space<vmem>>, vector<16x128xf32>
    %c1_58 = arith.constant 1 : index
    %c2_59 = arith.constant 2 : index
    %c0_60 = arith.constant 0 : index
    %c0_61 = arith.constant 0 : index
    %55 = vector.load %arg3[%c1_58, %c2_59, %c0_60, %c0_61] : memref<4x4x64x128xbf16, #tpu.memory_space<vmem>>, vector<1x1x64x128xbf16>
    %56 = vector.shape_cast %55 : vector<1x1x64x128xbf16> to vector<64x128xbf16>
    %cst_62 = arith.constant dense<0.000000e+00> : vector<16x128xf32>
    %57 = tpu.matmul %53, %56, %cst_62 {dimension_numbers = #tpu.dot_dimension_numbers<[1], [0], [0], [1], [0, 0, 1, 1], [], []>} : vector<16x64xbf16>, vector<64x128xbf16>, vector<16x128xf32> -> vector<16x128xf32>
    %58 = arith.addf %54, %57 : vector<16x128xf32>
    %c0_63 = arith.constant 0 : index
    %c0_64 = arith.constant 0 : index
    %59 = vector.load %arg8[%c0_63, %c0_64] : memref<16x128xf32, #tpu.memory_space<vmem>>, vector<16x128xf32>
    tpu.vector_store %arg8[%c0_63, %c0_64], %58 {strides = array<i32>} : memref<16x128xf32, #tpu.memory_space<vmem>>, vector<16x128xf32>,
    %60 = vector.extract_strided_slice %3 {offsets = [1, 3, 0], sizes = [2, 8, 64], strides = [1, 1, 1]} : vector<5x11x64xbf16> to vector<2x8x64xbf16>
    %61 = vector.shape_cast %60 : vector<2x8x64xbf16> to vector<16x64xbf16>
    %c0_65 = arith.constant 0 : index
    %c0_66 = arith.constant 0 : index
    %62 = vector.load %arg8[%c0_65, %c0_66] : memref<16x128xf32, #tpu.memory_space<vmem>>, vector<16x128xf32>
    %c1_67 = arith.constant 1 : index
    %c3_68 = arith.constant 3 : index
    %c0_69 = arith.constant 0 : index
    %c0_70 = arith.constant 0 : index
    %63 = vector.load %arg3[%c1_67, %c3_68, %c0_69, %c0_70] : memref<4x4x64x128xbf16, #tpu.memory_space<vmem>>, vector<1x1x64x128xbf16>
    %64 = vector.shape_cast %63 : vector<1x1x64x128xbf16> to vector<64x128xbf16>
    %cst_71 = arith.constant dense<0.000000e+00> : vector<16x128xf32>
    %65 = tpu.matmul %61, %64, %cst_71 {dimension_numbers = #tpu.dot_dimension_numbers<[1], [0], [0], [1], [0, 0, 1, 1], [], []>} : vector<16x64xbf16>, vector<64x128xbf16>, vector<16x128xf32> -> vector<16x128xf32>
    %66 = arith.addf %62, %65 : vector<16x128xf32>
    %c0_72 = arith.constant 0 : index
    %c0_73 = arith.constant 0 : index
    %67 = vector.load %arg8[%c0_72, %c0_73] : memref<16x128xf32, #tpu.memory_space<vmem>>, vector<16x128xf32>
    tpu.vector_store %arg8[%c0_72, %c0_73], %66 {strides = array<i32>} : memref<16x128xf32, #tpu.memory_space<vmem>>, vector<16x128xf32>,
    %68 = vector.extract_strided_slice %3 {offsets = [2, 0, 0], sizes = [2, 8, 64], strides = [1, 1, 1]} : vector<5x11x64xbf16> to vector<2x8x64xbf16>
    %69 = vector.shape_cast %68 : vector<2x8x64xbf16> to vector<16x64xbf16>
    %c0_74 = arith.constant 0 : index
    %c0_75 = arith.constant 0 : index
    %70 = vector.load %arg8[%c0_74, %c0_75] : memref<16x128xf32, #tpu.memory_space<vmem>>, vector<16x128xf32>
    %c2_76 = arith.constant 2 : index
    %c0_77 = arith.constant 0 : index
    %c0_78 = arith.constant 0 : index
    %c0_79 = arith.constant 0 : index
    %71 = vector.load %arg3[%c2_76, %c0_77, %c0_78, %c0_79] : memref<4x4x64x128xbf16, #tpu.memory_space<vmem>>, vector<1x1x64x128xbf16>
    %72 = vector.shape_cast %71 : vector<1x1x64x128xbf16> to vector<64x128xbf16>
    %cst_80 = arith.constant dense<0.000000e+00> : vector<16x128xf32>
    %73 = tpu.matmul %69, %72, %cst_80 {dimension_numbers = #tpu.dot_dimension_numbers<[1], [0], [0], [1], [0, 0, 1, 1], [], []>} : vector<16x64xbf16>, vector<64x128xbf16>, vector<16x128xf32> -> vector<16x128xf32>
    %74 = arith.addf %70, %73 : vector<16x128xf32>
    %c0_81 = arith.constant 0 : index
    %c0_82 = arith.constant 0 : index
    %75 = vector.load %arg8[%c0_81, %c0_82] : memref<16x128xf32, #tpu.memory_space<vmem>>, vector<16x128xf32>
    tpu.vector_store %arg8[%c0_81, %c0_82], %74 {strides = array<i32>} : memref<16x128xf32, #tpu.memory_space<vmem>>, vector<16x128xf32>,
    %76 = vector.extract_strided_slice %3 {offsets = [2, 1, 0], sizes = [2, 8, 64], strides = [1, 1, 1]} : vector<5x11x64xbf16> to vector<2x8x64xbf16>
    %77 = vector.shape_cast %76 : vector<2x8x64xbf16> to vector<16x64xbf16>
    %c0_83 = arith.constant 0 : index
    %c0_84 = arith.constant 0 : index
    %78 = vector.load %arg8[%c0_83, %c0_84] : memref<16x128xf32, #tpu.memory_space<vmem>>, vector<16x128xf32>
    %c2_85 = arith.constant 2 : index
    %c1_86 = arith.constant 1 : index
    %c0_87 = arith.constant 0 : index
    %c0_88 = arith.constant 0 : index
    %79 = vector.load %arg3[%c2_85, %c1_86, %c0_87, %c0_88] : memref<4x4x64x128xbf16, #tpu.memory_space<vmem>>, vector<1x1x64x128xbf16>
    %80 = vector.shape_cast %79 : vector<1x1x64x128xbf16> to vector<64x128xbf16>
    %cst_89 = arith.constant dense<0.000000e+00> : vector<16x128xf32>
    %81 = tpu.matmul %77, %80, %cst_89 {dimension_numbers = #tpu.dot_dimension_numbers<[1], [0], [0], [1], [0, 0, 1, 1], [], []>} : vector<16x64xbf16>, vector<64x128xbf16>, vector<16x128xf32> -> vector<16x128xf32>
    %82 = arith.addf %78, %81 : vector<16x128xf32>
    %c0_90 = arith.constant 0 : index
    %c0_91 = arith.constant 0 : index
    %83 = vector.load %arg8[%c0_90, %c0_91] : memref<16x128xf32, #tpu.memory_space<vmem>>, vector<16x128xf32>
    tpu.vector_store %arg8[%c0_90, %c0_91], %82 {strides = array<i32>} : memref<16x128xf32, #tpu.memory_space<vmem>>, vector<16x128xf32>,
    %84 = vector.extract_strided_slice %3 {offsets = [2, 2, 0], sizes = [2, 8, 64], strides = [1, 1, 1]} : vector<5x11x64xbf16> to vector<2x8x64xbf16>
    %85 = vector.shape_cast %84 : vector<2x8x64xbf16> to vector<16x64xbf16>
    %c0_92 = arith.constant 0 : index
    %c0_93 = arith.constant 0 : index
    %86 = vector.load %arg8[%c0_92, %c0_93] : memref<16x128xf32, #tpu.memory_space<vmem>>, vector<16x128xf32>
    %c2_94 = arith.constant 2 : index
    %c2_95 = arith.constant 2 : index
    %c0_96 = arith.constant 0 : index
    %c0_97 = arith.constant 0 : index
    %87 = vector.load %arg3[%c2_94, %c2_95, %c0_96, %c0_97] : memref<4x4x64x128xbf16, #tpu.memory_space<vmem>>, vector<1x1x64x128xbf16>
    %88 = vector.shape_cast %87 : vector<1x1x64x128xbf16> to vector<64x128xbf16>
    %cst_98 = arith.constant dense<0.000000e+00> : vector<16x128xf32>
    %89 = tpu.matmul %85, %88, %cst_98 {dimension_numbers = #tpu.dot_dimension_numbers<[1], [0], [0], [1], [0, 0, 1, 1], [], []>} : vector<16x64xbf16>, vector<64x128xbf16>, vector<16x128xf32> -> vector<16x128xf32>
    %90 = arith.addf %86, %89 : vector<16x128xf32>
    %c0_99 = arith.constant 0 : index
    %c0_100 = arith.constant 0 : index
    %91 = vector.load %arg8[%c0_99, %c0_100] : memref<16x128xf32, #tpu.memory_space<vmem>>, vector<16x128xf32>
    tpu.vector_store %arg8[%c0_99, %c0_100], %90 {strides = array<i32>} : memref<16x128xf32, #tpu.memory_space<vmem>>, vector<16x128xf32>,
    %92 = vector.extract_strided_slice %3 {offsets = [2, 3, 0], sizes = [2, 8, 64], strides = [1, 1, 1]} : vector<5x11x64xbf16> to vector<2x8x64xbf16>
    %93 = vector.shape_cast %92 : vector<2x8x64xbf16> to vector<16x64xbf16>
    %c0_101 = arith.constant 0 : index
    %c0_102 = arith.constant 0 : index
    %94 = vector.load %arg8[%c0_101, %c0_102] : memref<16x128xf32, #tpu.memory_space<vmem>>, vector<16x128xf32>
    %c2_103 = arith.constant 2 : index
    %c3_104 = arith.constant 3 : index
    %c0_105 = arith.constant 0 : index
    %c0_106 = arith.constant 0 : index
    %95 = vector.load %arg3[%c2_103, %c3_104, %c0_105, %c0_106] : memref<4x4x64x128xbf16, #tpu.memory_space<vmem>>, vector<1x1x64x128xbf16>
    %96 = vector.shape_cast %95 : vector<1x1x64x128xbf16> to vector<64x128xbf16>
    %cst_107 = arith.constant dense<0.000000e+00> : vector<16x128xf32>
    %97 = tpu.matmul %93, %96, %cst_107 {dimension_numbers = #tpu.dot_dimension_numbers<[1], [0], [0], [1], [0, 0, 1, 1], [], []>} : vector<16x64xbf16>, vector<64x128xbf16>, vector<16x128xf32> -> vector<16x128xf32>
    %98 = arith.addf %94, %97 : vector<16x128xf32>
    %c0_108 = arith.constant 0 : index
    %c0_109 = arith.constant 0 : index
    %99 = vector.load %arg8[%c0_108, %c0_109] : memref<16x128xf32, #tpu.memory_space<vmem>>, vector<16x128xf32>
    tpu.vector_store %arg8[%c0_108, %c0_109], %98 {strides = array<i32>} : memref<16x128xf32, #tpu.memory_space<vmem>>, vector<16x128xf32>,
    %100 = vector.extract_strided_slice %3 {offsets = [3, 0, 0], sizes = [2, 8, 64], strides = [1, 1, 1]} : vector<5x11x64xbf16> to vector<2x8x64xbf16>
    %101 = vector.shape_cast %100 : vector<2x8x64xbf16> to vector<16x64xbf16>
    %c0_110 = arith.constant 0 : index
    %c0_111 = arith.constant 0 : index
    %102 = vector.load %arg8[%c0_110, %c0_111] : memref<16x128xf32, #tpu.memory_space<vmem>>, vector<16x128xf32>
    %c3_112 = arith.constant 3 : index
    %c0_113 = arith.constant 0 : index
    %c0_114 = arith.constant 0 : index
    %c0_115 = arith.constant 0 : index
    %103 = vector.load %arg3[%c3_112, %c0_113, %c0_114, %c0_115] : memref<4x4x64x128xbf16, #tpu.memory_space<vmem>>, vector<1x1x64x128xbf16>
    %104 = vector.shape_cast %103 : vector<1x1x64x128xbf16> to vector<64x128xbf16>
    %cst_116 = arith.constant dense<0.000000e+00> : vector<16x128xf32>
    %105 = tpu.matmul %101, %104, %cst_116 {dimension_numbers = #tpu.dot_dimension_numbers<[1], [0], [0], [1], [0, 0, 1, 1], [], []>} : vector<16x64xbf16>, vector<64x128xbf16>, vector<16x128xf32> -> vector<16x128xf32>
    %106 = arith.addf %102, %105 : vector<16x128xf32>
    %c0_117 = arith.constant 0 : index
    %c0_118 = arith.constant 0 : index
    %107 = vector.load %arg8[%c0_117, %c0_118] : memref<16x128xf32, #tpu.memory_space<vmem>>, vector<16x128xf32>
    tpu.vector_store %arg8[%c0_117, %c0_118], %106 {strides = array<i32>} : memref<16x128xf32, #tpu.memory_space<vmem>>, vector<16x128xf32>,
    %108 = vector.extract_strided_slice %3 {offsets = [3, 1, 0], sizes = [2, 8, 64], strides = [1, 1, 1]} : vector<5x11x64xbf16> to vector<2x8x64xbf16>
    %109 = vector.shape_cast %108 : vector<2x8x64xbf16> to vector<16x64xbf16>
    %c0_119 = arith.constant 0 : index
    %c0_120 = arith.constant 0 : index
    %110 = vector.load %arg8[%c0_119, %c0_120] : memref<16x128xf32, #tpu.memory_space<vmem>>, vector<16x128xf32>
    %c3_121 = arith.constant 3 : index
    %c1_122 = arith.constant 1 : index
    %c0_123 = arith.constant 0 : index
    %c0_124 = arith.constant 0 : index
    %111 = vector.load %arg3[%c3_121, %c1_122, %c0_123, %c0_124] : memref<4x4x64x128xbf16, #tpu.memory_space<vmem>>, vector<1x1x64x128xbf16>
    %112 = vector.shape_cast %111 : vector<1x1x64x128xbf16> to vector<64x128xbf16>
    %cst_125 = arith.constant dense<0.000000e+00> : vector<16x128xf32>
    %113 = tpu.matmul %109, %112, %cst_125 {dimension_numbers = #tpu.dot_dimension_numbers<[1], [0], [0], [1], [0, 0, 1, 1], [], []>} : vector<16x64xbf16>, vector<64x128xbf16>, vector<16x128xf32> -> vector<16x128xf32>
    %114 = arith.addf %110, %113 : vector<16x128xf32>
    %c0_126 = arith.constant 0 : index
    %c0_127 = arith.constant 0 : index
    %115 = vector.load %arg8[%c0_126, %c0_127] : memref<16x128xf32, #tpu.memory_space<vmem>>, vector<16x128xf32>
    tpu.vector_store %arg8[%c0_126, %c0_127], %114 {strides = array<i32>} : memref<16x128xf32, #tpu.memory_space<vmem>>, vector<16x128xf32>,
    %116 = vector.extract_strided_slice %3 {offsets = [3, 2, 0], sizes = [2, 8, 64], strides = [1, 1, 1]} : vector<5x11x64xbf16> to vector<2x8x64xbf16>
    %117 = vector.shape_cast %116 : vector<2x8x64xbf16> to vector<16x64xbf16>
    %c0_128 = arith.constant 0 : index
    %c0_129 = arith.constant 0 : index
    %118 = vector.load %arg8[%c0_128, %c0_129] : memref<16x128xf32, #tpu.memory_space<vmem>>, vector<16x128xf32>
    %c3_130 = arith.constant 3 : index
    %c2_131 = arith.constant 2 : index
    %c0_132 = arith.constant 0 : index
    %c0_133 = arith.constant 0 : index
    %119 = vector.load %arg3[%c3_130, %c2_131, %c0_132, %c0_133] : memref<4x4x64x128xbf16, #tpu.memory_space<vmem>>, vector<1x1x64x128xbf16>
    %120 = vector.shape_cast %119 : vector<1x1x64x128xbf16> to vector<64x128xbf16>
    %cst_134 = arith.constant dense<0.000000e+00> : vector<16x128xf32>
    %121 = tpu.matmul %117, %120, %cst_134 {dimension_numbers = #tpu.dot_dimension_numbers<[1], [0], [0], [1], [0, 0, 1, 1], [], []>} : vector<16x64xbf16>, vector<64x128xbf16>, vector<16x128xf32> -> vector<16x128xf32>
    %122 = arith.addf %118, %121 : vector<16x128xf32>
    %c0_135 = arith.constant 0 : index
    %c0_136 = arith.constant 0 : index
    %123 = vector.load %arg8[%c0_135, %c0_136] : memref<16x128xf32, #tpu.memory_space<vmem>>, vector<16x128xf32>
    tpu.vector_store %arg8[%c0_135, %c0_136], %122 {strides = array<i32>} : memref<16x128xf32, #tpu.memory_space<vmem>>, vector<16x128xf32>,
    %124 = vector.extract_strided_slice %3 {offsets = [3, 3, 0], sizes = [2, 8, 64], strides = [1, 1, 1]} : vector<5x11x64xbf16> to vector<2x8x64xbf16>
    %125 = vector.shape_cast %124 : vector<2x8x64xbf16> to vector<16x64xbf16>
    %c0_137 = arith.constant 0 : index
    %c0_138 = arith.constant 0 : index
    %126 = vector.load %arg8[%c0_137, %c0_138] : memref<16x128xf32, #tpu.memory_space<vmem>>, vector<16x128xf32>
    %c3_139 = arith.constant 3 : index
    %c3_140 = arith.constant 3 : index
    %c0_141 = arith.constant 0 : index
    %c0_142 = arith.constant 0 : index
    %127 = vector.load %arg3[%c3_139, %c3_140, %c0_141, %c0_142] : memref<4x4x64x128xbf16, #tpu.memory_space<vmem>>, vector<1x1x64x128xbf16>
    %128 = vector.shape_cast %127 : vector<1x1x64x128xbf16> to vector<64x128xbf16>
    %cst_143 = arith.constant dense<0.000000e+00> : vector<16x128xf32>
    %129 = tpu.matmul %125, %128, %cst_143 {dimension_numbers = #tpu.dot_dimension_numbers<[1], [0], [0], [1], [0, 0, 1, 1], [], []>} : vector<16x64xbf16>, vector<64x128xbf16>, vector<16x128xf32> -> vector<16x128xf32>
    %130 = arith.addf %126, %129 : vector<16x128xf32>
    %c0_144 = arith.constant 0 : index
    %c0_145 = arith.constant 0 : index
    %131 = vector.load %arg8[%c0_144, %c0_145] : memref<16x128xf32, #tpu.memory_space<vmem>>, vector<16x128xf32>
    tpu.vector_store %arg8[%c0_144, %c0_145], %130 {strides = array<i32>} : memref<16x128xf32, #tpu.memory_space<vmem>>, vector<16x128xf32>,
    %c0_146 = arith.constant 0 : index
    %c0_147 = arith.constant 0 : index
    %132 = vector.load %arg8[%c0_146, %c0_147] : memref<16x128xf32, #tpu.memory_space<vmem>>, vector<16x128xf32>
    %c0_148 = arith.constant 0 : index
    %c0_149 = arith.constant 0 : index
    %133 = vector.load %arg4[%c0_148, %c0_149] : memref<1x128xf32, #tpu.memory_space<vmem>>, vector<1x128xf32>
    %134 = vector.broadcast %133 : vector<1x128xf32> to vector<16x128xf32>
    %135 = arith.addf %132, %134 : vector<16x128xf32>
    %136 = vector.shape_cast %135 : vector<16x128xf32> to vector<2x8x128xf32>
    %c0_150 = arith.constant 0 : index
    %c0_151 = arith.constant 0 : index
    %c0_152 = arith.constant 0 : index
    %c0_153 = arith.constant 0 : index
    %137 = vector.load %arg5[%c0_150, %c0_151, %c0_152, %c0_153] : memref<1x2x8x128xf32, #tpu.memory_space<vmem>>, vector<1x2x8x128xf32>
    %138 = vector.shape_cast %137 : vector<1x2x8x128xf32> to vector<2x8x128xf32>
    %139 = vector.shape_cast %136 : vector<2x8x128xf32> to vector<1x2x8x128xf32>
    tpu.vector_store %arg5[%c0_150, %c0_151, %c0_152, %c0_153], %139 {strides = array<i32>} : memref<1x2x8x128xf32, #tpu.memory_space<vmem>>, vector<1x2x8x128xf32>,
    %140 = tpu.iota {dimensions = array<i32: 0>} : vector<2x8x1xi32>
    %141 = tpu.iota {dimensions = array<i32: 1>} : vector<2x8x1xi32>
    %c1_i32 = arith.constant 1 : i32
    %c0_i32 = arith.constant 0 : i32
    %142 = arith.cmpi eq, %c1_i32, %c0_i32 : i32
    %c1_i32_154 = arith.constant 1 : i32
    %143 = arith.select %142, %c1_i32_154, %c1_i32 : i32
    %144 = arith.remsi %arg0, %143 : i32
    %c0_i32_155 = arith.constant 0 : i32
    %145 = arith.cmpi ne, %144, %c0_i32_155 : i32
    %c0_i32_156 = arith.constant 0 : i32
    %146 = arith.cmpi slt, %144, %c0_i32_156 : i32
    %c0_i32_157 = arith.constant 0 : i32
    %147 = arith.cmpi slt, %143, %c0_i32_157 : i32
    %148 = arith.xori %146, %147 : i1
    %149 = arith.andi %148, %145 : i1
    %150 = arith.addi %144, %143 : i32
    %151 = arith.select %149, %150, %144 : i32
    %c2_i32 = arith.constant 2 : i32
    %152 = arith.muli %151, %c2_i32 : i32
    %153 = vector.broadcast %152 : i32 to vector<2x8x1xi32>
    %154 = arith.addi %153, %140 : vector<2x8x1xi32>
    %c2_i32_158 = arith.constant 2 : i32
    %155 = vector.broadcast %c2_i32_158 : i32 to vector<2x8x1xi32>
    %156 = arith.cmpi slt, %154, %155 : vector<2x8x1xi32>
    %c2_i32_159 = arith.constant 2 : i32
    %157 = vector.broadcast %c2_i32_159 : i32 to vector<2x8x1xi32>
    %158 = arith.cmpi slt, %141, %157 : vector<2x8x1xi32>
    %159 = arith.andi %156, %158 : vector<2x8x1xi1>
    %cst_160 = arith.constant 0.000000e+00 : f32
    %160 = vector.shape_cast %159 : vector<2x8x1xi1> to vector<2x8x1xi1>
    %161 = vector.broadcast %160 : vector<2x8x1xi1> to vector<2x8x128xi1>
    %162 = vector.broadcast %cst_160 : f32 to vector<2x8x128xf32>
    %163 = arith.select %161, %136, %162 : vector<2x8x128xi1>, vector<2x8x128xf32>
    %164 = vector.shape_cast %163 : vector<2x8x128xf32> to vector<16x128xf32>
    %cst_161 = arith.constant dense<0.000000e+00> : vector<128xf32>
    %165 = vector.multi_reduction <add>, %164, %cst_161 [0] : vector<16x128xf32> to vector<128xf32>
    %166 = vector.shape_cast %165 : vector<128xf32> to vector<1x128xf32>
    %c0_162 = arith.constant 0 : index
    %c0_163 = arith.constant 0 : index
    %c0_164 = arith.constant 0 : index
    %167 = vector.load %arg6[%c0_162, %c0_163, %c0_164] : memref<1x1x128xf32, #tpu.memory_space<vmem>>, vector<1x1x128xf32>
    %168 = vector.shape_cast %167 : vector<1x1x128xf32> to vector<1x128xf32>
    %169 = vector.shape_cast %166 : vector<1x128xf32> to vector<1x1x128xf32>
    tpu.vector_store %arg6[%c0_162, %c0_163, %c0_164], %169 {strides = array<i32>} : memref<1x1x128xf32, #tpu.memory_space<vmem>>, vector<1x1x128xf32>,
    %170 = arith.mulf %164, %164 : vector<16x128xf32>
    %cst_165 = arith.constant dense<0.000000e+00> : vector<128xf32>
    %171 = vector.multi_reduction <add>, %170, %cst_165 [0] : vector<16x128xf32> to vector<128xf32>
    %172 = vector.shape_cast %171 : vector<128xf32> to vector<1x128xf32>
    %c0_166 = arith.constant 0 : index
    %c0_167 = arith.constant 0 : index
    %c0_168 = arith.constant 0 : index
    %173 = vector.load %arg7[%c0_166, %c0_167, %c0_168] : memref<1x1x128xf32, #tpu.memory_space<vmem>>, vector<1x1x128xf32>
    %174 = vector.shape_cast %173 : vector<1x1x128xf32> to vector<1x128xf32>
    %175 = vector.shape_cast %172 : vector<1x128xf32> to vector<1x1x128xf32>
    tpu.vector_store %arg7[%c0_166, %c0_167, %c0_168], %175 {strides = array<i32>} : memref<1x1x128xf32, #tpu.memory_space<vmem>>, vector<1x1x128xf32>,
    return
  }
  func.func @transform_0(%arg0: i32, %arg1: i32) -> (i32, i32, i32, i32) {
    %c0_i32 = arith.constant 0 : i32
    %c0_i32_0 = arith.constant 0 : i32
    %c0_i32_1 = arith.constant 0 : i32
    %c0_i32_2 = arith.constant 0 : i32
    return %arg0, %c0_i32, %c0_i32_0, %c0_i32_1 : i32, i32, i32, i32
  }
  func.func @transform_1(%arg0: i32, %arg1: i32) -> (i32, i32, i32, i32) {
    %c0_i32 = arith.constant 0 : i32
    %c0_i32_0 = arith.constant 0 : i32
    %c0_i32_1 = arith.constant 0 : i32
    %c0_i32_2 = arith.constant 0 : i32
    return %c0_i32, %c0_i32_0, %c0_i32_1, %arg1 : i32, i32, i32, i32
  }
  func.func @transform_2(%arg0: i32, %arg1: i32) -> (i32, i32) {
    %c0_i32 = arith.constant 0 : i32
    %c0_i32_0 = arith.constant 0 : i32
    return %c0_i32, %arg1 : i32, i32
  }
  func.func @transform_3(%arg0: i32, %arg1: i32) -> (i32, i32, i32, i32) {
    %c0_i32 = arith.constant 0 : i32
    %c0_i32_0 = arith.constant 0 : i32
    %c0_i32_1 = arith.constant 0 : i32
    return %arg0, %c0_i32, %c0_i32_0, %arg1 : i32, i32, i32, i32
  }
  func.func @transform_4(%arg0: i32, %arg1: i32) -> (i32, i32, i32) {
    %c0_i32 = arith.constant 0 : i32
    %c0_i32_0 = arith.constant 0 : i32
    return %arg0, %c0_i32, %arg1 : i32, i32, i32
  }
  func.func @transform_5(%arg0: i32, %arg1: i32) -> (i32, i32, i32) {
    %c0_i32 = arith.constant 0 : i32
    %c0_i32_0 = arith.constant 0 : i32
    return %arg0, %c0_i32, %arg1 : i32, i32, i32
  }
}

</mosaic_0001>

<bundles_post_ra>
// kernel: _lambda_.8
= control target key start
LH: loop header
LB: loop body
LE: loop exit
PB: predicated region body
PF: predicated region fallthrough
CT: control target
= control target key end

     0   :  { %11 = vsyncpa [#allocation4], 0  ;;  %s4281_s0 = inlined_call_operand.vmem [shape: bf16[2,17,17,16], index: 0, kind: input, shape index: {}]   ;;  %s4282_s1 = inlined_call_operand.vmem [shape: bf16[2,2,16,128], index: 1, kind: input, shape index: {}]   ;;  %s4283_s2 = inlined_call_operand.vmem [shape: f32[1,128], index: 2, kind: input, shape index: {}]   ;;  %s4284_s3 = inlined_call_operand.vmem [shape: bf16[2,16,16,128], index: 3, kind: output, shape index: {0}]   ;;  %s4285_s4 = inlined_call_operand.hbm [shape: f32[2,1,128], index: 4, kind: output, shape index: {1}]   ;;  %s4286_s5 = inlined_call_operand.hbm [shape: f32[2,1,128], index: 5, kind: output, shape index: {2}]  }
   0x1   :  { %13 = vsyncpa [#allocation4 + $0x1], 0 }
   0x2   :  { %14 = vsyncpa [#allocation6], 0 }
   0x3   :  { %16 = vsyncpa [#allocation6 + $0x1], 0  ;;  %s3582_s18 = smov 0   ;;  %s3584_s19 = smov 0  }
   0x4   :  { %s3586_s20 = smov 0   ;;  %s3588_s21 = smov 0  }
   0x5   :  { %s3590_s22 = smov 0   ;;  %s3592_s23 = smov 0  }
   0x6 LB: > { %s2773_s24 = sadd.s32 4294967295, %s3548_s23   ;;  %s2774_s25 = sadd.s32 4294967294, %s3548_s23   ;;  %s3548_s23 = sphi %s3592_s23, %s22_s23   ;;  %s3544_s22 = sphi %s3590_s22, %s4295_s22   ;;  %s3540_s21 = sphi %s3588_s21, %s4294_s21   ;;  %s3536_s20 = sphi %s3586_s20, %s4293_s20   ;;  %s3532_s19 = sphi %s3584_s19, %s4292_s19   ;;  %s3528_s18 = sphi %s3582_s18, %s4291_s18  }
   0x7   : > { %s34_s26 = sadd.s32 1, %s3544_s22  ;;  %s149_s27 = sadd.s32 1, %s3536_s20 }
   0x8   : > { %p36_p0 = scmp.ge.s32.totalorder %s34_s26, 2  ;;  %p159_p1 = scmp.ne.s32.totalorder %s3536_s20, %s3532_s19 }
   0x9   : > { %p160_p2 = scmp.eq.s32.totalorder %s2773_s24, 1  ;;  %p165_p3 = scmp.ne.s32.totalorder %s3532_s19, %s3528_s18 }
   0xa   : > { %s4297_s26 = smov (%p36_p0, %s34_s26), 0  ;;  %p166_p5 = scmp.eq.s32.totalorder %s2774_s25, 1 }
   0xb   : > { %p3622_p4 = por %p160_p2, %p159_p1  ;;  %s144_s29 = ssub.s32 %s3544_s22, %s4297_s26 }
   0xc   : > { %p2779_p6 = scmp.ge.s32.totalorder %s3548_s23, 1  ;;  %p147_p7 = scmp.eq.s32.totalorder %s144_s29, 0 }
   0xd   : > { %p3629_p8 = por %p166_p5, %p165_p3  ;;  %p233_p9 = scmp.lt.s32.totalorder %s3548_s23, 3 }
   0xe   : > { %s3635_s6 = scalar_select %p147_p7, %s3536_s20, %s149_s27  }
   0xf   : > { %p234_p10 = pnand %p2779_p6, %p233_p9 }
  0x10   : > { %v3417_v0 = vld [vmem:[%s4282_s1] sm:$0xff] (!%p234_p10)   ;;  %p279_p11 = scmp.lt.s32.totalorder (!%p234_p10), %s3540_s21, 1  ;;  %v3418_v1 = vld [vmem:[%s4282_s1 + $0x10] sm:$0xff] (!%p234_p10)   ;;  %v3420_v2 = vld [vmem:[%s4282_s1 + $0x8] sm:$0xff] (!%p234_p10)   ;;  %vm503_vm0 = vcmask (!%p234_p10), 130048   ;;  %s2924_s12 = sshll.u32 (!%p234_p10), %s3540_s21, 4 }
  0x11   : > { %237 = sbr.rel (%p234_p10) target bundleno = 436 (0x1b4), region = 32  ;;  %3124 = vmatprep.subr.bf16.mxu1 (!%p234_p10), %v3417_v0  ;;  %3192 = vmatprep.subr.bf16.mxu0 (!%p234_p10), %v3418_v1  ;;  %v3422_v3 = vld [vmem:[%s4282_s1 + $0x18] sm:$0xff] (!%p234_p10)   ;;  %vm777_vm1 = vsmask.f32 (!%p234_p10), 3328  ;;  %vm778_vm2 = vsmask.f32 (!%p234_p10), 7440  ;;  %s4209_s29 = scalar_lea.hbm (!%p234_p10), %s4286_s5, %s2924_s12 }
  0x12   : > { %3125 = vmatpush3.bf16.msra.mxu1 (!%p234_p10), %v3417_v0  ;;  %3193 = vmatpush3.bf16.msra.mxu0 (!%p234_p10), %v3418_v1  ;;  %vm3838_vm3 = vmor (!%p234_p10), %vm777_vm1, %vm778_vm2  ;;  %s3550_s9 = smov (!%p234_p10), [#allocation3]  }
  0x13   : > { %3158 = vmatprep.subr.bf16.mxu1 (!%p234_p10), %v3420_v2  ;;  %3226 = vmatprep.subr.bf16.mxu0 (!%p234_p10), %v3422_v3 }
  0x18   : > { %s3645_s11 = scalar_select %p279_p11, %s3540_s21, 1 }
  0x1a   : > { %s3356_s16 = smul.u32 204, %s3645_s11  ;;  %s2928_s7 = sshll.u32 %s3645_s11, 7 }
  0x1b   : > { %s4140_s10 = scalar_lea.vmem %s4284_s3, %s2928_s7  ;;  %s4192_s11 = sand.u32 1, %s3532_s19  }
  0x1c   : > { %s3657_s25 = scalar_lea.vmem %s4281_s0, %s3356_s16  ;;  %s272_s13 = scalar_lea.vmem [#allocation3], %s4192_s11 }
  0x1d   : > { %v3660_v4 = vld [vmem:[%s3657_s25] sm:$0xf]  ;;  %v3663_v5 = vld [vmem:[%s3657_s25 + $0x4] sm:$0xf]  ;;  %v3666_v6 = vld [vmem:[%s3657_s25 + $0xc] sm:$0xf] }
  0x1e   : > { %v2783_v7 = vcombine.low %v3660_v4, %v3663_v5  ;;  %v3671_v8 = vld [vmem:[%s3657_s25 + $0x10] sm:$0xf]  ;;  %v3676_v10 = vld [vmem:[%s3657_s25 + $0x18] sm:$0xf]  ;;  %v3680_v11 = vld [vmem:[%s3657_s25 + $0x1c] sm:$0xf] }
  0x1f   : > { %v2784_v9 = vcombine.low %v3666_v6, %v3671_v8  ;;  %v2785_v12 = vcombine.low %v3676_v10, %v3680_v11  ;;  %v3687_v13 = vld [vmem:[%s3657_s25 + $0x24] sm:$0xf]  ;;  %v3690_v14 = vld [vmem:[%s3657_s25 + $0x28] sm:$0xf]  ;;  %v3695_v15 = vld [vmem:[%s3657_s25 + $0x30] sm:$0xf] }
  0x20   : > { %3126 = vmatprep.mubr.msk.bf16.mxu1 %vm503_vm0, %v2783_v7  ;;  %v3698_v16 = vld [vmem:[%s3657_s25 + $0x34] sm:$0xf]  ;;  %v2786_v17 = vcombine.low %v3687_v13, %v3690_v14  ;;  %v3706_v19 = vld [vmem:[%s3657_s25 + $0x3c] sm:$0xf]  ;;  %v3709_v20 = vld [vmem:[%s3657_s25 + $0x40] sm:$0xf] }
  0x21   : > { %3194 = vmatprep.mubr.msk.bf16.mxu0 %vm503_vm0, %v2784_v9  ;;  %3127 = vmatmul.mubr.msk.bf16.vlgmr.msra.gmra.mrb[0].mxu1 %vm503_vm0, %v2784_v9  ;;  %v2787_v18 = vcombine.low %v3695_v15, %v3698_v16  ;;  %v2788_v21 = vcombine.low %v3706_v19, %v3709_v20  ;;  %v3718_v22 = vld [vmem:[%s3657_s25 + $0x48] sm:$0xf]  ;;  %v3721_v23 = vld [vmem:[%s3657_s25 + $0x4c] sm:$0xf]  ;;  %v3724_v24 = vld [vmem:[%s3657_s25 + $0x54] sm:$0xf] }
  0x22   : > { %3159 = vmatpush3.bf16.msra.mxu1 %v3420_v2  ;;  %3195 = vmatmul.mubr.msk.bf16.vlgmr.msra.gmra.mrb[0].mxu0 %vm503_vm0, %v2785_v12  ;;  %v3727_v25 = vld [vmem:[%s3657_s25 + $0x58] sm:$0xf]  ;;  %v2789_v26 = vcombine.low %v3718_v22, %v3721_v23  ;;  %v3738_v28 = vld [vmem:[%s3657_s25 + $0x60] sm:$0xf]  ;;  %v3741_v29 = vld [vmem:[%s3657_s25 + $0x64] sm:$0xf] }
  0x23   : > { %3130 = vmatprep.mubr.msk.bf16.mxu1 %vm503_vm0, %v2785_v12  ;;  %3227 = vmatpush3.bf16.msra.mxu0 %v3422_v3  ;;  %v2790_v27 = vcombine.low %v3724_v24, %v3727_v25  ;;  %v3744_v30 = vld [vmem:[%s3657_s25 + $0x6c] sm:$0xf]  ;;  %v3747_v31 = vld [vmem:[%s3657_s25 + $0x70] sm:$0xf]  ;;  %v2791_v32 = vcombine.low %v3738_v28, %v3741_v29  ;;  %v781_v34 = vshrl.u32 %v3660_v4, 16  ;;  %v784_v35 = vshll.u32 %v3660_v4, 16 }
  0x24   : > { %3198 = vmatprep.mubr.msk.bf16.mxu0 %vm503_vm0, %v2786_v17  ;;  %v2792_v33 = vcombine.low %v3744_v30, %v3747_v31  ;;  %v790_v36 = vshll.u32 %v3663_v5, 16  ;;  %v794_v37 = vshrl.u32 %v3663_v5, 16  ;;  %v3762_v38 = vld [vmem:[%s3657_s25 + $0x78] sm:$0xf]  ;;  %v3765_v39 = vld [vmem:[%s3657_s25 + $0x7c] sm:$0xf] }
  0x25   : > { %v805_v40 = vshrl.u32 %v3666_v6, 16  ;;  %v808_v41 = vshll.u32 %v3666_v6, 16  ;;  %v3770_v42 = vld [vmem:[%s3657_s25 + $0x84] sm:$0xf]  ;;  %v3773_v43 = vld [vmem:[%s3657_s25 + $0x88] sm:$0xf]  ;;  %v2793_v46 = vcombine.low %v3762_v38, %v3765_v39 }
  0x26   : > { %v829_v44 = vshrl.u32 %v3676_v10, 16  ;;  %v832_v45 = vshll.u32 %v3676_v10, 16  ;;  %v783_v47 = vrot.slane %v781_v34, 4  ;;  %v786_v48 = vrot.slane %v784_v35, 5  ;;  %v3792_v60 = vld [vmem:[%s3657_s25 + $0x90] sm:$0xf] }
  0x27   : > { %v2794_v49 = vcombine.low %v3770_v42, %v3773_v43  ;;  %v3782_v50 = vrot.slane %v790_v36, 5  ;;  %v796_v51 = vrot.slane %v794_v37, 4  ;;  %v807_v52 = vrot.slane %v805_v40, 4  ;;  %v3795_v61 = vld [vmem:[%s3657_s25 + $0x94] sm:$0xf]  ;;  %s2603_s14 = sshll.u32 %s272_s13, 4  ;;  %s4204_s14 = int_to_ptr.vmem [resolvable:$true] %s2603_s14 }
  0x28   : > { %v810_v53 = vrot.slane %v808_v41, 5  ;;  %v814_v54 = vshll.u32 %v3671_v8, 16  ;;  %v818_v55 = vshrl.u32 %v3671_v8, 16  ;;  %v831_v56 = vrot.slane %v829_v44, 4  ;;  %v3799_v1 = vld [vmem:[%s3657_s25 + $0x9c] sm:$0xf] }
  0x29   : > { %3131 = vmatmul.mubr.msk.bf16.gmra.mrb[4].mxu1 %vm503_vm0, %v2786_v17  ;;  %v834_v57 = vrot.slane %v832_v45, 5  ;;  %v838_v58 = vshll.u32 %v3680_v11, 16  ;;  %v842_v59 = vshrl.u32 %v3680_v11, 16  ;;  %v787_v62 = vor.u32 %v786_v48, %v783_v47  ;;  %v3802_v2 = vld [vmem:[%s3657_s25 + $0xa0] sm:$0xf]  ;;  %s278_s15 = scalar_lea.vmem [#allocation5], %s4192_s11 }
  0x2a   : > { %3134 = vmatprep.mubr.msk.bf16.mxu1 %vm503_vm0, %v2787_v18  ;;  %3199 = vmatmul.mubr.msk.bf16.gmra.mrb[4].mxu0 %vm503_vm0, %v2787_v18  ;;  %v797_v63 = vor.u32 %v796_v51, %v3782_v50  ;;  %v811_v0 = vor.u32 %v810_v53, %v807_v52  ;;  %v3804_v3 = vrot.slane %v814_v54, 5  ;;  %v820_v4 = vrot.slane %v818_v55, 4  ;;  %v334_v9 = vld [vmem:[%s3657_s25 + $0x8] sm:$0x1]  ;;  %v3834_v41 = vld [vmem:[%s3657_s25 + $0xac] sm:$0xf] }
  0x2b   : > { %3202 = vmatprep.mubr.msk.bf16.mxu0 %vm503_vm0, %v2788_v21  ;;  %v835_v5 = vor.u32 %v834_v57, %v831_v56  ;;  %v3806_v6 = vrot.slane %v838_v58, 5  ;;  %v844_v7 = vrot.slane %v842_v59, 4  ;;  %v2795_v8 = vcombine.low %v3792_v60, %v3795_v61  ;;  %v3844_v45 = vld [vmem:[%s3657_s25 + $0xb4] sm:$0xf]  ;;  %s2617_s16 = sshll.u32 %s278_s15, 4  ;;  %s2583_s7 = scalar_lea.sflag [#allocation4], %s4192_s11  ;;  %s4211_s16 = int_to_ptr.vmem [resolvable:$true] %s2617_s16 }
  0x2c   : > { %v2796_v10 = vcombine.low %v3799_v1, %v3802_v2  ;;  %v788_v11 = vrot.slane %v787_v62, 4  ;;  %v798_v12 = vrot.slane %v797_v63, 4  ;;  %v3814_v17 = vrot.slane %v811_v0, 4  ;;  %s3438_s8 = scalar_lea.vmem %s4204_s14, 16 }
  0x2d   : > { %v821_v18 = vor.u32 %v820_v4, %v3804_v3  ;;  %v845_v34 = vor.u32 %v844_v7, %v3806_v6  ;;  %v862_v35 = vshll.u32 %v3690_v14, 16  ;;  %v866_v36 = vshrl.u32 %v3690_v14, 16  ;;  %p3439_p12 = scmp.ne.s32.totalorder %s4204_s14, %s3438_s8 }
  0x2e   : > { %v877_v37 = vshrl.u32 %v3695_v15, 16  ;;  %v880_v40 = vshll.u32 %v3695_v15, 16  ;;  %v886_v14 = vshll.u32 %v3698_v16, 16  ;;  %v890_v58 = vshrl.u32 %v3698_v16, 16 }
  0x2f   : > { %v822_v15 = vrot.slane %v821_v18, 4  ;;  %v3849_v52 = vrot.slane %v845_v34, 4  ;;  %v3851_v53 = vrot.slane %v862_v35, 5  ;;  %v868_v54 = vrot.slane %v866_v36, 4  ;;  %p3440_p13 = pnand %p3439_p12, %p3622_p4 }
  0x30   : > { %v3859_v57 = vrot.slane %v877_v37, 4  ;;  %v3865_v62 = vrot.slane %v880_v40, 5  ;;  %v3867_v63 = vrot.slane %v886_v14, 5  ;;  %v901_v0 = vshrl.u32 %v3706_v19, 16 }
  0x31   : > { %3135 = vmatmul.mubr.msk.bf16.gmra.mrb[8].mxu1 %vm503_vm0, %v2788_v21  ;;  %v853_v21 = vshrl.u32 %v3687_v13, 16  ;;  %v904_v7 = vshll.u32 %v3706_v19, 16  ;;  %v910_v16 = vshll.u32 %v3709_v20, 16  ;;  %v914_v18 = vshrl.u32 %v3709_v20, 16  ;;  %p3441_p0 = pneg %p3440_p13 }
  0x32   : > { %3138 = vmatprep.mubr.msk.bf16.mxu1 %vm503_vm0, %v2789_v26  ;;  %3203 = vmatmul.mubr.msk.bf16.gmra.mrb[8].mxu0 %vm503_vm0, %v2789_v26  ;;  %v856_v26 = vshll.u32 %v3687_v13, 16  ;;  %v3831_v13 = vld [vmem:[%s3657_s25 + $0xa8] sm:$0xf]  ;;  %v938_v19 = vshrl.u32 %v3721_v23, 16  ;;  %v817_v20 = vsel %vm3838_vm3, %v3814_v17, %v3804_v3  ;;  %v869_v35 = vor.u32 %v868_v54, %v3851_v53 }
  0x33   : > { %3206 = vmatprep.mubr.msk.bf16.mxu0 %vm503_vm0, %v2790_v27  ;;  %v855_v48 = vrot.slane %v853_v21, 4  ;;  %v2797_v55 = vcombine.low %v3831_v13, %v3834_v41  ;;  %v925_v21 = vshrl.u32 %v3718_v22, 16  ;;  %v892_v36 = vrot.slane %v890_v58, 4 }
  0x34   : > { %v903_v37 = vrot.slane %v901_v0, 4  ;;  %v906_v40 = vrot.slane %v904_v7, 5  ;;  %v949_v14 = vshrl.u32 %v3724_v24, 16  ;;  %v3912_v58 = vrot.slane %v938_v19, 4 }
  0x35   : > { %v870_v0 = vrot.slane %v869_v35, 4 }
  0x36   : > { %v3916_v7 = vrot.slane %v949_v14, 4 }
  0x39   : > { %3139 = vmatmul.mubr.msk.bf16.gmra.mrb[12].mxu1 %vm503_vm0, %v2790_v27  ;;  %v800_v27 = vshll.u32 %v334_v9, 16 }
  0x3a   : > { %3142 = vmatprep.mubr.msk.bf16.mxu1 %vm503_vm0, %v2791_v32  ;;  %3207 = vmatmul.mubr.msk.bf16.gmra.mrb[12].mxu0 %vm503_vm0, %v2791_v32  ;;  %v337_v32 = vld [vmem:[%s3657_s25 + $0x14] sm:$0x1] }
  0x3b   : > { %3210 = vmatprep.mubr.msk.bf16.mxu0 %vm503_vm0, %v2792_v33  ;;  %v824_v47 = vshll.u32 %v337_v32, 16  ;;  %v802_v51 = vrot.slane %v800_v27, 5  ;;  %v934_v27 = vshll.u32 %v3721_v23, 16  ;;  %v3888_v32 = vld [vmem:[%s3657_s25 + $0xc0] sm:$0xf] }
  0x3d   : > { %v826_v4 = vrot.slane %v824_v47, 5  ;;  %v803_v9 = vsel %vm3838_vm3, %v798_v12, %v802_v51  ;;  %v3901_v47 = vrot.slane %v910_v16, 5  ;;  %v916_v51 = vrot.slane %v914_v18, 4 }
  0x3e   : > { %v3910_v54 = vrot.slane %v934_v27, 5  ;;  %v952_v16 = vshll.u32 %v3724_v24, 16  ;;  %v976_v18 = vshll.u32 %v3738_v28, 16  ;;  %v893_v27 = vor.u32 %v892_v36, %v3867_v63 }
  0x3f   : > { %v827_v34 = vsel %vm3838_vm3, %v822_v15, %v826_v4 }
  0x40   : > { %v2819_v15 = vcombine.low %v817_v20, %v827_v34  ;;  %v907_v20 = vor.u32 %v906_v40, %v903_v37  ;;  %v894_v40 = vrot.slane %v893_v27, 4 }
  0x41   : > { %3143 = vmatmul.mubr.msk.bf16.gmra.mrb[16].mxu1 %vm503_vm0, %v2792_v33  ;;  %v3821_v33 = vrot.slane %v835_v5, 4  ;;  %v340_v5 = vld [vmem:[%s3657_s25 + $0x20] sm:$0x1] }
  0x42   : > { %3146 = vmatprep.mubr.msk.bf16.mxu1 %vm503_vm0, %v2793_v46  ;;  %3211 = vmatmul.mubr.msk.bf16.gmra.mrb[16].mxu0 %vm503_vm0, %v2793_v46  ;;  %v3847_v46 = vld [vmem:[%s3657_s25 + $0xb8] sm:$0xf] }
  0x43   : > { %3214 = vmatprep.mubr.msk.bf16.mxu0 %vm503_vm0, %v2794_v49  ;;  %v841_v56 = vsel %vm3838_vm3, %v3821_v33, %v3806_v6  ;;  %v2798_v59 = vcombine.low %v3844_v45, %v3847_v46  ;;  %v1000_v6 = vshll.u32 %v3744_v30, 16  ;;  %v1006_v33 = vshll.u32 %v3747_v31, 16 }
  0x49   : > { %3147 = vmatmul.mubr.msk.bf16.gmra.mrb[20].mxu1 %vm503_vm0, %v2794_v49  ;;  %v858_v49 = vrot.slane %v856_v26, 5  ;;  %v928_v26 = vshll.u32 %v3718_v22, 16 }
  0x4a   : > { %3150 = vmatprep.mubr.msk.bf16.mxu1 %vm503_vm0, %v2795_v8  ;;  %3215 = vmatmul.mubr.msk.bf16.gmra.mrb[20].mxu0 %vm503_vm0, %v2795_v8  ;;  %v793_v8 = vsel %vm3838_vm3, %v788_v11, %v3782_v50  ;;  %v3891_v50 = vld [vmem:[%s3657_s25 + $0xc4] sm:$0xf]  ;;  %v848_v11 = vshll.u32 %v340_v5, 16  ;;  %v346_v5 = vld [vmem:[%s3657_s25 + $0x38] sm:$0x1] }
  0x4b   : > { %3218 = vmatprep.mubr.msk.bf16.mxu0 %vm503_vm0, %v2796_v10  ;;  %v859_v12 = vor.u32 %v858_v49, %v855_v48  ;;  %v2818_v22 = vcombine.low %v793_v8, %v803_v9  ;;  %v2853_v3 = vcombine.low %v3888_v32, %v3891_v50  ;;  %v3907_v17 = vrot.slane %v928_v26, 5  ;;  %v349_v9 = vld [vmem:[%s3657_s25 + $0x44] sm:$0x1] }
  0x4c   : > { %v850_v48 = vrot.slane %v848_v11, 5  ;;  %v958_v8 = vshll.u32 %v3727_v25, 16  ;;  %v883_v26 = vor.u32 %v3865_v62, %v3859_v57  ;;  %v917_v11 = vor.u32 %v916_v51, %v3901_v47 }
  0x4d   : > { %v860_v49 = vrot.slane %v859_v12, 4  ;;  %v920_v57 = vshll.u32 %v349_v9, 16  ;;  %v954_v62 = vrot.slane %v952_v16, 5  ;;  %v908_v51 = vrot.slane %v907_v20, 4 }
  0x4e   : > { %v851_v24 = vsel %vm3838_vm3, %v3849_v52, %v850_v48  ;;  %v3939_v12 = vrot.slane %v958_v8, 5  ;;  %v986_v52 = vshrl.u32 %v3741_v29, 16 }
  0x4f   : > { %v2820_v35 = vcombine.low %v841_v56, %v851_v24  ;;  %v922_v48 = vrot.slane %v920_v57, 5  ;;  %v1010_v56 = vshrl.u32 %v3747_v31, 16  ;;  %v941_v31 = vor.u32 %v3912_v58, %v3910_v54 }
  0x50   : > { %v913_v9 = vsel %vm3838_vm3, %v908_v51, %v3901_v47  ;;  %v1030_v58 = vshll.u32 %v3765_v39, 16 }
  0x51   : > { %3151 = vmatmul.mubr.msk.bf16.gmra.mrb[24].mxu1 %vm503_vm0, %v2796_v10  ;;  %v343_v10 = vld [vmem:[%s3657_s25 + $0x2c] sm:$0x1] }
  0x52   : > { %3154 = vmatprep.mubr.msk.bf16.mxu1 %vm503_vm0, %v2797_v55  ;;  %3219 = vmatmul.mubr.msk.bf16.gmra.mrb[24].mxu0 %vm503_vm0, %v2797_v55  ;;  %v872_v23 = vshll.u32 %v343_v10, 16  ;;  %v3903_v55 = vrot.slane %v925_v21, 4  ;;  %v973_v10 = vshrl.u32 %v3738_v28, 16  ;;  %v982_v21 = vshll.u32 %v3741_v29, 16 }
  0x53   : > { %3222 = vmatprep.mubr.msk.bf16.mxu0 %vm503_vm0, %v2798_v59  ;;  %v896_v28 = vshll.u32 %v346_v5, 16  ;;  %v997_v29 = vshrl.u32 %v3744_v30, 16  ;;  %v1024_v5 = vshll.u32 %v3762_v38, 16 }
  0x54   : > { %v874_v4 = vrot.slane %v872_v23, 5  ;;  %v3942_v34 = vrot.slane %v973_v10, 4  ;;  %v884_v23 = vrot.slane %v883_v26, 4  ;;  %v3951_v36 = vrot.slane %v982_v21, 5 }
  0x55   : > { %v898_v14 = vrot.slane %v896_v28, 5  ;;  %v931_v8 = vor.u32 %v3907_v17, %v3903_v55  ;;  %v999_v10 = vrot.slane %v997_v29, 4  ;;  %v3983_v21 = vrot.slane %v1006_v33, 5 }
  0x56   : > { %v875_v19 = vsel %vm3838_vm3, %v870_v0, %v874_v4  ;;  %v3957_v0 = vrot.slane %v986_v52, 4  ;;  %v1021_v4 = vshrl.u32 %v3762_v38, 16  ;;  %v889_v16 = vsel %vm3838_vm3, %v884_v23, %v3867_v63 }
  0x57   : > { %v899_v30 = vsel %vm3838_vm3, %v894_v40, %v898_v14  ;;  %v955_v38 = vor.u32 %v954_v62, %v3916_v7  ;;  %v1012_v26 = vrot.slane %v1010_v56, 4  ;;  %v1034_v7 = vshrl.u32 %v3765_v39, 16 }
  0x58   : > { %v2822_v24 = vcombine.low %v889_v16, %v899_v30  ;;  %v3987_v47 = vrot.slane %v1021_v4, 4  ;;  %v942_v28 = vrot.slane %v941_v31, 4  ;;  %v3990_v20 = vrot.slane %v1024_v5, 5 }
  0x59   : > { %3155 = vmatmul.mubr.msk.bf16.gmra.mrb[28].mxu1 %vm503_vm0, %v2798_v59  ;;  %v962_v59 = vshrl.u32 %v3727_v25, 16  ;;  %v865_v25 = vsel %vm3838_vm3, %v860_v49, %v3851_v53  ;;  %v3944_v53 = vrot.slane %v976_v18, 5  ;;  %v352_v49 = vld [vmem:[%s3657_s25 + $0x50] sm:$0x1]  ;;  %v1002_v18 = vrot.slane %v1000_v6, 5 }
  0x5a   : > { %3160 = vmatprep.mubr.msk.bf16.mxu1 %vm503_vm0, %v2818_v22  ;;  %3223 = vmatmul.mubr.msk.bf16.gmra.mrb[28].mxu0 %vm503_vm0, %v2853_v3  ;;  %v2821_v37 = vcombine.low %v865_v25, %v875_v19  ;;  %v918_v3 = vrot.slane %v917_v11, 4  ;;  %v932_v25 = vrot.slane %v931_v8, 4  ;;  %v956_v11 = vrot.slane %v955_v38, 4 }
  0x5b   : > { %3228 = vmatprep.mubr.msk.bf16.mxu0 %vm503_vm0, %v2819_v15  ;;  %v964_v22 = vrot.slane %v962_v59, 4  ;;  %v944_v59 = vshll.u32 %v352_v49, 16  ;;  %v3994_v52 = vrot.slane %v1030_v58, 5  ;;  %v1045_v39 = vshrl.u32 %v3770_v42, 16  ;;  %v367_v58 = vld [vmem:[%s3657_s25 + $0x8c] sm:$0x1] }
  0x5c   : > { %v923_v63 = vsel %vm3838_vm3, %v918_v3, %v922_v48  ;;  %v1054_v23 = vshll.u32 %v3773_v43, 16  ;;  %v1058_v40 = vshrl.u32 %v3773_v43, 16  ;;  %v1069_v14 = vshrl.u32 %v3792_v60, 16 }
  0x5d   : > { %v965_v55 = vor.u32 %v964_v22, %v3939_v12  ;;  %v2823_v27 = vcombine.low %v913_v9, %v923_v63  ;;  %v946_v19 = vrot.slane %v944_v59, 5  ;;  %v358_v22 = vld [vmem:[%s3657_s25 + $0x68] sm:$0x1]  ;;  %v937_v29 = vsel %vm3838_vm3, %v932_v25, %v3910_v54  ;;  %v364_v63 = vld [vmem:[%s3657_s25 + $0x80] sm:$0x1] }
  0x5e   : > { %v979_v51 = vor.u32 %v3944_v53, %v3942_v34  ;;  %v989_v3 = vor.u32 %v3957_v0, %v3951_v36  ;;  %v992_v43 = vshll.u32 %v358_v22, 16  ;;  %v1003_v48 = vor.u32 %v1002_v18, %v999_v10 }
  0x5f   : > { %v966_v57 = vrot.slane %v965_v55, 4  ;;  %v961_v49 = vsel %vm3838_vm3, %v956_v11, %v3939_v12  ;;  %v1013_v6 = vor.u32 %v1012_v26, %v3983_v21  ;;  %v1036_v53 = vrot.slane %v1034_v7, 4 }
  0x60   : > { %v1047_v33 = vrot.slane %v1045_v39, 4  ;;  %v4020_v4 = vrot.slane %v1054_v23, 5  ;;  %v1078_v0 = vshll.u32 %v3795_v61, 16  ;;  %v980_v16 = vrot.slane %v979_v51, 4 }
  0x61   : > { %3161 = vmatmul.mubr.msk.bf16.vlgmr.msra.gmra.mrb[0].mxu1 %vm503_vm0, %v2819_v15  ;;  %v355_v15 = vld [vmem:[%s3657_s25 + $0x5c] sm:$0x1]  ;;  %v990_v8 = vrot.slane %v989_v3, 4  ;;  %v994_v30 = vrot.slane %v992_v43, 5  ;;  %v1004_v31 = vrot.slane %v1003_v48, 4  ;;  %v1060_v59 = vrot.slane %v1058_v40, 4 }
  0x62   : > { %3164 = vmatprep.mubr.msk.bf16.mxu1 %vm503_vm0, %v2820_v35  ;;  %3229 = vmatmul.mubr.msk.bf16.vlgmr.msra.gmra.mrb[0].mxu0 %vm503_vm0, %v2820_v35  ;;  %v968_v17 = vshll.u32 %v355_v15, 16  ;;  %v1048_v35 = vshll.u32 %v3770_v42, 16  ;;  %v947_v42 = vsel %vm3838_vm3, %v942_v28, %v946_v19  ;;  %v1072_v15 = vshll.u32 %v3792_v60, 16  ;;  %v370_v43 = vld [vmem:[%s3657_s25 + $0x98] sm:$0x1] }
  0x63   : > { %3232 = vmatprep.mubr.msk.bf16.mxu0 %vm503_vm0, %v2821_v37  ;;  %v2824_v5 = vcombine.low %v937_v29, %v947_v42  ;;  %v4024_v38 = vrot.slane %v1069_v14, 4  ;;  %v1014_v9 = vrot.slane %v1013_v6, 4  ;;  %v1093_v10 = vshrl.u32 %v3799_v1, 16  ;;  %v373_v6 = vld [vmem:[%s3657_s25 + $0xa4] sm:$0x1] }
  0x64   : > { %v970_v62 = vrot.slane %v968_v17, 5  ;;  %v1050_v56 = vrot.slane %v1048_v35, 5  ;;  %v4028_v55 = vrot.slane %v1072_v15, 5  ;;  %v1082_v17 = vshrl.u32 %v3795_v61, 16 }
  0x65   : > { %v1096_v18 = vshll.u32 %v3799_v1, 16  ;;  %v1102_v26 = vshll.u32 %v3802_v2, 16  ;;  %v1106_v7 = vshrl.u32 %v3802_v2, 16  ;;  %v1027_v25 = vor.u32 %v3990_v20, %v3987_v47 }
  0x66   : > { %v971_v54 = vsel %vm3838_vm3, %v966_v57, %v970_v62  ;;  %v995_v61 = vsel %vm3838_vm3, %v990_v8, %v994_v30  ;;  %v1009_v1 = vsel %vm3838_vm3, %v1004_v31, %v3983_v21  ;;  %v1037_v2 = vor.u32 %v1036_v53, %v3994_v52 }
  0x67   : > { %v2825_v12 = vcombine.low %v961_v49, %v971_v54  ;;  %v1051_v19 = vor.u32 %v1050_v56, %v1047_v33  ;;  %v1064_v11 = vshll.u32 %v367_v58, 16  ;;  %v4052_v47 = vrot.slane %v1078_v0, 5 }
  0x68   : > { %v1084_v20 = vrot.slane %v1082_v17, 4  ;;  %v1095_v57 = vrot.slane %v1093_v10, 4  ;;  %v1098_v62 = vrot.slane %v1096_v18, 5  ;;  %v1117_v22 = vshrl.u32 %v3831_v13, 16 }
  0x69   : > { %3165 = vmatmul.mubr.msk.bf16.gmra.mrb[4].mxu1 %vm503_vm0, %v2821_v37  ;;  %v361_v37 = vld [vmem:[%s3657_s25 + $0x74] sm:$0x1]  ;;  %v1120_v21 = vshll.u32 %v3831_v13, 16  ;;  %v1028_v35 = vrot.slane %v1027_v25, 4  ;;  %v4056_v23 = vrot.slane %v1102_v26, 5  ;;  %v1038_v40 = vrot.slane %v1037_v2, 4 }
  0x6a   : > { %3168 = vmatprep.mubr.msk.bf16.mxu1 %vm503_vm0, %v2822_v24  ;;  %3233 = vmatmul.mubr.msk.bf16.gmra.mrb[4].mxu0 %vm503_vm0, %v2822_v24  ;;  %v1016_v34 = vshll.u32 %v361_v37, 16  ;;  %v985_v24 = vsel %vm3838_vm3, %v980_v16, %v3951_v36  ;;  %v1061_v36 = vor.u32 %v1060_v59, %v4020_v4  ;;  %v1108_v29 = vrot.slane %v1106_v7, 4  ;;  %v376_v7 = vld [vmem:[%s3657_s25 + $0xb0] sm:$0x1] }
  0x6b   : > { %3236 = vmatprep.mubr.msk.bf16.mxu0 %vm503_vm0, %v2823_v27  ;;  %v2826_v39 = vcombine.low %v985_v24, %v995_v61  ;;  %v1052_v51 = vrot.slane %v1051_v19, 4  ;;  %v1066_v3 = vrot.slane %v1064_v11, 5  ;;  %v1126_v48 = vshll.u32 %v3834_v41, 16  ;;  %v379_v61 = vld [vmem:[%s3657_s25 + $0xbc] sm:$0x1] }
  0x6c   : > { %v1018_v60 = vrot.slane %v1016_v34, 5  ;;  %v1062_v42 = vrot.slane %v1061_v36, 4  ;;  %v1130_v13 = vshrl.u32 %v3834_v41, 16  ;;  %v1141_v49 = vshrl.u32 %v3844_v45, 16 }
  0x6d   : > { %v1144_v54 = vshll.u32 %v3844_v45, 16  ;;  %v1150_v34 = vshll.u32 %v3847_v46, 16  ;;  %v1154_v53 = vshrl.u32 %v3847_v46, 16  ;;  %v1033_v33 = vsel %vm3838_vm3, %v1028_v35, %v3994_v52 }
  0x6e   : > { %v1019_v28 = vsel %vm3838_vm3, %v1014_v9, %v1018_v60  ;;  %v1075_v56 = vor.u32 %v4028_v55, %v4024_v38  ;;  %v1085_v45 = vor.u32 %v1084_v20, %v4052_v47  ;;  %v1088_v15 = vshll.u32 %v370_v43, 16 }
  0x6f   : > { %v2827_v37 = vcombine.low %v1009_v1, %v1019_v28  ;;  %v1099_v0 = vor.u32 %v1098_v62, %v1095_v57  ;;  %v1057_v46 = vsel %vm3838_vm3, %v1052_v51, %v4020_v4  ;;  %v1109_v52 = vor.u32 %v1108_v29, %v4056_v23 }
  0x70   : > { %v1112_v16 = vshll.u32 %v373_v6, 16  ;;  %v1122_v8 = vrot.slane %v1120_v21, 5  ;;  %v1128_v30 = vrot.slane %v1126_v48, 5  ;;  %v1132_v31 = vrot.slane %v1130_v13, 4 }
  0x71   : > { %3169 = vmatmul.mubr.msk.bf16.gmra.mrb[8].mxu1 %vm503_vm0, %v2823_v27  ;;  %v1040_v27 = vshll.u32 %v364_v63, 16  ;;  %v1143_v59 = vrot.slane %v1141_v49, 4  ;;  %v1146_v38 = vrot.slane %v1144_v54, 5  ;;  %v1076_v60 = vrot.slane %v1075_v56, 4 }
  0x72   : > { %3172 = vmatprep.mubr.msk.bf16.mxu1 %vm503_vm0, %v2824_v5  ;;  %3237 = vmatmul.mubr.msk.bf16.gmra.mrb[8].mxu0 %vm503_vm0, %v2824_v5  ;;  %v1067_v5 = vsel %vm3838_vm3, %v1062_v42, %v1066_v3  ;;  %v1086_v4 = vrot.slane %v1085_v45, 4  ;;  %v1090_v55 = vrot.slane %v1088_v15, 5  ;;  %v1100_v17 = vrot.slane %v1099_v0, 4  ;;  %v382_v3 = vld [vmem:[%s3657_s25 + $0xc8] sm:$0x1]  ;;  %s4202_s25 = scalar_lea.hbm %s4285_s4, %s2924_s12 }
  0x73   : > { %3240 = vmatprep.mubr.msk.bf16.mxu0 %vm503_vm0, %v2825_v12  ;;  %v1042_v14 = vrot.slane %v1040_v27, 5  ;;  %v2829_v63 = vcombine.low %v1057_v46, %v1067_v5  ;;  %v1152_v10 = vrot.slane %v1150_v34, 5  ;;  %v1156_v18 = vrot.slane %v1154_v53, 4 }
  0x74   : > { %v1110_v58 = vrot.slane %v1109_v52, 4  ;;  %v1114_v26 = vrot.slane %v1112_v16, 5  ;;  %v1801_v24 = vshrl.u32 %v3888_v32, 16  ;;  %v1804_v25 = vshll.u32 %v3888_v32, 16 }
  0x75   : > { %v1043_v41 = vsel %vm3838_vm3, %v1038_v40, %v1042_v14  ;;  %v1810_v1 = vshll.u32 %v3891_v50, 16  ;;  %v1814_v2 = vshrl.u32 %v3891_v50, 16  ;;  %v1081_v27 = vsel %vm3838_vm3, %v1076_v60, %v4052_v47 }
  0x76   : > { %v2828_v9 = vcombine.low %v1033_v33, %v1043_v41  ;;  %v1091_v19 = vsel %vm3838_vm3, %v1086_v4, %v1090_v55  ;;  %v1105_v32 = vsel %vm3838_vm3, %v1100_v17, %v4056_v23  ;;  %v1133_v36 = vor.u32 %v1132_v31, %v1128_v30 }
  0x77   : > { %v1136_v11 = vshll.u32 %v376_v7, 16  ;;  %v1115_v50 = vsel %vm3838_vm3, %v1110_v58, %v1114_v26  ;;  %v1147_v20 = vor.u32 %v1146_v38, %v1143_v59  ;;  %v1157_v57 = vor.u32 %v1156_v18, %v1152_v10 }
  0x78   : > { %v1160_v62 = vshll.u32 %v379_v61, 16  ;;  %v1803_v47 = vrot.slane %v1801_v24, 4  ;;  %v1812_v21 = vrot.slane %v1810_v1, 5  ;;  %v2831_v40 = vcombine.low %v1105_v32, %v1115_v50 }
  0x79   : > { %3173 = vmatmul.mubr.msk.bf16.gmra.mrb[12].mxu1 %vm503_vm0, %v2825_v12  ;;  %v1119_v12 = vrot.slane %v1117_v22, 4  ;;  %v1806_v22 = vrot.slane %v1804_v25, 5  ;;  %v1134_v14 = vrot.slane %v1133_v36, 4  ;;  %v1138_v23 = vrot.slane %v1136_v11, 5 }
  0x7a   : > { %3176 = vmatprep.mubr.msk.bf16.mxu1 %vm503_vm0, %v2826_v39  ;;  %3241 = vmatmul.mubr.msk.bf16.gmra.mrb[12].mxu0 %vm503_vm0, %v2826_v39  ;;  %v2830_v39 = vcombine.low %v1081_v27, %v1091_v19  ;;  %v1148_v29 = vrot.slane %v1147_v20, 4  ;;  %v1158_v51 = vrot.slane %v1157_v57, 4  ;;  %v1162_v42 = vrot.slane %v1160_v62, 5 }
  0x7b   : > { %3244 = vmatprep.mubr.msk.bf16.mxu0 %vm503_vm0, %v2827_v37  ;;  %v1123_v28 = vor.u32 %v1122_v8, %v1119_v12  ;;  %v1139_v48 = vsel %vm3838_vm3, %v1134_v14, %v1138_v23  ;;  %v1807_v13 = vor.u32 %v1806_v22, %v1803_v47  ;;  %v1820_v54 = vshll.u32 %v382_v3, 16  ;;  %v4130_v8 = vld [vmem:[%s4283_s2] ss:$0 sm:$0xff] }
  0x7c   : > { %v1153_v6 = vsel %vm3838_vm3, %v1148_v29, %v1152_v10  ;;  %v1163_v34 = vsel %vm3838_vm3, %v1158_v51, %v1162_v42 }
  0x7d   : > { %v1124_v35 = vrot.slane %v1123_v28, 4  ;;  %v2833_v33 = vcombine.low %v1153_v6, %v1163_v34  ;;  %v1808_v56 = vrot.slane %v1807_v13, 4  ;;  %v1822_v45 = vrot.slane %v1820_v54, 5 }
  0x7f   : > { %v1129_v43 = vsel %vm3838_vm3, %v1124_v35, %v1128_v30  ;;  %v1813_v15 = vsel %vm3838_vm3, %v1808_v56, %v1812_v21 }
  0x80   : > { %v2832_v53 = vcombine.low %v1129_v43, %v1139_v48 }
  0x81   : > { %3177 = vmatmul.mubr.msk.bf16.gmra.mrb[16].mxu1 %vm503_vm0, %v2827_v37  ;;  %v1816_v37 = vrot.slane %v1814_v2, 4 }
  0x82   : > { %3180 = vmatprep.mubr.msk.bf16.mxu1 %vm503_vm0, %v2828_v9  ;;  %3245 = vmatmul.mubr.msk.bf16.gmra.mrb[16].mxu0 %vm503_vm0, %v2828_v9 }
  0x83   : > { %3248 = vmatprep.mubr.msk.bf16.mxu0 %vm503_vm0, %v2829_v63  ;;  %v1817_v49 = vor.u32 %v1816_v37, %v1812_v21 }
  0x85   : > { %v1818_v41 = vrot.slane %v1817_v49, 4 }
  0x87   : > { %v1823_v0 = vsel %vm3838_vm3, %v1818_v41, %v1822_v45 }
  0x88   : > { %v2873_v46 = vcombine.low %v1813_v15, %v1823_v0 }
  0x89   : > { %3181 = vmatmul.mubr.msk.bf16.gmra.mrb[20].mxu1 %vm503_vm0, %v2829_v63 }
  0x8a   : > { %3184 = vmatprep.mubr.msk.bf16.mxu1 %vm503_vm0, %v2830_v39  ;;  %3249 = vmatmul.mubr.msk.bf16.gmra.mrb[20].mxu0 %vm503_vm0, %v2830_v39 }
  0x8b   : > { %3252 = vmatprep.mubr.msk.bf16.mxu0 %vm503_vm0, %v2831_v40 }
  0x91   : > { %3185 = vmatmul.mubr.msk.bf16.gmra.mrb[24].mxu1 %vm503_vm0, %v2831_v40 }
  0x92   : > { %3188 = vmatprep.mubr.msk.bf16.mxu1 %vm503_vm0, %v2832_v53  ;;  %3253 = vmatmul.mubr.msk.bf16.gmra.mrb[24].mxu0 %vm503_vm0, %v2832_v53 }
  0x93   : > { %3256 = vmatprep.mubr.msk.bf16.mxu0 %vm503_vm0, %v2833_v33 }
  0x99   : > { %3189 = vmatmul.mubr.msk.bf16.gmra.mrb[28].mxu1 %vm503_vm0, %v2833_v33 }
  0x9a   : > { %3257 = vmatmul.mubr.msk.bf16.gmra.mrb[28].mxu0 %vm503_vm0, %v2873_v46 }
 0x134   : > { %v3162_v5 = vpop.f32.mrb[0].mxu1 }
 0x135   : > { %v1335_v52 = vpop.f32.mrb[1].mxu1  ;;  %v3230_v12 = vpop.f32.mrb[0].mxu0 }
 0x136   : > { %v3163_v16 = vpop.f32.mrb[2].mxu1  ;;  %v3260_v31 = vadd.f32 %v3230_v12, %v3162_v5  ;;  %v1905_v59 = vpop.f32.mrb[1].mxu0 }
 0x137   : > { %v1338_v30 = vpop.f32.mrb[3].mxu1  ;;  %v3261_v44 = vadd.f32 %v1905_v59, %v1335_v52  ;;  %v3231_v38 = vpop.f32.mrb[2].mxu0 }
 0x138   : > { %v2137_v9 = vadd.f32 %v3260_v31, %v4130_v8  ;;  %v3262_v60 = vadd.f32 %v3231_v38, %v3163_v16  ;;  %v1908_v63 = vpop.f32.mrb[3].mxu0 }
 0x139   : > { %v2135_v4 = vadd.f32 %v3261_v44, %v4130_v8  ;;  %v3263_v55 = vadd.f32 %v1908_v63, %v1338_v30 }
 0x13a   : > { %v2201_v17 = vmul.f32 0.2, %v2137_v9  ;;  %v2138_v10 = vadd.f32 %v3262_v60, %v4130_v8  ;;  %vm2169_vm4 = vcmp.ge.f32.partialorder %v2137_v9, 0.0 }
 0x13b   : > { %vm2167_vm5 = vcmp.ge.f32.partialorder %v2135_v4, 0.0  ;;  %v2199_v58 = vmul.f32 0.2, %v2135_v4  ;;  %v2136_v26 = vadd.f32 %v3263_v55, %v4130_v8 }
 0x13c   : > { %v3166_v18 = vpop.f32.mrb[4].mxu1  ;;  %vm2170_vm6 = vcmp.ge.f32.partialorder %v2138_v10, 0.0  ;;  %v2202_v24 = vmul.f32 0.2, %v2138_v10  ;;  %v2233_v28 = vsel %vm2169_vm4, %v2137_v9, %v2201_v17 }
 0x13d   : > { %v1351_v7 = vpop.f32.mrb[5].mxu1  ;;  %v2231_v61 = vsel %vm2167_vm5, %v2135_v4, %v2199_v58  ;;  %vm2168_vm7 = vcmp.ge.f32.partialorder %v2136_v26, 0.0  ;;  %v2200_v1 = vmul.f32 0.2, %v2136_v26  ;;  %v3234_v2 = vpop.f32.mrb[4].mxu0  ;;  %v2506_v37 = vmul.f32 %v2233_v28, %v2233_v28 }
 0x13e   : > { %v3167_v25 = vpop.f32.mrb[6].mxu1  ;;  %v2234_v19 = vsel %vm2170_vm6, %v2138_v10, %v2202_v24  ;;  %v3264_v32 = vadd.f32 %v3234_v2, %v3166_v18  ;;  %v1921_v36 = vpop.f32.mrb[5].mxu0  ;;  %v2504_v11 = vmul.f32 %v2231_v61, %v2231_v61 }
 0x13f   : > { %v1354_v27 = vpop.f32.mrb[7].mxu1  ;;  %v2969_v50 = vpack.c.bf16 %v2234_v19, %v2233_v28  ;;  %v2232_v20 = vsel %vm2168_vm7, %v2136_v26, %v2200_v1  ;;  %v3265_v57 = vadd.f32 %v1921_v36, %v1351_v7  ;;  %v3235_v62 = vpop.f32.mrb[6].mxu0  ;;  %v2507_v54 = vmul.f32 %v2234_v19, %v2234_v19 }
 0x140   : > { %v2964_v47 = vpack.c.bf16 %v2232_v20, %v2231_v61  ;;  %v2466_v22 = vadd.f32 %v2232_v20, %v2231_v61  ;;  %v2505_v21 = vmul.f32 %v2232_v20, %v2232_v20  ;;  %v2141_v39 = vadd.f32 %v3264_v32, %v4130_v8  ;;  %v1924_v35 = vpop.f32.mrb[7].mxu0 }
 0x141   : > { %3041 = vst [vmem:[%s4140_s10 + $0x8] sm:$0xff] %v2969_v50   ;;  %v2139_v40 = vadd.f32 %v3265_v57, %v4130_v8  ;;  %v3266_v14 = vadd.f32 %v3235_v62, %v3167_v25  ;;  %v3267_v23 = vadd.f32 %v1924_v35, %v1354_v27 }
 0x142   : > { %2965 = vst [vmem:[%s4140_s10] sm:$0xff] %v2964_v47   ;;  %v2467_v29 = vadd.f32 %v2466_v22, %v2233_v28  ;;  %v2536_v51 = vadd.f32 %v2505_v21, %v2504_v11  ;;  %vm2173_vm8 = vcmp.ge.f32.partialorder %v2141_v39, 0.0  ;;  %v2205_v42 = vmul.f32 0.2, %v2141_v39 }
 0x143   : > { %vm2171_vm9 = vcmp.ge.f32.partialorder %v2139_v40, 0.0  ;;  %v2203_v43 = vmul.f32 0.2, %v2139_v40  ;;  %v2142_v48 = vadd.f32 %v3266_v14, %v4130_v8  ;;  %v2140_v13 = vadd.f32 %v3267_v23, %v4130_v8 }
 0x144   : > { %v3170_v3 = vpop.f32.mrb[8].mxu1  ;;  %v2537_v6 = vadd.f32 %v2536_v51, %v2506_v37  ;;  %v2468_v34 = vadd.f32 %v2467_v29, %v2234_v19  ;;  %v2237_v33 = vsel %vm2173_vm8, %v2141_v39, %v2205_v42 }
 0x145   : > { %v1367_v49 = vpop.f32.mrb[9].mxu1  ;;  %v2235_v56 = vsel %vm2171_vm9, %v2139_v40, %v2203_v43  ;;  %vm2174_vm10 = vcmp.ge.f32.partialorder %v2142_v48, 0.0  ;;  %v2206_v41 = vmul.f32 0.2, %v2142_v48  ;;  %v3238_v45 = vpop.f32.mrb[8].mxu0  ;;  %vm2172_vm11 = vcmp.ge.f32.partialorder %v2140_v13, 0.0 }
 0x146   : > { %v3171_v53 = vpop.f32.mrb[10].mxu1  ;;  %v2469_v0 = vadd.f32 %v2468_v34, %v2235_v56  ;;  %v2508_v46 = vmul.f32 %v2235_v56, %v2235_v56  ;;  %v2538_v5 = vadd.f32 %v2537_v6, %v2507_v54  ;;  %v1937_v52 = vpop.f32.mrb[9].mxu0  ;;  %v2204_v12 = vmul.f32 0.2, %v2140_v13 }
 0x147   : > { %v1370_v15 = vpop.f32.mrb[11].mxu1  ;;  %v2238_v16 = vsel %vm2174_vm10, %v2142_v48, %v2206_v41  ;;  %v3268_v30 = vadd.f32 %v3238_v45, %v3170_v3  ;;  %v3269_v31 = vadd.f32 %v1937_v52, %v1367_v49  ;;  %v3239_v59 = vpop.f32.mrb[10].mxu0  ;;  %v2510_v44 = vmul.f32 %v2237_v33, %v2237_v33 }
 0x148   : > { %v2539_v38 = vadd.f32 %v2538_v5, %v2508_v46  ;;  %v2979_v9 = vpack.c.bf16 %v2238_v16, %v2237_v33  ;;  %v3270_v60 = vadd.f32 %v3239_v59, %v3171_v53  ;;  %v1940_v63 = vpop.f32.mrb[11].mxu0  ;;  %v2236_v4 = vsel %vm2172_vm11, %v2140_v13, %v2204_v12 }
 0x149   : > { %v2145_v55 = vadd.f32 %v3268_v30, %v4130_v8  ;;  %v2143_v17 = vadd.f32 %v3269_v31, %v4130_v8  ;;  %v3271_v10 = vadd.f32 %v1940_v63, %v1370_v15  ;;  %v2974_v18 = vpack.c.bf16 %v2236_v4, %v2235_v56 }
 0x14a   : > { %3043 = vst [vmem:[%s4140_s10 + $0x18] sm:$0xff] %v2979_v9   ;;  %v2470_v58 = vadd.f32 %v2469_v0, %v2236_v4  ;;  %v2509_v26 = vmul.f32 %v2236_v4, %v2236_v4  ;;  %v2146_v7 = vadd.f32 %v3270_v60, %v4130_v8  ;;  %v2511_v19 = vmul.f32 %v2238_v16, %v2238_v16 }
 0x14b   : > { %vm2177_vm12 = vcmp.ge.f32.partialorder %v2145_v55, 0.0  ;;  %v2209_v25 = vmul.f32 0.2, %v2145_v55  ;;  %vm2175_vm13 = vcmp.ge.f32.partialorder %v2143_v17, 0.0  ;;  %v2207_v61 = vmul.f32 0.2, %v2143_v17 }
 0x14c   : > { %v3174_v24 = vpop.f32.mrb[12].mxu1  ;;  %3042 = vst [vmem:[%s4140_s10 + $0x10] sm:$0xff] %v2974_v18   ;;  %v2471_v1 = vadd.f32 %v2470_v58, %v2237_v33  ;;  %v2540_v2 = vadd.f32 %v2539_v38, %v2509_v26  ;;  %vm2178_vm14 = vcmp.ge.f32.partialorder %v2146_v7, 0.0  ;;  %v2210_v27 = vmul.f32 0.2, %v2146_v7 }
 0x14d   : > { %v1383_v28 = vpop.f32.mrb[13].mxu1  ;;  %v2239_v32 = vsel %vm2175_vm13, %v2143_v17, %v2207_v61  ;;  %v2144_v36 = vadd.f32 %v3271_v10, %v4130_v8  ;;  %v3242_v11 = vpop.f32.mrb[12].mxu0  ;;  %v2241_v57 = vsel %vm2177_vm12, %v2145_v55, %v2209_v25 }
 0x14e   : > { %v3175_v50 = vpop.f32.mrb[14].mxu1  ;;  %v2541_v20 = vadd.f32 %v2540_v2, %v2510_v44  ;;  %v2472_v62 = vadd.f32 %v2471_v1, %v2238_v16  ;;  %v2512_v47 = vmul.f32 %v2239_v32, %v2239_v32  ;;  %v1953_v22 = vpop.f32.mrb[13].mxu0  ;;  %v2242_v39 = vsel %vm2178_vm14, %v2146_v7, %v2210_v27 }
 0x14f   : > { %v1386_v21 = vpop.f32.mrb[15].mxu1  ;;  %vm2176_vm15 = vcmp.ge.f32.partialorder %v2144_v36, 0.0  ;;  %v2208_v35 = vmul.f32 0.2, %v2144_v36  ;;  %v3272_v37 = vadd.f32 %v3242_v11, %v3174_v24  ;;  %v3243_v40 = vpop.f32.mrb[14].mxu0  ;;  %v2989_v29 = vpack.c.bf16 %v2242_v39, %v2241_v57 }
 0x150   : > { %v2473_v14 = vadd.f32 %v2472_v62, %v2239_v32  ;;  %v2542_v23 = vadd.f32 %v2541_v20, %v2511_v19  ;;  %v1956_v51 = vpop.f32.mrb[15].mxu0  ;;  %v3273_v43 = vadd.f32 %v1953_v22, %v1383_v28  ;;  %v3274_v48 = vadd.f32 %v3243_v40, %v3175_v50 }
 0x151   : > { %v2240_v42 = vsel %vm2176_vm15, %v2144_v36, %v2208_v35  ;;  %v2149_v3 = vadd.f32 %v3272_v37, %v4130_v8  ;;  %3045 = vst [vmem:[%s4140_s10 + $0x28] sm:$0xff] %v2989_v29   ;;  %v2514_v45 = vmul.f32 %v2241_v57, %v2241_v57  ;;  %v3275_v46 = vadd.f32 %v1956_v51, %v1386_v21 }
 0x152   : > { %v2543_v13 = vadd.f32 %v2542_v23, %v2512_v47  ;;  %v2984_v49 = vpack.c.bf16 %v2240_v42, %v2239_v32  ;;  %v2474_v54 = vadd.f32 %v2473_v14, %v2240_v42  ;;  %v2513_v6 = vmul.f32 %v2240_v42, %v2240_v42 }
 0x153   : > { %vm2181_vm0 = vcmp.ge.f32.partialorder %v2149_v3, 0.0  ;;  %v2213_v53 = vmul.f32 0.2, %v2149_v3  ;;  %v2147_v33 = vadd.f32 %v3273_v43, %v4130_v8  ;;  %v2150_v56 = vadd.f32 %v3274_v48, %v4130_v8 }
 0x154   : > { %v3178_v34 = vpop.f32.mrb[16].mxu1  ;;  %3044 = vst [vmem:[%s4140_s10 + $0x20] sm:$0xff] %v2984_v49   ;;  %v2475_v15 = vadd.f32 %v2474_v54, %v2241_v57  ;;  %v2544_v0 = vadd.f32 %v2543_v13, %v2513_v6  ;;  %v2515_v52 = vmul.f32 %v2242_v39, %v2242_v39  ;;  %v2148_v63 = vadd.f32 %v3275_v46, %v4130_v8 }
 0x155   : > { %v1399_v41 = vpop.f32.mrb[17].mxu1  ;;  %vm2179_vm1 = vcmp.ge.f32.partialorder %v2147_v33, 0.0  ;;  %v2211_v16 = vmul.f32 0.2, %v2147_v33  ;;  %vm2182_vm2 = vcmp.ge.f32.partialorder %v2150_v56, 0.0  ;;  %v3246_v12 = vpop.f32.mrb[16].mxu0  ;;  %v2245_v59 = vsel %vm2181_vm0, %v2149_v3, %v2213_v53 }
 0x156   : > { %v3179_v5 = vpop.f32.mrb[18].mxu1  ;;  %v2545_v31 = vadd.f32 %v2544_v0, %v2514_v45  ;;  %v2476_v44 = vadd.f32 %v2475_v15, %v2242_v39  ;;  %v2214_v38 = vmul.f32 0.2, %v2150_v56  ;;  %v1969_v9 = vpop.f32.mrb[17].mxu0  ;;  %v3276_v4 = vadd.f32 %v3246_v12, %v3178_v34 }
 0x157   : > { %v1402_v30 = vpop.f32.mrb[19].mxu1  ;;  %v2243_v60 = vsel %vm2179_vm1, %v2147_v33, %v2211_v16  ;;  %v3277_v55 = vadd.f32 %v1969_v9, %v1399_v41  ;;  %v3247_v17 = vpop.f32.mrb[18].mxu0  ;;  %vm2180_vm3 = vcmp.ge.f32.partialorder %v2148_v63, 0.0  ;;  %v2212_v25 = vmul.f32 0.2, %v2148_v63 }
 0x158   : > { %v2477_v10 = vadd.f32 %v2476_v44, %v2243_v60  ;;  %v2516_v18 = vmul.f32 %v2243_v60, %v2243_v60  ;;  %v2546_v58 = vadd.f32 %v2545_v31, %v2515_v52  ;;  %v2246_v26 = vsel %vm2182_vm2, %v2150_v56, %v2214_v38  ;;  %v1972_v7 = vpop.f32.mrb[19].mxu0 }
 0x159   : > { %v2999_v24 = vpack.c.bf16 %v2246_v26, %v2245_v59  ;;  %v2153_v1 = vadd.f32 %v3276_v4, %v4130_v8  ;;  %v2151_v2 = vadd.f32 %v3277_v55, %v4130_v8  ;;  %v3278_v27 = vadd.f32 %v3247_v17, %v3179_v5 }
 0x15a   : > { %v2547_v61 = vadd.f32 %v2546_v58, %v2516_v18  ;;  %v2518_v19 = vmul.f32 %v2245_v59, %v2245_v59  ;;  %v2244_v32 = vsel %vm2180_vm3, %v2148_v63, %v2212_v25  ;;  %v3279_v36 = vadd.f32 %v1972_v7, %v1402_v30 }
 0x15b   : > { %3047 = vst [vmem:[%s4140_s10 + $0x38] sm:$0xff] %v2999_v24   ;;  %v2994_v50 = vpack.c.bf16 %v2244_v32, %v2243_v60  ;;  %v2478_v20 = vadd.f32 %v2477_v10, %v2244_v32  ;;  %v2517_v57 = vmul.f32 %v2244_v32, %v2244_v32  ;;  %vm2185_vm4 = vcmp.ge.f32.partialorder %v2153_v1, 0.0 }
 0x15c   : > { %v3182_v28 = vpop.f32.mrb[20].mxu1  ;;  %v2217_v47 = vmul.f32 0.2, %v2153_v1  ;;  %vm2183_vm5 = vcmp.ge.f32.partialorder %v2151_v2, 0.0  ;;  %v2215_v22 = vmul.f32 0.2, %v2151_v2  ;;  %v2154_v21 = vadd.f32 %v3278_v27, %v4130_v8 }
 0x15d   : > { %v1415_v11 = vpop.f32.mrb[21].mxu1  ;;  %v3250_v39 = vpop.f32.mrb[20].mxu0  ;;  %3046 = vst [vmem:[%s4140_s10 + $0x30] sm:$0xff] %v2994_v50   ;;  %v2479_v35 = vadd.f32 %v2478_v20, %v2245_v59  ;;  %v2548_v37 = vadd.f32 %v2547_v61, %v2517_v57  ;;  %v2152_v40 = vadd.f32 %v3279_v36, %v4130_v8  ;;  %v2519_v48 = vmul.f32 %v2246_v26, %v2246_v26 }
 0x15e   : > { %v3183_v62 = vpop.f32.mrb[22].mxu1  ;;  %v3280_v14 = vadd.f32 %v3250_v39, %v3182_v28  ;;  %v1985_v23 = vpop.f32.mrb[21].mxu0  ;;  %v2249_v51 = vsel %vm2185_vm4, %v2153_v1, %v2217_v47  ;;  %v2247_v42 = vsel %vm2183_vm5, %v2151_v2, %v2215_v22  ;;  %vm2186_vm6 = vcmp.ge.f32.partialorder %v2154_v21, 0.0 }
 0x15f   : > { %v1418_v29 = vpop.f32.mrb[23].mxu1  ;;  %v2218_v3 = vmul.f32 0.2, %v2154_v21  ;;  %v3251_v43 = vpop.f32.mrb[22].mxu0  ;;  %v2549_v13 = vadd.f32 %v2548_v37, %v2518_v19  ;;  %v2480_v49 = vadd.f32 %v2479_v35, %v2246_v26  ;;  %v2520_v54 = vmul.f32 %v2247_v42, %v2247_v42 }
 0x160   : > { %v1988_v6 = vpop.f32.mrb[23].mxu0  ;;  %vm2184_vm7 = vcmp.ge.f32.partialorder %v2152_v40, 0.0  ;;  %v2216_v53 = vmul.f32 0.2, %v2152_v40  ;;  %v2157_v33 = vadd.f32 %v3280_v14, %v4130_v8  ;;  %v2522_v56 = vmul.f32 %v2249_v51, %v2249_v51 }
 0x161   : > { %v2250_v34 = vsel %vm2186_vm6, %v2154_v21, %v2218_v3  ;;  %v2481_v41 = vadd.f32 %v2480_v49, %v2247_v42  ;;  %v2550_v45 = vadd.f32 %v2549_v13, %v2519_v48  ;;  %v3281_v52 = vadd.f32 %v1985_v23, %v1415_v11 }
 0x162   : > { %v3009_v15 = vpack.c.bf16 %v2250_v34, %v2249_v51  ;;  %v2248_v46 = vsel %vm2184_vm7, %v2152_v40, %v2216_v53  ;;  %vm2189_vm8 = vcmp.ge.f32.partialorder %v2157_v33, 0.0  ;;  %v2221_v5 = vmul.f32 0.2, %v2157_v33 }
 0x163   : > { %v2551_v12 = vadd.f32 %v2550_v45, %v2520_v54  ;;  %v3004_v30 = vpack.c.bf16 %v2248_v46, %v2247_v42  ;;  %v2482_v31 = vadd.f32 %v2481_v41, %v2248_v46  ;;  %v2521_v59 = vmul.f32 %v2248_v46, %v2248_v46 }
 0x164   : > { %v3186_v0 = vpop.f32.mrb[24].mxu1  ;;  %3049 = vst [vmem:[%s4140_s10 + $0x48] sm:$0xff] %v3009_v15   ;;  %v2523_v38 = vmul.f32 %v2250_v34, %v2250_v34  ;;  %v2155_v9 = vadd.f32 %v3281_v52, %v4130_v8  ;;  %v3282_v60 = vadd.f32 %v3251_v43, %v3183_v62  ;;  %v3283_v63 = vadd.f32 %v1988_v6, %v1418_v29 }
 0x165   : > { %v1431_v16 = vpop.f32.mrb[25].mxu1  ;;  %v3254_v4 = vpop.f32.mrb[24].mxu0  ;;  %3048 = vst [vmem:[%s4140_s10 + $0x40] sm:$0xff] %v3004_v30   ;;  %v2483_v17 = vadd.f32 %v2482_v31, %v2249_v51  ;;  %v2552_v10 = vadd.f32 %v2551_v12, %v2521_v59  ;;  %v2253_v18 = vsel %vm2189_vm8, %v2157_v33, %v2221_v5 }
 0x166   : > { %v3187_v44 = vpop.f32.mrb[26].mxu1  ;;  %v3284_v58 = vadd.f32 %v3254_v4, %v3186_v0  ;;  %v2001_v26 = vpop.f32.mrb[25].mxu0  ;;  %vm2187_vm9 = vcmp.ge.f32.partialorder %v2155_v9, 0.0  ;;  %v2219_v7 = vmul.f32 0.2, %v2155_v9  ;;  %v2158_v24 = vadd.f32 %v3282_v60, %v4130_v8 }
 0x167   : > { %v1434_v55 = vpop.f32.mrb[27].mxu1  ;;  %v2156_v25 = vadd.f32 %v3283_v63, %v4130_v8  ;;  %v3255_v61 = vpop.f32.mrb[26].mxu0  ;;  %v2553_v1 = vadd.f32 %v2552_v10, %v2522_v56  ;;  %v2484_v2 = vadd.f32 %v2483_v17, %v2250_v34  ;;  %v3285_v28 = vadd.f32 %v2001_v26, %v1431_v16 }
 0x168   : > { %v2161_v27 = vadd.f32 %v3284_v58, %v4130_v8  ;;  %v2004_v19 = vpop.f32.mrb[27].mxu0  ;;  %v2251_v32 = vsel %vm2187_vm9, %v2155_v9, %v2219_v7  ;;  %vm2190_vm10 = vcmp.ge.f32.partialorder %v2158_v24, 0.0  ;;  %v2222_v36 = vmul.f32 0.2, %v2158_v24 }
 0x169   : > { %vm2188_vm11 = vcmp.ge.f32.partialorder %v2156_v25, 0.0  ;;  %v2485_v11 = vadd.f32 %v2484_v2, %v2251_v32  ;;  %v2524_v50 = vmul.f32 %v2251_v32, %v2251_v32  ;;  %v2554_v20 = vadd.f32 %v2553_v1, %v2523_v38 }
 0x16a   : > { %v2220_v57 = vmul.f32 0.2, %v2156_v25  ;;  %v2526_v47 = vmul.f32 %v2253_v18, %v2253_v18  ;;  %v2254_v22 = vsel %vm2190_vm10, %v2158_v24, %v2222_v36  ;;  %v2159_v21 = vadd.f32 %v3285_v28, %v4130_v8 }
 0x16b   : > { %v2555_v35 = vadd.f32 %v2554_v20, %v2524_v50  ;;  %v3019_v37 = vpack.c.bf16 %v2254_v22, %v2253_v18  ;;  %vm2193_vm12 = vcmp.ge.f32.partialorder %v2161_v27, 0.0  ;;  %v2225_v42 = vmul.f32 0.2, %v2161_v27 }
 0x16c   : > { %v3190_v62 = vpop.f32.mrb[28].mxu1  ;;  %v2252_v40 = vsel %vm2188_vm11, %v2156_v25, %v2220_v57  ;;  %v2527_v48 = vmul.f32 %v2254_v22, %v2254_v22  ;;  %vm2191_vm13 = vcmp.ge.f32.partialorder %v2159_v21, 0.0  ;;  %v2223_v13 = vmul.f32 0.2, %v2159_v21 }
 0x16d   : > { %v1447_v39 = vpop.f32.mrb[29].mxu1  ;;  %v3014_v23 = vpack.c.bf16 %v2252_v40, %v2251_v32  ;;  %v2486_v29 = vadd.f32 %v2485_v11, %v2252_v40  ;;  %v2525_v51 = vmul.f32 %v2252_v40, %v2252_v40  ;;  %v3258_v3 = vpop.f32.mrb[28].mxu0  ;;  %3051 = vst [vmem:[%s4140_s10 + $0x58] sm:$0xff] %v3019_v37   ;;  %v3286_v49 = vadd.f32 %v3255_v61, %v3187_v44 }
 0x16e   : > { %v3191_v14 = vpop.f32.mrb[30].mxu1  ;;  %v2017_v54 = vpop.f32.mrb[29].mxu0  ;;  %v3287_v53 = vadd.f32 %v2004_v19, %v1434_v55  ;;  %v3288_v33 = vadd.f32 %v3258_v3, %v3190_v62  ;;  %v2255_v41 = vsel %vm2191_vm13, %v2159_v21, %v2223_v13  ;;  %v2257_v60 = vsel %vm2193_vm12, %v2161_v27, %v2225_v42 }
 0x16f   : > { %v1450_v43 = vpop.f32.mrb[31].mxu1  ;;  %3050 = vst [vmem:[%s4140_s10 + $0x50] sm:$0xff] %v3014_v23   ;;  %v2487_v6 = vadd.f32 %v2486_v29, %v2253_v18  ;;  %v2556_v34 = vadd.f32 %v2555_v35, %v2525_v51  ;;  %v3259_v56 = vpop.f32.mrb[30].mxu0  ;;  %v2162_v45 = vadd.f32 %v3286_v49, %v4130_v8  ;;  %v3289_v15 = vadd.f32 %v2017_v54, %v1447_v39 }
 0x170   : > { %v3290_v0 = vadd.f32 %v3259_v56, %v3191_v14  ;;  %v2020_v46 = vpop.f32.mrb[31].mxu0  ;;  %v2528_v16 = vmul.f32 %v2255_v41, %v2255_v41  ;;  %v2160_v12 = vadd.f32 %v3287_v53, %v4130_v8  ;;  %v2165_v31 = vadd.f32 %v3288_v33, %v4130_v8 }
 0x171   : > { %v2557_v5 = vadd.f32 %v2556_v34, %v2526_v47  ;;  %v2488_v52 = vadd.f32 %v2487_v6, %v2254_v22  ;;  %vm2194_vm14 = vcmp.ge.f32.partialorder %v2162_v45, 0.0  ;;  %v2226_v30 = vmul.f32 0.2, %v2162_v45 }
 0x172   : > { %v2163_v59 = vadd.f32 %v3289_v15, %v4130_v8  ;;  %vm2192_vm15 = vcmp.ge.f32.partialorder %v2160_v12, 0.0  ;;  %v2224_v9 = vmul.f32 0.2, %v2160_v12  ;;  %v2229_v26 = vmul.f32 0.2, %v2165_v31 }
 0x173   : > { %v2489_v44 = vadd.f32 %v2488_v52, %v2255_v41  ;;  %v2558_v38 = vadd.f32 %v2557_v5, %v2527_v48  ;;  %v2258_v63 = vsel %vm2194_vm14, %v2162_v45, %v2226_v30  ;;  %v2166_v24 = vadd.f32 %v3290_v0, %v4130_v8 }
 0x174   : > { %v3029_v55 = vpack.c.bf16 %v2258_v63, %v2257_v60  ;;  %v2256_v17 = vsel %vm2192_vm15, %v2160_v12, %v2224_v9  ;;  %vm2195_vm0 = vcmp.ge.f32.partialorder %v2163_v59, 0.0  ;;  %v2227_v7 = vmul.f32 0.2, %v2163_v59 }
 0x175   : > { %v2559_v4 = vadd.f32 %v2558_v38, %v2528_v16  ;;  %v3024_v10 = vpack.c.bf16 %v2256_v17, %v2255_v41  ;;  %v2490_v18 = vadd.f32 %v2489_v44, %v2256_v17  ;;  %v2529_v58 = vmul.f32 %v2256_v17, %v2256_v17 }
 0x176   : > { %3053 = vst [vmem:[%s4140_s10 + $0x68] sm:$0xff] %v3029_v55   ;;  %v3291_v25 = vadd.f32 %v2020_v46, %v1450_v43  ;;  %v2530_v61 = vmul.f32 %v2257_v60, %v2257_v60  ;;  %vm2197_vm1 = vcmp.ge.f32.partialorder %v2165_v31, 0.0  ;;  %v2259_v27 = vsel %vm2195_vm0, %v2163_v59, %v2227_v7 }
 0x177   : > { %3052 = vst [vmem:[%s4140_s10 + $0x60] sm:$0xff] %v3024_v10   ;;  %v2491_v1 = vadd.f32 %v2490_v18, %v2257_v60  ;;  %v2560_v2 = vadd.f32 %v2559_v4, %v2529_v58  ;;  %vm2198_vm2 = vcmp.ge.f32.partialorder %v2166_v24, 0.0  ;;  %v2230_v28 = vmul.f32 0.2, %v2166_v24 }
 0x178   : > { %v2164_v19 = vadd.f32 %v3291_v25, %v4130_v8  ;;  %v2531_v32 = vmul.f32 %v2258_v63, %v2258_v63  ;;  %v2532_v50 = vmul.f32 %v2259_v27, %v2259_v27  ;;  %v2261_v20 = vsel %vm2197_vm1, %v2165_v31, %v2229_v26 }
 0x179   : > { %v2561_v36 = vadd.f32 %v2560_v2, %v2530_v61  ;;  %v2492_v11 = vadd.f32 %v2491_v1, %v2258_v63  ;;  %v2262_v57 = vsel %vm2198_vm2, %v2166_v24, %v2230_v28  ;;  %v2534_v8 = vmul.f32 %v2261_v20, %v2261_v20 }
 0x17a   : > { %vm2196_vm3 = vcmp.ge.f32.partialorder %v2164_v19, 0.0  ;;  %v2228_v62 = vmul.f32 0.2, %v2164_v19  ;;  %v3039_v21 = vpack.c.bf16 %v2262_v57, %v2261_v20  ;;  %v2535_v51 = vmul.f32 %v2262_v57, %v2262_v57 }
 0x17b   : > { %v2493_v47 = vadd.f32 %v2492_v11, %v2259_v27  ;;  %v2562_v22 = vadd.f32 %v2561_v36, %v2531_v32 }
 0x17c   : > { %v2260_v39 = vsel %vm2196_vm3, %v2164_v19, %v2228_v62  ;;  %3055 = vst [vmem:[%s4140_s10 + $0x78] sm:$0xff] %v3039_v21  }
 0x17d   : > { %v2563_v35 = vadd.f32 %v2562_v22, %v2532_v50  ;;  %v3034_v37 = vpack.c.bf16 %v2260_v39, %v2259_v27  ;;  %v2494_v40 = vadd.f32 %v2493_v47, %v2260_v39  ;;  %v2533_v14 = vmul.f32 %v2260_v39, %v2260_v39 }
 0x17f   : > { %3054 = vst [vmem:[%s4140_s10 + $0x70] sm:$0xff] %v3034_v37   ;;  %v2495_v23 = vadd.f32 %v2494_v40, %v2261_v20  ;;  %v2564_v29 = vadd.f32 %v2563_v35, %v2533_v14  ;;  %s3442_s10 = sshll.u32 %s3550_s9, 4  ;;  %s3443_s10 = int_to_ptr.vmem [resolvable:$false] %s3442_s10 }
 0x180   : > { %s3444_s17 = scalar_lea.vmem %s3443_s10, 32  ;;  %p3445_p1 = scmp.lt.s32.totalorder %s4204_s14, %s3443_s10 }
 0x181   : > { %v2565_v42 = vadd.f32 %v2564_v29, %v2534_v8  ;;  %v2496_v3 = vadd.f32 %v2495_v23, %v2262_v57  ;;  %p3446_p2 = scmp.lt.s32.totalorder %s3444_s17, %s3438_s8 }
 0x183   : > { %v2497_v43 = vrot.slane %v2496_v3, 4  ;;  %v2566_v48 = vadd.f32 %v2565_v42, %v2535_v51  ;;  %p3447_p3 = por %p3446_p2, %p3445_p1 }
 0x185   : > { %v2498_v13 = vadd.f32 %v2497_v43, %v2496_v3  ;;  %v2567_v49 = vrot.slane %v2566_v48, 4  ;;  %p3448_p5 = pnand %p3447_p3, %p3441_p0 }
 0x187   : > { %v2499_v54 = vrot.slane %v2498_v13, 2  ;;  %v2568_v6 = vadd.f32 %v2567_v49, %v2566_v48 }
 0x189   : > { %v2500_v34 = vadd.f32 %v2499_v54, %v2498_v13  ;;  %v2569_v53 = vrot.slane %v2568_v6, 2 }
 0x18b   : > { %v2501_v33 = vrot.slane %v2500_v34, 1  ;;  %v2570_v56 = vadd.f32 %v2569_v53, %v2568_v6 }
 0x18d   : > { %v2502_v41 = vadd.f32 %v2501_v33, %v2500_v34  ;;  %v2571_v45 = vrot.slane %v2570_v56, 1 }
 0x18f   : > { %2503 = vst [vmem:[%s272_s13] sm:$0x1] %v2502_v41  ;;  %v2572_v15 = vadd.f32 %v2571_v45, %v2570_v56 }
 0x190   : > { %3451 = shalt.err (!%p3448_p5)
}
 0x191   : > { %s3452_s12 = scalar_lea.hbm %s4202_s25, 16  ;;  %s3456_s21 = scalar_lea.hbm %s4285_s4, 32 }
 0x192   : > { %p3453_p6 = scmp.ne.s32.totalorder %s4202_s25, %s3452_s12  ;;  %p3457_p10 = scmp.lt.u32.totalorder %s4202_s25, %s4285_s4 }
 0x193   : > { %p3458_p11 = scmp.lt.u32.totalorder %s3456_s21, %s3452_s12  ;;  %p3460_p13 = scmp.lt.u32.totalorder %s3452_s12, %s4202_s25 }
 0x194   : > { %p3454_p7 = pnand %p3453_p6, %p3622_p4 }
 0x195   : > { %p3459_p12 = por %p3458_p11, %p3457_p10 }
 0x196   : > { %p3455_p9 = pneg %p3454_p7 }
 0x197   : > { %p3461_p0 = por %p3460_p13, %p3459_p12 }
 0x199   : > { %p3462_p1 = pnand %p3461_p0, %p3455_p9 }
 0x19b   : > { %3465 = shalt.err (!%p3462_p1)
}
 0x19c   : > { %3357 = dma.vmem_to_hbm [thread:$0]  (%p3622_p4), %s4204_s14, 16, %s4202_s25, %s2583_s7   ;;  %2573 = vst [vmem:[%s278_s15] sm:$0x1] %v2572_v15 }
 0x19d   : > { %s2587_s8 = scalar_lea.sflag [#allocation6], %s4192_s11  ;;  %s3466_s10 = scalar_lea.vmem %s4211_s16, 16 }
 0x19e   : > { %p3467_p2 = scmp.ne.s32.totalorder %s4211_s16, %s3466_s10  ;;  %s3551_s17 = smov [#allocation5]  }
 0x19f   : > { %s3470_s12 = sshll.u32 %s3551_s17, 4  ;;  %s3471_s12 = int_to_ptr.vmem [resolvable:$false] %s3470_s12 }
 0x1a0   : > { %p3468_p3 = pnand %p3467_p2, %p3622_p4  ;;  %s3472_s13 = scalar_lea.vmem %s3471_s12, 32 }
 0x1a1   : > { %p3473_p6 = scmp.lt.s32.totalorder %s4211_s16, %s3471_s12  ;;  %p3474_p7 = scmp.lt.s32.totalorder %s3472_s13, %s3466_s10 }
 0x1a2   : > { %p3469_p5 = pneg %p3468_p3 }
 0x1a3   : > { %p3475_p9 = por %p3474_p7, %p3473_p6 }
 0x1a5   : > { %p3476_p10 = pnand %p3475_p9, %p3469_p5 }
 0x1a7   : > { %3479 = shalt.err (!%p3476_p10)
}
 0x1a8   : > { %s3480_s11 = scalar_lea.hbm %s4209_s29, 16  ;;  %s3484_s25 = scalar_lea.hbm %s4286_s5, 32 }
 0x1a9   : > { %p3481_p11 = scmp.ne.s32.totalorder %s4209_s29, %s3480_s11  ;;  %p3485_p0 = scmp.lt.u32.totalorder %s4209_s29, %s4286_s5 }
 0x1aa   : > { %p3486_p1 = scmp.lt.u32.totalorder %s3484_s25, %s3480_s11  ;;  %p3488_p3 = scmp.lt.u32.totalorder %s3480_s11, %s4209_s29 }
 0x1ab   : > { %p3482_p12 = pnand %p3481_p11, %p3622_p4 }
 0x1ac   : > { %p3487_p2 = por %p3486_p1, %p3485_p0 }
 0x1ad   : > { %p3483_p13 = pneg %p3482_p12 }
 0x1ae   : > { %p3489_p5 = por %p3488_p3, %p3487_p2 }
 0x1b0   : > { %p3490_p6 = pnand %p3489_p5, %p3483_p13 }
 0x1b2   : > { %3493 = shalt.err (!%p3490_p6)
}
 0x1b3   : > { %3358 = dma.vmem_to_hbm [thread:$0]  (%p3622_p4), %s4211_s16, 16, %s4209_s29, %s2587_s8  }
 0x1b4 PF: > { %p3368_p7 = scmp.ge.s32.totalorder %s3548_s23, 2  ;;  %s2640_s21 = sand.u32 1, %s3528_s18  }
 0x1b5   : > { %s2641_s27 = scalar_lea.sflag [#allocation4], %s2640_s21 }
 0x1b6   : > { %p3362_p9 = pnand %p3368_p7, %p3629_p8 }
 0x1b8   : > { %3519 = dma.done.wait (!%p3362_p9), %s2641_s27, 16  }
 0x1b9   : > { %3521 = vsyncadd (!%p3362_p9), %s2641_s27, 4294967280  ;;  %s2649_s9 = scalar_lea.sflag [#allocation6], %s2640_s21 }
 0x1ba   : > { %3523 = dma.done.wait (!%p3362_p9), %s2649_s9, 16  }
 0x1bb   : > { %3525 = vsyncadd (!%p3362_p9), %s2649_s9, 4294967280  ;;  %s22_s23 = sadd.s32 1, %s3548_s23   ;;  %s4291_s18 = smov %s3532_s19 }
 0x1bc   : > { %p19_p10 = scmp.ge.s32.totalorder %s22_s23, 4   ;;  %s4292_s19 = smov %s3536_s20 }
 0x1bd   : > { %s4293_s20 = smov %s3635_s6  ;;  %s4294_s21 = smov %s3544_s22 }
 0x1be   : > { %s4295_s22 = smov %s4297_s26  ;;  %21 = sbr.rel (!%p19_p10) target bundleno = 6 (0x6), region = 105 }
 0x1c5   :  { %2653 = vsyncpa [#allocation4], 1 }
 0x1c6   :  { %2655 = vsyncpa [#allocation4 + $0x1], 1 }
 0x1c7   :  { %2656 = vsyncpa [#allocation6], 1 }
 0x1c8   :  { %2658 = vsyncpa [#allocation6 + $0x1], 1 }

// kernel: _lambda_.10
= control target key start
LH: loop header
LB: loop body
LE: loop exit
PB: predicated region body
PF: predicated region fallthrough
CT: control target
= control target key end

     0   :  { %s405_s12 = smov 0   ;;  %s435_s0 = inlined_call_operand.vmem [shape: bf16[2,8,8,128], index: 0, kind: input, shape index: {}]   ;;  %s436_s1 = inlined_call_operand.vmem [shape: f32[1,1,1,128], index: 1, kind: input, shape index: {}]   ;;  %s437_s2 = inlined_call_operand.vmem [shape: f32[1,1,1,128], index: 2, kind: input, shape index: {}]   ;;  %s438_s3 = inlined_call_operand.vmem [shape: bf16[2,8,8,128], index: 3, kind: output, shape index: {}]  }
   0x1 LB: > { %s312_s13 = sadd.s32 4294967295, %s383_s12   ;;  %p316_p0 = scmp.ge.s32.totalorder %s383_s12, 1  ;;  %s383_s12 = sphi %s405_s12, %s13_s12  }
   0x2   : > { %p137_p1 = scmp.lt.s32.totalorder %s383_s12, 3 }
   0x4   : > { %p138_p2 = pnand %p316_p0, %p137_p1 }
   0x5   : > { %p161_p3 = scmp.lt.s32.totalorder (!%p138_p2), %s312_s13, 1  ;;  %v321_v0 = vld [vmem:[%s436_s1] ss:$0 sm:$0xff] (!%p138_p2) }
   0x6   : > { %141 = sbr.rel (%p138_p2) target bundleno = 34 (0x22), region = 32  ;;  %v322_v13 = vld [vmem:[%s437_s2] ss:$0 sm:$0xff] (!%p138_p2) }
   0xd   : > { %s440_s13 = smov (!%p161_p3, %s312_s13), 1 }
   0xe   : > { %s325_s14 = sshll.u32 %s440_s13, 5 }
   0xf   : > { %s165_s17 = scalar_lea.vmem %s435_s0, %s325_s14  ;;  %s170_s24 = scalar_lea.vmem %s438_s3, %s325_s14 }
  0x10   : > { %v328_v1 = vld [vmem:[%s165_s17] sm:$0xff]   ;;  %v363_v2 = vld [vmem:[%s165_s17 + $0x8] sm:$0xff]   ;;  %v364_v3 = vld [vmem:[%s165_s17 + $0x10] sm:$0xff]  }
  0x11   : > { %v329_v4 = vunpack.c.l.bf16 %v328_v1  ;;  %v330_v5 = vunpack.c.h.bf16 %v328_v1  ;;  %v333_v6 = vunpack.c.l.bf16 %v363_v2  ;;  %v334_v7 = vunpack.c.h.bf16 %v363_v2  ;;  %v365_v8 = vld [vmem:[%s165_s17 + $0x18] sm:$0xff]  }
  0x12   : > { %v337_v9 = vunpack.c.l.bf16 %v364_v3  ;;  %v338_v10 = vunpack.c.h.bf16 %v364_v3  ;;  %v341_v11 = vunpack.c.l.bf16 %v365_v8  ;;  %v342_v12 = vunpack.c.h.bf16 %v365_v8 }
  0x13   : > { %v194_v14 = vmul.f32 %v329_v4, %v321_v0  ;;  %v195_v15 = vmul.f32 %v330_v5, %v321_v0  ;;  %v196_v16 = vmul.f32 %v333_v6, %v321_v0  ;;  %v197_v17 = vmul.f32 %v334_v7, %v321_v0 }
  0x14   : > { %v198_v18 = vmul.f32 %v337_v9, %v321_v0  ;;  %v199_v19 = vmul.f32 %v338_v10, %v321_v0  ;;  %v200_v20 = vmul.f32 %v341_v11, %v321_v0  ;;  %v201_v21 = vmul.f32 %v342_v12, %v321_v0 }
  0x15   : > { %v209_v22 = vadd.f32 %v322_v13, %v194_v14  ;;  %v210_v23 = vadd.f32 %v322_v13, %v195_v15  ;;  %v211_v24 = vadd.f32 %v322_v13, %v196_v16  ;;  %v212_v25 = vadd.f32 %v322_v13, %v197_v17 }
  0x16   : > { %v213_v26 = vadd.f32 %v322_v13, %v198_v18  ;;  %v214_v27 = vadd.f32 %v322_v13, %v199_v19  ;;  %v215_v28 = vadd.f32 %v322_v13, %v200_v20  ;;  %v216_v29 = vadd.f32 %v322_v13, %v201_v21 }
  0x17   : > { %vm217_vm0 = vcmp.ge.f32.partialorder %v209_v22, 0.0  ;;  %vm218_vm1 = vcmp.ge.f32.partialorder %v210_v23, 0.0  ;;  %v225_v30 = vmul.f32 0.2, %v209_v22  ;;  %v226_v31 = vmul.f32 0.2, %v210_v23 }
  0x18   : > { %vm219_vm2 = vcmp.ge.f32.partialorder %v211_v24, 0.0  ;;  %vm220_vm3 = vcmp.ge.f32.partialorder %v212_v25, 0.0  ;;  %v227_v32 = vmul.f32 0.2, %v211_v24  ;;  %v228_v33 = vmul.f32 0.2, %v212_v25 }
  0x19   : > { %v233_v34 = vsel %vm217_vm0, %v209_v22, %v225_v30  ;;  %v234_v35 = vsel %vm218_vm1, %v210_v23, %v226_v31  ;;  %vm221_vm4 = vcmp.ge.f32.partialorder %v213_v26, 0.0  ;;  %vm222_vm5 = vcmp.ge.f32.partialorder %v214_v27, 0.0 }
  0x1a   : > { %v346_v36 = vpack.c.bf16 %v234_v35, %v233_v34  ;;  %v235_v37 = vsel %vm219_vm2, %v211_v24, %v227_v32  ;;  %v236_v38 = vsel %vm220_vm3, %v212_v25, %v228_v33  ;;  %v229_v39 = vmul.f32 0.2, %v213_v26 }
  0x1b   : > { %v351_v40 = vpack.c.bf16 %v236_v38, %v235_v37  ;;  %v230_v41 = vmul.f32 0.2, %v214_v27  ;;  %vm223_vm6 = vcmp.ge.f32.partialorder %v215_v28, 0.0  ;;  %vm224_vm7 = vcmp.ge.f32.partialorder %v216_v29, 0.0 }
  0x1c   : > { %347 = vst [vmem:[%s170_s24] sm:$0xff] %v346_v36   ;;  %v237_v42 = vsel %vm221_vm4, %v213_v26, %v229_v39  ;;  %v231_v43 = vmul.f32 0.2, %v215_v28  ;;  %v232_v44 = vmul.f32 0.2, %v216_v29 }
  0x1d   : > { %366 = vst [vmem:[%s170_s24 + $0x8] sm:$0xff] %v351_v40   ;;  %v238_v45 = vsel %vm222_vm5, %v214_v27, %v230_v41 }
  0x1e   : > { %v356_v46 = vpack.c.bf16 %v238_v45, %v237_v42  ;;  %v239_v47 = vsel %vm223_vm6, %v215_v28, %v231_v43  ;;  %v240_v48 = vsel %vm224_vm7, %v216_v29, %v232_v44 }
  0x1f   : > { %v361_v49 = vpack.c.bf16 %v240_v48, %v239_v47 }
  0x20   : > { %367 = vst [vmem:[%s170_s24 + $0x10] sm:$0xff] %v356_v46  }
  0x21   : > { %368 = vst [vmem:[%s170_s24 + $0x18] sm:$0xff] %v361_v49  }
  0x22 PF: > { %s13_s12 = sadd.s32 1, %s383_s12  }
  0x23   : > { %p10_p4 = scmp.ge.s32.totalorder %s13_s12, 4  }
  0x25   :  { %12 = sbr.rel (!%p10_p4) target bundleno = 1 (0x1), region = 62 }

// kernel: _lambda_.9
= control target key start
LH: loop header
LB: loop body
LE: loop exit
PB: predicated region body
PF: predicated region fallthrough
CT: control target
= control target key end

     0   :  { %s1524_s18 = smov 0   ;;  %s1526_s19 = smov 0   ;;  %s1678_s0 = inlined_call_operand.vmem [shape: bf16[2,9,9,32], index: 0, kind: input, shape index: {}]   ;;  %s1679_s1 = inlined_call_operand.vmem [shape: bf16[2,2,32,128], index: 1, kind: input, shape index: {}]   ;;  %s1680_s2 = inlined_call_operand.vmem [shape: f32[1,128], index: 2, kind: input, shape index: {}]   ;;  %s1681_s3 = inlined_call_operand.vmem [shape: bf16[2,8,8,128], index: 3, kind: output, shape index: {0}]   ;;  %s1682_s4 = inlined_call_operand.vmem [shape: f32[2,1,128], index: 4, kind: output, shape index: {1}]   ;;  %s1683_s5 = inlined_call_operand.vmem [shape: f32[2,1,128], index: 5, kind: output, shape index: {2}]  }
   0x1   :  { %s1528_s20 = smov 0  }
   0x2 LB: > { %s28_s21 = sadd.s32 1, %s1488_s19  ;;  %p1250_p0 = scmp.ge.s32.totalorder %s1492_s20, 1  ;;  %s1492_s20 = sphi %s1528_s20, %s16_s20   ;;  %s1488_s19 = sphi %s1526_s19, %s1687_s19   ;;  %s1484_s18 = sphi %s1524_s18, %s1686_s18  }
   0x3   : > { %p30_p1 = scmp.ge.s32.totalorder %s28_s21, 2  ;;  %p227_p2 = scmp.lt.s32.totalorder %s1492_s20, 3 }
   0x5   : > { %s1689_s21 = smov (%p30_p1, %s28_s21), 0  ;;  %p228_p3 = pnand %p1250_p0, %p227_p2 }
   0x6   : > { %v1454_v0 = vld [vmem:[%s1679_s1] sm:$0xff] (!%p228_p3)   ;;  %p277_p4 = scmp.lt.s32.totalorder (!%p228_p3), %s1484_s18, 1  ;;  %v1456_v2 = vld [vmem:[%s1679_s1 + $0x8] sm:$0xff] (!%p228_p3)   ;;  %v1461_v4 = vld [vmem:[%s1679_s1 + $0x10] sm:$0xff] (!%p228_p3)   ;;  %vm380_vm0 = vcmask (!%p228_p3), 261120  }
   0x7   : > { %231 = sbr.rel (%p228_p3) target bundleno = 290 (0x122), region = 32  ;;  %v1455_v1 = vld [vmem:[%s1679_s1 + $0x20] sm:$0xff] (!%p228_p3)   ;;  %1357 = vmatprep.subr.bf16.mxu1 (!%p228_p3), %v1454_v0  ;;  %v1457_v3 = vld [vmem:[%s1679_s1 + $0x28] sm:$0xff] (!%p228_p3)   ;;  %v1463_v5 = vld [vmem:[%s1679_s1 + $0x30] sm:$0xff] (!%p228_p3)   ;;  %vm474_vm1 = vsmask.f32 (!%p228_p3), 3328 }
   0x8   : > { %1381 = vmatprep.subr.bf16.mxu0 (!%p228_p3), %v1455_v1  ;;  %1358 = vmatpush3.bf16.msra.mxu1 (!%p228_p3), %v1454_v0  ;;  %v1467_v24 = vld [vmem:[%s1679_s1 + $0x18] sm:$0xff] (!%p228_p3)   ;;  %vm475_vm2 = vsmask.f32 (!%p228_p3), 7440 }
   0x9   : > { %1382 = vmatpush3.bf16.msra.mxu0 (!%p228_p3), %v1455_v1  ;;  %1359 = vmatprep.subr.bf16.mxu1 (!%p228_p3), %v1456_v2  ;;  %v1469_v40 = vld [vmem:[%s1679_s1 + $0x38] sm:$0xff] (!%p228_p3)   ;;  %vm1613_vm3 = vmor (!%p228_p3), %vm474_vm1, %vm475_vm2 }
   0xa   : > { %1383 = vmatprep.subr.bf16.mxu0 (!%p228_p3), %v1457_v3 }
   0xc   : > { %1360 = vmatpush3.bf16.msra.mxu1 (!%p228_p3), %v1456_v2 }
   0xd   : > { %1384 = vmatpush3.bf16.msra.mxu0 (!%p228_p3), %v1457_v3  ;;  %1369 = vmatprep.subr.bf16.mxu1 (!%p228_p3), %v1461_v4 }
   0xe   : > { %s1691_s18 = smov (!%p277_p4, %s1484_s18), 1  ;;  %1393 = vmatprep.subr.bf16.mxu0 %v1463_v5 }
   0xf   : > { %s1429_s30 = smul.u32 72, %s1691_s18  ;;  %s1309_s23 = sshll.u32 %s1691_s18, 5 }
  0x10   : > { %s1655_s26 = scalar_lea.vmem %s1681_s3, %s1309_s23  ;;  %s302_s29 = scalar_lea.vmem %s1682_s4, %s1691_s18 }
  0x11   : > { %s1566_s12 = scalar_lea.vmem %s1678_s0, %s1429_s30  ;;  %s308_s7 = scalar_lea.vmem %s1683_s5, %s1691_s18 }
  0x12   : > { %v318_v6 = vld [vmem:[%s1566_s12] sm:$0xf]  ;;  %v320_v7 = vld [vmem:[%s1566_s12 + $0x8] sm:$0xf]  ;;  %v322_v8 = vld [vmem:[%s1566_s12 + $0x10] sm:$0xf] }
  0x13   : > { %v1254_v9 = vcombine.low %v318_v6, %v320_v7  ;;  %v478_v10 = vshrl.u32 %v318_v6, 16  ;;  %v481_v11 = vshll.u32 %v318_v6, 16  ;;  %v492_v12 = vshrl.u32 %v320_v7, 16  ;;  %v324_v13 = vld [vmem:[%s1566_s12 + $0x18] sm:$0xf] }
  0x14   : > { %v495_v14 = vshll.u32 %v320_v7, 16  ;;  %v506_v15 = vshrl.u32 %v322_v8, 16  ;;  %v509_v16 = vshll.u32 %v322_v8, 16  ;;  %v1282_v17 = vcombine.low %v320_v7, %v322_v8  ;;  %v326_v18 = vld [vmem:[%s1566_s12 + $0x20] sm:$0xf] }
  0x15   : > { %1361 = vmatprep.mubr.msk.bf16.mxu1 %vm380_vm0, %v1254_v9  ;;  %v480_v19 = vrot.slane %v478_v10, 4  ;;  %v483_v20 = vrot.slane %v481_v11, 5  ;;  %v494_v21 = vrot.slane %v492_v12, 4  ;;  %v1255_v22 = vcombine.low %v322_v8, %v324_v13  ;;  %v1575_v23 = vld [vmem:[%s1566_s12 + $0x28] sm:$0xf] }
  0x16   : > { %v497_v25 = vrot.slane %v495_v14, 5  ;;  %v508_v26 = vrot.slane %v506_v15, 4  ;;  %v511_v27 = vrot.slane %v509_v16, 5  ;;  %1385 = vmatprep.mubr.msk.bf16.mxu0 %vm380_vm0, %v1282_v17  ;;  %v520_v28 = vshrl.u32 %v324_v13, 16  ;;  %v1582_v29 = vld [vmem:[%s1566_s12 + $0x30] sm:$0xf] }
  0x17   : > { %v484_v30 = vor.u32 %v483_v20, %v480_v19  ;;  %1362 = vmatmul.mubr.msk.bf16.vlgmr.msra.gmra.mrb[0].mxu1 %vm380_vm0, %v1255_v22  ;;  %v523_v31 = vshll.u32 %v324_v13, 16  ;;  %v534_v32 = vshrl.u32 %v326_v18, 16  ;;  %v537_v33 = vshll.u32 %v326_v18, 16  ;;  %v1586_v34 = vld [vmem:[%s1566_s12 + $0x38] sm:$0xf] }
  0x18   : > { %v498_v35 = vor.u32 %v497_v25, %v494_v21  ;;  %v512_v36 = vor.u32 %v511_v27, %v508_v26  ;;  %v522_v37 = vrot.slane %v520_v28, 4  ;;  %v1283_v38 = vcombine.low %v324_v13, %v326_v18  ;;  %1370 = vmatpush3.bf16.msra.mxu1 %v1461_v4  ;;  %v334_v39 = vld [vmem:[%s1566_s12 + $0x40] sm:$0xf]  ;;  %v319_v49 = vld [vmem:[%s1566_s12 + $0x4] sm:$0x1] }
  0x19   : > { %v485_v41 = vrot.slane %v484_v30, 4  ;;  %v525_v42 = vrot.slane %v523_v31, 5  ;;  %v536_v43 = vrot.slane %v534_v32, 4  ;;  %v539_v44 = vrot.slane %v537_v33, 5  ;;  %1371 = vmatprep.subr.bf16.mxu1 %v1467_v24  ;;  %v321_v54 = vld [vmem:[%s1566_s12 + $0xc] sm:$0x1] }
  0x1a   : > { %v499_v45 = vrot.slane %v498_v35, 4  ;;  %v513_v46 = vrot.slane %v512_v36, 4  ;;  %1386 = vmatmul.mubr.msk.bf16.vlgmr.msra.gmra.mrb[0].mxu0 %vm380_vm0, %v1283_v38  ;;  %v1256_v47 = vcombine.low %v326_v18, %v1575_v23  ;;  %v548_v48 = vshrl.u32 %v1575_v23, 16  ;;  %v323_v59 = vld [vmem:[%s1566_s12 + $0x14] sm:$0x1] }
  0x1b   : > { %1394 = vmatpush3.bf16.msra.mxu0 %v1463_v5  ;;  %v551_v50 = vshll.u32 %v1575_v23, 16  ;;  %v562_v51 = vshrl.u32 %v1582_v29, 16  ;;  %v565_v52 = vshll.u32 %v1582_v29, 16  ;;  %v1284_v53 = vcombine.low %v1575_v23, %v1582_v29  ;;  %v325_v60 = vld [vmem:[%s1566_s12 + $0x1c] sm:$0x1] }
  0x1c   : > { %1365 = vmatprep.mubr.msk.bf16.mxu1 %vm380_vm0, %v1256_v47  ;;  %v1257_v55 = vcombine.low %v1582_v29, %v1586_v34  ;;  %v576_v56 = vshrl.u32 %v1586_v34, 16  ;;  %v579_v57 = vshll.u32 %v1586_v34, 16  ;;  %v1285_v58 = vcombine.low %v1586_v34, %v334_v39  ;;  %1395 = vmatprep.subr.bf16.mxu0 %v1469_v40  ;;  %v327_v1 = vld [vmem:[%s1566_s12 + $0x24] sm:$0x1]  ;;  %v329_v16 = vld [vmem:[%s1566_s12 + $0x2c] sm:$0x1] }
  0x1d   : > { %1389 = vmatprep.mubr.msk.bf16.mxu0 %vm380_vm0, %v1284_v53  ;;  %v844_v61 = vshrl.u32 %v334_v39, 16  ;;  %v847_v62 = vshll.u32 %v334_v39, 16  ;;  %1372 = vmatpush3.bf16.msra.mxu1 %v1467_v24  ;;  %v487_v63 = vshll.u32 %v319_v49, 16  ;;  %v501_v0 = vshll.u32 %v321_v54, 16  ;;  %v331_v22 = vld [vmem:[%s1566_s12 + $0x34] sm:$0x1] }
  0x1e   : > { %v515_v2 = vshll.u32 %v323_v59, 16  ;;  %v526_v3 = vor.u32 %v525_v42, %v522_v37  ;;  %v529_v7 = vshll.u32 %v325_v60, 16  ;;  %v540_v8 = vor.u32 %v539_v44, %v536_v43  ;;  %v333_v31 = vld [vmem:[%s1566_s12 + $0x3c] sm:$0x1]  ;;  %v335_v36 = vld [vmem:[%s1566_s12 + $0x44] sm:$0x1] }
  0x1f   : > { %1366 = vmatmul.mubr.msk.bf16.gmra.mrb[4].mxu1 %vm380_vm0, %v1257_v55  ;;  %v846_v4 = vrot.slane %v844_v61, 4  ;;  %v849_v5 = vrot.slane %v847_v62, 5  ;;  %1396 = vmatpush3.bf16.msra.mxu0 %v1469_v40  ;;  %v489_v9 = vrot.slane %v487_v63, 5  ;;  %v503_v10 = vrot.slane %v501_v0, 5 }
  0x20   : > { %v517_v11 = vrot.slane %v515_v2, 5  ;;  %v527_v12 = vrot.slane %v526_v3, 4  ;;  %v531_v13 = vrot.slane %v529_v7, 5  ;;  %v541_v14 = vrot.slane %v540_v8, 4  ;;  %v1306_v2 = vld [vmem:[%s1680_s2] ss:$0 sm:$0xff] }
  0x21   : > { %v543_v15 = vshll.u32 %v327_v1, 16  ;;  %v550_v17 = vrot.slane %v548_v48, 4  ;;  %v490_v18 = vsel %vm1613_vm3, %v485_v41, %v489_v9  ;;  %v504_v19 = vsel %vm1613_vm3, %v499_v45, %v503_v10 }
  0x22   : > { %1390 = vmatmul.mubr.msk.bf16.gmra.mrb[4].mxu0 %vm380_vm0, %v1285_v58  ;;  %v518_v20 = vsel %vm1613_vm3, %v513_v46, %v517_v11  ;;  %v553_v21 = vrot.slane %v551_v50, 5  ;;  %v1268_v23 = vcombine.low %v490_v18, %v504_v19  ;;  %v532_v24 = vsel %vm1613_vm3, %v527_v12, %v531_v13 }
  0x23   : > { %v545_v25 = vrot.slane %v543_v15, 5  ;;  %v1296_v26 = vcombine.low %v504_v19, %v518_v20  ;;  %v1269_v27 = vcombine.low %v518_v20, %v532_v24  ;;  %v557_v29 = vshll.u32 %v329_v16, 16 }
  0x24   : > { %v554_v28 = vor.u32 %v553_v21, %v550_v17  ;;  %v564_v30 = vrot.slane %v562_v51, 4  ;;  %1373 = vmatprep.mubr.msk.bf16.mxu1 %vm380_vm0, %v1268_v23  ;;  %v567_v33 = vrot.slane %v565_v52, 5  ;;  %v571_v34 = vshll.u32 %v331_v22, 16 }
  0x25   : > { %v546_v32 = vsel %vm1613_vm3, %v541_v14, %v545_v25  ;;  %1397 = vmatprep.mubr.msk.bf16.mxu0 %vm380_vm0, %v1296_v26  ;;  %v578_v35 = vrot.slane %v576_v56, 4  ;;  %v559_v39 = vrot.slane %v557_v29, 5  ;;  %v581_v40 = vrot.slane %v579_v57, 5 }
  0x26   : > { %v1297_v37 = vcombine.low %v532_v24, %v546_v32  ;;  %v555_v38 = vrot.slane %v554_v28, 4  ;;  %v568_v41 = vor.u32 %v567_v33, %v564_v30  ;;  %v573_v42 = vrot.slane %v571_v34, 5 }
  0x27   : > { %1374 = vmatmul.mubr.msk.bf16.vlgmr.msra.gmra.mrb[0].mxu1 %vm380_vm0, %v1269_v27  ;;  %v585_v43 = vshll.u32 %v333_v31, 16  ;;  %v850_v44 = vor.u32 %v849_v5, %v846_v4  ;;  %v582_v46 = vor.u32 %v581_v40, %v578_v35  ;;  %v853_v47 = vshll.u32 %v335_v36, 16 }
  0x28   : > { %v560_v45 = vsel %vm1613_vm3, %v555_v38, %v559_v39  ;;  %v569_v49 = vrot.slane %v568_v41, 4 }
  0x29   : > { %v1270_v48 = vcombine.low %v546_v32, %v560_v45  ;;  %v587_v50 = vrot.slane %v585_v43, 5  ;;  %v851_v51 = vrot.slane %v850_v44, 4  ;;  %v583_v52 = vrot.slane %v582_v46, 4 }
  0x2a   : > { %1398 = vmatmul.mubr.msk.bf16.vlgmr.msra.gmra.mrb[0].mxu0 %vm380_vm0, %v1297_v37  ;;  %v855_v53 = vrot.slane %v853_v47, 5  ;;  %v574_v54 = vsel %vm1613_vm3, %v569_v49, %v573_v42 }
  0x2b   : > { %1377 = vmatprep.mubr.msk.bf16.mxu1 %vm380_vm0, %v1270_v48  ;;  %v1298_v55 = vcombine.low %v560_v45, %v574_v54  ;;  %v588_v56 = vsel %vm1613_vm3, %v583_v52, %v587_v50 }
  0x2c   : > { %v856_v57 = vsel %vm1613_vm3, %v851_v51, %v855_v53  ;;  %v1271_v58 = vcombine.low %v574_v54, %v588_v56 }
  0x2d   : > { %1401 = vmatprep.mubr.msk.bf16.mxu0 %vm380_vm0, %v1298_v55  ;;  %v1299_v59 = vcombine.low %v588_v56, %v856_v57 }
  0x2f   : > { %1378 = vmatmul.mubr.msk.bf16.gmra.mrb[4].mxu1 %vm380_vm0, %v1271_v58 }
  0x32   : > { %1402 = vmatmul.mubr.msk.bf16.gmra.mrb[4].mxu0 %vm380_vm0, %v1299_v59 }
  0xfa   : > { %v1375_v60 = vpop.f32.mrb[0].mxu1 }
  0xfb   : > { %v672_v61 = vpop.f32.mrb[1].mxu1 }
  0xfc   : > { %v1376_v62 = vpop.f32.mrb[2].mxu1 }
  0xfd   : > { %v1399_v63 = vpop.f32.mrb[0].mxu0  ;;  %v675_v0 = vpop.f32.mrb[3].mxu1 }
  0xfe   : > { %v1405_v1 = vadd.f32 %v1399_v63, %v1375_v60  ;;  %v933_v3 = vpop.f32.mrb[1].mxu0 }
  0xff   : > { %v1406_v4 = vadd.f32 %v933_v3, %v672_v61  ;;  %v1400_v5 = vpop.f32.mrb[2].mxu0 }
 0x100   : > { %v1407_v6 = vadd.f32 %v1400_v5, %v1376_v62  ;;  %v936_v7 = vpop.f32.mrb[3].mxu0  ;;  %v997_v10 = vadd.f32 %v1405_v1, %v1306_v2 }
 0x101   : > { %v995_v8 = vadd.f32 %v1406_v4, %v1306_v2  ;;  %v1408_v9 = vadd.f32 %v936_v7, %v675_v0 }
 0x102   : > { %v998_v11 = vadd.f32 %v1407_v6, %v1306_v2  ;;  %v1379_v12 = vpop.f32.mrb[4].mxu1  ;;  %v1049_v25 = vmul.f32 %v997_v10, %v997_v10 }
 0x103   : > { %v996_v13 = vadd.f32 %v1408_v9, %v1306_v2  ;;  %v688_v14 = vpop.f32.mrb[5].mxu1  ;;  %v1047_v17 = vmul.f32 %v995_v8, %v995_v8 }
 0x104   : > { %v1318_v15 = vpack.c.bf16 %v998_v11, %v997_v10  ;;  %v1380_v16 = vpop.f32.mrb[6].mxu1  ;;  %v1050_v30 = vmul.f32 %v998_v11, %v998_v11 }
 0x105   : > { %v1313_v18 = vpack.c.bf16 %v996_v13, %v995_v8  ;;  %v1033_v19 = vadd.f32 %v996_v13, %v995_v8  ;;  %v1048_v20 = vmul.f32 %v996_v13, %v996_v13  ;;  %v1403_v21 = vpop.f32.mrb[4].mxu0  ;;  %v691_v22 = vpop.f32.mrb[7].mxu1 }
 0x106   : > { %1330 = vst [vmem:[%s1655_s26 + $0x8] sm:$0xff] %v1318_v15   ;;  %v1409_v23 = vadd.f32 %v1403_v21, %v1379_v12  ;;  %v949_v24 = vpop.f32.mrb[5].mxu0 }
 0x107   : > { %1314 = vst [vmem:[%s1655_s26] sm:$0xff] %v1313_v18   ;;  %v1034_v26 = vadd.f32 %v1033_v19, %v997_v10  ;;  %v1055_v27 = vadd.f32 %v1048_v20, %v1047_v17  ;;  %v1410_v28 = vadd.f32 %v949_v24, %v688_v14  ;;  %v1404_v29 = vpop.f32.mrb[6].mxu0 }
 0x108   : > { %v1411_v31 = vadd.f32 %v1404_v29, %v1380_v16  ;;  %v952_v32 = vpop.f32.mrb[7].mxu0  ;;  %v1001_v37 = vadd.f32 %v1409_v23, %v1306_v2 }
 0x109   : > { %v1056_v33 = vadd.f32 %v1055_v27, %v1049_v25  ;;  %v999_v34 = vadd.f32 %v1410_v28, %v1306_v2  ;;  %v1035_v35 = vadd.f32 %v1034_v26, %v998_v11  ;;  %v1412_v36 = vadd.f32 %v952_v32, %v691_v22 }
 0x10a   : > { %v1002_v38 = vadd.f32 %v1411_v31, %v1306_v2  ;;  %v1053_v48 = vmul.f32 %v1001_v37, %v1001_v37 }
 0x10b   : > { %v1036_v39 = vadd.f32 %v1035_v35, %v999_v34  ;;  %v1051_v40 = vmul.f32 %v999_v34, %v999_v34  ;;  %v1057_v41 = vadd.f32 %v1056_v33, %v1050_v30  ;;  %v1000_v42 = vadd.f32 %v1412_v36, %v1306_v2 }
 0x10c   : > { %v1328_v43 = vpack.c.bf16 %v1002_v38, %v1001_v37  ;;  %v1054_v51 = vmul.f32 %v1002_v38, %v1002_v38 }
 0x10d   : > { %v1058_v44 = vadd.f32 %v1057_v41, %v1051_v40  ;;  %v1323_v45 = vpack.c.bf16 %v1000_v42, %v999_v34  ;;  %v1037_v46 = vadd.f32 %v1036_v39, %v1000_v42  ;;  %v1052_v47 = vmul.f32 %v1000_v42, %v1000_v42 }
 0x10e   : > { %1332 = vst [vmem:[%s1655_s26 + $0x18] sm:$0xff] %v1328_v43  }
 0x10f   : > { %1331 = vst [vmem:[%s1655_s26 + $0x10] sm:$0xff] %v1323_v45   ;;  %v1038_v49 = vadd.f32 %v1037_v46, %v1001_v37  ;;  %v1059_v50 = vadd.f32 %v1058_v44, %v1052_v47 }
 0x111   : > { %v1039_v52 = vadd.f32 %v1038_v49, %v1002_v38  ;;  %v1060_v53 = vadd.f32 %v1059_v50, %v1053_v48 }
 0x113   : > { %v1040_v54 = vrot.slane %v1039_v52, 4  ;;  %v1061_v55 = vadd.f32 %v1060_v53, %v1054_v51 }
 0x115   : > { %v1041_v56 = vadd.f32 %v1040_v54, %v1039_v52  ;;  %v1062_v57 = vrot.slane %v1061_v55, 4 }
 0x117   : > { %v1042_v58 = vrot.slane %v1041_v56, 2  ;;  %v1063_v59 = vadd.f32 %v1062_v57, %v1061_v55 }
 0x119   : > { %v1043_v60 = vadd.f32 %v1042_v58, %v1041_v56  ;;  %v1064_v61 = vrot.slane %v1063_v59, 2 }
 0x11b   : > { %v1044_v62 = vrot.slane %v1043_v60, 1  ;;  %v1065_v63 = vadd.f32 %v1064_v61, %v1063_v59 }
 0x11d   : > { %v1045_v0 = vadd.f32 %v1044_v62, %v1043_v60  ;;  %v1066_v1 = vrot.slane %v1065_v63, 1 }
 0x11f   : > { %1046 = vst [vmem:[%s302_s29] sm:$0x1] %v1045_v0  ;;  %v1067_v2 = vadd.f32 %v1066_v1, %v1065_v63 }
 0x121   : > { %1068 = vst [vmem:[%s308_s7] sm:$0x1] %v1067_v2 }
 0x122 PF: > { %s16_s20 = sadd.s32 1, %s1492_s20   ;;  %s1686_s18 = smov %s1488_s19 }
 0x123   : > { %p13_p5 = scmp.ge.s32.totalorder %s16_s20, 4   ;;  %s1687_s19 = smov %s1689_s21 }
 0x125   :  { %15 = sbr.rel (!%p13_p5) target bundleno = 2 (0x2), region = 95 }

// kernel: _lambda_.11
= control target key start
LH: loop header
LB: loop body
LE: loop exit
PB: predicated region body
PF: predicated region fallthrough
CT: control target
= control target key end

     0   :  { %s1316_s18 = smov 0   ;;  %s1318_s19 = smov 0   ;;  %s1450_s0 = inlined_call_operand.vmem [shape: bf16[2,5,9,64], index: 0, kind: input, shape index: {}]   ;;  %s1451_s1 = inlined_call_operand.vmem [shape: bf16[2,2,64,128], index: 1, kind: input, shape index: {}]   ;;  %s1452_s2 = inlined_call_operand.vmem [shape: f32[1,128], index: 2, kind: input, shape index: {}]   ;;  %s1453_s3 = inlined_call_operand.vmem [shape: bf16[2,4,8,128], index: 3, kind: output, shape index: {0}]   ;;  %s1454_s4 = inlined_call_operand.vmem [shape: f32[2,1,128], index: 4, kind: output, shape index: {1}]   ;;  %s1455_s5 = inlined_call_operand.vmem [shape: f32[2,1,128], index: 5, kind: output, shape index: {2}]  }
   0x1   :  { %s1320_s20 = smov 0  }
   0x2 LB: > { %s28_s21 = sadd.s32 1, %s1280_s19  ;;  %p1058_p0 = scmp.ge.s32.totalorder %s1284_s20, 1  ;;  %s1284_s20 = sphi %s1320_s20, %s16_s20   ;;  %s1280_s19 = sphi %s1318_s19, %s1459_s19   ;;  %s1276_s18 = sphi %s1316_s18, %s1458_s18  }
   0x3   : > { %p30_p1 = scmp.ge.s32.totalorder %s28_s21, 2  ;;  %p227_p2 = scmp.lt.s32.totalorder %s1284_s20, 3 }
   0x5   : > { %s1461_s21 = smov (%p30_p1, %s28_s21), 0  ;;  %p228_p3 = pnand %p1058_p0, %p227_p2 }
   0x6   : > { %v1242_v0 = vld [vmem:[%s1451_s1] sm:$0xff] (!%p228_p3)   ;;  %p277_p4 = scmp.lt.s32.totalorder (!%p228_p3), %s1276_s18, 1  ;;  %v1244_v2 = vld [vmem:[%s1451_s1 + $0x8] sm:$0xff] (!%p228_p3)   ;;  %v1246_v4 = vld [vmem:[%s1451_s1 + $0x10] sm:$0xff] (!%p228_p3)   ;;  %vm370_vm0 = vcmask (!%p228_p3), 523264  }
   0x7   : > { %231 = sbr.rel (%p228_p3) target bundleno = 282 (0x11a), region = 32  ;;  %v1243_v1 = vld [vmem:[%s1451_s1 + $0x40] sm:$0xff] (!%p228_p3)   ;;  %1157 = vmatprep.subr.bf16.mxu1 (!%p228_p3), %v1242_v0  ;;  %v1245_v3 = vld [vmem:[%s1451_s1 + $0x48] sm:$0xff] (!%p228_p3)   ;;  %v1247_v5 = vld [vmem:[%s1451_s1 + $0x50] sm:$0xff] (!%p228_p3)   ;;  %vm434_vm1 = vsmask.f32 (!%p228_p3), 3328 }
   0x8   : > { %1181 = vmatprep.subr.bf16.mxu0 (!%p228_p3), %v1243_v1  ;;  %1158 = vmatpush3.bf16.msra.mxu1 (!%p228_p3), %v1242_v0  ;;  %v1248_v6 = vld [vmem:[%s1451_s1 + $0x18] sm:$0xff] (!%p228_p3)   ;;  %v1251_v15 = vld [vmem:[%s1451_s1 + $0x20] sm:$0xff] (!%p228_p3)   ;;  %v1256_v39 = vld [vmem:[%s1451_s1 + $0x28] sm:$0xff] (!%p228_p3)   ;;  %vm435_vm2 = vsmask.f32 (!%p228_p3), 7440 }
   0x9   : > { %1182 = vmatpush3.bf16.msra.mxu0 (!%p228_p3), %v1243_v1  ;;  %1159 = vmatprep.subr.bf16.mxu1 (!%p228_p3), %v1244_v2  ;;  %v1249_v9 = vld [vmem:[%s1451_s1 + $0x58] sm:$0xff] (!%p228_p3)   ;;  %v1253_v27 = vld [vmem:[%s1451_s1 + $0x60] sm:$0xff] (!%p228_p3)   ;;  %v1257_v42 = vld [vmem:[%s1451_s1 + $0x68] sm:$0xff] (!%p228_p3)  }
   0xa   : > { %1183 = vmatprep.subr.bf16.mxu0 (!%p228_p3), %v1245_v3  ;;  %v1258_v48 = vld [vmem:[%s1451_s1 + $0x30] sm:$0xff] (!%p228_p3)   ;;  %vm1395_vm3 = vmor (!%p228_p3), %vm434_vm1, %vm435_vm2  ;;  %v1260_v0 = vld [vmem:[%s1451_s1 + $0x38] sm:$0xff] (!%p228_p3)  }
   0xb   : > { %v1259_v51 = vld [vmem:[%s1451_s1 + $0x70] sm:$0xff] (!%p228_p3)  }
   0xc   : > { %1160 = vmatpush3.bf16.msra.mxu1 (!%p228_p3), %v1244_v2 }
   0xd   : > { %1184 = vmatpush3.bf16.msra.mxu0 (!%p228_p3), %v1245_v3  ;;  %1161 = vmatprep.subr.bf16.mxu1 (!%p228_p3), %v1246_v4  ;;  %v1261_v3 = vld [vmem:[%s1451_s1 + $0x78] sm:$0xff] (!%p228_p3)  }
   0xe   : > { %s1463_s18 = smov (!%p277_p4, %s1276_s18), 1  ;;  %1185 = vmatprep.subr.bf16.mxu0 %v1247_v5 }
   0xf   : > { %s1217_s7 = smul.u32 40, %s1463_s18  ;;  %s1121_s14 = sshll.u32 %s1463_s18, 4 }
  0x10   : > { %1162 = vmatpush3.bf16.msra.mxu1 %v1246_v4  ;;  %s296_s17 = scalar_lea.vmem %s1453_s3, %s1121_s14  ;;  %s302_s24 = scalar_lea.vmem %s1454_s4, %s1463_s18 }
  0x11   : > { %s1358_s12 = scalar_lea.vmem %s1450_s0, %s1217_s7  ;;  %1186 = vmatpush3.bf16.msra.mxu0 %v1247_v5  ;;  %1163 = vmatprep.subr.bf16.mxu1 %v1248_v6  ;;  %s308_s27 = scalar_lea.vmem %s1455_s5, %s1463_s18 }
  0x12   : > { %v314_v7 = vld [vmem:[%s1358_s12] sm:$0xf]  ;;  %v316_v8 = vld [vmem:[%s1358_s12 + $0x8] sm:$0xf]  ;;  %v318_v16 = vld [vmem:[%s1358_s12 + $0x10] sm:$0xf]  ;;  %1187 = vmatprep.subr.bf16.mxu0 %v1249_v9 }
  0x13   : > { %v1062_v10 = vcombine.low %v314_v7, %v316_v8  ;;  %v438_v11 = vshrl.u32 %v314_v7, 16  ;;  %v441_v12 = vshll.u32 %v314_v7, 16  ;;  %v452_v13 = vshrl.u32 %v316_v8, 16  ;;  %v320_v24 = vld [vmem:[%s1358_s12 + $0x18] sm:$0xf] }
  0x14   : > { %v455_v14 = vshll.u32 %v316_v8, 16  ;;  %v466_v20 = vshrl.u32 %v318_v16, 16  ;;  %v469_v22 = vshll.u32 %v318_v16, 16  ;;  %v1094_v23 = vcombine.low %v316_v8, %v318_v16  ;;  %v322_v25 = vld [vmem:[%s1358_s12 + $0x20] sm:$0xf]  ;;  %1164 = vmatpush3.bf16.msra.mxu1 %v1248_v6 }
  0x15   : > { %1165 = vmatprep.mubr.msk.bf16.mxu1 %vm370_vm0, %v1062_v10  ;;  %v440_v17 = vrot.slane %v438_v11, 4  ;;  %v443_v18 = vrot.slane %v441_v12, 5  ;;  %v454_v19 = vrot.slane %v452_v13, 4  ;;  %v480_v28 = vshrl.u32 %v320_v24, 16  ;;  %1188 = vmatpush3.bf16.msra.mxu0 %v1249_v9  ;;  %v315_v49 = vld [vmem:[%s1358_s12 + $0x4] sm:$0x1] }
  0x16   : > { %v457_v21 = vrot.slane %v455_v14, 5  ;;  %v468_v29 = vrot.slane %v466_v20, 4  ;;  %v471_v30 = vrot.slane %v469_v22, 5  ;;  %1189 = vmatprep.mubr.msk.bf16.mxu0 %vm370_vm0, %v1094_v23  ;;  %v1063_v31 = vcombine.low %v318_v16, %v320_v24  ;;  %1169 = vmatprep.subr.bf16.mxu1 %v1251_v15  ;;  %v317_v50 = vld [vmem:[%s1358_s12 + $0xc] sm:$0x1] }
  0x17   : > { %v444_v26 = vor.u32 %v443_v18, %v440_v17  ;;  %v483_v32 = vshll.u32 %v320_v24, 16  ;;  %v482_v33 = vrot.slane %v480_v28, 4  ;;  %v1095_v34 = vcombine.low %v320_v24, %v322_v25  ;;  %1193 = vmatprep.subr.bf16.mxu0 %v1253_v27  ;;  %v319_v56 = vld [vmem:[%s1358_s12 + $0x14] sm:$0x1]  ;;  %v321_v57 = vld [vmem:[%s1358_s12 + $0x1c] sm:$0x1] }
  0x18   : > { %v704_v35 = vshrl.u32 %v322_v25, 16  ;;  %v707_v36 = vshll.u32 %v322_v25, 16  ;;  %v458_v37 = vor.u32 %v457_v21, %v454_v19  ;;  %v472_v44 = vor.u32 %v471_v30, %v468_v29  ;;  %1166 = vmatmul.mubr.msk.bf16.vlgmr.msra.gmra.mrb[0].mxu1 %vm370_vm0, %v1063_v31  ;;  %v323_v59 = vld [vmem:[%s1358_s12 + $0x24] sm:$0x1]  ;;  %v1118_v22 = vld [vmem:[%s1452_s2] ss:$0 sm:$0xff] }
  0x19   : > { %v485_v38 = vrot.slane %v483_v32, 5  ;;  %v445_v43 = vrot.slane %v444_v26, 4  ;;  %1170 = vmatpush3.bf16.msra.mxu1 %v1251_v15  ;;  %1190 = vmatmul.mubr.msk.bf16.vlgmr.msra.gmra.mrb[0].mxu0 %vm370_vm0, %v1095_v34  ;;  %v447_v52 = vshll.u32 %v315_v49, 16  ;;  %v461_v55 = vshll.u32 %v317_v50, 16 }
  0x1a   : > { %v706_v40 = vrot.slane %v704_v35, 4  ;;  %v709_v41 = vrot.slane %v707_v36, 5  ;;  %v459_v46 = vrot.slane %v458_v37, 4  ;;  %1194 = vmatpush3.bf16.msra.mxu0 %v1253_v27  ;;  %1171 = vmatprep.subr.bf16.mxu1 %v1256_v39  ;;  %v473_v53 = vrot.slane %v472_v44, 4 }
  0x1b   : > { %v486_v45 = vor.u32 %v485_v38, %v482_v33  ;;  %1195 = vmatprep.subr.bf16.mxu0 %v1257_v42  ;;  %v449_v58 = vrot.slane %v447_v52, 5  ;;  %v475_v60 = vshll.u32 %v319_v56, 16  ;;  %v489_v62 = vshll.u32 %v321_v57, 16 }
  0x1c   : > { %v710_v47 = vor.u32 %v709_v41, %v706_v40  ;;  %v463_v1 = vrot.slane %v461_v55, 5  ;;  %v713_v2 = vshll.u32 %v323_v59, 16  ;;  %v843_v16 = vlaneseq }
  0x1d   : > { %1172 = vmatpush3.bf16.msra.mxu1 %v1256_v39  ;;  %v487_v61 = vrot.slane %v486_v45, 4  ;;  %v450_v4 = vsel %vm1395_vm3, %v445_v43, %v449_v58  ;;  %v477_v5 = vrot.slane %v475_v60, 5  ;;  %v491_v6 = vrot.slane %v489_v62, 5 }
  0x1e   : > { %v711_v63 = vrot.slane %v710_v47, 4  ;;  %1196 = vmatpush3.bf16.msra.mxu0 %v1257_v42  ;;  %1173 = vmatprep.subr.bf16.mxu1 %v1258_v48  ;;  %v464_v7 = vsel %vm1395_vm3, %v459_v46, %v463_v1  ;;  %v715_v8 = vrot.slane %v713_v2, 5  ;;  %v844_v18 = vshrl.u32 %v843_v16, 7 }
  0x1f   : > { %1197 = vmatprep.subr.bf16.mxu0 %v1259_v51  ;;  %v1078_v9 = vcombine.low %v450_v4, %v464_v7  ;;  %v478_v10 = vsel %vm1395_vm3, %v473_v53, %v477_v5  ;;  %v492_v11 = vsel %vm1395_vm3, %v487_v61, %v491_v6 }
  0x20   : > { %v716_v12 = vsel %vm1395_vm3, %v711_v63, %v715_v8  ;;  %v1110_v13 = vcombine.low %v464_v7, %v478_v10  ;;  %v1079_v14 = vcombine.low %v478_v10, %v492_v11  ;;  %vm845_vm4 = vcmp.lt.s32.totalorder %v844_v18, 4 }
  0x21   : > { %1174 = vmatpush3.bf16.msra.mxu1 %v1258_v48  ;;  %1177 = vmatprep.mubr.msk.bf16.mxu1 %vm370_vm0, %v1078_v9  ;;  %v1111_v15 = vcombine.low %v492_v11, %v716_v12 }
  0x22   : > { %1198 = vmatpush3.bf16.msra.mxu0 %v1259_v51  ;;  %1175 = vmatprep.subr.bf16.mxu1 %v1260_v0 }
  0x23   : > { %1199 = vmatprep.subr.bf16.mxu0 %v1261_v3  ;;  %1201 = vmatprep.mubr.msk.bf16.mxu0 %vm370_vm0, %v1110_v13 }
  0x25   : > { %1176 = vmatpush3.bf16.msra.mxu1 %v1260_v0 }
  0x26   : > { %1200 = vmatpush3.bf16.msra.mxu0 %v1261_v3 }
  0x28   : > { %1178 = vmatmul.mubr.msk.bf16.vlgmr.msra.gmra.mrb[0].mxu1 %vm370_vm0, %v1079_v14 }
  0x29   : > { %1202 = vmatmul.mubr.msk.bf16.vlgmr.msra.gmra.mrb[0].mxu0 %vm370_vm0, %v1111_v15 }
  0xfb   : > { %v1179_v17 = vpop.f32.mrb[0].mxu1 }
  0xfc   : > { %v1203_v19 = vpop.f32.mrb[0].mxu0  ;;  %v576_v20 = vpop.f32.mrb[1].mxu1 }
  0xfd   : > { %v1205_v21 = vadd.f32 %v1203_v19, %v1179_v17  ;;  %v797_v23 = vpop.f32.mrb[1].mxu0  ;;  %v1180_v24 = vpop.f32.mrb[2].mxu1 }
  0xfe   : > { %v1206_v25 = vadd.f32 %v797_v23, %v576_v20  ;;  %v1204_v26 = vpop.f32.mrb[2].mxu0  ;;  %v579_v27 = vpop.f32.mrb[3].mxu1 }
  0xff   : > { %v1207_v28 = vadd.f32 %v1204_v26, %v1180_v24  ;;  %v800_v29 = vpop.f32.mrb[3].mxu0  ;;  %v833_v30 = vadd.f32 %v1205_v21, %v1118_v22 }
 0x100   : > { %v831_v31 = vadd.f32 %v1206_v25, %v1118_v22  ;;  %v1208_v32 = vadd.f32 %v800_v29, %v579_v27 }
 0x101   : > { %v834_v33 = vadd.f32 %v1207_v28, %v1118_v22  ;;  %v851_v37 = vsel %vm845_vm4, %v833_v30, 0.0 }
 0x102   : > { %v849_v34 = vsel %vm845_vm4, %v831_v31, 0.0  ;;  %v832_v35 = vadd.f32 %v1208_v32, %v1118_v22  ;;  %v865_v44 = vmul.f32 %v851_v37, %v851_v37 }
 0x103   : > { %v1130_v36 = vpack.c.bf16 %v834_v33, %v833_v30  ;;  %v863_v40 = vmul.f32 %v849_v34, %v849_v34  ;;  %v852_v43 = vsel %vm845_vm4, %v834_v33, 0.0 }
 0x104   : > { %v1125_v38 = vpack.c.bf16 %v832_v35, %v831_v31  ;;  %v850_v39 = vsel %vm845_vm4, %v832_v35, 0.0  ;;  %v866_v47 = vmul.f32 %v852_v43, %v852_v43 }
 0x105   : > { %1132 = vst [vmem:[%s296_s17 + $0x8] sm:$0xff] %v1130_v36   ;;  %v853_v41 = vadd.f32 %v850_v39, %v849_v34  ;;  %v864_v42 = vmul.f32 %v850_v39, %v850_v39 }
 0x106   : > { %1126 = vst [vmem:[%s296_s17] sm:$0xff] %v1125_v38  }
 0x107   : > { %v854_v45 = vadd.f32 %v853_v41, %v851_v37  ;;  %v867_v46 = vadd.f32 %v864_v42, %v863_v40 }
 0x109   : > { %v855_v48 = vadd.f32 %v854_v45, %v852_v43  ;;  %v868_v49 = vadd.f32 %v867_v46, %v865_v44 }
 0x10b   : > { %v856_v50 = vrot.slane %v855_v48, 4  ;;  %v869_v51 = vadd.f32 %v868_v49, %v866_v47 }
 0x10d   : > { %v857_v52 = vadd.f32 %v856_v50, %v855_v48  ;;  %v870_v53 = vrot.slane %v869_v51, 4 }
 0x10f   : > { %v858_v54 = vrot.slane %v857_v52, 2  ;;  %v871_v55 = vadd.f32 %v870_v53, %v869_v51 }
 0x111   : > { %v859_v56 = vadd.f32 %v858_v54, %v857_v52  ;;  %v872_v57 = vrot.slane %v871_v55, 2 }
 0x113   : > { %v860_v58 = vrot.slane %v859_v56, 1  ;;  %v873_v59 = vadd.f32 %v872_v57, %v871_v55 }
 0x115   : > { %v861_v60 = vadd.f32 %v860_v58, %v859_v56  ;;  %v874_v61 = vrot.slane %v873_v59, 1 }
 0x117   : > { %862 = vst [vmem:[%s302_s24] sm:$0x1] %v861_v60  ;;  %v875_v62 = vadd.f32 %v874_v61, %v873_v59 }
 0x119   : > { %876 = vst [vmem:[%s308_s27] sm:$0x1] %v875_v62 }
 0x11a PF: > { %s16_s20 = sadd.s32 1, %s1284_s20   ;;  %s1458_s18 = smov %s1280_s19 }
 0x11b   : > { %p13_p5 = scmp.ge.s32.totalorder %s16_s20, 4   ;;  %s1459_s19 = smov %s1461_s21 }
 0x11d   :  { %15 = sbr.rel (!%p13_p5) target bundleno = 2 (0x2), region = 95 }

// kernel: _lambda_.12
= control target key start
LH: loop header
LB: loop body
LE: loop exit
PB: predicated region body
PF: predicated region fallthrough
CT: control target
= control target key end

     0   :  { %s347_s12 = smov 0   ;;  %s370_s0 = inlined_call_operand.vmem [shape: bf16[2,4,8,128], index: 0, kind: input, shape index: {}]   ;;  %s371_s1 = inlined_call_operand.vmem [shape: f32[1,1,1,128], index: 1, kind: input, shape index: {}]   ;;  %s372_s2 = inlined_call_operand.vmem [shape: f32[1,1,1,128], index: 2, kind: input, shape index: {}]   ;;  %s373_s3 = inlined_call_operand.vmem [shape: bf16[2,4,8,128], index: 3, kind: output, shape index: {}]  }
   0x1 LB: > { %s276_s13 = sadd.s32 4294967295, %s325_s12   ;;  %p280_p0 = scmp.ge.s32.totalorder %s325_s12, 1  ;;  %s325_s12 = sphi %s347_s12, %s13_s12  }
   0x2   : > { %p137_p1 = scmp.lt.s32.totalorder %s325_s12, 3 }
   0x4   : > { %p138_p2 = pnand %p280_p0, %p137_p1 }
   0x5   : > { %p161_p3 = scmp.lt.s32.totalorder (!%p138_p2), %s276_s13, 1  ;;  %v285_v2 = vld [vmem:[%s371_s1] ss:$0 sm:$0xff] (!%p138_p2) }
   0x6   : > { %141 = sbr.rel (%p138_p2) target bundleno = 30 (0x1e), region = 32  ;;  %v286_v7 = vld [vmem:[%s372_s2] ss:$0 sm:$0xff] (!%p138_p2) }
   0xd   : > { %s375_s13 = smov (!%p161_p3, %s276_s13), 1 }
   0xe   : > { %s289_s14 = sshll.u32 %s375_s13, 4 }
   0xf   : > { %s165_s17 = scalar_lea.vmem %s370_s0, %s289_s14  ;;  %s170_s24 = scalar_lea.vmem %s373_s3, %s289_s14 }
  0x10   : > { %v292_v0 = vld [vmem:[%s165_s17] sm:$0xff]   ;;  %v309_v1 = vld [vmem:[%s165_s17 + $0x8] sm:$0xff]  }
  0x11   : > { %v293_v3 = vunpack.c.l.bf16 %v292_v0  ;;  %v294_v4 = vunpack.c.h.bf16 %v292_v0  ;;  %v297_v5 = vunpack.c.l.bf16 %v309_v1  ;;  %v298_v6 = vunpack.c.h.bf16 %v309_v1 }
  0x13   : > { %v186_v8 = vmul.f32 %v293_v3, %v285_v2  ;;  %v187_v9 = vmul.f32 %v294_v4, %v285_v2  ;;  %v188_v10 = vmul.f32 %v297_v5, %v285_v2  ;;  %v189_v11 = vmul.f32 %v298_v6, %v285_v2 }
  0x15   : > { %v197_v12 = vadd.f32 %v286_v7, %v186_v8  ;;  %v198_v13 = vadd.f32 %v286_v7, %v187_v9  ;;  %v199_v14 = vadd.f32 %v286_v7, %v188_v10  ;;  %v200_v15 = vadd.f32 %v286_v7, %v189_v11 }
  0x17   : > { %vm201_vm0 = vcmp.ge.f32.partialorder %v197_v12, 0.0  ;;  %vm202_vm1 = vcmp.ge.f32.partialorder %v198_v13, 0.0  ;;  %v205_v16 = vmul.f32 0.2, %v197_v12  ;;  %v206_v17 = vmul.f32 0.2, %v198_v13 }
  0x18   : > { %vm203_vm2 = vcmp.ge.f32.partialorder %v199_v14, 0.0  ;;  %vm204_vm3 = vcmp.ge.f32.partialorder %v200_v15, 0.0  ;;  %v207_v18 = vmul.f32 0.2, %v199_v14  ;;  %v208_v19 = vmul.f32 0.2, %v200_v15 }
  0x19   : > { %v209_v20 = vsel %vm201_vm0, %v197_v12, %v205_v16  ;;  %v210_v21 = vsel %vm202_vm1, %v198_v13, %v206_v17 }
  0x1a   : > { %v302_v22 = vpack.c.bf16 %v210_v21, %v209_v20  ;;  %v211_v23 = vsel %vm203_vm2, %v199_v14, %v207_v18  ;;  %v212_v24 = vsel %vm204_vm3, %v200_v15, %v208_v19 }
  0x1b   : > { %v307_v25 = vpack.c.bf16 %v212_v24, %v211_v23 }
  0x1c   : > { %303 = vst [vmem:[%s170_s24] sm:$0xff] %v302_v22  }
  0x1d   : > { %310 = vst [vmem:[%s170_s24 + $0x8] sm:$0xff] %v307_v25  }
  0x1e PF: > { %s13_s12 = sadd.s32 1, %s325_s12  }
  0x1f   : > { %p10_p4 = scmp.ge.s32.totalorder %s13_s12, 4  }
  0x21   :  { %12 = sbr.rel (!%p10_p4) target bundleno = 1 (0x1), region = 62 }

// kernel: _lambda_.14
= control target key start
LH: loop header
LB: loop body
LE: loop exit
PB: predicated region body
PF: predicated region fallthrough
CT: control target
= control target key end

     0   :  { %s324_s12 = smov 0   ;;  %s347_s0 = inlined_call_operand.vmem [shape: bf16[2,3,8,128], index: 0, kind: input, shape index: {}]   ;;  %s348_s1 = inlined_call_operand.vmem [shape: f32[1,1,1,128], index: 1, kind: input, shape index: {}]   ;;  %s349_s2 = inlined_call_operand.vmem [shape: f32[1,1,1,128], index: 2, kind: input, shape index: {}]   ;;  %s350_s3 = inlined_call_operand.vmem [shape: bf16[2,3,8,128], index: 3, kind: output, shape index: {}]  }
   0x1 LB: > { %s267_s13 = sadd.s32 4294967295, %s302_s12   ;;  %p271_p0 = scmp.ge.s32.totalorder %s302_s12, 1  ;;  %s302_s12 = sphi %s324_s12, %s13_s12  }
   0x2   : > { %p137_p1 = scmp.lt.s32.totalorder %s302_s12, 3 }
   0x4   : > { %p138_p2 = pnand %p271_p0, %p137_p1 }
   0x5   : > { %p161_p3 = scmp.lt.s32.totalorder (!%p138_p2), %s267_s13, 1  ;;  %v274_v2 = vld [vmem:[%s348_s1] ss:$0 sm:$0xff] (!%p138_p2) }
   0x6   : > { %141 = sbr.rel (%p138_p2) target bundleno = 31 (0x1f), region = 32  ;;  %v275_v6 = vld [vmem:[%s349_s2] ss:$0 sm:$0xff] (!%p138_p2) }
   0xd   : > { %s352_s13 = smov (!%p161_p3, %s267_s13), 1 }
   0xe   : > { %s287_s14 = smul.u32 12, %s352_s13 }
  0x10   : > { %s165_s17 = scalar_lea.vmem %s347_s0, %s287_s14  ;;  %s170_s24 = scalar_lea.vmem %s350_s3, %s287_s14 }
  0x11   : > { %v279_v0 = vld [vmem:[%s165_s17] sm:$0xff]   ;;  %v173_v1 = vld [vmem:[%s165_s17 + $0x8] sm:$0xf] }
  0x12   : > { %v280_v3 = vunpack.c.l.bf16 %v279_v0  ;;  %v281_v4 = vunpack.c.h.bf16 %v279_v0  ;;  %v176_v5 = vunpack.c.l.bf16 %v173_v1 }
  0x14   : > { %v184_v7 = vmul.f32 %v280_v3, %v274_v2  ;;  %v185_v8 = vmul.f32 %v281_v4, %v274_v2  ;;  %v186_v9 = vmul.f32 %v274_v2, %v176_v5 }
  0x16   : > { %v194_v10 = vadd.f32 %v275_v6, %v184_v7  ;;  %v195_v11 = vadd.f32 %v275_v6, %v185_v8  ;;  %v196_v12 = vadd.f32 %v275_v6, %v186_v9 }
  0x18   : > { %vm197_vm0 = vcmp.ge.f32.partialorder %v194_v10, 0.0  ;;  %vm198_vm1 = vcmp.ge.f32.partialorder %v195_v11, 0.0  ;;  %v200_v13 = vmul.f32 0.2, %v194_v10  ;;  %v201_v14 = vmul.f32 0.2, %v195_v11 }
  0x19   : > { %vm199_vm2 = vcmp.ge.f32.partialorder %v196_v12, 0.0  ;;  %v202_v15 = vmul.f32 0.2, %v196_v12 }
  0x1a   : > { %v203_v16 = vsel %vm197_vm0, %v194_v10, %v200_v13  ;;  %v204_v17 = vsel %vm198_vm1, %v195_v11, %v201_v14 }
  0x1b   : > { %v285_v18 = vpack.c.bf16 %v204_v17, %v203_v16  ;;  %v205_v19 = vsel %vm199_vm2, %v196_v12, %v202_v15 }
  0x1c   : > { %v208_v20 = vpack.c.bf16 %v205_v19, %v205_v19 }
  0x1d   : > { %286 = vst [vmem:[%s170_s24] sm:$0xff] %v285_v18  }
  0x1e   : > { %211 = vst [vmem:[%s170_s24 + $0x8] sm:$0xf] %v208_v20 }
  0x1f PF: > { %s13_s12 = sadd.s32 1, %s302_s12  }
  0x20   : > { %p10_p4 = scmp.ge.s32.totalorder %s13_s12, 4  }
  0x22   :  { %12 = sbr.rel (!%p10_p4) target bundleno = 1 (0x1), region = 62 }

// kernel: _lambda_.13
= control target key start
LH: loop header
LB: loop body
LE: loop exit
PB: predicated region body
PF: predicated region fallthrough
CT: control target
= control target key end

     0   :  { %s2565_s18 = smov 0   ;;  %s2567_s19 = smov 0   ;;  %s2931_s0 = inlined_call_operand.vmem [shape: bf16[2,6,11,32], index: 0, kind: input, shape index: {}]   ;;  %s2932_s1 = inlined_call_operand.vmem [shape: bf16[4,4,32,128], index: 1, kind: input, shape index: {}]   ;;  %s2933_s2 = inlined_call_operand.vmem [shape: f32[1,128], index: 2, kind: input, shape index: {}]   ;;  %s2934_s3 = inlined_call_operand.vmem [shape: bf16[2,3,8,128], index: 3, kind: output, shape index: {0}]   ;;  %s2935_s4 = inlined_call_operand.vmem [shape: f32[2,1,128], index: 4, kind: output, shape index: {1}]   ;;  %s2936_s5 = inlined_call_operand.vmem [shape: f32[2,1,128], index: 5, kind: output, shape index: {2}]  }
   0x1   :  { %s2569_s20 = smov 0  }
   0x2 LB: > { %s28_s21 = sadd.s32 1, %s2529_s19  ;;  %p2080_p0 = scmp.ge.s32.totalorder %s2533_s20, 1  ;;  %s2533_s20 = sphi %s2569_s20, %s16_s20   ;;  %s2529_s19 = sphi %s2567_s19, %s2944_s19   ;;  %s2525_s18 = sphi %s2565_s18, %s2943_s18  }
   0x3   : > { %p30_p1 = scmp.ge.s32.totalorder %s28_s21, 2  ;;  %p227_p2 = scmp.lt.s32.totalorder %s2533_s20, 3 }
   0x5   : > { %s2946_s21 = smov (%p30_p1, %s28_s21), 0  ;;  %p228_p3 = pnand %p2080_p0, %p227_p2 }
   0x6   : > { %v2471_v0 = vld [vmem:[%s2932_s1] sm:$0xff] (!%p228_p3)   ;;  %p277_p4 = scmp.lt.s32.totalorder (!%p228_p3), %s2525_s18, 1  ;;  %v2472_v1 = vld [vmem:[%s2932_s1 + $0x8] sm:$0xff] (!%p228_p3)   ;;  %v2473_v2 = vld [vmem:[%s2932_s1 + $0x10] sm:$0xff] (!%p228_p3)   ;;  %vm352_vm0 = vcmask (!%p228_p3), 261120   ;;  %vm546_vm3 = vcmask (!%p228_p3), 1042432  }
   0x7   : > { %231 = sbr.rel (%p228_p3) target bundleno = 329 (0x149), region = 32  ;;  %2317 = vmatprep.subr.bf16.mxu0 (!%p228_p3), %v2471_v0  ;;  %v2476_v3 = vld [vmem:[%s2932_s1 + $0x20] sm:$0xff] (!%p228_p3)   ;;  %2325 = vmatprep.subr.bf16.mxu1 (!%p228_p3), %v2473_v2  ;;  %v2477_v4 = vld [vmem:[%s2932_s1 + $0x18] sm:$0xff] (!%p228_p3)   ;;  %vm413_vm1 = vsmask.f32 (!%p228_p3), 3328  ;;  %v2478_v8 = vld [vmem:[%s2932_s1 + $0x28] sm:$0xff] (!%p228_p3)  }
   0x8   : > { %2318 = vmatpush3.bf16.msra.mxu0 (!%p228_p3), %v2471_v0  ;;  %2326 = vmatpush3.bf16.msra.mxu1 (!%p228_p3), %v2473_v2  ;;  %vm414_vm2 = vsmask.f32 (!%p228_p3), 7440  ;;  %vm547_vm4 = vcmask (!%p228_p3), 1046532   ;;  %v2629_v14 = vld [vmem:[%s2932_s1 + $0x30] sm:$0xff] (!%p228_p3)   ;;  %v2656_v32 = vld [vmem:[%s2932_s1 + $0x40] sm:$0xff] (!%p228_p3)  }
   0x9   : > { %2319 = vmatprep.subr.bf16.mxu0 (!%p228_p3), %v2472_v1  ;;  %2327 = vmatprep.subr.bf16.mxu1 (!%p228_p3), %v2477_v4  ;;  %vm2660_vm5 = vmor (!%p228_p3), %vm413_vm1, %vm414_vm2  ;;  %vm646_vm7 = vsmask.f32 (!%p228_p3), 2304  ;;  %vm647_vm8 = vsmask.f32 (!%p228_p3), 6416 }
   0xa   : > { %vm2675_vm6 = vmor (!%p228_p3), %vm546_vm3, %vm547_vm4 }
   0xb   : > { %vm2717_vm9 = vmor (!%p228_p3), %vm646_vm7, %vm647_vm8 }
   0xc   : > { %2320 = vmatpush3.bf16.msra.mxu0 (!%p228_p3), %v2472_v1  ;;  %2328 = vmatpush3.bf16.msra.mxu1 (!%p228_p3), %v2477_v4 }
   0xd   : > { %2333 = vmatprep.subr.bf16.mxu0 (!%p228_p3), %v2476_v3  ;;  %2341 = vmatprep.subr.bf16.mxu1 (!%p228_p3), %v2629_v14 }
   0xe   : > { %s2948_s18 = smov (!%p277_p4, %s2525_s18), 1 }
   0xf   : > { %s2445_s30 = smul.u32 48, %s2948_s18  ;;  %s302_s12 = scalar_lea.vmem %s2935_s4, %s2948_s18 }
  0x10   : > { %s2446_s28 = smul.u32 12, %s2948_s18  ;;  %s308_s14 = scalar_lea.vmem %s2936_s5, %s2948_s18 }
  0x11   : > { %s2604_s10 = scalar_lea.vmem %s2931_s0, %s2445_s30 }
  0x12   : > { %v2607_v5 = vld [vmem:[%s2604_s10] sm:$0xf]  ;;  %v2610_v6 = vld [vmem:[%s2604_s10 + $0x8] sm:$0xf]  ;;  %v2613_v7 = vld [vmem:[%s2604_s10 + $0x10] sm:$0xf]  ;;  %s296_s8 = scalar_lea.vmem %s2934_s3, %s2446_s28 }
  0x13   : > { %v2083_v9 = vcombine.low %v2607_v5, %v2610_v6  ;;  %v417_v10 = vshrl.u32 %v2607_v5, 16  ;;  %v420_v11 = vshll.u32 %v2607_v5, 16  ;;  %v2099_v12 = vrot.slane %v2607_v5, 9  ;;  %v2624_v13 = vld [vmem:[%s2604_s10 + $0x4] sm:$0x3] }
  0x14   : > { %v2084_v15 = vcombine.low %v2613_v7, %v2613_v7  ;;  %v2634_v16 = vld [vmem:[%s2604_s10 + $0xc] sm:$0x3]  ;;  %v2637_v17 = vld [vmem:[%s2604_s10 + $0x14] sm:$0x3]  ;;  %v426_v18 = vshll.u32 %v2624_v13, 16  ;;  %v431_v19 = vshrl.u32 %v2610_v6, 16 }
  0x15   : > { %2321 = vmatprep.mubr.msk.bf16.mxu0 %vm352_vm0, %v2083_v9  ;;  %v2642_v20 = vrot.slane %v417_v10, 5  ;;  %v2644_v21 = vrot.slane %v420_v11, 6  ;;  %v419_v22 = vrot.slane %v417_v10, 4  ;;  %v422_v23 = vrot.slane %v420_v11, 5  ;;  %v2481_v10 = vld [vmem:[%s2932_s1 + $0x38] sm:$0xff]  }
  0x16   : > { %2322 = vmatmul.mubr.msk.bf16.vlgmr.msra.gmra.mrb[0].mxu0 %vm352_vm0, %v2084_v15  ;;  %v428_v24 = vrot.slane %v426_v18, 5  ;;  %v433_v25 = vrot.slane %v431_v19, 4  ;;  %v434_v26 = vshll.u32 %v2610_v6, 16  ;;  %v440_v27 = vshll.u32 %v2634_v16, 16 }
  0x17   : > { %2334 = vmatpush3.bf16.msra.mxu0 %v2476_v3  ;;  %v423_v28 = vor.u32 %v422_v23, %v419_v22  ;;  %v445_v29 = vshrl.u32 %v2613_v7, 16  ;;  %v448_v30 = vshll.u32 %v2613_v7, 16  ;;  %v454_v31 = vshll.u32 %v2637_v17, 16  ;;  %v2692_v3 = vld [vmem:[%s2604_s10 + $0x18] sm:$0xf] }
  0x18   : > { %2335 = vmatprep.subr.bf16.mxu0 %v2478_v8  ;;  %v436_v34 = vrot.slane %v434_v26, 5  ;;  %v442_v35 = vrot.slane %v440_v27, 5  ;;  %v559_v36 = vrot.slane %v2637_v17, 5  ;;  %v653_v37 = vshrl.u32 %v2624_v13, 16 }
  0x19   : > { %v424_v38 = vrot.slane %v423_v28, 4  ;;  %v447_v39 = vrot.slane %v445_v29, 4  ;;  %v450_v40 = vrot.slane %v448_v30, 5  ;;  %v456_v41 = vrot.slane %v454_v31, 5 }
  0x1a   : > { %v437_v42 = vor.u32 %v436_v34, %v433_v25  ;;  %v2666_v43 = vrot.slane %v653_v37, 5  ;;  %v656_v44 = vrot.slane %v426_v18, 6  ;;  %v659_v45 = vrot.slane %v431_v19, 5  ;;  %v2482_v19 = vld [vmem:[%s2932_s1 + $0x48] sm:$0xff]   ;;  %v320_v25 = vld [vmem:[%s2604_s10 + $0x1c] sm:$0x3] }
  0x1b   : > { %v429_v46 = vsel %vm2660_vm5, %v424_v38, %v428_v24  ;;  %v451_v47 = vor.u32 %v450_v40, %v447_v39  ;;  %v660_v48 = vrot.slane %v434_v26, 6  ;;  %v663_v49 = vshrl.u32 %v2634_v16, 16  ;;  %2336 = vmatpush3.bf16.msra.mxu0 %v2478_v8  ;;  %v2487_v37 = vld [vmem:[%s2932_s1 + $0x58] sm:$0xff]  }
  0x1c   : > { %v438_v50 = vrot.slane %v437_v42, 4  ;;  %v666_v51 = vrot.slane %v440_v27, 6  ;;  %v669_v52 = vrot.slane %v445_v29, 5  ;;  %v670_v53 = vrot.slane %v448_v30, 6  ;;  %2349 = vmatprep.subr.bf16.mxu0 %v2656_v32 }
  0x1d   : > { %v452_v54 = vrot.slane %v451_v47, 4  ;;  %v665_v55 = vrot.slane %v663_v49, 5  ;;  %v673_v56 = vshrl.u32 %v2637_v17, 16  ;;  %v676_v57 = vrot.slane %v454_v31, 6  ;;  %v2762_v47 = vld [vmem:[%s2604_s10 + $0x20] sm:$0xf] }
  0x1e   : > { %v2681_v59 = vsel %vm2660_vm5, %v438_v50, %v442_v35  ;;  %v671_v60 = vor.u32 %v670_v53, %v669_v52  ;;  %v551_v61 = vrot.slane %v2624_v13, 5  ;;  %v2100_v62 = vrot.slane %v2610_v6, 9 }
  0x1f   : > { %v2687_v63 = vsel %vm2660_vm5, %v452_v54, %v456_v41  ;;  %v2093_v0 = vcombine.low %v429_v46, %v2681_v59  ;;  %v675_v1 = vrot.slane %v673_v56, 5  ;;  %v555_v2 = vrot.slane %v2634_v16, 5 }
  0x20   : > { %v2094_v4 = vcombine.low %v2687_v63, %v2687_v63  ;;  %v552_v8 = vsel %vm2675_vm6, %v2099_v12, %v551_v61  ;;  %v2101_v9 = vrot.slane %v2613_v7, 9  ;;  %v2126_v11 = vcombine.low %v2610_v6, %v2613_v7 }
  0x21   : > { %2329 = vmatprep.mubr.msk.bf16.mxu1 %vm352_vm0, %v2093_v0  ;;  %v677_v13 = vor.u32 %v676_v57, %v675_v1  ;;  %v2709_v15 = vsel %vm2675_vm6, %v2100_v62, %v555_v2  ;;  %v651_v16 = vor.u32 %v2644_v21, %v2642_v20  ;;  %v657_v17 = vor.u32 %v656_v44, %v2666_v43  ;;  %v2483_v20 = vld [vmem:[%s2932_s1 + $0x50] sm:$0xff]   ;;  %v322_v1 = vld [vmem:[%s2604_s10 + $0x24] sm:$0x3] }
  0x22   : > { %2330 = vmatmul.mubr.msk.bf16.vlgmr.msra.gmra.mrb[0].mxu1 %vm352_vm0, %v2094_v4  ;;  %v2106_v5 = vcombine.low %v552_v8, %v2709_v15  ;;  %v2715_v12 = vsel %vm2675_vm6, %v2101_v9, %v559_v36  ;;  %v661_v22 = vor.u32 %v660_v48, %v659_v45  ;;  %v667_v23 = vor.u32 %v666_v51, %v665_v55  ;;  %v2488_v51 = vld [vmem:[%s2932_s1 + $0x68] sm:$0xff]   ;;  %v2489_v57 = vld [vmem:[%s2932_s1 + $0x70] sm:$0xff]  }
  0x23   : > { %2342 = vmatpush3.bf16.msra.mxu1 %v2629_v14  ;;  %v2107_v18 = vcombine.low %v2715_v12, %v2715_v12  ;;  %v672_v24 = vrot.slane %v671_v60, 4  ;;  %v652_v26 = vrot.slane %v651_v16, 4  ;;  %v849_v14 = vshrl.u32 %v2692_v3, 16  ;;  %v2490_v60 = vld [vmem:[%s2932_s1 + $0x80] sm:$0xff]  }
  0x24   : > { %2337 = vmatprep.mubr.msk.bf16.mxu0 %vm352_vm0, %v2106_v5  ;;  %2343 = vmatprep.subr.bf16.mxu1 %v2481_v10  ;;  %v852_v21 = vshll.u32 %v2692_v3, 16  ;;  %v662_v27 = vrot.slane %v661_v22, 4  ;;  %v858_v29 = vshll.u32 %v320_v25, 16  ;;  %v2136_v39 = vcombine.low %v2681_v59, %v2687_v63 }
  0x25   : > { %2338 = vmatmul.mubr.msk.bf16.vlgmr.msra.gmra.mrb[4].mxu0 %vm352_vm0, %v2107_v18  ;;  %v2740_v28 = vsel %vm2717_vm9, %v672_v24, %v677_v13  ;;  %v658_v30 = vsel %vm2717_vm9, %v652_v26, %v657_v17  ;;  %v851_v31 = vrot.slane %v849_v14, 4  ;;  %v2127_v41 = vcombine.low %v2692_v3, %v2692_v3 }
  0x26   : > { %2350 = vmatpush3.bf16.msra.mxu0 %v2656_v32  ;;  %2353 = vmatprep.mubr.msk.bf16.mxu0 %vm352_vm0, %v2126_v11  ;;  %v854_v34 = vrot.slane %v852_v21, 5  ;;  %v668_v35 = vsel %vm2717_vm9, %v662_v27, %v667_v23  ;;  %v2117_v36 = vcombine.low %v2740_v28, %v2740_v28  ;;  %v2486_v32 = vld [vmem:[%s2932_s1 + $0x60] sm:$0xff]   ;;  %v860_v38 = vrot.slane %v858_v29, 5  ;;  %v2491_v11 = vld [vmem:[%s2932_s1 + $0x78] sm:$0xff]  }
  0x27   : > { %2344 = vmatpush3.bf16.msra.mxu1 %v2481_v10  ;;  %2351 = vmatprep.subr.bf16.mxu0 %v2482_v19  ;;  %v2116_v40 = vcombine.low %v658_v30, %v668_v35  ;;  %v2142_v43 = vrot.slane %v2692_v3, 9  ;;  %v1033_v44 = vrot.slane %v849_v14, 5  ;;  %v1034_v45 = vrot.slane %v852_v21, 6  ;;  %v2823_v14 = vld [vmem:[%s2604_s10 + $0x28] sm:$0xf]  ;;  %v2497_v27 = vld [vmem:[%s2932_s1 + $0x98] sm:$0xff]  }
  0x28   : > { %2357 = vmatprep.subr.bf16.mxu1 %v2483_v20  ;;  %v855_v42 = vor.u32 %v854_v34, %v851_v31  ;;  %v1037_v46 = vshrl.u32 %v320_v25, 16  ;;  %v2147_v49 = vcombine.low %v2709_v15, %v2715_v12  ;;  %v948_v50 = vrot.slane %v320_v25, 5  ;;  %v2492_v15 = vld [vmem:[%s2932_s1 + $0x88] sm:$0xff]  }
  0x29   : > { %2345 = vmatprep.mubr.msk.bf16.mxu1 %vm352_vm0, %v2116_v40  ;;  %v1035_v52 = vor.u32 %v1034_v45, %v1033_v44  ;;  %v1040_v53 = vrot.slane %v858_v29, 6  ;;  %v1211_v56 = vshrl.u32 %v2762_v47, 16  ;;  %v1214_v62 = vshll.u32 %v2762_v47, 16  ;;  %v2498_v31 = vld [vmem:[%s2932_s1 + $0xa8] sm:$0xff]  }
  0x2a   : > { %2352 = vmatpush3.bf16.msra.mxu0 %v2482_v19  ;;  %v856_v48 = vrot.slane %v855_v42, 4  ;;  %2346 = vmatmul.mubr.msk.bf16.vlgmr.msra.gmra.mrb[4].mxu1 %vm352_vm0, %v2117_v36  ;;  %v1039_v55 = vrot.slane %v1037_v46, 5  ;;  %v2784_v59 = vsel %vm2675_vm6, %v2142_v43, %v948_v50  ;;  %v2157_v2 = vcombine.low %v668_v35, %v2740_v28  ;;  %v2496_v19 = vld [vmem:[%s2932_s1 + $0xa0] sm:$0xff]   ;;  %v324_v50 = vld [vmem:[%s2604_s10 + $0x2c] sm:$0x3] }
  0x2b   : > { %2365 = vmatprep.subr.bf16.mxu0 %v2486_v32  ;;  %2358 = vmatpush3.bf16.msra.mxu1 %v2483_v20  ;;  %v1036_v61 = vrot.slane %v1035_v52, 4  ;;  %v1213_v8 = vrot.slane %v1211_v56, 4  ;;  %v1216_v9 = vrot.slane %v1214_v62, 5  ;;  %v2148_v10 = vcombine.low %v2784_v59, %v2784_v59 }
  0x2c   : > { %2361 = vmatprep.mubr.msk.bf16.mxu1 %vm352_vm0, %v2136_v39  ;;  %v2774_v54 = vsel %vm2660_vm5, %v856_v48, %v860_v38  ;;  %2359 = vmatprep.subr.bf16.mxu1 %v2487_v37  ;;  %v1041_v4 = vor.u32 %v1040_v53, %v1039_v55  ;;  %v2167_v13 = vcombine.low %v2613_v7, %v2692_v3  ;;  %v1220_v5 = vshll.u32 %v322_v1, 16  ;;  %v2493_v7 = vld [vmem:[%s2932_s1 + $0x90] sm:$0xff]  }
  0x2d   : > { %2354 = vmatmul.mubr.msk.bf16.vlgmr.msra.gmra.mrb[8].mxu0 %vm352_vm0, %v2127_v41  ;;  %v2137_v0 = vcombine.low %v2774_v54, %v2774_v54  ;;  %v1217_v17 = vor.u32 %v1216_v9, %v1213_v8  ;;  %v2177_v22 = vcombine.low %v2687_v63, %v2774_v54  ;;  %v1395_v25 = vrot.slane %v1211_v56, 5  ;;  %v2499_v38 = vld [vmem:[%s2932_s1 + $0xb0] sm:$0xff]   ;;  %v2500_v41 = vld [vmem:[%s2932_s1 + $0xc0] sm:$0xff]  }
  0x2e   : > { %2366 = vmatpush3.bf16.msra.mxu0 %v2486_v32  ;;  %2369 = vmatprep.mubr.msk.bf16.mxu0 %vm352_vm0, %v2147_v49  ;;  %v2808_v16 = vsel %vm2717_vm9, %v1036_v61, %v1041_v4  ;;  %v1222_v23 = vrot.slane %v1220_v5, 5  ;;  %v1396_v26 = vrot.slane %v1214_v62, 6  ;;  %v1399_v20 = vshrl.u32 %v322_v1, 16  ;;  %v2501_v49 = vld [vmem:[%s2932_s1 + $0xb8] sm:$0xff]   ;;  %v2506_v56 = vld [vmem:[%s2932_s1 + $0xe0] sm:$0xff]  }
  0x2f   : > { %2367 = vmatprep.subr.bf16.mxu0 %v2488_v51  ;;  %2360 = vmatpush3.bf16.msra.mxu1 %v2487_v37  ;;  %v2158_v18 = vcombine.low %v2808_v16, %v2808_v16  ;;  %v1218_v24 = vrot.slane %v1217_v17, 4  ;;  %v2168_v21 = vcombine.low %v2762_v47, %v2762_v47  ;;  %v2188_v63 = vcombine.low %v2715_v12, %v2784_v59  ;;  %v2507_v4 = vld [vmem:[%s2932_s1 + $0xd8] sm:$0xff]  }
  0x30   : > { %2373 = vmatprep.subr.bf16.mxu1 %v2489_v57  ;;  %v2183_v29 = vrot.slane %v2762_v47, 9  ;;  %v1310_v30 = vrot.slane %v322_v1, 5  ;;  %v1402_v34 = vrot.slane %v1220_v5, 6  ;;  %v1573_v35 = vshrl.u32 %v2823_v14, 16 }
  0x31   : > { %v1223_v36 = vsel %vm2660_vm5, %v1218_v24, %v1222_v23  ;;  %v1397_v12 = vor.u32 %v1396_v26, %v1395_v25  ;;  %v1401_v32 = vrot.slane %v1399_v20, 5  ;;  %v1576_v37 = vshll.u32 %v2823_v14, 16  ;;  %v2510_v23 = vld [vmem:[%s2932_s1 + $0xf8] sm:$0xff]  }
  0x32   : > { %2368 = vmatpush3.bf16.msra.mxu0 %v2488_v51  ;;  %2362 = vmatmul.mubr.msk.bf16.vlgmr.msra.gmra.mrb[8].mxu1 %vm352_vm0, %v2137_v0  ;;  %v1311_v39 = vsel %vm2675_vm6, %v2183_v29, %v1310_v30  ;;  %v2178_v40 = vcombine.low %v1223_v36, %v1223_v36  ;;  %v2198_v42 = vcombine.low %v2740_v28, %v2808_v16  ;;  %v1575_v45 = vrot.slane %v1573_v35, 4  ;;  %v2502_v28 = vld [vmem:[%s2932_s1 + $0xc8] sm:$0xff]  }
  0x33   : > { %2381 = vmatprep.subr.bf16.mxu0 %v2490_v60  ;;  %2374 = vmatpush3.bf16.msra.mxu1 %v2489_v57  ;;  %v1398_v43 = vrot.slane %v1397_v12, 4  ;;  %v1403_v44 = vor.u32 %v1402_v34, %v1401_v32  ;;  %v1578_v46 = vrot.slane %v1576_v37, 5  ;;  %v2189_v48 = vcombine.low %v1311_v39, %v1311_v39 }
  0x34   : > { %2377 = vmatprep.mubr.msk.bf16.mxu1 %vm352_vm0, %v2157_v2  ;;  %2375 = vmatprep.subr.bf16.mxu1 %v2491_v11  ;;  %v2208_v51 = vcombine.low %v2692_v3, %v2762_v47  ;;  %v1582_v55 = vshll.u32 %v324_v50, 16  ;;  %v2503_v3 = vld [vmem:[%s2932_s1 + $0xd0] sm:$0xff]   ;;  %v2218_v57 = vcombine.low %v2774_v54, %v1223_v36  ;;  %v1758_v0 = vrot.slane %v1576_v37, 6 }
  0x35   : > { %2370 = vmatmul.mubr.msk.bf16.vlgmr.msra.gmra.mrb[12].mxu0 %vm352_vm0, %v2148_v10  ;;  %v1404_v52 = vsel %vm2717_vm9, %v1398_v43, %v1403_v44  ;;  %v1579_v53 = vor.u32 %v1578_v46, %v1575_v45  ;;  %v1761_v1 = vshrl.u32 %v324_v50, 16  ;;  %v2209_v2 = vcombine.low %v2823_v14, %v2823_v14  ;;  %v2508_v10 = vld [vmem:[%s2932_s1 + $0xe8] sm:$0xff]  }
  0x36   : > { %2382 = vmatpush3.bf16.msra.mxu0 %v2490_v60  ;;  %2385 = vmatprep.mubr.msk.bf16.mxu0 %vm352_vm0, %v2167_v13  ;;  %v2199_v47 = vcombine.low %v1404_v52, %v1404_v52  ;;  %v1757_v60 = vrot.slane %v1573_v35, 5  ;;  %v1584_v62 = vrot.slane %v1582_v55, 5  ;;  %v2229_v8 = vcombine.low %v2784_v59, %v1311_v39  ;;  %v2509_v59 = vld [vmem:[%s2932_s1 + $0xf0] sm:$0xff]  }
  0x37   : > { %2383 = vmatprep.subr.bf16.mxu0 %v2492_v15  ;;  %2376 = vmatpush3.bf16.msra.mxu1 %v2491_v11  ;;  %v1580_v61 = vrot.slane %v1579_v53, 4  ;;  %v2224_v9 = vrot.slane %v2823_v14, 9  ;;  %v1672_v54 = vrot.slane %v324_v50, 5  ;;  %v1764_v5 = vrot.slane %v1582_v55, 6 }
  0x38   : > { %2389 = vmatprep.subr.bf16.mxu1 %v2493_v7  ;;  %v1759_v13 = vor.u32 %v1758_v0, %v1757_v60  ;;  %v2239_v33 = vcombine.low %v2808_v16, %v1404_v52 }
  0x39   : > { %v1585_v11 = vsel %vm2660_vm5, %v1580_v61, %v1584_v62  ;;  %v1673_v17 = vsel %vm2675_vm6, %v2224_v9, %v1672_v54 }
  0x3a   : > { %2384 = vmatpush3.bf16.msra.mxu0 %v2492_v15  ;;  %2378 = vmatmul.mubr.msk.bf16.vlgmr.msra.gmra.mrb[12].mxu1 %vm352_vm0, %v2158_v18  ;;  %v1763_v15 = vrot.slane %v1761_v1, 5  ;;  %v1760_v18 = vrot.slane %v1759_v13, 4 }
  0x3b   : > { %2397 = vmatprep.subr.bf16.mxu0 %v2496_v19  ;;  %2390 = vmatpush3.bf16.msra.mxu1 %v2493_v7  ;;  %v2219_v7 = vcombine.low %v1585_v11, %v1585_v11 }
  0x3c   : > { %2393 = vmatprep.mubr.msk.bf16.mxu1 %vm352_vm0, %v2177_v22  ;;  %2391 = vmatprep.subr.bf16.mxu1 %v2497_v27  ;;  %v2230_v22 = vcombine.low %v1673_v17, %v1673_v17 }
  0x3d   : > { %2386 = vmatmul.mubr.msk.bf16.vlgmr.msra.gmra.mrb[16].mxu0 %vm352_vm0, %v2168_v21 }
  0x3e   : > { %2398 = vmatpush3.bf16.msra.mxu0 %v2496_v19  ;;  %2401 = vmatprep.mubr.msk.bf16.mxu0 %vm352_vm0, %v2188_v63  ;;  %v1765_v19 = vor.u32 %v1764_v5, %v1763_v15 }
  0x3f   : > { %2399 = vmatprep.subr.bf16.mxu0 %v2498_v31  ;;  %2392 = vmatpush3.bf16.msra.mxu1 %v2497_v27 }
  0x40   : > { %2405 = vmatprep.subr.bf16.mxu1 %v2499_v38  ;;  %v1766_v58 = vsel %vm2717_vm9, %v1760_v18, %v1765_v19 }
  0x41   : > { %v2240_v16 = vcombine.low %v1766_v58, %v1766_v58 }
  0x42   : > { %2400 = vmatpush3.bf16.msra.mxu0 %v2498_v31  ;;  %2394 = vmatmul.mubr.msk.bf16.vlgmr.msra.gmra.mrb[16].mxu1 %vm352_vm0, %v2178_v40 }
  0x43   : > { %2413 = vmatprep.subr.bf16.mxu0 %v2500_v41  ;;  %2406 = vmatpush3.bf16.msra.mxu1 %v2499_v38 }
  0x44   : > { %2409 = vmatprep.mubr.msk.bf16.mxu1 %vm352_vm0, %v2198_v42  ;;  %2407 = vmatprep.subr.bf16.mxu1 %v2501_v49 }
  0x45   : > { %2402 = vmatmul.mubr.msk.bf16.vlgmr.msra.gmra.mrb[20].mxu0 %vm352_vm0, %v2189_v48 }
  0x46   : > { %2414 = vmatpush3.bf16.msra.mxu0 %v2500_v41  ;;  %2417 = vmatprep.mubr.msk.bf16.mxu0 %vm352_vm0, %v2208_v51 }
  0x47   : > { %2415 = vmatprep.subr.bf16.mxu0 %v2502_v28  ;;  %2408 = vmatpush3.bf16.msra.mxu1 %v2501_v49 }
  0x48   : > { %2421 = vmatprep.subr.bf16.mxu1 %v2503_v3 }
  0x4a   : > { %2416 = vmatpush3.bf16.msra.mxu0 %v2502_v28  ;;  %2410 = vmatmul.mubr.msk.bf16.vlgmr.msra.gmra.mrb[20].mxu1 %vm352_vm0, %v2199_v47 }
  0x4b   : > { %2429 = vmatprep.subr.bf16.mxu0 %v2506_v56  ;;  %2422 = vmatpush3.bf16.msra.mxu1 %v2503_v3 }
  0x4c   : > { %2425 = vmatprep.mubr.msk.bf16.mxu1 %vm352_vm0, %v2218_v57  ;;  %2423 = vmatprep.subr.bf16.mxu1 %v2507_v4 }
  0x4d   : > { %2418 = vmatmul.mubr.msk.bf16.vlgmr.msra.gmra.mrb[24].mxu0 %vm352_vm0, %v2209_v2 }
  0x4e   : > { %2430 = vmatpush3.bf16.msra.mxu0 %v2506_v56  ;;  %2433 = vmatprep.mubr.msk.bf16.mxu0 %vm352_vm0, %v2229_v8 }
  0x4f   : > { %2431 = vmatprep.subr.bf16.mxu0 %v2508_v10  ;;  %2424 = vmatpush3.bf16.msra.mxu1 %v2507_v4 }
  0x50   : > { %2437 = vmatprep.subr.bf16.mxu1 %v2509_v59 }
  0x52   : > { %2432 = vmatpush3.bf16.msra.mxu0 %v2508_v10  ;;  %2426 = vmatmul.mubr.msk.bf16.vlgmr.msra.gmra.mrb[24].mxu1 %vm352_vm0, %v2219_v7 }
  0x53   : > { %2438 = vmatpush3.bf16.msra.mxu1 %v2509_v59  ;;  %2441 = vmatprep.mubr.msk.bf16.mxu1 %vm352_vm0, %v2239_v33 }
  0x54   : > { %2439 = vmatprep.subr.bf16.mxu1 %v2510_v23 }
  0x55   : > { %2434 = vmatmul.mubr.msk.bf16.vlgmr.msra.gmra.mrb[28].mxu0 %vm352_vm0, %v2230_v22 }
  0x57   : > { %2440 = vmatpush3.bf16.msra.mxu1 %v2510_v23 }
  0x5a   : > { %2442 = vmatmul.mubr.msk.bf16.vlgmr.msra.gmra.mrb[28].mxu1 %vm352_vm0, %v2240_v16 }
  0xe9   : > { %v2323_v24 = vpop.f32.mrb[0].mxu0 }
  0xea   : > { %v393_v25 = vpop.f32.mrb[1].mxu0 }
  0xeb   : > { %v2324_v26 = vpop.f32.mrb[2].mxu0 }
  0xec   : > { %v396_v20 = vpop.f32.mrb[3].mxu0 }
  0xf5   : > { %v2331_v14 = vpop.f32.mrb[0].mxu1 }
  0xf6   : > { %v539_v21 = vadd.f32 %v2331_v14, %v2323_v24  ;;  %v523_v27 = vpop.f32.mrb[1].mxu1 }
  0xf7   : > { %v537_v63 = vadd.f32 %v523_v27, %v393_v25  ;;  %v2332_v29 = vpop.f32.mrb[2].mxu1 }
  0xf8   : > { %v2339_v30 = vpop.f32.mrb[4].mxu0  ;;  %v526_v31 = vpop.f32.mrb[3].mxu1 }
  0xf9   : > { %v642_v6 = vadd.f32 %v2339_v30, %v539_v21  ;;  %v538_v34 = vadd.f32 %v526_v31, %v396_v20  ;;  %v626_v35 = vpop.f32.mrb[5].mxu0 }
  0xfa   : > { %v640_v36 = vadd.f32 %v626_v35, %v537_v63  ;;  %v2340_v12 = vpop.f32.mrb[6].mxu0 }
  0xfb   : > { %v629_v32 = vpop.f32.mrb[7].mxu0 }
  0xfc   : > { %v641_v37 = vadd.f32 %v629_v32, %v538_v34 }
  0xfd   : > { %v2347_v38 = vpop.f32.mrb[4].mxu1 }
  0xfe   : > { %v760_v39 = vadd.f32 %v2347_v38, %v642_v6  ;;  %v744_v40 = vpop.f32.mrb[5].mxu1 }
  0xff   : > { %v758_v41 = vadd.f32 %v744_v40, %v640_v36  ;;  %v2348_v42 = vpop.f32.mrb[6].mxu1 }
 0x100   : > { %v2355_v43 = vpop.f32.mrb[8].mxu0  ;;  %v747_v45 = vpop.f32.mrb[7].mxu1 }
 0x101   : > { %v844_v44 = vadd.f32 %v2355_v43, %v760_v39  ;;  %v828_v46 = vpop.f32.mrb[9].mxu0  ;;  %v759_v48 = vadd.f32 %v747_v45, %v641_v37 }
 0x102   : > { %v842_v49 = vadd.f32 %v828_v46, %v758_v41  ;;  %v2356_v50 = vpop.f32.mrb[10].mxu0 }
 0x103   : > { %v831_v51 = vpop.f32.mrb[11].mxu0 }
 0x104   : > { %v843_v28 = vadd.f32 %v831_v51, %v759_v48 }
 0x105   : > { %v2363_v52 = vpop.f32.mrb[8].mxu1 }
 0x106   : > { %v941_v53 = vadd.f32 %v2363_v52, %v844_v44  ;;  %v925_v55 = vpop.f32.mrb[9].mxu1 }
 0x107   : > { %v939_v3 = vadd.f32 %v925_v55, %v842_v49  ;;  %v2364_v47 = vpop.f32.mrb[10].mxu1 }
 0x108   : > { %v2371_v56 = vpop.f32.mrb[12].mxu0  ;;  %v928_v60 = vpop.f32.mrb[11].mxu1 }
 0x109   : > { %v1029_v57 = vadd.f32 %v2371_v56, %v941_v53  ;;  %v1013_v61 = vpop.f32.mrb[13].mxu0  ;;  %v940_v62 = vadd.f32 %v928_v60, %v843_v28  ;;  %v1869_v53 = vlaneseq }
 0x10a   : > { %v1027_v0 = vadd.f32 %v1013_v61, %v939_v3  ;;  %v2372_v1 = vpop.f32.mrb[14].mxu0 }
 0x10b   : > { %v1016_v2 = vpop.f32.mrb[15].mxu0  ;;  %v1870_v60 = vshrl.u32 %v1869_v53, 7 }
 0x10c   : > { %v1028_v4 = vadd.f32 %v1016_v2, %v940_v62  ;;  %v2245_v62 = vld [vmem:[%s2933_s2] ss:$0 sm:$0xff] }
 0x10d   : > { %v2379_v8 = vpop.f32.mrb[12].mxu1  ;;  %vm1871_vm10 = vcmp.lt.s32.totalorder %v1870_v60, 3 }
 0x10e   : > { %v1122_v9 = vadd.f32 %v2379_v8, %v1029_v57  ;;  %v1106_v54 = vpop.f32.mrb[13].mxu1 }
 0x10f   : > { %v1120_v10 = vadd.f32 %v1106_v54, %v1027_v0  ;;  %v2380_v11 = vpop.f32.mrb[14].mxu1 }
 0x110   : > { %v2387_v13 = vpop.f32.mrb[16].mxu0  ;;  %v1109_v5 = vpop.f32.mrb[15].mxu1 }
 0x111   : > { %v1206_v15 = vadd.f32 %v2387_v13, %v1122_v9  ;;  %v1190_v59 = vpop.f32.mrb[17].mxu0  ;;  %v1121_v17 = vadd.f32 %v1109_v5, %v1028_v4 }
 0x112   : > { %v1204_v7 = vadd.f32 %v1190_v59, %v1120_v10  ;;  %v2388_v33 = vpop.f32.mrb[18].mxu0 }
 0x113   : > { %v1193_v18 = vpop.f32.mrb[19].mxu0 }
 0x114   : > { %v1205_v19 = vadd.f32 %v1193_v18, %v1121_v17 }
 0x115   : > { %v2395_v22 = vpop.f32.mrb[16].mxu1 }
 0x116   : > { %v1303_v23 = vadd.f32 %v2395_v22, %v1206_v15  ;;  %v1287_v58 = vpop.f32.mrb[17].mxu1 }
 0x117   : > { %v1301_v16 = vadd.f32 %v1287_v58, %v1204_v7  ;;  %v2396_v24 = vpop.f32.mrb[18].mxu1 }
 0x118   : > { %v2403_v25 = vpop.f32.mrb[20].mxu0  ;;  %v1290_v20 = vpop.f32.mrb[19].mxu1 }
 0x119   : > { %v1391_v26 = vadd.f32 %v2403_v25, %v1303_v23  ;;  %v1375_v14 = vpop.f32.mrb[21].mxu0  ;;  %v1302_v21 = vadd.f32 %v1290_v20, %v1205_v19 }
 0x11a   : > { %v1389_v27 = vadd.f32 %v1375_v14, %v1301_v16  ;;  %v2404_v63 = vpop.f32.mrb[22].mxu0 }
 0x11b   : > { %v1378_v29 = vpop.f32.mrb[23].mxu0 }
 0x11c   : > { %v1390_v30 = vadd.f32 %v1378_v29, %v1302_v21 }
 0x11d   : > { %v2411_v31 = vpop.f32.mrb[20].mxu1 }
 0x11e   : > { %v1484_v6 = vadd.f32 %v2411_v31, %v1391_v26  ;;  %v1468_v34 = vpop.f32.mrb[21].mxu1 }
 0x11f   : > { %v1482_v35 = vadd.f32 %v1468_v34, %v1389_v27  ;;  %v2412_v36 = vpop.f32.mrb[22].mxu1 }
 0x120   : > { %v2419_v12 = vpop.f32.mrb[24].mxu0  ;;  %v1471_v37 = vpop.f32.mrb[23].mxu1 }
 0x121   : > { %v1568_v32 = vadd.f32 %v2419_v12, %v1484_v6  ;;  %v1552_v38 = vpop.f32.mrb[25].mxu0  ;;  %v1483_v39 = vadd.f32 %v1471_v37, %v1390_v30 }
 0x122   : > { %v1566_v40 = vadd.f32 %v1552_v38, %v1482_v35  ;;  %v2420_v41 = vpop.f32.mrb[26].mxu0 }
 0x123   : > { %v1555_v42 = vpop.f32.mrb[27].mxu0 }
 0x124   : > { %v1567_v43 = vadd.f32 %v1555_v42, %v1483_v39 }
 0x125   : > { %v2427_v44 = vpop.f32.mrb[24].mxu1 }
 0x126   : > { %v1665_v45 = vadd.f32 %v2427_v44, %v1568_v32  ;;  %v1649_v46 = vpop.f32.mrb[25].mxu1 }
 0x127   : > { %v1663_v48 = vadd.f32 %v1649_v46, %v1566_v40  ;;  %v2428_v49 = vpop.f32.mrb[26].mxu1 }
 0x128   : > { %v2435_v50 = vpop.f32.mrb[28].mxu0  ;;  %v1652_v28 = vpop.f32.mrb[27].mxu1 }
 0x129   : > { %v1753_v51 = vadd.f32 %v2435_v50, %v1665_v45  ;;  %v1737_v52 = vpop.f32.mrb[29].mxu0  ;;  %v1664_v55 = vadd.f32 %v1652_v28, %v1567_v43 }
 0x12a   : > { %v1751_v3 = vadd.f32 %v1737_v52, %v1663_v48  ;;  %v2436_v47 = vpop.f32.mrb[30].mxu0 }
 0x12b   : > { %v1740_v56 = vpop.f32.mrb[31].mxu0 }
 0x12c   : > { %v1752_v57 = vadd.f32 %v1740_v56, %v1664_v55 }
 0x12d   : > { %v2443_v61 = vpop.f32.mrb[28].mxu1 }
 0x12e   : > { %v1846_v0 = vadd.f32 %v2443_v61, %v1753_v51  ;;  %v1830_v1 = vpop.f32.mrb[29].mxu1 }
 0x12f   : > { %v1844_v2 = vadd.f32 %v1830_v1, %v1751_v3  ;;  %v2444_v4 = vpop.f32.mrb[30].mxu1 }
 0x130   : > { %v1862_v8 = vadd.f32 %v2245_v62, %v1846_v0  ;;  %v1833_v9 = vpop.f32.mrb[31].mxu1 }
 0x131   : > { %v1860_v54 = vadd.f32 %v2245_v62, %v1844_v2  ;;  %v1845_v10 = vadd.f32 %v1833_v9, %v1752_v57 }
 0x132   : > { %v1865_v11 = vpack.c.bf16 %v1862_v8, %v1862_v8  ;;  %v1877_v5 = vsel %vm1871_vm10, %v1862_v8, 0.0 }
 0x133   : > { %v1875_v13 = vsel %vm1871_vm10, %v1860_v54, 0.0  ;;  %v1861_v15 = vadd.f32 %v2245_v62, %v1845_v10  ;;  %v1889_v19 = vmul.f32 %v1877_v5, %v1877_v5 }
 0x134   : > { %1868 = vst [vmem:[%s296_s8 + $0x8] sm:$0xf] %v1865_v11  ;;  %v1887_v7 = vmul.f32 %v1875_v13, %v1875_v13 }
 0x135   : > { %v2251_v59 = vpack.c.bf16 %v1861_v15, %v1860_v54  ;;  %v1876_v17 = vsel %vm1871_vm10, %v1861_v15, 0.0 }
 0x136   : > { %v1878_v33 = vadd.f32 %v1876_v17, %v1875_v13  ;;  %v1888_v18 = vmul.f32 %v1876_v17, %v1876_v17 }
 0x137   : > { %2252 = vst [vmem:[%s296_s8] sm:$0xff] %v2251_v59  }
 0x138   : > { %v1879_v22 = vadd.f32 %v1878_v33, %v1877_v5  ;;  %v1890_v23 = vadd.f32 %v1888_v18, %v1887_v7 }
 0x13a   : > { %v1880_v58 = vrot.slane %v1879_v22, 4  ;;  %v1891_v16 = vadd.f32 %v1890_v23, %v1889_v19 }
 0x13c   : > { %v1881_v24 = vadd.f32 %v1880_v58, %v1879_v22  ;;  %v1892_v25 = vrot.slane %v1891_v16, 4 }
 0x13e   : > { %v1882_v26 = vrot.slane %v1881_v24, 2  ;;  %v1893_v20 = vadd.f32 %v1892_v25, %v1891_v16 }
 0x140   : > { %v1883_v14 = vadd.f32 %v1882_v26, %v1881_v24  ;;  %v1894_v21 = vrot.slane %v1893_v20, 2 }
 0x142   : > { %v1884_v27 = vrot.slane %v1883_v14, 1  ;;  %v1895_v63 = vadd.f32 %v1894_v21, %v1893_v20 }
 0x144   : > { %v1885_v29 = vadd.f32 %v1884_v27, %v1883_v14  ;;  %v1896_v30 = vrot.slane %v1895_v63, 1 }
 0x146   : > { %1886 = vst [vmem:[%s302_s12] sm:$0x1] %v1885_v29  ;;  %v1897_v31 = vadd.f32 %v1896_v30, %v1895_v63 }
 0x148   : > { %1898 = vst [vmem:[%s308_s14] sm:$0x1] %v1897_v31 }
 0x149 PF: > { %s16_s20 = sadd.s32 1, %s2533_s20   ;;  %s2943_s18 = smov %s2529_s19 }
 0x14a   : > { %p13_p5 = scmp.ge.s32.totalorder %s16_s20, 4   ;;  %s2944_s19 = smov %s2946_s21 }
 0x14c   :  { %15 = sbr.rel (!%p13_p5) target bundleno = 2 (0x2), region = 107 }

// kernel: _lambda_.15
= control target key start
LH: loop header
LB: loop body
LE: loop exit
PB: predicated region body
PF: predicated region fallthrough
CT: control target
= control target key end

     0   :  { %11 = vsyncpa [#allocation4], 0  ;;  %s3507_s0 = inlined_call_operand.vmem [shape: bf16[2,5,11,64], index: 0, kind: input, shape index: {}]   ;;  %s3508_s1 = inlined_call_operand.vmem [shape: bf16[4,4,64,128], index: 1, kind: input, shape index: {}]   ;;  %s3509_s2 = inlined_call_operand.vmem [shape: f32[1,128], index: 2, kind: input, shape index: {}]   ;;  %s3510_s3 = inlined_call_operand.vmem [shape: f32[2,2,8,128], index: 3, kind: output, shape index: {0}]   ;;  %s3511_s4 = inlined_call_operand.hbm [shape: f32[2,1,128], index: 4, kind: output, shape index: {1}]   ;;  %s3512_s5 = inlined_call_operand.hbm [shape: f32[2,1,128], index: 5, kind: output, shape index: {2}]  }
   0x1   :  { %13 = vsyncpa [#allocation4 + $0x1], 0 }
   0x2   :  { %14 = vsyncpa [#allocation6], 0 }
   0x3   :  { %16 = vsyncpa [#allocation6 + $0x1], 0  ;;  %s2859_s18 = smov 0   ;;  %s2861_s19 = smov 0  }
   0x4   :  { %s2863_s20 = smov 0   ;;  %s2865_s21 = smov 0  }
   0x5   :  { %s2867_s22 = smov 0   ;;  %s2869_s23 = smov 0  }
   0x6 LB: > { %s2073_s24 = sadd.s32 4294967295, %s2823_s23   ;;  %s2074_s25 = sadd.s32 4294967294, %s2823_s23   ;;  %s2823_s23 = sphi %s2869_s23, %s22_s23   ;;  %s2819_s22 = sphi %s2867_s22, %s3525_s22   ;;  %s2815_s21 = sphi %s2865_s21, %s3524_s21   ;;  %s2811_s20 = sphi %s2863_s20, %s3523_s20   ;;  %s2807_s19 = sphi %s2861_s19, %s3522_s19   ;;  %s2803_s18 = sphi %s2859_s18, %s3521_s18  }
   0x7   : > { %s34_s26 = sadd.s32 1, %s2819_s22  ;;  %s149_s27 = sadd.s32 1, %s2811_s20 }
   0x8   : > { %p36_p0 = scmp.ge.s32.totalorder %s34_s26, 2  ;;  %p159_p1 = scmp.ne.s32.totalorder %s2811_s20, %s2807_s19 }
   0x9   : > { %p160_p2 = scmp.eq.s32.totalorder %s2073_s24, 1  ;;  %p165_p3 = scmp.ne.s32.totalorder %s2807_s19, %s2803_s18 }
   0xa   : > { %s3527_s26 = smov (%p36_p0, %s34_s26), 0  ;;  %p166_p5 = scmp.eq.s32.totalorder %s2074_s25, 1 }
   0xb   : > { %p2899_p4 = por %p160_p2, %p159_p1  ;;  %s144_s29 = ssub.s32 %s2819_s22, %s3527_s26 }
   0xc   : > { %p2079_p6 = scmp.ge.s32.totalorder %s2823_s23, 1  ;;  %p147_p7 = scmp.eq.s32.totalorder %s144_s29, 0 }
   0xd   : > { %p2906_p8 = por %p166_p5, %p165_p3  ;;  %p233_p9 = scmp.lt.s32.totalorder %s2823_s23, 3 }
   0xe   : > { %s2912_s6 = scalar_select %p147_p7, %s2811_s20, %s149_s27  }
   0xf   : > { %p234_p10 = pnand %p2079_p6, %p233_p9 }
  0x10   : > { %v2645_v0 = vld [vmem:[%s3508_s1] sm:$0xff] (!%p234_p10)   ;;  %v2825_v1 = vmov (!%p234_p10), 0.0   ;;  %v2647_v3 = vld [vmem:[%s3508_s1 + $0x8] sm:$0xff] (!%p234_p10)   ;;  %vm2826_vm0 = vmmov (!%p234_p10), 0   ;;  %p279_p11 = scmp.lt.s32.totalorder (!%p234_p10), %s2815_s21, 1  ;;  %v2649_v5 = vld [vmem:[%s3508_s1 + $0x10] sm:$0xff] (!%p234_p10)  }
  0x11   : > { %237 = sbr.rel (%p234_p10) target bundleno = 424 (0x1a8), region = 32  ;;  %2390 = vmatprep.subr.bf16.mxu0 (!%p234_p10), %v2825_v1  ;;  %2402 = vmatprep.subr.bf16.mxu1 (!%p234_p10), %v2825_v1  ;;  %v2646_v2 = vld [vmem:[%s3508_s1 + $0x20] sm:$0xff] (!%p234_p10)   ;;  %v2648_v4 = vld [vmem:[%s3508_s1 + $0x28] sm:$0xff] (!%p234_p10)   ;;  %v2650_v6 = vld [vmem:[%s3508_s1 + $0x30] sm:$0xff] (!%p234_p10)   ;;  %vm400_vm1 = vsmask.f32 (!%p234_p10), 3328 }
  0x12   : > { %2391 = vmatpush3.bf16.msra.mxu0 (!%p234_p10), %v2645_v0  ;;  %2398 = vmatprep.mubr.msk.bf16.mxu0 (!%p234_p10), %vm2826_vm0, %v2825_v1  ;;  %v2651_v7 = vld [vmem:[%s3508_s1 + $0x18] sm:$0xff] (!%p234_p10)   ;;  %vm401_vm2 = vsmask.f32 (!%p234_p10), 7440  ;;  %vm351_vm3 = vcmask (!%p234_p10), 523264   ;;  %v2654_v24 = vld [vmem:[%s3508_s1 + $0x40] sm:$0xff] (!%p234_p10)   ;;  %vm519_vm4 = vcmask (!%p234_p10), 1042432  }
  0x13   : > { %2403 = vmatpush3.bf16.msra.mxu1 (!%p234_p10), %v2646_v2  ;;  %2392 = vmatprep.subr.bf16.mxu0 (!%p234_p10), %v2825_v1  ;;  %v2652_v14 = vld [vmem:[%s3508_s1 + $0x38] sm:$0xff] (!%p234_p10)   ;;  %vm2993_vm5 = vmor (!%p234_p10), %vm400_vm1, %vm401_vm2  ;;  %vm520_vm6 = vcmask (!%p234_p10), 1046532   ;;  %v2656_v38 = vld [vmem:[%s3508_s1 + $0x48] sm:$0xff] (!%p234_p10)   ;;  %vm616_vm8 = vsmask.f32 (!%p234_p10), 2304  ;;  %s2305_s9 = sshll.u32 (!%p234_p10), %s2815_s21, 4 }
  0x14   : > { %2404 = vmatprep.subr.bf16.mxu1 (!%p234_p10), %v2825_v1  ;;  %2410 = vmatprep.mubr.msk.bf16.mxu1 (!%p234_p10), %vm2826_vm0, %v2825_v1  ;;  %v2655_v43 = vld [vmem:[%s3508_s1 + $0x60] sm:$0xff] (!%p234_p10)   ;;  %v2658_v50 = vld [vmem:[%s3508_s1 + $0x50] sm:$0xff] (!%p234_p10)   ;;  %vm3032_vm7 = vmor (!%p234_p10), %vm519_vm4, %vm520_vm6  ;;  %vm617_vm9 = vsmask.f32 (!%p234_p10), 6416  ;;  %s2827_s29 = smov (!%p234_p10), [#allocation3]  }
  0x15   : > { %v2657_v62 = vld [vmem:[%s3508_s1 + $0x68] sm:$0xff] (!%p234_p10)   ;;  %vm3073_vm10 = vmor (!%p234_p10), %vm616_vm8, %vm617_vm9  ;;  %v2688_v29 = vld [vmem:[%s3508_s1 + $0x140] sm:$0xff] (!%p234_p10)  }
  0x16   : > { %2393 = vmatpush3.bf16.msra.mxu0 (!%p234_p10), %v2647_v3  ;;  %v2660_v3 = vld [vmem:[%s3508_s1 + $0x58] sm:$0xff] (!%p234_p10)  }
  0x17   : > { %2405 = vmatpush3.bf16.msra.mxu1 (!%p234_p10), %v2648_v4  ;;  %2394 = vmatprep.subr.bf16.mxu0 (!%p234_p10), %v2825_v1 }
  0x18   : > { %s2934_s15 = scalar_select %p279_p11, %s2815_s21, 1  ;;  %2406 = vmatprep.subr.bf16.mxu1 %v2825_v1 }
  0x1a   : > { %s2582_s24 = smul.u32 40, %s2934_s15  ;;  %2395 = vmatpush3.bf16.msra.mxu0 %v2649_v5  ;;  %s2309_s17 = sshll.u32 %s2934_s15, 4 }
  0x1b   : > { %2407 = vmatpush3.bf16.msra.mxu1 %v2650_v6  ;;  %2396 = vmatprep.subr.bf16.mxu0 %v2825_v1  ;;  %s298_s7 = scalar_lea.vmem %s3510_s3, %s2309_s17  ;;  %s3418_s15 = sand.u32 1, %s2807_s19  }
  0x1c   : > { %s2950_s8 = scalar_lea.vmem %s3507_s0, %s2582_s24  ;;  %2408 = vmatprep.subr.bf16.mxu1 %v2825_v1  ;;  %s272_s10 = scalar_lea.vmem [#allocation3], %s3418_s15 }
  0x1d   : > { %v2956_v8 = vld [vmem:[%s2950_s8] sm:$0xf]  ;;  %v2959_v9 = vld [vmem:[%s2950_s8 + $0x8] sm:$0xf]  ;;  %v2964_v12 = vld [vmem:[%s2950_s8 + $0x4] sm:$0x3]  ;;  %s3435_s24 = scalar_lea.hbm %s3512_s5, %s2305_s9 }
  0x1e   : > { %v404_v10 = vshrl.u32 %v2956_v8, 16  ;;  %v407_v11 = vshll.u32 %v2956_v8, 16  ;;  %v2967_v13 = vld [vmem:[%s2950_s8 + $0xc] sm:$0x3]  ;;  %v2083_v15 = vcombine.low %v2956_v8, %v2959_v9  ;;  %v413_v18 = vshll.u32 %v2964_v12, 16  ;;  %2397 = vmatpush3.bf16.msra.mxu0 %v2651_v7  ;;  %s1903_s11 = sshll.u32 %s272_s10, 4  ;;  %s3430_s11 = int_to_ptr.vmem [resolvable:$true] %s1903_s11 }
  0x1f   : > { %v418_v19 = vshrl.u32 %v2959_v9, 16  ;;  %v421_v20 = vshll.u32 %v2959_v9, 16  ;;  %v427_v21 = vshll.u32 %v2967_v13, 16  ;;  %v2981_v22 = vld [vmem:[%s2950_s8 + $0x18] sm:$0xf]  ;;  %2409 = vmatpush3.bf16.msra.mxu1 %v2652_v14  ;;  %2414 = vmatprep.subr.bf16.mxu0 %v2825_v1  ;;  %v2103_v31 = vrot.slane %v2956_v8, 9 }
  0x20   : > { %v406_v16 = vrot.slane %v404_v10, 4  ;;  %v409_v17 = vrot.slane %v407_v11, 5  ;;  %v415_v25 = vrot.slane %v413_v18, 5  ;;  %2426 = vmatprep.subr.bf16.mxu1 %v2825_v1  ;;  %v2989_v28 = vld [vmem:[%s2950_s8 + $0x1c] sm:$0x3]  ;;  %v619_v32 = vrot.slane %v404_v10, 5 }
  0x21   : > { %v420_v26 = vrot.slane %v418_v19, 4  ;;  %v423_v27 = vrot.slane %v421_v20, 5  ;;  %2399 = vmatmul.mubr.msk.bf16.vlgmr.msra.gmra.mrb[0].mxu0 %vm351_vm3, %v2083_v15  ;;  %v429_v34 = vrot.slane %v427_v21, 5  ;;  %v620_v35 = vrot.slane %v407_v11, 6  ;;  %v3046_v0 = vld [vmem:[%s2950_s8 + $0x10] sm:$0xf] }
  0x22   : > { %v410_v23 = vor.u32 %v409_v17, %v406_v16  ;;  %v1182_v36 = vshrl.u32 %v2981_v22, 16  ;;  %v1185_v37 = vshll.u32 %v2981_v22, 16  ;;  %2415 = vmatpush3.bf16.msra.mxu0 %v2654_v24  ;;  %2422 = vmatprep.mubr.msk.bf16.mxu0 %vm2826_vm0, %v2825_v1  ;;  %v623_v41 = vshrl.u32 %v2964_v12, 16  ;;  %v2659_v8 = vld [vmem:[%s3508_s1 + $0x70] sm:$0xff]   ;;  %v2662_v15 = vld [vmem:[%s3508_s1 + $0x80] sm:$0xff]   ;;  %s278_s12 = scalar_lea.vmem [#allocation5], %s3418_s15 }
  0x23   : > { %v424_v33 = vor.u32 %v423_v27, %v420_v26  ;;  %v1191_v42 = vshll.u32 %v2989_v28, 16  ;;  %2416 = vmatprep.subr.bf16.mxu0 %v2825_v1  ;;  %v629_v44 = vrot.slane %v418_v19, 5  ;;  %v630_v45 = vrot.slane %v421_v20, 6  ;;  %v2661_v19 = vld [vmem:[%s3508_s1 + $0x78] sm:$0xff]   ;;  %s1917_s13 = sshll.u32 %s278_s12, 4  ;;  %s1883_s25 = scalar_lea.sflag [#allocation4], %s3418_s15  ;;  %s3437_s13 = int_to_ptr.vmem [resolvable:$true] %s1917_s13 }
  0x24   : > { %v411_v30 = vrot.slane %v410_v23, 4  ;;  %v1184_v46 = vrot.slane %v1182_v36, 4  ;;  %v1187_v47 = vrot.slane %v1185_v37, 5  ;;  %v626_v53 = vrot.slane %v413_v18, 6  ;;  %v2664_v23 = vld [vmem:[%s3508_s1 + $0x88] sm:$0xff]   ;;  %s2713_s27 = scalar_lea.vmem %s3430_s11, 16 }
  0x25   : > { %v425_v40 = vrot.slane %v424_v33, 4  ;;  %v1193_v49 = vrot.slane %v1191_v42, 5  ;;  %v633_v54 = vshrl.u32 %v2967_v13, 16  ;;  %v621_v56 = vor.u32 %v620_v35, %v619_v32  ;;  %v2663_v32 = vld [vmem:[%s3508_s1 + $0xa0] sm:$0xff]   ;;  %p2714_p12 = scmp.ne.s32.totalorder %s3430_s11, %s2713_s27 }
  0x26   : > { %v416_v39 = vsel %vm2993_vm5, %v411_v30, %v415_v25  ;;  %v1188_v52 = vor.u32 %v1187_v47, %v1184_v46  ;;  %2417 = vmatpush3.bf16.msra.mxu0 %v2656_v38  ;;  %v524_v58 = vrot.slane %v2964_v12, 5  ;;  %v2104_v59 = vrot.slane %v2959_v9, 9  ;;  %v3096_v25 = vld [vmem:[%s2950_s8 + $0x14] sm:$0x3] }
  0x27   : > { %v3020_v48 = vsel %vm2993_vm5, %v425_v40, %v429_v34  ;;  %2418 = vmatprep.subr.bf16.mxu0 %v2825_v1  ;;  %v528_v60 = vrot.slane %v2967_v13, 5  ;;  %v636_v61 = vrot.slane %v427_v21, 6  ;;  %v631_v63 = vor.u32 %v630_v45, %v629_v44  ;;  %v2666_v34 = vld [vmem:[%s3508_s1 + $0x90] sm:$0xff]   ;;  %v2665_v44 = vld [vmem:[%s3508_s1 + $0xa8] sm:$0xff]   ;;  %v2668_v45 = vld [vmem:[%s3508_s1 + $0x98] sm:$0xff]   ;;  %p2715_p13 = pnand %p2714_p12, %p2899_p4 }
  0x28   : > { %v2097_v51 = vcombine.low %v416_v39, %v3020_v48  ;;  %v1189_v57 = vrot.slane %v1188_v52, 4  ;;  %v525_v4 = vsel %vm3032_vm7, %v2103_v31, %v524_v58  ;;  %v625_v5 = vrot.slane %v623_v41, 5  ;;  %v2671_v52 = vld [vmem:[%s3508_s1 + $0xc0] sm:$0xff]  }
  0x29   : > { %v3061_v6 = vsel %vm3032_vm7, %v2104_v59, %v528_v60  ;;  %v635_v7 = vrot.slane %v633_v54, 5  ;;  %v622_v10 = vrot.slane %v621_v56, 4  ;;  %v632_v13 = vrot.slane %v631_v63, 4  ;;  %v2673_v54 = vld [vmem:[%s3508_s1 + $0xc8] sm:$0xff]   ;;  %v2672_v60 = vld [vmem:[%s3508_s1 + $0xe0] sm:$0xff]   ;;  %p2716_p0 = pneg %p2715_p13 }
  0x2a   : > { %2411 = vmatmul.mubr.msk.bf16.vlgmr.msra.gmra.mrb[0].mxu1 %vm351_vm3, %v2097_v51  ;;  %v3050_v2 = vsel %vm2993_vm5, %v1189_v57, %v1193_v49  ;;  %2419 = vmatpush3.bf16.msra.mxu0 %v2658_v50  ;;  %v2113_v11 = vcombine.low %v525_v4, %v3061_v6  ;;  %v627_v12 = vor.u32 %v626_v53, %v625_v5  ;;  %v812_v17 = vshrl.u32 %v3046_v0, 16  ;;  %v2667_v49 = vld [vmem:[%s3508_s1 + $0xb0] sm:$0xff]  }
  0x2b   : > { %2427 = vmatpush3.bf16.msra.mxu1 %v2655_v43  ;;  %2434 = vmatprep.mubr.msk.bf16.mxu1 %vm2826_vm0, %v2825_v1  ;;  %v637_v14 = vor.u32 %v636_v61, %v635_v7  ;;  %v815_v18 = vshll.u32 %v3046_v0, 16  ;;  %v2218_v24 = vrot.slane %v2981_v22, 9  ;;  %v1283_v31 = vrot.slane %v2989_v28, 5  ;;  %v2677_v7 = vld [vmem:[%s3508_s1 + $0xd8] sm:$0xff]  }
  0x2c   : > { %2428 = vmatprep.subr.bf16.mxu1 %v2825_v1  ;;  %2420 = vmatprep.subr.bf16.mxu0 %v2825_v1  ;;  %v628_v20 = vsel %vm3073_vm10, %v622_v10, %v627_v12  ;;  %v814_v26 = vrot.slane %v812_v17, 4  ;;  %v1370_v33 = vrot.slane %v1182_v36, 5  ;;  %v1371_v38 = vrot.slane %v1185_v37, 6  ;;  %v2676_v10 = vld [vmem:[%s3508_s1 + $0xf0] sm:$0xff]  }
  0x2d   : > { %v3088_v21 = vsel %vm3073_vm10, %v632_v13, %v637_v14  ;;  %v817_v27 = vrot.slane %v815_v18, 5  ;;  %v3118_v35 = vsel %vm3032_vm7, %v2218_v24, %v1283_v31  ;;  %v1374_v39 = vshrl.u32 %v2989_v28, 16  ;;  %v2679_v14 = vld [vmem:[%s3508_s1 + $0x100] sm:$0xff]  }
  0x2e   : > { %2421 = vmatpush3.bf16.msra.mxu0 %v2660_v3  ;;  %v2127_v30 = vcombine.low %v628_v20, %v3088_v21  ;;  %v821_v36 = vshll.u32 %v3096_v25, 16  ;;  %v1372_v40 = vor.u32 %v1371_v38, %v1370_v33  ;;  %v1377_v41 = vrot.slane %v1191_v42, 6  ;;  %v2674_v3 = vld [vmem:[%s3508_s1 + $0xe8] sm:$0xff]  }
  0x2f   : > { %2429 = vmatpush3.bf16.msra.mxu1 %v2657_v62  ;;  %2438 = vmatprep.subr.bf16.mxu0 %v2825_v1  ;;  %v818_v43 = vor.u32 %v817_v27, %v814_v26  ;;  %v1376_v37 = vrot.slane %v1374_v39, 5  ;;  %v2141_v50 = vcombine.low %v2959_v9, %v3046_v0  ;;  %v2669_v9 = vld [vmem:[%s3508_s1 + $0xb8] sm:$0xff]   ;;  %v2161_v56 = vrot.slane %v3046_v0, 9  ;;  %v2680_v26 = vld [vmem:[%s3508_s1 + $0x120] sm:$0xff]   ;;  %v2683_v27 = vld [vmem:[%s3508_s1 + $0x110] sm:$0xff]  }
  0x30   : > { %2430 = vmatprep.subr.bf16.mxu1 %v2825_v1  ;;  %v1373_v46 = vrot.slane %v1372_v40, 4  ;;  %v823_v42 = vrot.slane %v821_v36, 5  ;;  %v1000_v58 = vrot.slane %v812_v17, 5  ;;  %v1001_v59 = vrot.slane %v815_v18, 6  ;;  %v2681_v17 = vld [vmem:[%s3508_s1 + $0x108] sm:$0xff]  }
  0x31   : > { %2423 = vmatmul.mubr.msk.bf16.vlgmr.msra.gmra.mrb[4].mxu0 %vm351_vm3, %v2113_v11  ;;  %v1378_v28 = vor.u32 %v1377_v41, %v1376_v37  ;;  %v819_v47 = vrot.slane %v818_v43, 4  ;;  %v1004_v61 = vshrl.u32 %v3096_v25, 16  ;;  %v913_v62 = vrot.slane %v3096_v25, 5  ;;  %v3222_v18 = vld [vmem:[%s2950_s8 + $0x20] sm:$0xf]  ;;  %v2682_v39 = vld [vmem:[%s3508_s1 + $0x128] sm:$0xff]  }
  0x32   : > { %2439 = vmatpush3.bf16.msra.mxu0 %v2662_v15  ;;  %2446 = vmatprep.mubr.msk.bf16.mxu0 %vm2826_vm0, %v2825_v1  ;;  %v1007_v63 = vrot.slane %v821_v36, 6  ;;  %v1002_v4 = vor.u32 %v1001_v59, %v1000_v58  ;;  %v2678_v15 = vld [vmem:[%s3508_s1 + $0xf8] sm:$0xff]   ;;  %v1552_v20 = vshrl.u32 %v3222_v18, 16  ;;  %v2692_v58 = vld [vmem:[%s3508_s1 + $0x150] sm:$0xff]  }
  0x33   : > { %2431 = vmatpush3.bf16.msra.mxu1 %v2659_v8  ;;  %2440 = vmatprep.subr.bf16.mxu0 %v2825_v1  ;;  %v3145_v51 = vsel %vm3073_vm10, %v1373_v46, %v1378_v28  ;;  %v3154_v53 = vsel %vm2993_vm5, %v819_v47, %v823_v42  ;;  %v1006_v5 = vrot.slane %v1004_v61, 5  ;;  %v3196_v8 = vsel %vm3032_vm7, %v2161_v56, %v913_v62  ;;  %v2685_v41 = vld [vmem:[%s3508_s1 + $0x118] sm:$0xff]   ;;  %v2684_v42 = vld [vmem:[%s3508_s1 + $0x130] sm:$0xff]   ;;  %v2696_v61 = vld [vmem:[%s3508_s1 + $0x180] sm:$0xff]  }
  0x34   : > { %2432 = vmatprep.subr.bf16.mxu1 %v2825_v1  ;;  %v2155_v57 = vcombine.low %v3020_v48, %v3154_v53  ;;  %v2675_v48 = vld [vmem:[%s3508_s1 + $0xd0] sm:$0xff]   ;;  %v2170_v11 = vcombine.low %v3061_v6, %v3196_v8  ;;  %v1003_v12 = vrot.slane %v1002_v4, 4  ;;  %v1740_v38 = vrot.slane %v1552_v20, 5  ;;  %v2698_v62 = vld [vmem:[%s3508_s1 + $0x188] sm:$0xff]  }
  0x35   : > { %v1008_v13 = vor.u32 %v1007_v63, %v1006_v5  ;;  %v2198_v47 = vcombine.low %v3046_v0, %v2981_v22  ;;  %v2212_v16 = vcombine.low %v3154_v53, %v3050_v2  ;;  %v2694_v53 = vld [vmem:[%s3508_s1 + $0x158] sm:$0xff]   ;;  %v2693_v59 = vld [vmem:[%s3508_s1 + $0x170] sm:$0xff]   ;;  %v2699_v5 = vld [vmem:[%s3508_s1 + $0x1a8] sm:$0xff]  }
  0x36   : > { %2441 = vmatpush3.bf16.msra.mxu0 %v2664_v23  ;;  %v1555_v23 = vshll.u32 %v3222_v18, 16  ;;  %v2700_v4 = vld [vmem:[%s3508_s1 + $0x190] sm:$0xff]  }
  0x37   : > { %2433 = vmatpush3.bf16.msra.mxu1 %v2661_v19  ;;  %2442 = vmatprep.subr.bf16.mxu0 %v2825_v1  ;;  %v3215_v6 = vsel %vm3073_vm10, %v1003_v12, %v1008_v13  ;;  %v311_v19 = vld [vmem:[%s2950_s8 + $0x24] sm:$0x3]  ;;  %v2703_v12 = vld [vmem:[%s3508_s1 + $0x1b8] sm:$0xff]   ;;  %s3428_s8 = scalar_lea.hbm %s3511_s4, %s2305_s9 }
  0x38   : > { %2450 = vmatprep.subr.bf16.mxu1 %v2825_v1  ;;  %v1561_v24 = vshll.u32 %v311_v19, 16  ;;  %v2184_v25 = vcombine.low %v3088_v21, %v3215_v6  ;;  %v1557_v31 = vrot.slane %v1555_v23, 5  ;;  %v2241_v63 = vcombine.low %v3215_v6, %v3145_v51  ;;  %v2706_v13 = vld [vmem:[%s3508_s1 + $0x1e0] sm:$0xff]   ;;  %v2711_v6 = vld [vmem:[%s3508_s1 + $0x1d8] sm:$0xff]  }
  0x3a   : > { %2435 = vmatmul.mubr.msk.bf16.vlgmr.msra.gmra.mrb[4].mxu1 %vm351_vm3, %v2127_v30  ;;  %2443 = vmatpush3.bf16.msra.mxu0 %v2666_v34  ;;  %v1554_v30 = vrot.slane %v1552_v20, 4  ;;  %v1563_v21 = vrot.slane %v1561_v24, 5  ;;  %v1653_v34 = vrot.slane %v311_v19, 5  ;;  %v1747_v55 = vrot.slane %v1561_v24, 6 }
  0x3b   : > { %2451 = vmatpush3.bf16.msra.mxu1 %v2663_v32  ;;  %2458 = vmatprep.mubr.msk.bf16.mxu1 %vm2826_vm0, %v2825_v1  ;;  %v2275_v32 = vrot.slane %v3222_v18, 9 }
  0x3c   : > { %2452 = vmatprep.subr.bf16.mxu1 %v2825_v1  ;;  %2444 = vmatprep.subr.bf16.mxu0 %v2825_v1  ;;  %v1558_v33 = vor.u32 %v1557_v31, %v1554_v30 }
  0x3d   : > { %v3249_v40 = vsel %vm3032_vm7, %v2275_v32, %v1653_v34 }
  0x3e   : > { %2445 = vmatpush3.bf16.msra.mxu0 %v2668_v45  ;;  %v1559_v36 = vrot.slane %v1558_v33, 4  ;;  %v2284_v43 = vcombine.low %v3118_v35, %v3249_v40  ;;  %v1744_v45 = vshrl.u32 %v311_v19, 16 }
  0x3f   : > { %2453 = vmatpush3.bf16.msra.mxu1 %v2665_v44  ;;  %2462 = vmatprep.subr.bf16.mxu0 %v2825_v1  ;;  %v1741_v44 = vrot.slane %v1555_v23, 6 }
  0x40   : > { %2454 = vmatprep.subr.bf16.mxu1 %v2825_v1  ;;  %v1564_v37 = vsel %vm2993_vm5, %v1559_v36, %v1563_v21 }
  0x41   : > { %2447 = vmatmul.mubr.msk.bf16.vlgmr.msra.gmra.mrb[8].mxu0 %vm351_vm3, %v2141_v50  ;;  %v3261_v46 = vcombine.low %v3050_v2, %v1564_v37  ;;  %v1742_v28 = vor.u32 %v1741_v44, %v1740_v38  ;;  %v2691_v2 = vld [vmem:[%s3508_s1 + $0x168] sm:$0xff]  }
  0x42   : > { %2463 = vmatpush3.bf16.msra.mxu0 %v2671_v52  ;;  %2470 = vmatprep.mubr.msk.bf16.mxu0 %vm2826_vm0, %v2825_v1 }
  0x43   : > { %2455 = vmatpush3.bf16.msra.mxu1 %v2667_v49  ;;  %2464 = vmatprep.subr.bf16.mxu0 %v2825_v1  ;;  %v1746_v49 = vrot.slane %v1744_v45, 5  ;;  %v1743_v50 = vrot.slane %v1742_v28, 4 }
  0x44   : > { %2456 = vmatprep.subr.bf16.mxu1 %v2825_v1 }
  0x45   : > { %v1748_v52 = vor.u32 %v1747_v55, %v1746_v49 }
  0x46   : > { %2465 = vmatpush3.bf16.msra.mxu0 %v2673_v54  ;;  %v2690_v54 = vld [vmem:[%s3508_s1 + $0x148] sm:$0xff]  }
  0x47   : > { %2457 = vmatpush3.bf16.msra.mxu1 %v2669_v9  ;;  %2466 = vmatprep.subr.bf16.mxu0 %v2825_v1  ;;  %v2686_v9 = vld [vmem:[%s3508_s1 + $0x138] sm:$0xff]   ;;  %v3279_v0 = vsel %vm3073_vm10, %v1743_v50, %v1748_v52 }
  0x48   : > { %2474 = vmatprep.subr.bf16.mxu1 %v2825_v1  ;;  %v2298_v56 = vcombine.low %v3145_v51, %v3279_v0 }
  0x4a   : > { %2459 = vmatmul.mubr.msk.bf16.vlgmr.msra.gmra.mrb[8].mxu1 %vm351_vm3, %v2155_v57  ;;  %2467 = vmatpush3.bf16.msra.mxu0 %v2675_v48  ;;  %v2689_v57 = vld [vmem:[%s3508_s1 + $0x160] sm:$0xff]   ;;  %v2695_v48 = vld [vmem:[%s3508_s1 + $0x178] sm:$0xff]  }
  0x4b   : > { %2475 = vmatpush3.bf16.msra.mxu1 %v2672_v60  ;;  %2482 = vmatprep.mubr.msk.bf16.mxu1 %vm2826_vm0, %v2825_v1  ;;  %v2227_v60 = vcombine.low %v3196_v8, %v3118_v35  ;;  %v2701_v8 = vld [vmem:[%s3508_s1 + $0x1b0] sm:$0xff]  }
  0x4c   : > { %2476 = vmatprep.subr.bf16.mxu1 %v2825_v1  ;;  %2468 = vmatprep.subr.bf16.mxu0 %v2825_v1 }
  0x4e   : > { %2469 = vmatpush3.bf16.msra.mxu0 %v2677_v7  ;;  %v2702_v7 = vld [vmem:[%s3508_s1 + $0x198] sm:$0xff]  }
  0x4f   : > { %2477 = vmatpush3.bf16.msra.mxu1 %v2674_v3  ;;  %2486 = vmatprep.subr.bf16.mxu0 %v2825_v1  ;;  %v2697_v3 = vld [vmem:[%s3508_s1 + $0x1a0] sm:$0xff]  }
  0x50   : > { %2478 = vmatprep.subr.bf16.mxu1 %v2825_v1 }
  0x51   : > { %2471 = vmatmul.mubr.msk.bf16.vlgmr.msra.gmra.mrb[12].mxu0 %vm351_vm3, %v2170_v11  ;;  %v2705_v11 = vld [vmem:[%s3508_s1 + $0x1c0] sm:$0xff]  }
  0x52   : > { %2487 = vmatpush3.bf16.msra.mxu0 %v2679_v14  ;;  %2494 = vmatprep.mubr.msk.bf16.mxu0 %vm2826_vm0, %v2825_v1  ;;  %v2709_v14 = vld [vmem:[%s3508_s1 + $0x1d0] sm:$0xff]  }
  0x53   : > { %2479 = vmatpush3.bf16.msra.mxu1 %v2676_v10  ;;  %2488 = vmatprep.subr.bf16.mxu0 %v2825_v1  ;;  %v2255_v10 = vcombine.low %v2981_v22, %v3222_v18  ;;  %v2707_v22 = vld [vmem:[%s3508_s1 + $0x1c8] sm:$0xff]   ;;  %v2712_v18 = vld [vmem:[%s3508_s1 + $0x1f8] sm:$0xff]  }
  0x54   : > { %2480 = vmatprep.subr.bf16.mxu1 %v2825_v1 }
  0x56   : > { %2489 = vmatpush3.bf16.msra.mxu0 %v2681_v17  ;;  %v2710_v17 = vld [vmem:[%s3508_s1 + $0x1f0] sm:$0xff]  }
  0x57   : > { %2481 = vmatpush3.bf16.msra.mxu1 %v2678_v15  ;;  %2490 = vmatprep.subr.bf16.mxu0 %v2825_v1  ;;  %v2708_v15 = vld [vmem:[%s3508_s1 + $0x1e8] sm:$0xff]  }
  0x58   : > { %2498 = vmatprep.subr.bf16.mxu1 %v2825_v1 }
  0x5a   : > { %2483 = vmatmul.mubr.msk.bf16.vlgmr.msra.gmra.mrb[12].mxu1 %vm351_vm3, %v2184_v25  ;;  %2491 = vmatpush3.bf16.msra.mxu0 %v2683_v27 }
  0x5b   : > { %2499 = vmatpush3.bf16.msra.mxu1 %v2680_v26  ;;  %2506 = vmatprep.mubr.msk.bf16.mxu1 %vm2826_vm0, %v2825_v1 }
  0x5c   : > { %2500 = vmatprep.subr.bf16.mxu1 %v2825_v1  ;;  %2492 = vmatprep.subr.bf16.mxu0 %v2825_v1 }
  0x5e   : > { %2493 = vmatpush3.bf16.msra.mxu0 %v2685_v41 }
  0x5f   : > { %2501 = vmatpush3.bf16.msra.mxu1 %v2682_v39  ;;  %2510 = vmatprep.subr.bf16.mxu0 %v2825_v1 }
  0x60   : > { %2502 = vmatprep.subr.bf16.mxu1 %v2825_v1 }
  0x61   : > { %2495 = vmatmul.mubr.msk.bf16.vlgmr.msra.gmra.mrb[16].mxu0 %vm351_vm3, %v2198_v47 }
  0x62   : > { %2511 = vmatpush3.bf16.msra.mxu0 %v2688_v29  ;;  %2518 = vmatprep.mubr.msk.bf16.mxu0 %vm2826_vm0, %v2825_v1 }
  0x63   : > { %2503 = vmatpush3.bf16.msra.mxu1 %v2684_v42  ;;  %2512 = vmatprep.subr.bf16.mxu0 %v2825_v1 }
  0x64   : > { %2504 = vmatprep.subr.bf16.mxu1 %v2825_v1 }
  0x66   : > { %2513 = vmatpush3.bf16.msra.mxu0 %v2690_v54 }
  0x67   : > { %2505 = vmatpush3.bf16.msra.mxu1 %v2686_v9  ;;  %2514 = vmatprep.subr.bf16.mxu0 %v2825_v1 }
  0x68   : > { %2522 = vmatprep.subr.bf16.mxu1 %v2825_v1 }
  0x6a   : > { %2507 = vmatmul.mubr.msk.bf16.vlgmr.msra.gmra.mrb[16].mxu1 %vm351_vm3, %v2212_v16  ;;  %2515 = vmatpush3.bf16.msra.mxu0 %v2692_v58 }
  0x6b   : > { %2523 = vmatpush3.bf16.msra.mxu1 %v2689_v57  ;;  %2530 = vmatprep.mubr.msk.bf16.mxu1 %vm2826_vm0, %v2825_v1 }
  0x6c   : > { %2524 = vmatprep.subr.bf16.mxu1 %v2825_v1  ;;  %2516 = vmatprep.subr.bf16.mxu0 %v2825_v1 }
  0x6e   : > { %2517 = vmatpush3.bf16.msra.mxu0 %v2694_v53 }
  0x6f   : > { %2525 = vmatpush3.bf16.msra.mxu1 %v2691_v2  ;;  %2534 = vmatprep.subr.bf16.mxu0 %v2825_v1 }
  0x70   : > { %2526 = vmatprep.subr.bf16.mxu1 %v2825_v1 }
  0x71   : > { %2519 = vmatmul.mubr.msk.bf16.vlgmr.msra.gmra.mrb[20].mxu0 %vm351_vm3, %v2227_v60 }
  0x72   : > { %2535 = vmatpush3.bf16.msra.mxu0 %v2696_v61  ;;  %2542 = vmatprep.mubr.msk.bf16.mxu0 %vm2826_vm0, %v2825_v1 }
  0x73   : > { %2527 = vmatpush3.bf16.msra.mxu1 %v2693_v59  ;;  %2536 = vmatprep.subr.bf16.mxu0 %v2825_v1 }
  0x74   : > { %2528 = vmatprep.subr.bf16.mxu1 %v2825_v1 }
  0x76   : > { %2537 = vmatpush3.bf16.msra.mxu0 %v2698_v62 }
  0x77   : > { %2529 = vmatpush3.bf16.msra.mxu1 %v2695_v48  ;;  %2538 = vmatprep.subr.bf16.mxu0 %v2825_v1 }
  0x78   : > { %2546 = vmatprep.subr.bf16.mxu1 %v2825_v1 }
  0x7a   : > { %2531 = vmatmul.mubr.msk.bf16.vlgmr.msra.gmra.mrb[20].mxu1 %vm351_vm3, %v2241_v63  ;;  %2539 = vmatpush3.bf16.msra.mxu0 %v2700_v4 }
  0x7b   : > { %2547 = vmatpush3.bf16.msra.mxu1 %v2697_v3  ;;  %2554 = vmatprep.mubr.msk.bf16.mxu1 %vm2826_vm0, %v2825_v1 }
  0x7c   : > { %2548 = vmatprep.subr.bf16.mxu1 %v2825_v1  ;;  %2540 = vmatprep.subr.bf16.mxu0 %v2825_v1 }
  0x7e   : > { %2541 = vmatpush3.bf16.msra.mxu0 %v2702_v7 }
  0x7f   : > { %2549 = vmatpush3.bf16.msra.mxu1 %v2699_v5  ;;  %2558 = vmatprep.subr.bf16.mxu0 %v2825_v1 }
  0x80   : > { %2550 = vmatprep.subr.bf16.mxu1 %v2825_v1 }
  0x81   : > { %2543 = vmatmul.mubr.msk.bf16.vlgmr.msra.gmra.mrb[24].mxu0 %vm351_vm3, %v2255_v10 }
  0x82   : > { %2559 = vmatpush3.bf16.msra.mxu0 %v2705_v11  ;;  %2566 = vmatprep.mubr.msk.bf16.mxu0 %vm2826_vm0, %v2825_v1 }
  0x83   : > { %2551 = vmatpush3.bf16.msra.mxu1 %v2701_v8  ;;  %2560 = vmatprep.subr.bf16.mxu0 %v2825_v1 }
  0x84   : > { %2552 = vmatprep.subr.bf16.mxu1 %v2825_v1 }
  0x86   : > { %2561 = vmatpush3.bf16.msra.mxu0 %v2707_v22 }
  0x87   : > { %2553 = vmatpush3.bf16.msra.mxu1 %v2703_v12  ;;  %2562 = vmatprep.subr.bf16.mxu0 %v2825_v1 }
  0x88   : > { %2570 = vmatprep.subr.bf16.mxu1 %v2825_v1 }
  0x8a   : > { %2555 = vmatmul.mubr.msk.bf16.vlgmr.msra.gmra.mrb[24].mxu1 %vm351_vm3, %v3261_v46  ;;  %2563 = vmatpush3.bf16.msra.mxu0 %v2709_v14 }
  0x8b   : > { %2571 = vmatpush3.bf16.msra.mxu1 %v2706_v13  ;;  %2578 = vmatprep.mubr.msk.bf16.mxu1 %vm2826_vm0, %v2825_v1 }
  0x8c   : > { %2572 = vmatprep.subr.bf16.mxu1 %v2825_v1  ;;  %2564 = vmatprep.subr.bf16.mxu0 %v2825_v1 }
  0x8e   : > { %2565 = vmatpush3.bf16.msra.mxu0 %v2711_v6 }
  0x8f   : > { %2573 = vmatpush3.bf16.msra.mxu1 %v2708_v15 }
  0x90   : > { %2574 = vmatprep.subr.bf16.mxu1 %v2825_v1 }
  0x91   : > { %2567 = vmatmul.mubr.msk.bf16.vlgmr.msra.gmra.mrb[28].mxu0 %vm351_vm3, %v2284_v43 }
  0x93   : > { %2575 = vmatpush3.bf16.msra.mxu1 %v2710_v17 }
  0x94   : > { %2576 = vmatprep.subr.bf16.mxu1 %v2825_v1 }
  0x97   : > { %2577 = vmatpush3.bf16.msra.mxu1 %v2712_v18 }
  0x9a   : > { %2579 = vmatmul.mubr.msk.bf16.vlgmr.msra.gmra.mrb[28].mxu1 %vm351_vm3, %v2298_v56 }
  0xf4   : > { %v389_v19 = vpop.f32.mrb[0].mxu0 }
  0xf5   : > { %v2400_v20 = vpop.f32.mrb[1].mxu0 }
  0xf6   : > { %v392_v23 = vpop.f32.mrb[2].mxu0 }
  0xf7   : > { %v2401_v24 = vpop.f32.mrb[3].mxu0 }
  0xfd   : > { %v506_v25 = vpop.f32.mrb[0].mxu1 }
  0xfe   : > { %v513_v26 = vadd.f32 %v506_v25, %v389_v19  ;;  %v2412_v27 = vpop.f32.mrb[1].mxu1 }
  0xff   : > { %v509_v30 = vpop.f32.mrb[2].mxu1 }
 0x100   : > { %v514_v31 = vadd.f32 %v509_v30, %v392_v23  ;;  %v2413_v35 = vpop.f32.mrb[3].mxu1 }
 0x104   : > { %v605_v32 = vpop.f32.mrb[4].mxu0 }
 0x105   : > { %v612_v33 = vadd.f32 %v605_v32, %v513_v26  ;;  %v2424_v21 = vpop.f32.mrb[5].mxu0 }
 0x106   : > { %v608_v1 = vpop.f32.mrb[6].mxu0 }
 0x107   : > { %v613_v34 = vadd.f32 %v608_v1, %v514_v31  ;;  %v2425_v38 = vpop.f32.mrb[7].mxu0 }
 0x10d   : > { %v714_v39 = vpop.f32.mrb[4].mxu1 }
 0x10e   : > { %v721_v51 = vadd.f32 %v714_v39, %v612_v33  ;;  %v2436_v36 = vpop.f32.mrb[5].mxu1 }
 0x10f   : > { %v717_v40 = vpop.f32.mrb[6].mxu1 }
 0x110   : > { %v722_v41 = vadd.f32 %v717_v40, %v613_v34  ;;  %v2437_v43 = vpop.f32.mrb[7].mxu1 }
 0x114   : > { %v800_v44 = vpop.f32.mrb[8].mxu0 }
 0x115   : > { %v807_v37 = vadd.f32 %v800_v44, %v721_v51  ;;  %v2448_v45 = vpop.f32.mrb[9].mxu0 }
 0x116   : > { %v803_v55 = vpop.f32.mrb[10].mxu0 }
 0x117   : > { %v808_v46 = vadd.f32 %v803_v55, %v722_v41  ;;  %v2449_v28 = vpop.f32.mrb[11].mxu0  ;;  %v1848_v41 = vlaneseq }
 0x118   : > { %v2304_v28 = vld [vmem:[%s3509_s2] ss:$0 sm:$0xff] }
 0x119   : > { %v1849_v55 = vshrl.u32 %v1848_v41, 7 }
 0x11b   : > { %vm1850_vm11 = vcmp.lt.s32.totalorder %v1849_v55, 2 }
 0x11d   : > { %v899_v42 = vpop.f32.mrb[8].mxu1 }
 0x11e   : > { %v906_v47 = vadd.f32 %v899_v42, %v807_v37  ;;  %v2460_v49 = vpop.f32.mrb[9].mxu1 }
 0x11f   : > { %v902_v29 = vpop.f32.mrb[10].mxu1 }
 0x120   : > { %v907_v50 = vadd.f32 %v902_v29, %v808_v46  ;;  %v2461_v52 = vpop.f32.mrb[11].mxu1 }
 0x124   : > { %v989_v9 = vpop.f32.mrb[12].mxu0 }
 0x125   : > { %v996_v0 = vadd.f32 %v989_v9, %v906_v47  ;;  %v2472_v54 = vpop.f32.mrb[13].mxu0 }
 0x126   : > { %v992_v56 = vpop.f32.mrb[14].mxu0 }
 0x127   : > { %v997_v16 = vadd.f32 %v992_v56, %v907_v50  ;;  %v2473_v57 = vpop.f32.mrb[15].mxu0 }
 0x12d   : > { %v1084_v58 = vpop.f32.mrb[12].mxu1 }
 0x12e   : > { %v1091_v2 = vadd.f32 %v1084_v58, %v996_v0  ;;  %v2484_v53 = vpop.f32.mrb[13].mxu1 }
 0x12f   : > { %v1087_v59 = vpop.f32.mrb[14].mxu1 }
 0x130   : > { %v1092_v60 = vadd.f32 %v1087_v59, %v997_v16  ;;  %v2485_v61 = vpop.f32.mrb[15].mxu1 }
 0x134   : > { %v1170_v48 = vpop.f32.mrb[16].mxu0 }
 0x135   : > { %v1177_v62 = vadd.f32 %v1170_v48, %v1091_v2  ;;  %v2496_v63 = vpop.f32.mrb[17].mxu0 }
 0x136   : > { %v1173_v3 = vpop.f32.mrb[18].mxu0 }
 0x137   : > { %v1178_v4 = vadd.f32 %v1173_v3, %v1092_v60  ;;  %v2497_v5 = vpop.f32.mrb[19].mxu0 }
 0x13d   : > { %v1269_v7 = vpop.f32.mrb[16].mxu1 }
 0x13e   : > { %v1276_v8 = vadd.f32 %v1269_v7, %v1177_v62  ;;  %v2508_v10 = vpop.f32.mrb[17].mxu1 }
 0x13f   : > { %v1272_v11 = vpop.f32.mrb[18].mxu1 }
 0x140   : > { %v1277_v12 = vadd.f32 %v1272_v11, %v1178_v4  ;;  %v2509_v22 = vpop.f32.mrb[19].mxu1 }
 0x144   : > { %v1359_v13 = vpop.f32.mrb[20].mxu0 }
 0x145   : > { %v1366_v14 = vadd.f32 %v1359_v13, %v1276_v8  ;;  %v2520_v15 = vpop.f32.mrb[21].mxu0 }
 0x146   : > { %v1362_v6 = vpop.f32.mrb[22].mxu0 }
 0x147   : > { %v1367_v17 = vadd.f32 %v1362_v6, %v1277_v12  ;;  %v2521_v18 = vpop.f32.mrb[23].mxu0 }
 0x14d   : > { %v1454_v19 = vpop.f32.mrb[20].mxu1 }
 0x14e   : > { %v1461_v20 = vadd.f32 %v1454_v19, %v1366_v14  ;;  %v2532_v23 = vpop.f32.mrb[21].mxu1 }
 0x14f   : > { %v1457_v24 = vpop.f32.mrb[22].mxu1 }
 0x150   : > { %v1462_v25 = vadd.f32 %v1457_v24, %v1367_v17  ;;  %v2533_v26 = vpop.f32.mrb[23].mxu1 }
 0x154   : > { %v1540_v27 = vpop.f32.mrb[24].mxu0 }
 0x155   : > { %v1547_v30 = vadd.f32 %v1540_v27, %v1461_v20  ;;  %v2544_v31 = vpop.f32.mrb[25].mxu0 }
 0x156   : > { %v1543_v35 = vpop.f32.mrb[26].mxu0 }
 0x157   : > { %v1548_v32 = vadd.f32 %v1543_v35, %v1462_v25  ;;  %v2545_v33 = vpop.f32.mrb[27].mxu0 }
 0x15d   : > { %v1639_v21 = vpop.f32.mrb[24].mxu1 }
 0x15e   : > { %v1646_v1 = vadd.f32 %v1639_v21, %v1547_v30  ;;  %v2556_v34 = vpop.f32.mrb[25].mxu1 }
 0x15f   : > { %v1642_v38 = vpop.f32.mrb[26].mxu1 }
 0x160   : > { %v1647_v39 = vadd.f32 %v1642_v38, %v1548_v32  ;;  %v2557_v51 = vpop.f32.mrb[27].mxu1 }
 0x164   : > { %v1729_v36 = vpop.f32.mrb[28].mxu0 }
 0x165   : > { %v1736_v40 = vadd.f32 %v1729_v36, %v1646_v1  ;;  %v2568_v43 = vpop.f32.mrb[29].mxu0 }
 0x166   : > { %v1732_v44 = vpop.f32.mrb[30].mxu0 }
 0x167   : > { %v1737_v37 = vadd.f32 %v1732_v44, %v1647_v39  ;;  %v2569_v45 = vpop.f32.mrb[31].mxu0 }
 0x16d   : > { %v1824_v46 = vpop.f32.mrb[28].mxu1 }
 0x16e   : > { %v1831_v42 = vadd.f32 %v1824_v46, %v1736_v40  ;;  %v2580_v47 = vpop.f32.mrb[29].mxu1 }
 0x16f   : > { %v1827_v49 = vpop.f32.mrb[30].mxu1 }
 0x170   : > { %v1844_v29 = vadd.f32 %v2304_v28, %v1831_v42  ;;  %v1832_v50 = vadd.f32 %v1827_v49, %v1737_v37  ;;  %v2581_v52 = vpop.f32.mrb[31].mxu1 }
 0x172   : > { %1846 = vst [vmem:[%s298_s7] sm:$0xff] %v1844_v29  ;;  %v1854_v9 = vsel %vm1850_vm11, %v1844_v29, 0.0  ;;  %v1845_v0 = vadd.f32 %v2304_v28, %v1832_v50 }
 0x173   : > { %v1864_v56 = vmul.f32 %v1854_v9, %v1854_v9 }
 0x174   : > { %1847 = vst [vmem:[%s298_s7 + $0x8] sm:$0xff] %v1845_v0  ;;  %v1855_v54 = vsel %vm1850_vm11, %v1845_v0, 0.0  ;;  %s2717_s7 = sshll.u32 %s2827_s29, 4  ;;  %s2718_s7 = int_to_ptr.vmem [resolvable:$false] %s2717_s7 }
 0x175   : > { %v1856_v16 = vadd.f32 %v1855_v54, %v1854_v9  ;;  %v1865_v57 = vmul.f32 %v1855_v54, %v1855_v54  ;;  %s2719_s14 = scalar_lea.vmem %s2718_s7, 32  ;;  %p2720_p1 = scmp.lt.s32.totalorder %s3430_s11, %s2718_s7 }
 0x176   : > { %p2721_p2 = scmp.lt.s32.totalorder %s2719_s14, %s2713_s27 }
 0x177   : > { %v1857_v58 = vrot.slane %v1856_v16, 4  ;;  %v1866_v2 = vadd.f32 %v1865_v57, %v1864_v56 }
 0x178   : > { %p2722_p3 = por %p2721_p2, %p2720_p1 }
 0x179   : > { %v1858_v53 = vadd.f32 %v1857_v58, %v1856_v16  ;;  %v1867_v59 = vrot.slane %v1866_v2, 4 }
 0x17a   : > { %p2723_p5 = pnand %p2722_p3, %p2716_p0 }
 0x17b   : > { %v1859_v60 = vrot.slane %v1858_v53, 2  ;;  %v1868_v61 = vadd.f32 %v1867_v59, %v1866_v2 }
 0x17d   : > { %v1860_v48 = vadd.f32 %v1859_v60, %v1858_v53  ;;  %v1869_v62 = vrot.slane %v1868_v61, 2 }
 0x17f   : > { %v1861_v63 = vrot.slane %v1860_v48, 1  ;;  %v1870_v3 = vadd.f32 %v1869_v62, %v1868_v61 }
 0x181   : > { %v1862_v4 = vadd.f32 %v1861_v63, %v1860_v48  ;;  %v1871_v5 = vrot.slane %v1870_v3, 1 }
 0x183   : > { %1863 = vst [vmem:[%s272_s10] sm:$0x1] %v1862_v4  ;;  %v1872_v7 = vadd.f32 %v1871_v5, %v1870_v3 }
 0x184   : > { %2726 = shalt.err (!%p2723_p5)
}
 0x185   : > { %s2727_s9 = scalar_lea.hbm %s3428_s8, 16  ;;  %s2731_s21 = scalar_lea.hbm %s3511_s4, 32 }
 0x186   : > { %p2728_p6 = scmp.ne.s32.totalorder %s3428_s8, %s2727_s9  ;;  %p2732_p10 = scmp.lt.u32.totalorder %s3428_s8, %s3511_s4 }
 0x187   : > { %p2733_p11 = scmp.lt.u32.totalorder %s2731_s21, %s2727_s9  ;;  %p2735_p13 = scmp.lt.u32.totalorder %s2727_s9, %s3428_s8 }
 0x188   : > { %p2729_p7 = pnand %p2728_p6, %p2899_p4 }
 0x189   : > { %p2734_p12 = por %p2733_p11, %p2732_p10 }
 0x18a   : > { %p2730_p9 = pneg %p2729_p7 }
 0x18b   : > { %p2736_p0 = por %p2735_p13, %p2734_p12 }
 0x18d   : > { %p2737_p1 = pnand %p2736_p0, %p2730_p9 }
 0x18f   : > { %2740 = shalt.err (!%p2737_p1)
}
 0x190   : > { %2583 = dma.vmem_to_hbm [thread:$0]  (%p2899_p4), %s3430_s11, 16, %s3428_s8, %s1883_s25   ;;  %1873 = vst [vmem:[%s278_s12] sm:$0x1] %v1872_v7 }
 0x191   : > { %s1887_s27 = scalar_lea.sflag [#allocation6], %s3418_s15  ;;  %s2741_s7 = scalar_lea.vmem %s3437_s13, 16 }
 0x192   : > { %p2742_p2 = scmp.ne.s32.totalorder %s3437_s13, %s2741_s7  ;;  %s2828_s14 = smov [#allocation5]  }
 0x193   : > { %s2745_s9 = sshll.u32 %s2828_s14, 4  ;;  %s2746_s9 = int_to_ptr.vmem [resolvable:$false] %s2745_s9 }
 0x194   : > { %p2743_p3 = pnand %p2742_p2, %p2899_p4  ;;  %s2747_s10 = scalar_lea.vmem %s2746_s9, 32 }
 0x195   : > { %p2748_p6 = scmp.lt.s32.totalorder %s3437_s13, %s2746_s9  ;;  %p2749_p7 = scmp.lt.s32.totalorder %s2747_s10, %s2741_s7 }
 0x196   : > { %p2744_p5 = pneg %p2743_p3 }
 0x197   : > { %p2750_p9 = por %p2749_p7, %p2748_p6 }
 0x199   : > { %p2751_p10 = pnand %p2750_p9, %p2744_p5 }
 0x19b   : > { %2754 = shalt.err (!%p2751_p10)
}
 0x19c   : > { %s2755_s15 = scalar_lea.hbm %s3435_s24, 16  ;;  %s2759_s8 = scalar_lea.hbm %s3512_s5, 32 }
 0x19d   : > { %p2756_p11 = scmp.ne.s32.totalorder %s3435_s24, %s2755_s15  ;;  %p2760_p0 = scmp.lt.u32.totalorder %s3435_s24, %s3512_s5 }
 0x19e   : > { %p2761_p1 = scmp.lt.u32.totalorder %s2759_s8, %s2755_s15  ;;  %p2763_p3 = scmp.lt.u32.totalorder %s2755_s15, %s3435_s24 }
 0x19f   : > { %p2757_p12 = pnand %p2756_p11, %p2899_p4 }
 0x1a0   : > { %p2762_p2 = por %p2761_p1, %p2760_p0 }
 0x1a1   : > { %p2758_p13 = pneg %p2757_p12 }
 0x1a2   : > { %p2764_p5 = por %p2763_p3, %p2762_p2 }
 0x1a4   : > { %p2765_p6 = pnand %p2764_p5, %p2758_p13 }
 0x1a6   : > { %2768 = shalt.err (!%p2765_p6)
}
 0x1a7   : > { %2584 = dma.vmem_to_hbm [thread:$0]  (%p2899_p4), %s3437_s13, 16, %s3435_s24, %s1887_s27  }
 0x1a8 PF: > { %p2594_p7 = scmp.ge.s32.totalorder %s2823_s23, 2  ;;  %s1940_s21 = sand.u32 1, %s2803_s18  }
 0x1a9   : > { %s1941_s17 = scalar_lea.sflag [#allocation4], %s1940_s21 }
 0x1aa   : > { %p2588_p9 = pnand %p2594_p7, %p2906_p8 }
 0x1ac   : > { %2794 = dma.done.wait (!%p2588_p9), %s1941_s17, 16  }
 0x1ad   : > { %2796 = vsyncadd (!%p2588_p9), %s1941_s17, 4294967280  ;;  %s1949_s29 = scalar_lea.sflag [#allocation6], %s1940_s21 }
 0x1ae   : > { %2798 = dma.done.wait (!%p2588_p9), %s1949_s29, 16  }
 0x1af   : > { %2800 = vsyncadd (!%p2588_p9), %s1949_s29, 4294967280  ;;  %s22_s23 = sadd.s32 1, %s2823_s23   ;;  %s3521_s18 = smov %s2807_s19 }
 0x1b0   : > { %p19_p10 = scmp.ge.s32.totalorder %s22_s23, 4   ;;  %s3522_s19 = smov %s2811_s20 }
 0x1b1   : > { %s3523_s20 = smov %s2912_s6  ;;  %s3524_s21 = smov %s2819_s22 }
 0x1b2   : > { %s3525_s22 = smov %s3527_s26  ;;  %21 = sbr.rel (!%p19_p10) target bundleno = 6 (0x6), region = 117 }
 0x1b9   :  { %1953 = vsyncpa [#allocation4], 1 }
 0x1ba   :  { %1955 = vsyncpa [#allocation4 + $0x1], 1 }
 0x1bb   :  { %1956 = vsyncpa [#allocation6], 1 }
 0x1bc   :  { %1958 = vsyncpa [#allocation6 + $0x1], 1 }

</bundles_post_ra>
